<compile_context>
chip_gen: v7x
topology: tpu7x:2x2x1
jax: 0.10.0
libtpu: 0.0.40
codegen_flags: <defaults>
</compile_context>

<pallas_src>
import jax
import jax.numpy as jnp
from jax import lax
from jax.experimental import pallas as pl
from jax.experimental.pallas import tpu as pltpu


# ----------------------------------------------------------------------------
# Kernels
# ----------------------------------------------------------------------------
def _double_cols(rows, W, C):
    """(n, W, C) -> (n, 2W, C) nearest-neighbour column doubling (one interleave)."""
    n = rows.shape[0]
    return jnp.broadcast_to(rows[:, :, None, :], (n, W, 2, C)).reshape(n, 2 * W, C)


def _double_rows(rows, W2, C):
    """(n, W2, C) -> (2n, W2, C) nearest-neighbour row doubling (leading-dim reshape)."""
    n = rows.shape[0]
    return jnp.broadcast_to(rows[:, None, :, :], (n, 2, W2, C)).reshape(2 * n, W2, C)


def _upsample_nn_kernel(x_ref, o_ref):
    """Nearest-2x only (with_conv=False). Direct store, no scratch.

    x_ref: (tH,  W,  C)   input tile
    o_ref: (2tH, 2W, C)   output tile
    """
    tH, W, C = x_ref.shape
    up_w = _double_cols(x_ref[...], W, C)          # (tH, 2W, C)
    o_ref[...] = _double_rows(up_w, 2 * W, C)      # (2tH, 2W, C), single wide store


def _upsample_conv_kernel(x_ref, halo_ref, w_ref, b_ref, o_ref, xp_ref):
    """Nearest-2x + 3x3 conv (stride 1, pad 1), phase-decomposed.

    The 3x3 conv on the 2x-upsampled image equals, for each output sub-pixel phase
    (a,b) in {0,1}^2, a 2x2 conv over the ORIGINAL input with phase-combined weights
    (computed in the wrapper).  Each phase is one im2col matmul; the four phase
    results are interleaved back into the (2tH, 2W, C) output tile.

    x_ref   : (tH, W, C)       input H-tile
    halo_ref: (2,  W, C)       rows just above / below this tile (zeros at image edge)
    w_ref   : (2, 2, 4C, C)    phase-combined weights, rows ordered (dy, dx, ci)
    b_ref   : (1, C)           conv bias
    o_ref   : (2tH, 2W, C)     output tile
    xp_ref  : (tH+2, W+2, C)   VMEM scratch: zero-column-haloed input tile + row halos
    """
    tH, W, C = x_ref.shape

    # Left/right image-edge columns are always zero padding (W is not tiled);
    # row halos come from halo_ref (already zero at the top/bottom image edge).
    zcol = jnp.zeros((tH + 2, 1, C), xp_ref.dtype)
    xp_ref[:, 0:1, :] = zcol
    xp_ref[:, W + 1:W + 2, :] = zcol
    xp_ref[1:1 + tH, 1:1 + W, :] = x_ref[...]
    xp_ref[0:1, 1:1 + W, :] = halo_ref[0:1, :, :]
    xp_ref[tH + 1:tH + 2, 1:1 + W, :] = halo_ref[1:2, :, :]

    M = tH * W
    bias = b_ref[...].astype(jnp.float32)          # (1, C)

    half_rows = []
    for a in (0, 1):                               # output row phase: rows 2i+a
        cols = []
        for b in (0, 1):                           # output col phase: cols 2j+b
            taps = [xp_ref[a + dy:a + dy + tH, b + dx:b + dx + W, :].reshape(M, C)
                    for dy in (0, 1) for dx in (0, 1)]
            slab = jnp.concatenate(taps, axis=-1)  # (M, 4C), matches (dy,dx,ci) order
            acc = jnp.dot(slab, w_ref[a, b],
                          preferred_element_type=jnp.float32) + bias
            cols.append(acc.reshape(tH, W, C))
        # interleave column phases: out[:, 2j+b] = cols[b][:, j]
        half_rows.append(jnp.stack(cols, axis=2).reshape(tH, 2 * W, C))
    # interleave row phases: out[2i+a] = half_rows[a][i]
    out = jnp.stack(half_rows, axis=1).reshape(2 * tH, 2 * W, C)
    o_ref[...] = out.astype(o_ref.dtype)


# ----------------------------------------------------------------------------
# Wrappers
# ----------------------------------------------------------------------------
def _phase_weights(w_hwio):
    """(3,3,Ci,Co) HWIO -> (2,2,4Ci,Co) phase-combined 2x2 weights.

    Row combine: a=0 -> [ky0, ky1+ky2]; a=1 -> [ky0+ky1, ky2].
    Col combine: b=0 -> [kx0, kx1+kx2]; b=1 -> [kx0+kx1, kx2].
    The last-two-dim flatten order is (dy, dx, ci), matching the kernel's tap concat.
    """
    w = w_hwio
    ci, co = w.shape[2], w.shape[3]
    wy = jnp.stack([jnp.stack([w[0], w[1] + w[2]], axis=0),       # a=0: (dy, kx, ci, co)
                    jnp.stack([w[0] + w[1], w[2]], axis=0)],      # a=1
                   axis=0)                                        # (a, dy, kx, ci, co)
    wx0 = jnp.stack([wy[:, :, 0], wy[:, :, 1] + wy[:, :, 2]], axis=2)  # b=0: (a,dy,dx,ci,co)
    wx1 = jnp.stack([wy[:, :, 0] + wy[:, :, 1], wy[:, :, 2]], axis=2)  # b=1
    wp = jnp.stack([wx0, wx1], axis=1)                                 # (a,b,dy,dx,ci,co)
    return wp.reshape(2, 2, 4 * ci, co)


def _pick_tile_h(H, W, C, itemsize, with_conv, budget_bytes=24 << 20):
    """Largest divisor of H whose per-step working set fits a conservative VMEM
    budget (sized for v7x's 64 MiB VMEM with double-buffering headroom)."""
    best = 1
    for th in range(1, H + 1):
        if H % th:
            continue
        m = th * W
        x_tile = 2 * m * C * itemsize                 # double-buffered input tile
        out_tile = 2 * 4 * m * C * itemsize           # double-buffered output tile
        if with_conv:
            xp = (th + 2) * (W + 2) * C * itemsize    # padded scratch
            slab = 2 * m * 4 * C * itemsize           # per-phase im2col slab
            f32_tmp = 8 * m * C * 4                   # f32 phase results + assembly
            weights = 2 * 16 * C * C * itemsize       # phase weights (double-buffered)
            need = x_tile + out_tile + xp + slab + f32_tmp + weights
        else:
            need = x_tile + out_tile
        if need <= budget_bytes:
            best = th
    return best


def upsample_forward_nhwc(x_nhwc, weight_hwio=None, bias=None, *,
                          with_conv=True, tile_h=None):
    """NHWC-native Upsample.forward (preferred entry point: no HBM transposes)."""
    B, H, W, C = x_nhwc.shape
    H2, W2 = 2 * H, 2 * W
    dtype = x_nhwc.dtype

    if tile_h is None:
        tile_h = _pick_tile_h(H, W, C, jnp.dtype(dtype).itemsize, with_conv)
    assert H % tile_h == 0, (H, tile_h)
    n_t = H // tile_h

    cparams = pltpu.CompilerParams(
        dimension_semantics=("parallel", "parallel"),
        vmem_limit_bytes=48 * 1024 * 1024,
    )

    if not with_conv:
        # Pure nearest-2x: fully tiled input and output, direct stores.
        return pl.pallas_call(
            _upsample_nn_kernel,
            out_shape=jax.ShapeDtypeStruct((B, H2, W2, C), dtype),
            grid_spec=pltpu.PrefetchScalarGridSpec(
                num_scalar_prefetch=0,
                grid=(B, n_t),
                in_specs=[
                    pl.BlockSpec((None, tile_h, W, C), lambda b, t: (b, t, 0, 0)),
                ],
                out_specs=pl.BlockSpec((None, 2 * tile_h, W2, C),
                                       lambda b, t: (b, t, 0, 0)),
            ),
            compiler_params=cparams,
        )(x_nhwc)

    # Phase-combined 2x2 weights and per-tile row halos are prepared once here
    # (cheap XLA ops on O(C^2) / O(B*n_t*W*C) data).
    wp = _phase_weights(weight_hwio)                      # (2, 2, 4C, C)
    bias2d = bias.reshape(1, C)
    zrow = jnp.zeros((B, 1, W, C), dtype)
    top = jnp.concatenate(
        [zrow, x_nhwc[:, tile_h - 1::tile_h, :, :][:, :n_t - 1]], axis=1)
    bot = jnp.concatenate([x_nhwc[:, tile_h::tile_h, :, :], zrow], axis=1)
    halo = jnp.stack([top, bot], axis=2)                  # (B, n_t, 2, W, C)

    # TODO(synk): for very large C (>= 1024) the (2,2,4C,C) phase-weight block itself
    # becomes VMEM-heavy; it would then need to be split over an output-channel grid axis.
    return pl.pallas_call(
        _upsample_conv_kernel,
        out_shape=jax.ShapeDtypeStruct((B, H2, W2, C), dtype),
        grid_spec=pltpu.PrefetchScalarGridSpec(
            num_scalar_prefetch=0,
            grid=(B, n_t),
            in_specs=[
                pl.BlockSpec((None, tile_h, W, C), lambda b, t: (b, t, 0, 0)),
                pl.BlockSpec((None, None, 2, W, C), lambda b, t: (b, t, 0, 0, 0)),
                pl.BlockSpec((2, 2, 4 * C, C), lambda b, t: (0, 0, 0, 0)),
                pl.BlockSpec((1, C), lambda b, t: (0, 0)),
            ],
            out_specs=pl.BlockSpec((None, 2 * tile_h, W2, C),
                                   lambda b, t: (b, t, 0, 0)),
            scratch_shapes=[pltpu.VMEM((tile_h + 2, W + 2, C), dtype)],
        ),
        compiler_params=cparams,
    )(x_nhwc, halo, wp, bias2d)


def upsample_forward(x_nchw, weight_hwio=None, bias=None, *,
                     with_conv=True, tile_h=None):
    """PyTorch-compatible NCHW wrapper. Callers that can consume NHWC should use
    upsample_forward_nhwc directly and skip both HBM transpose passes."""
    x = jnp.transpose(x_nchw, (0, 2, 3, 1))
    y = upsample_forward_nhwc(x, weight_hwio, bias,
                              with_conv=with_conv, tile_h=tile_h)
    return jnp.transpose(y, (0, 3, 1, 2))


# ----------------------------------------------------------------------------
# Test
# ----------------------------------------------------------------------------
if __name__ == "__main__":
    key = jax.random.PRNGKey(0)
    kx, kw, kb = jax.random.split(key, 3)

    # TODO(synk): deployed VQGAN uses C in {128,256,512}; with C not a multiple
    # of 128 (test C=4) every lane op is masked -- pad channels for production.
    B, C, H, W = 2, 4, 16, 16
    x = jax.random.normal(kx, (B, C, H, W), dtype=jnp.float32)

    # Deterministic Conv2d(C, C, kernel_size=3) parameters (fan_in-style init).
    fan_in = C * 3 * 3
    bound = 1.0 / (fan_in ** 0.5)
    w_hwio = jax.random.uniform(kw, (3, 3, C, C), jnp.float32, -bound, bound)
    bias = jax.random.uniform(kb, (C,), jnp.float32, -bound, bound)

    # Pure-JAX reference.
    x_nhwc = jnp.transpose(x, (0, 2, 3, 1))
    up_ref = jnp.repeat(jnp.repeat(x_nhwc, 2, axis=1), 2, axis=2)
    conv_ref = lax.conv_general_dilated(
        up_ref, w_hwio, (1, 1), 'SAME',
        dimension_numbers=('NHWC', 'HWIO', 'NHWC')) + bias
    ref = jnp.transpose(conv_ref, (0, 3, 1, 2))

    # with_conv=True, auto tile (single H-tile at this size).
    out = jax.block_until_ready(upsample_forward(x, w_hwio, bias, with_conv=True))
    assert out.shape == (B, C, 2 * H, 2 * W), out.shape
    assert jnp.allclose(out, ref, atol=1e-4, rtol=1e-4), \
        float(jnp.max(jnp.abs(out - ref)))

    # with_conv=True, forced H-tiling (exercises the row-halo path).
    out_t8 = jax.block_until_ready(
        upsample_forward(x, w_hwio, bias, with_conv=True, tile_h=8))
    assert jnp.allclose(out_t8, ref, atol=1e-4, rtol=1e-4), \
        float(jnp.max(jnp.abs(out_t8 - ref)))

    # with_conv=False (pure nearest upsample, direct-store kernel).
    out_nc = jax.block_until_ready(
        upsample_forward(x, with_conv=False, tile_h=8))
    ref_nc = jnp.transpose(up_ref, (0, 3, 1, 2))
    assert jnp.allclose(out_nc, ref_nc, atol=1e-6), \
        float(jnp.max(jnp.abs(out_nc - ref_nc)))

    print("KERNEL_OK")
</pallas_src>

<mosaic_0001>
module attributes {stable_mosaic.version = 11 : i64} {
  func.func @_upsample_conv_kernel(%arg0: i32, %arg1: i32, %arg2: memref<1x16x16x4xf32, #tpu.memory_space<vmem>>, %arg3: memref<1x1x2x16x4xf32, #tpu.memory_space<vmem>>, %arg4: memref<2x2x16x4xf32, #tpu.memory_space<vmem>>, %arg5: memref<1x4xf32, #tpu.memory_space<vmem>>, %arg6: memref<1x32x32x4xf32, #tpu.memory_space<vmem>>, %arg7: memref<18x18x4xf32, #tpu.memory_space<vmem>>) attributes {dimension_semantics = [#tpu.dimension_semantics<parallel>, #tpu.dimension_semantics<parallel>], iteration_bounds = array<i64: 2, 1>, scalar_prefetch = 0 : i64, scratch_operands = 1 : i64, tpu.core_type = #tpu.core_type<tc>, window_params = [{transform_indices = @transform_0, window_bounds = array<i64: 1, 16, 16, 4>}, {transform_indices = @transform_1, window_bounds = array<i64: 1, 1, 2, 16, 4>}, {pipeline_mode = #tpu.pipeline_mode<synchronous>, transform_indices = @transform_2, window_bounds = array<i64: 2, 2, 16, 4>}, {pipeline_mode = #tpu.pipeline_mode<synchronous>, transform_indices = @transform_3, window_bounds = array<i64: 1, 4>}, {transform_indices = @transform_4, window_bounds = array<i64: 1, 32, 32, 4>}]} {
    %cst = arith.constant 0.000000e+00 : f32
    %0 = vector.broadcast %cst : f32 to vector<18x1x4xf32>
    %c0 = arith.constant 0 : index
    %c0_0 = arith.constant 0 : index
    %c0_1 = arith.constant 0 : index
    %1 = vector.load %arg7[%c0, %c0_0, %c0_1] : memref<18x18x4xf32, #tpu.memory_space<vmem>>, vector<18x1x4xf32>
    tpu.vector_store %arg7[%c0, %c0_0, %c0_1], %0 {strides = array<i32>} : memref<18x18x4xf32, #tpu.memory_space<vmem>>, vector<18x1x4xf32>,
    %c0_2 = arith.constant 0 : index
    %c17 = arith.constant 17 : index
    %c0_3 = arith.constant 0 : index
    %2 = vector.load %arg7[%c0_2, %c17, %c0_3] : memref<18x18x4xf32, #tpu.memory_space<vmem>>, vector<18x1x4xf32>
    tpu.vector_store %arg7[%c0_2, %c17, %c0_3], %0 {strides = array<i32>} : memref<18x18x4xf32, #tpu.memory_space<vmem>>, vector<18x1x4xf32>,
    %c0_4 = arith.constant 0 : index
    %c0_5 = arith.constant 0 : index
    %c0_6 = arith.constant 0 : index
    %c0_7 = arith.constant 0 : index
    %3 = vector.load %arg2[%c0_4, %c0_5, %c0_6, %c0_7] : memref<1x16x16x4xf32, #tpu.memory_space<vmem>>, vector<1x16x16x4xf32>
    %4 = vector.shape_cast %3 : vector<1x16x16x4xf32> to vector<16x16x4xf32>
    %c1 = arith.constant 1 : index
    %c1_8 = arith.constant 1 : index
    %c0_9 = arith.constant 0 : index
    %5 = vector.load %arg7[%c1, %c1_8, %c0_9] : memref<18x18x4xf32, #tpu.memory_space<vmem>>, vector<16x16x4xf32>
    tpu.vector_store %arg7[%c1, %c1_8, %c0_9], %4 {strides = array<i32>} : memref<18x18x4xf32, #tpu.memory_space<vmem>>, vector<16x16x4xf32>,
    %c0_10 = arith.constant 0 : index
    %c0_11 = arith.constant 0 : index
    %c0_12 = arith.constant 0 : index
    %c0_13 = arith.constant 0 : index
    %c0_14 = arith.constant 0 : index
    %6 = vector.load %arg3[%c0_10, %c0_11, %c0_12, %c0_13, %c0_14] : memref<1x1x2x16x4xf32, #tpu.memory_space<vmem>>, vector<1x1x1x16x4xf32>
    %7 = vector.shape_cast %6 : vector<1x1x1x16x4xf32> to vector<1x16x4xf32>
    %c0_15 = arith.constant 0 : index
    %c1_16 = arith.constant 1 : index
    %c0_17 = arith.constant 0 : index
    %8 = vector.load %arg7[%c0_15, %c1_16, %c0_17] : memref<18x18x4xf32, #tpu.memory_space<vmem>>, vector<1x16x4xf32>
    tpu.vector_store %arg7[%c0_15, %c1_16, %c0_17], %7 {strides = array<i32>} : memref<18x18x4xf32, #tpu.memory_space<vmem>>, vector<1x16x4xf32>,
    %c0_18 = arith.constant 0 : index
    %c0_19 = arith.constant 0 : index
    %c1_20 = arith.constant 1 : index
    %c0_21 = arith.constant 0 : index
    %c0_22 = arith.constant 0 : index
    %9 = vector.load %arg3[%c0_18, %c0_19, %c1_20, %c0_21, %c0_22] : memref<1x1x2x16x4xf32, #tpu.memory_space<vmem>>, vector<1x1x1x16x4xf32>
    %10 = vector.shape_cast %9 : vector<1x1x1x16x4xf32> to vector<1x16x4xf32>
    %c17_23 = arith.constant 17 : index
    %c1_24 = arith.constant 1 : index
    %c0_25 = arith.constant 0 : index
    %11 = vector.load %arg7[%c17_23, %c1_24, %c0_25] : memref<18x18x4xf32, #tpu.memory_space<vmem>>, vector<1x16x4xf32>
    tpu.vector_store %arg7[%c17_23, %c1_24, %c0_25], %10 {strides = array<i32>} : memref<18x18x4xf32, #tpu.memory_space<vmem>>, vector<1x16x4xf32>,
    %c0_26 = arith.constant 0 : index
    %c0_27 = arith.constant 0 : index
    %12 = vector.load %arg5[%c0_26, %c0_27] : memref<1x4xf32, #tpu.memory_space<vmem>>, vector<1x4xf32>
    %c0_28 = arith.constant 0 : index
    %c0_29 = arith.constant 0 : index
    %c0_30 = arith.constant 0 : index
    %13 = vector.load %arg7[%c0_28, %c0_29, %c0_30] : memref<18x18x4xf32, #tpu.memory_space<vmem>>, vector<16x16x4xf32>
    %14 = vector.shape_cast %13 : vector<16x16x4xf32> to vector<256x4xf32>
    %c0_31 = arith.constant 0 : index
    %c1_32 = arith.constant 1 : index
    %c0_33 = arith.constant 0 : index
    %15 = vector.load %arg7[%c0_31, %c1_32, %c0_33] : memref<18x18x4xf32, #tpu.memory_space<vmem>>, vector<16x16x4xf32>
    %16 = vector.shape_cast %15 : vector<16x16x4xf32> to vector<256x4xf32>
    %c1_34 = arith.constant 1 : index
    %c0_35 = arith.constant 0 : index
    %c0_36 = arith.constant 0 : index
    %17 = vector.load %arg7[%c1_34, %c0_35, %c0_36] : memref<18x18x4xf32, #tpu.memory_space<vmem>>, vector<16x16x4xf32>
    %18 = vector.shape_cast %17 : vector<16x16x4xf32> to vector<256x4xf32>
    %c1_37 = arith.constant 1 : index
    %c1_38 = arith.constant 1 : index
    %c0_39 = arith.constant 0 : index
    %19 = vector.load %arg7[%c1_37, %c1_38, %c0_39] : memref<18x18x4xf32, #tpu.memory_space<vmem>>, vector<16x16x4xf32>
    %20 = vector.shape_cast %19 : vector<16x16x4xf32> to vector<256x4xf32>
    %21 = tpu.concatenate %14, %16, %18, %20 in 1 : vector<256x4xf32>, vector<256x4xf32>, vector<256x4xf32>, vector<256x4xf32> -> vector<256x16xf32>
    %c0_40 = arith.constant 0 : index
    %c0_41 = arith.constant 0 : index
    %c0_42 = arith.constant 0 : index
    %c0_43 = arith.constant 0 : index
    %22 = vector.load %arg4[%c0_40, %c0_41, %c0_42, %c0_43] : memref<2x2x16x4xf32, #tpu.memory_space<vmem>>, vector<1x1x16x4xf32>
    %23 = vector.shape_cast %22 : vector<1x1x16x4xf32> to vector<16x4xf32>
    %cst_44 = arith.constant dense<0.000000e+00> : vector<256x4xf32>
    %24 = tpu.matmul %21, %23, %cst_44 {dimension_numbers = #tpu.dot_dimension_numbers<[1], [0], [0], [1], [0, 0, 1, 1], [], []>} : vector<256x16xf32>, vector<16x4xf32>, vector<256x4xf32> -> vector<256x4xf32>
    %25 = vector.broadcast %12 : vector<1x4xf32> to vector<256x4xf32>
    %26 = arith.addf %24, %25 : vector<256x4xf32>
    %27 = vector.shape_cast %26 : vector<256x4xf32> to vector<16x16x4xf32>
    %c0_45 = arith.constant 0 : index
    %c1_46 = arith.constant 1 : index
    %c0_47 = arith.constant 0 : index
    %28 = vector.load %arg7[%c0_45, %c1_46, %c0_47] : memref<18x18x4xf32, #tpu.memory_space<vmem>>, vector<16x16x4xf32>
    %29 = vector.shape_cast %28 : vector<16x16x4xf32> to vector<256x4xf32>
    %c0_48 = arith.constant 0 : index
    %c2 = arith.constant 2 : index
    %c0_49 = arith.constant 0 : index
    %30 = vector.load %arg7[%c0_48, %c2, %c0_49] : memref<18x18x4xf32, #tpu.memory_space<vmem>>, vector<16x16x4xf32>
    %31 = vector.shape_cast %30 : vector<16x16x4xf32> to vector<256x4xf32>
    %c1_50 = arith.constant 1 : index
    %c1_51 = arith.constant 1 : index
    %c0_52 = arith.constant 0 : index
    %32 = vector.load %arg7[%c1_50, %c1_51, %c0_52] : memref<18x18x4xf32, #tpu.memory_space<vmem>>, vector<16x16x4xf32>
    %33 = vector.shape_cast %32 : vector<16x16x4xf32> to vector<256x4xf32>
    %c1_53 = arith.constant 1 : index
    %c2_54 = arith.constant 2 : index
    %c0_55 = arith.constant 0 : index
    %34 = vector.load %arg7[%c1_53, %c2_54, %c0_55] : memref<18x18x4xf32, #tpu.memory_space<vmem>>, vector<16x16x4xf32>
    %35 = vector.shape_cast %34 : vector<16x16x4xf32> to vector<256x4xf32>
    %36 = tpu.concatenate %29, %31, %33, %35 in 1 : vector<256x4xf32>, vector<256x4xf32>, vector<256x4xf32>, vector<256x4xf32> -> vector<256x16xf32>
    %c0_56 = arith.constant 0 : index
    %c1_57 = arith.constant 1 : index
    %c0_58 = arith.constant 0 : index
    %c0_59 = arith.constant 0 : index
    %37 = vector.load %arg4[%c0_56, %c1_57, %c0_58, %c0_59] : memref<2x2x16x4xf32, #tpu.memory_space<vmem>>, vector<1x1x16x4xf32>
    %38 = vector.shape_cast %37 : vector<1x1x16x4xf32> to vector<16x4xf32>
    %cst_60 = arith.constant dense<0.000000e+00> : vector<256x4xf32>
    %39 = tpu.matmul %36, %38, %cst_60 {dimension_numbers = #tpu.dot_dimension_numbers<[1], [0], [0], [1], [0, 0, 1, 1], [], []>} : vector<256x16xf32>, vector<16x4xf32>, vector<256x4xf32> -> vector<256x4xf32>
    %40 = vector.broadcast %12 : vector<1x4xf32> to vector<256x4xf32>
    %41 = arith.addf %39, %40 : vector<256x4xf32>
    %42 = vector.shape_cast %41 : vector<256x4xf32> to vector<16x16x4xf32>
    %43 = vector.shape_cast %27 : vector<16x16x4xf32> to vector<16x16x1x4xf32>
    %44 = vector.shape_cast %42 : vector<16x16x4xf32> to vector<16x16x1x4xf32>
    %45 = tpu.concatenate %43, %44 in 2 : vector<16x16x1x4xf32>, vector<16x16x1x4xf32> -> vector<16x16x2x4xf32>
    %46 = vector.shape_cast %45 : vector<16x16x2x4xf32> to vector<16x32x4xf32>
    %c1_61 = arith.constant 1 : index
    %c0_62 = arith.constant 0 : index
    %c0_63 = arith.constant 0 : index
    %47 = vector.load %arg7[%c1_61, %c0_62, %c0_63] : memref<18x18x4xf32, #tpu.memory_space<vmem>>, vector<16x16x4xf32>
    %48 = vector.shape_cast %47 : vector<16x16x4xf32> to vector<256x4xf32>
    %c1_64 = arith.constant 1 : index
    %c1_65 = arith.constant 1 : index
    %c0_66 = arith.constant 0 : index
    %49 = vector.load %arg7[%c1_64, %c1_65, %c0_66] : memref<18x18x4xf32, #tpu.memory_space<vmem>>, vector<16x16x4xf32>
    %50 = vector.shape_cast %49 : vector<16x16x4xf32> to vector<256x4xf32>
    %c2_67 = arith.constant 2 : index
    %c0_68 = arith.constant 0 : index
    %c0_69 = arith.constant 0 : index
    %51 = vector.load %arg7[%c2_67, %c0_68, %c0_69] : memref<18x18x4xf32, #tpu.memory_space<vmem>>, vector<16x16x4xf32>
    %52 = vector.shape_cast %51 : vector<16x16x4xf32> to vector<256x4xf32>
    %c2_70 = arith.constant 2 : index
    %c1_71 = arith.constant 1 : index
    %c0_72 = arith.constant 0 : index
    %53 = vector.load %arg7[%c2_70, %c1_71, %c0_72] : memref<18x18x4xf32, #tpu.memory_space<vmem>>, vector<16x16x4xf32>
    %54 = vector.shape_cast %53 : vector<16x16x4xf32> to vector<256x4xf32>
    %55 = tpu.concatenate %48, %50, %52, %54 in 1 : vector<256x4xf32>, vector<256x4xf32>, vector<256x4xf32>, vector<256x4xf32> -> vector<256x16xf32>
    %c1_73 = arith.constant 1 : index
    %c0_74 = arith.constant 0 : index
    %c0_75 = arith.constant 0 : index
    %c0_76 = arith.constant 0 : index
    %56 = vector.load %arg4[%c1_73, %c0_74, %c0_75, %c0_76] : memref<2x2x16x4xf32, #tpu.memory_space<vmem>>, vector<1x1x16x4xf32>
    %57 = vector.shape_cast %56 : vector<1x1x16x4xf32> to vector<16x4xf32>
    %cst_77 = arith.constant dense<0.000000e+00> : vector<256x4xf32>
    %58 = tpu.matmul %55, %57, %cst_77 {dimension_numbers = #tpu.dot_dimension_numbers<[1], [0], [0], [1], [0, 0, 1, 1], [], []>} : vector<256x16xf32>, vector<16x4xf32>, vector<256x4xf32> -> vector<256x4xf32>
    %59 = vector.broadcast %12 : vector<1x4xf32> to vector<256x4xf32>
    %60 = arith.addf %58, %59 : vector<256x4xf32>
    %61 = vector.shape_cast %60 : vector<256x4xf32> to vector<16x16x4xf32>
    %c1_78 = arith.constant 1 : index
    %c1_79 = arith.constant 1 : index
    %c0_80 = arith.constant 0 : index
    %62 = vector.load %arg7[%c1_78, %c1_79, %c0_80] : memref<18x18x4xf32, #tpu.memory_space<vmem>>, vector<16x16x4xf32>
    %63 = vector.shape_cast %62 : vector<16x16x4xf32> to vector<256x4xf32>
    %c1_81 = arith.constant 1 : index
    %c2_82 = arith.constant 2 : index
    %c0_83 = arith.constant 0 : index
    %64 = vector.load %arg7[%c1_81, %c2_82, %c0_83] : memref<18x18x4xf32, #tpu.memory_space<vmem>>, vector<16x16x4xf32>
    %65 = vector.shape_cast %64 : vector<16x16x4xf32> to vector<256x4xf32>
    %c2_84 = arith.constant 2 : index
    %c1_85 = arith.constant 1 : index
    %c0_86 = arith.constant 0 : index
    %66 = vector.load %arg7[%c2_84, %c1_85, %c0_86] : memref<18x18x4xf32, #tpu.memory_space<vmem>>, vector<16x16x4xf32>
    %67 = vector.shape_cast %66 : vector<16x16x4xf32> to vector<256x4xf32>
    %c2_87 = arith.constant 2 : index
    %c2_88 = arith.constant 2 : index
    %c0_89 = arith.constant 0 : index
    %68 = vector.load %arg7[%c2_87, %c2_88, %c0_89] : memref<18x18x4xf32, #tpu.memory_space<vmem>>, vector<16x16x4xf32>
    %69 = vector.shape_cast %68 : vector<16x16x4xf32> to vector<256x4xf32>
    %70 = tpu.concatenate %63, %65, %67, %69 in 1 : vector<256x4xf32>, vector<256x4xf32>, vector<256x4xf32>, vector<256x4xf32> -> vector<256x16xf32>
    %c1_90 = arith.constant 1 : index
    %c1_91 = arith.constant 1 : index
    %c0_92 = arith.constant 0 : index
    %c0_93 = arith.constant 0 : index
    %71 = vector.load %arg4[%c1_90, %c1_91, %c0_92, %c0_93] : memref<2x2x16x4xf32, #tpu.memory_space<vmem>>, vector<1x1x16x4xf32>
    %72 = vector.shape_cast %71 : vector<1x1x16x4xf32> to vector<16x4xf32>
    %cst_94 = arith.constant dense<0.000000e+00> : vector<256x4xf32>
    %73 = tpu.matmul %70, %72, %cst_94 {dimension_numbers = #tpu.dot_dimension_numbers<[1], [0], [0], [1], [0, 0, 1, 1], [], []>} : vector<256x16xf32>, vector<16x4xf32>, vector<256x4xf32> -> vector<256x4xf32>
    %74 = vector.broadcast %12 : vector<1x4xf32> to vector<256x4xf32>
    %75 = arith.addf %73, %74 : vector<256x4xf32>
    %76 = vector.shape_cast %75 : vector<256x4xf32> to vector<16x16x4xf32>
    %77 = vector.shape_cast %61 : vector<16x16x4xf32> to vector<16x16x1x4xf32>
    %78 = vector.shape_cast %76 : vector<16x16x4xf32> to vector<16x16x1x4xf32>
    %79 = tpu.concatenate %77, %78 in 2 : vector<16x16x1x4xf32>, vector<16x16x1x4xf32> -> vector<16x16x2x4xf32>
    %80 = vector.shape_cast %79 : vector<16x16x2x4xf32> to vector<16x32x4xf32>
    %81 = vector.shape_cast %46 : vector<16x32x4xf32> to vector<16x1x32x4xf32>
    %82 = vector.shape_cast %80 : vector<16x32x4xf32> to vector<16x1x32x4xf32>
    %83 = tpu.concatenate %81, %82 in 1 : vector<16x1x32x4xf32>, vector<16x1x32x4xf32> -> vector<16x2x32x4xf32>
    %84 = vector.shape_cast %83 : vector<16x2x32x4xf32> to vector<32x32x4xf32>
    %c0_95 = arith.constant 0 : index
    %c0_96 = arith.constant 0 : index
    %c0_97 = arith.constant 0 : index
    %c0_98 = arith.constant 0 : index
    %85 = vector.load %arg6[%c0_95, %c0_96, %c0_97, %c0_98] : memref<1x32x32x4xf32, #tpu.memory_space<vmem>>, vector<1x32x32x4xf32>
    %86 = vector.shape_cast %85 : vector<1x32x32x4xf32> to vector<32x32x4xf32>
    %87 = vector.shape_cast %84 : vector<32x32x4xf32> to vector<1x32x32x4xf32>
    tpu.vector_store %arg6[%c0_95, %c0_96, %c0_97, %c0_98], %87 {strides = array<i32>} : memref<1x32x32x4xf32, #tpu.memory_space<vmem>>, vector<1x32x32x4xf32>,
    return
  }
  func.func @transform_0(%arg0: i32, %arg1: i32) -> (i32, i32, i32, i32) {
    %c0_i32 = arith.constant 0 : i32
    %c0_i32_0 = arith.constant 0 : i32
    %c0_i32_1 = arith.constant 0 : i32
    return %arg0, %arg1, %c0_i32, %c0_i32_0 : i32, i32, i32, i32
  }
  func.func @transform_1(%arg0: i32, %arg1: i32) -> (i32, i32, i32, i32, i32) {
    %c0_i32 = arith.constant 0 : i32
    %c0_i32_0 = arith.constant 0 : i32
    %c0_i32_1 = arith.constant 0 : i32
    %c0_i32_2 = arith.constant 0 : i32
    return %arg0, %arg1, %c0_i32, %c0_i32_0, %c0_i32_1 : i32, i32, i32, i32, i32
  }
  func.func @transform_2(%arg0: i32, %arg1: i32) -> (i32, i32, i32, i32) {
    %c0_i32 = arith.constant 0 : i32
    %c0_i32_0 = arith.constant 0 : i32
    %c0_i32_1 = arith.constant 0 : i32
    %c0_i32_2 = arith.constant 0 : i32
    %c0_i32_3 = arith.constant 0 : i32
    return %c0_i32, %c0_i32_0, %c0_i32_1, %c0_i32_2 : i32, i32, i32, i32
  }
  func.func @transform_3(%arg0: i32, %arg1: i32) -> (i32, i32) {
    %c0_i32 = arith.constant 0 : i32
    %c0_i32_0 = arith.constant 0 : i32
    %c0_i32_1 = arith.constant 0 : i32
    return %c0_i32, %c0_i32_0 : i32, i32
  }
  func.func @transform_4(%arg0: i32, %arg1: i32) -> (i32, i32, i32, i32) {
    %c0_i32 = arith.constant 0 : i32
    %c0_i32_0 = arith.constant 0 : i32
    %c0_i32_1 = arith.constant 0 : i32
    return %arg0, %arg1, %c0_i32, %c0_i32_0 : i32, i32, i32, i32
  }
}

</mosaic_0001>

<bundles_post_ra>
// kernel: tpu_custom_call.1
= control target key start
LH: loop header
LB: loop body
LE: loop exit
PB: predicated region body
PF: predicated region fallthrough
CT: control target
= control target key end

     0   :  { %s17564_s15 = smov 0   ;;  %s17566_s16 = smov 0   ;;  %s24821_s0 = inlined_call_operand.vmem [shape: f32[2,16,16,4], index: 0, kind: input, shape index: {}]   ;;  %s24822_s1 = inlined_call_operand.vmem [shape: f32[2,1,2,16,4], index: 1, kind: input, shape index: {}]   ;;  %s24823_s2 = inlined_call_operand.vmem [shape: f32[2,2,16,4], index: 2, kind: input, shape index: {}]   ;;  %s24824_s3 = inlined_call_operand.vmem [shape: f32[1,4], index: 3, kind: input, shape index: {}]   ;;  %s24825_s4 = inlined_call_operand.vmem [shape: f32[2,32,32,4], index: 4, kind: output, shape index: {}]  }
   0x1   :  { %s17568_s17 = smov 0  }
   0x2 LB: > { %s26_s18 = sadd.s32 1, %s17527_s16  ;;  %p16825_p0 = scmp.ge.s32.totalorder %s17531_s17, 1  ;;  %s17531_s17 = sphi %s17568_s17, %s14_s17   ;;  %s17527_s16 = sphi %s17566_s16, %s25779_s16   ;;  %s17523_s15 = sphi %s17564_s15, %s25778_s15  }
   0x3   : > { %p28_p1 = scmp.ge.s32.totalorder %s26_s18, 2  ;;  %p200_p2 = scmp.lt.s32.totalorder %s17531_s17, 3 }
   0x5   : > { %s25781_s18 = smov (%p28_p1, %s26_s18), 0  ;;  %p201_p3 = pnand %p16825_p0, %p200_p2 }
   0x7   : > { %204 = sbr.rel (%p201_p3) target bundleno = 1519 (0x5ef), region = 36 }
   0xe   : > { %p246_p4 = scmp.lt.s32.totalorder %s17523_s15, 1  ;;  %vm276_vm0 = vcmask 24576   ;;  %v17533_v0 = vmov 0.0   ;;  %vm346_vm1 = vcmask 31744   ;;  %s17534_s27 = smov 4   ;;  %vm934_vm2 = vcmask 64512  }
   0xf   : > { %278 = vst.msk [vmem:[#allocation2 + $0x18] sm:$0x1] %vm276_vm0, %v17533_v0  ;;  %277 = vst.msk [vmem:[#allocation2] sm:$0x1] %vm276_vm0, %v17533_v0  ;;  %s17535_s28 = smov 8   ;;  %s17536_s7 = smov 12  }
  0x10   : > { %279 = vst.msk [vmem:[#allocation2 + $0x30] sm:$0x1] %vm276_vm0, %v17533_v0  ;;  %280 = vst.msk [vmem:[#allocation2 + $0x48] sm:$0x1] %vm276_vm0, %v17533_v0  ;;  %s25783_s15 = smov (!%p246_p4, %s17523_s15), 1  ;;  %vm967_vm3 = vcmask 97280  }
  0x11   : > { %281 = vst.msk [vmem:[#allocation2 + $0x60] sm:$0x1] %vm276_vm0, %v17533_v0  ;;  %282 = vst.msk [vmem:[#allocation2 + $0x78] sm:$0x1] %vm276_vm0, %v17533_v0  ;;  %s16972_s19 = sshll.u32 %s25783_s15, 5  ;;  %s16971_s23 = sshll.u32 %s25783_s15, 8 }
  0x12   : > { %283 = vst.msk [vmem:[#allocation2 + $0x90] sm:$0x1] %vm276_vm0, %v17533_v0  ;;  %284 = vst.msk [vmem:[#allocation2 + $0xa8] sm:$0x1] %vm276_vm0, %v17533_v0  ;;  %s17630_s22 = scalar_lea.vmem %s24822_s1, %s16972_s19  ;;  %s17639_s26 = scalar_lea.vmem %s24821_s0, %s16971_s23  ;;  %vm1008_vm4 = vcmask 130048   ;;  %vm6902_vm5 = vcmask 1040384  }
  0x13   : > { %285 = vst.msk [vmem:[#allocation2 + $0xc0] sm:$0x1] %vm276_vm0, %v17533_v0  ;;  %286 = vst.msk [vmem:[#allocation2 + $0xd8] sm:$0x1] %vm276_vm0, %v17533_v0  ;;  %v379_v1 = vld [vmem:[%s17630_s22] sm:$0xff]  ;;  %v380_v2 = vld [vmem:[%s17630_s22 + $0x8] sm:$0xff] }
  0x14   : > { %287 = vst.msk [vmem:[#allocation2 + $0xf0] sm:$0x1] %vm276_vm0, %v17533_v0  ;;  %288 = vst.msk [vmem:[#allocation2 + $0x108] sm:$0x1] %vm276_vm0, %v17533_v0  ;;  %v313_v3 = vld [vmem:[%s17639_s26] sm:$0xff]  ;;  %v314_v4 = vld [vmem:[%s17639_s26 + $0x8] sm:$0xff] }
  0x15   : > { %289 = vst.msk [vmem:[#allocation2 + $0x120] sm:$0x1] %vm276_vm0, %v17533_v0  ;;  %290 = vst.msk [vmem:[#allocation2 + $0x138] sm:$0x1] %vm276_vm0, %v17533_v0  ;;  %v315_v5 = vld [vmem:[%s17639_s26 + $0x10] sm:$0xff]  ;;  %v316_v6 = vld [vmem:[%s17639_s26 + $0x18] sm:$0xff] }
  0x16   : > { %291 = vst.msk [vmem:[#allocation2 + $0x150] sm:$0x1] %vm276_vm0, %v17533_v0  ;;  %292 = vst.msk [vmem:[#allocation2 + $0x168] sm:$0x1] %vm276_vm0, %v17533_v0  ;;  %v317_v7 = vld [vmem:[%s17639_s26 + $0x20] sm:$0xff]  ;;  %v318_v8 = vld [vmem:[%s17639_s26 + $0x28] sm:$0xff] }
  0x17   : > { %293 = vst.msk [vmem:[#allocation2 + $0x180] sm:$0x1] %vm276_vm0, %v17533_v0  ;;  %294 = vst.msk [vmem:[#allocation2 + $0x198] sm:$0x1] %vm276_vm0, %v17533_v0  ;;  %v319_v9 = vld [vmem:[%s17639_s26 + $0x30] sm:$0xff]  ;;  %v320_v10 = vld [vmem:[%s17639_s26 + $0x38] sm:$0xff] }
  0x18   : > { %295 = vst.msk [vmem:[#allocation2 + $0x11] sm:$0x1] %vm276_vm0, %v17533_v0  ;;  %296 = vst.msk [vmem:[#allocation2 + $0x29] sm:$0x1] %vm276_vm0, %v17533_v0  ;;  %v321_v11 = vld [vmem:[%s17639_s26 + $0x40] sm:$0xff]  ;;  %v322_v12 = vld [vmem:[%s17639_s26 + $0x48] sm:$0xff] }
  0x19   : > { %297 = vst.msk [vmem:[#allocation2 + $0x41] sm:$0x1] %vm276_vm0, %v17533_v0  ;;  %298 = vst.msk [vmem:[#allocation2 + $0x59] sm:$0x1] %vm276_vm0, %v17533_v0  ;;  %v323_v13 = vld [vmem:[%s17639_s26 + $0x50] sm:$0xff]  ;;  %v324_v14 = vld [vmem:[%s17639_s26 + $0x58] sm:$0xff] }
  0x1a   : > { %299 = vst.msk [vmem:[#allocation2 + $0x71] sm:$0x1] %vm276_vm0, %v17533_v0  ;;  %300 = vst.msk [vmem:[#allocation2 + $0x89] sm:$0x1] %vm276_vm0, %v17533_v0  ;;  %v325_v15 = vld [vmem:[%s17639_s26 + $0x60] sm:$0xff]  ;;  %v326_v16 = vld [vmem:[%s17639_s26 + $0x68] sm:$0xff] }
  0x1b   : > { %301 = vst.msk [vmem:[#allocation2 + $0xa1] sm:$0x1] %vm276_vm0, %v17533_v0  ;;  %302 = vst.msk [vmem:[#allocation2 + $0xb9] sm:$0x1] %vm276_vm0, %v17533_v0  ;;  %v327_v17 = vld [vmem:[%s17639_s26 + $0x70] sm:$0xff]  ;;  %v328_v18 = vld [vmem:[%s17639_s26 + $0x78] sm:$0xff] }
  0x1c   : > { %303 = vst.msk [vmem:[#allocation2 + $0xd1] sm:$0x1] %vm276_vm0, %v17533_v0  ;;  %304 = vst.msk [vmem:[#allocation2 + $0xe9] sm:$0x1] %vm276_vm0, %v17533_v0  ;;  %v329_v19 = vld [vmem:[%s17639_s26 + $0x80] sm:$0xff]  ;;  %v330_v20 = vld [vmem:[%s17639_s26 + $0x88] sm:$0xff] }
  0x1d   : > { %305 = vst.msk [vmem:[#allocation2 + $0x101] sm:$0x1] %vm276_vm0, %v17533_v0  ;;  %306 = vst.msk [vmem:[#allocation2 + $0x119] sm:$0x1] %vm276_vm0, %v17533_v0  ;;  %v331_v22 = vld [vmem:[%s17639_s26 + $0x90] sm:$0xff]  ;;  %v332_v23 = vld [vmem:[%s17639_s26 + $0x98] sm:$0xff] }
  0x1e   : > { %307 = vst.msk [vmem:[#allocation2 + $0x131] sm:$0x1] %vm276_vm0, %v17533_v0  ;;  %308 = vst.msk [vmem:[#allocation2 + $0x149] sm:$0x1] %vm276_vm0, %v17533_v0  ;;  %v333_v24 = vld [vmem:[%s17639_s26 + $0xa0] sm:$0xff]  ;;  %v334_v25 = vld [vmem:[%s17639_s26 + $0xa8] sm:$0xff] }
  0x1f   : > { %309 = vst.msk [vmem:[#allocation2 + $0x161] sm:$0x1] %vm276_vm0, %v17533_v0  ;;  %310 = vst.msk [vmem:[#allocation2 + $0x179] sm:$0x1] %vm276_vm0, %v17533_v0  ;;  %v335_v31 = vld [vmem:[%s17639_s26 + $0xb0] sm:$0xff]  ;;  %v336_v32 = vld [vmem:[%s17639_s26 + $0xb8] sm:$0xff] }
  0x20   : > { %311 = vst.msk [vmem:[#allocation2 + $0x191] sm:$0x1] %vm276_vm0, %v17533_v0  ;;  %312 = vst.msk [vmem:[#allocation2 + $0x1a9] sm:$0x1] %vm276_vm0, %v17533_v0  ;;  %v337_v34 = vld [vmem:[%s17639_s26 + $0xc0] sm:$0xff]  ;;  %v338_v35 = vld [vmem:[%s17639_s26 + $0xc8] sm:$0xff] }
  0x21   : > { %381 = vst.msk [vmem:[#allocation2 + $0x1] sm:$0xff] %vm346_vm1, %v379_v1  ;;  %382 = vst.msk [vmem:[#allocation2 + $0x9] sm:$0xff] %vm346_vm1, %v380_v2  ;;  %v339_v36 = vld [vmem:[%s17639_s26 + $0xd0] sm:$0xff]  ;;  %v340_v37 = vld [vmem:[%s17639_s26 + $0xd8] sm:$0xff]  ;;  %s16973_s5 = sshll.u32 %s25783_s15, 10 }
  0x22   : > { %347 = vst.msk [vmem:[#allocation2 + $0x19] sm:$0xff] %vm346_vm1, %v313_v3  ;;  %348 = vst.msk [vmem:[#allocation2 + $0x21] sm:$0xff] %vm346_vm1, %v314_v4  ;;  %v341_v38 = vld [vmem:[%s17639_s26 + $0xe0] sm:$0xff]  ;;  %v342_v39 = vld [vmem:[%s17639_s26 + $0xe8] sm:$0xff]  ;;  %s20460_s8 = scalar_lea.vmem %s24825_s4, %s16973_s5 }
  0x23   : > { %349 = vst.msk [vmem:[#allocation2 + $0x31] sm:$0xff] %vm346_vm1, %v315_v5  ;;  %350 = vst.msk [vmem:[#allocation2 + $0x39] sm:$0xff] %vm346_vm1, %v316_v6  ;;  %v343_v47 = vld [vmem:[%s17639_s26 + $0xf0] sm:$0xff]  ;;  %v344_v48 = vld [vmem:[%s17639_s26 + $0xf8] sm:$0xff] }
  0x24   : > { %351 = vst.msk [vmem:[#allocation2 + $0x49] sm:$0xff] %vm346_vm1, %v317_v7  ;;  %352 = vst.msk [vmem:[#allocation2 + $0x51] sm:$0xff] %vm346_vm1, %v318_v8 }
  0x25   : > { %353 = vst.msk [vmem:[#allocation2 + $0x61] sm:$0xff] %vm346_vm1, %v319_v9  ;;  %354 = vst.msk [vmem:[#allocation2 + $0x69] sm:$0xff] %vm346_vm1, %v320_v10 }
  0x26   : > { %355 = vst.msk [vmem:[#allocation2 + $0x79] sm:$0xff] %vm346_vm1, %v321_v11  ;;  %356 = vst.msk [vmem:[#allocation2 + $0x81] sm:$0xff] %vm346_vm1, %v322_v12 }
  0x27   : > { %357 = vst.msk [vmem:[#allocation2 + $0x91] sm:$0xff] %vm346_vm1, %v323_v13  ;;  %358 = vst.msk [vmem:[#allocation2 + $0x99] sm:$0xff] %vm346_vm1, %v324_v14 }
  0x28   : > { %359 = vst.msk [vmem:[#allocation2 + $0xa9] sm:$0xff] %vm346_vm1, %v325_v15  ;;  %360 = vst.msk [vmem:[#allocation2 + $0xb1] sm:$0xff] %vm346_vm1, %v326_v16  ;;  %v422_v21 = vld [vmem:[#allocation2 + $0x1] sm:$0xff]  ;;  %v423_v27 = vld [vmem:[#allocation2 + $0x9] sm:$0xff] }
  0x29   : > { %361 = vst.msk [vmem:[#allocation2 + $0xc1] sm:$0xff] %vm346_vm1, %v327_v17  ;;  %362 = vst.msk [vmem:[#allocation2 + $0xc9] sm:$0xff] %vm346_vm1, %v328_v18  ;;  %550 = vrot.lane.b32.xlu0 %v422_v21, %s17534_s27  ;;  %v17684_v26 = vld [vmem:[#allocation2 + $0x19] sm:$0xff]  ;;  %v17691_v28 = vld [vmem:[#allocation2 + $0x21] sm:$0xff] }
  0x2a   : > { %363 = vst.msk [vmem:[#allocation2 + $0xd9] sm:$0xff] %vm346_vm1, %v329_v19  ;;  %364 = vst.msk [vmem:[#allocation2 + $0xe1] sm:$0xff] %vm346_vm1, %v330_v20  ;;  %554 = vrot.lane.b32.xlu1 %v17684_v26, %s17534_s27  ;;  %v17694_v29 = vld [vmem:[#allocation2 + $0x31] sm:$0xff]  ;;  %v17698_v30 = vld [vmem:[#allocation2 + $0x39] sm:$0xff] }
  0x2b   : > { %365 = vst.msk [vmem:[#allocation2 + $0xf1] sm:$0xff] %vm346_vm1, %v331_v22  ;;  %366 = vst.msk [vmem:[#allocation2 + $0xf9] sm:$0xff] %vm346_vm1, %v332_v23  ;;  %v17704_v33 = vld [vmem:[#allocation2 + $0x49] sm:$0xff]  ;;  %v17719_v40 = vld [vmem:[#allocation2 + $0x51] sm:$0xff] }
  0x2c   : > { %367 = vst.msk [vmem:[#allocation2 + $0x109] sm:$0xff] %vm346_vm1, %v333_v24  ;;  %368 = vst.msk [vmem:[#allocation2 + $0x111] sm:$0xff] %vm346_vm1, %v334_v25  ;;  %v17726_v41 = vld [vmem:[#allocation2 + $0x61] sm:$0xff]  ;;  %v17730_v42 = vld [vmem:[#allocation2 + $0x69] sm:$0xff] }
  0x2d   : > { %552 = vrot.lane.b32.xlu0 %v423_v27, %s17534_s27  ;;  %369 = vst.msk [vmem:[#allocation2 + $0x121] sm:$0xff] %vm346_vm1, %v335_v31  ;;  %370 = vst.msk [vmem:[#allocation2 + $0x129] sm:$0xff] %vm346_vm1, %v336_v32  ;;  %v17734_v43 = vld [vmem:[#allocation2 + $0x79] sm:$0xff]  ;;  %v17738_v44 = vld [vmem:[#allocation2 + $0x81] sm:$0xff] }
  0x2e   : > { %556 = vrot.lane.b32.xlu1 %v17691_v28, %s17534_s27  ;;  %371 = vst.msk [vmem:[#allocation2 + $0x139] sm:$0xff] %vm346_vm1, %v337_v34  ;;  %372 = vst.msk [vmem:[#allocation2 + $0x141] sm:$0xff] %vm346_vm1, %v338_v35  ;;  %v17742_v45 = vld [vmem:[#allocation2 + $0x91] sm:$0xff]  ;;  %v17746_v46 = vld [vmem:[#allocation2 + $0x99] sm:$0xff] }
  0x2f   : > { %373 = vst.msk [vmem:[#allocation2 + $0x151] sm:$0xff] %vm346_vm1, %v339_v36  ;;  %374 = vst.msk [vmem:[#allocation2 + $0x159] sm:$0xff] %vm346_vm1, %v340_v37  ;;  %v17752_v49 = vld [vmem:[#allocation2 + $0xa9] sm:$0xff]  ;;  %v17758_v50 = vld [vmem:[#allocation2 + $0xb1] sm:$0xff] }
  0x30   : > { %375 = vst.msk [vmem:[#allocation2 + $0x169] sm:$0xff] %vm346_vm1, %v341_v38  ;;  %376 = vst.msk [vmem:[#allocation2 + $0x171] sm:$0xff] %vm346_vm1, %v342_v39  ;;  %v17762_v51 = vld [vmem:[#allocation2 + $0xc1] sm:$0xff]  ;;  %v17766_v52 = vld [vmem:[#allocation2 + $0xc9] sm:$0xff] }
  0x31   : > { %558 = vrot.lane.b32.xlu0 %v17694_v29, %s17534_s27  ;;  %25119 = vst [vmem:[#allocation3_spill] sm:$0xff] %v17734_v43  ;;  %25120 = vst [vmem:[#allocation4_spill] sm:$0xff] %v17738_v44  ;;  %v17770_v53 = vld [vmem:[#allocation2 + $0xd9] sm:$0xff]  ;;  %v17774_v54 = vld [vmem:[#allocation2 + $0xe1] sm:$0xff] }
  0x32   : > { %560 = vrot.lane.b32.xlu1 %v17698_v30, %s17534_s27  ;;  %25121 = vst [vmem:[#allocation5_spill] sm:$0xff] %v17742_v45  ;;  %25122 = vst [vmem:[#allocation6_spill] sm:$0xff] %v17746_v46  ;;  %v17778_v55 = vld [vmem:[#allocation2 + $0xf1] sm:$0xff]  ;;  %v17782_v56 = vld [vmem:[#allocation2 + $0xf9] sm:$0xff] }
  0x33   : > { %25123 = vst [vmem:[#allocation7_spill] sm:$0xff] %v17752_v49  ;;  %377 = vst.msk [vmem:[#allocation2 + $0x181] sm:$0xff] %vm346_vm1, %v343_v47  ;;  %v17786_v57 = vld [vmem:[#allocation2 + $0x109] sm:$0xff]  ;;  %v17790_v58 = vld [vmem:[#allocation2 + $0x111] sm:$0xff] }
  0x34   : > { %378 = vst.msk [vmem:[#allocation2 + $0x189] sm:$0xff] %vm346_vm1, %v344_v48  ;;  %25124 = vst [vmem:[#allocation8_spill] sm:$0xff] %v17758_v50  ;;  %v17794_v59 = vld [vmem:[#allocation2 + $0x121] sm:$0xff]  ;;  %v17798_v60 = vld [vmem:[#allocation2 + $0x129] sm:$0xff] }
  0x35   : > { %562 = vrot.lane.b32.xlu0 %v17704_v33, %s17534_s27  ;;  %25125 = vst [vmem:[#allocation9_spill] sm:$0xff] %v17762_v51  ;;  %25126 = vst [vmem:[#allocation10_spill] sm:$0xff] %v17766_v52  ;;  %v17802_v61 = vld [vmem:[#allocation2 + $0x139] sm:$0xff]  ;;  %v17806_v62 = vld [vmem:[#allocation2 + $0x141] sm:$0xff] }
  0x36   : > { %564 = vrot.lane.b32.xlu1 %v17719_v40, %s17534_s27  ;;  %25127 = vst [vmem:[#allocation11_spill] sm:$0xff] %v17770_v53  ;;  %25128 = vst [vmem:[#allocation12_spill] sm:$0xff] %v17774_v54  ;;  %v17810_v63 = vld [vmem:[#allocation2 + $0x151] sm:$0xff]  ;;  %v17814_v0 = vld [vmem:[#allocation2 + $0x159] sm:$0xff] }
  0x37   : > { %25129 = vst [vmem:[#allocation13_spill] sm:$0xff] %v17778_v55  ;;  %25130 = vst [vmem:[#allocation14_spill] sm:$0xff] %v17782_v56  ;;  %v17818_v1 = vld [vmem:[#allocation2 + $0x169] sm:$0xff]  ;;  %v17822_v2 = vld [vmem:[#allocation2 + $0x171] sm:$0xff] }
  0x38   : > { %25131 = vst [vmem:[#allocation15_spill] sm:$0xff] %v17786_v57  ;;  %25132 = vst [vmem:[#allocation16_spill] sm:$0xff] %v17790_v58  ;;  %v17826_v3 = vld [vmem:[#allocation2 + $0x18] sm:$0xff]  ;;  %v17830_v4 = vld [vmem:[#allocation2 + $0x20] sm:$0xff] }
  0x39   : > { %566 = vrot.lane.b32.xlu0 %v17726_v41, %s17534_s27  ;;  %25133 = vst [vmem:[#allocation17_spill] sm:$0xff] %v17794_v59  ;;  %25134 = vst [vmem:[#allocation18_spill] sm:$0xff] %v17798_v60  ;;  %v17834_v5 = vld [vmem:[#allocation2 + $0x30] sm:$0xff]  ;;  %v17838_v6 = vld [vmem:[#allocation2 + $0x38] sm:$0xff] }
  0x3a   : > { %568 = vrot.lane.b32.xlu1 %v17730_v42, %s17534_s27  ;;  %25135 = vst [vmem:[#allocation19_spill] sm:$0xff] %v17802_v61  ;;  %25136 = vst [vmem:[#allocation20_spill] sm:$0xff] %v17806_v62  ;;  %v17842_v7 = vld [vmem:[#allocation2 + $0x48] sm:$0xff]  ;;  %v17846_v8 = vld [vmem:[#allocation2 + $0x50] sm:$0xff] }
  0x3b   : > { %25137 = vst [vmem:[#allocation21_spill] sm:$0xff] %v17810_v63  ;;  %25138 = vst [vmem:[#allocation22_spill] sm:$0xff] %v17814_v0  ;;  %v17850_v9 = vld [vmem:[#allocation2 + $0x60] sm:$0xff]  ;;  %v17854_v10 = vld [vmem:[#allocation2 + $0x68] sm:$0xff] }
  0x3c   : > { %25139 = vst [vmem:[#allocation23_spill] sm:$0xff] %v17818_v1  ;;  %25140 = vst [vmem:[#allocation24_spill] sm:$0xff] %v17822_v2  ;;  %v17858_v11 = vld [vmem:[#allocation2 + $0x78] sm:$0xff]  ;;  %v17862_v12 = vld [vmem:[#allocation2 + $0x80] sm:$0xff] }
  0x3d   : > { %570 = vrot.lane.b32.xlu0 %v17734_v43, %s17534_s27  ;;  %v17866_v13 = vld [vmem:[#allocation2 + $0x90] sm:$0xff]  ;;  %v17870_v14 = vld [vmem:[#allocation2 + $0x98] sm:$0xff]  ;;  %v17874_v15 = vld [vmem:[#allocation2 + $0xa8] sm:$0xff] }
  0x3e   : > { %572 = vrot.lane.b32.xlu1 %v17738_v44, %s17534_s27  ;;  %v17878_v16 = vld [vmem:[#allocation2 + $0xb0] sm:$0xff]  ;;  %v17882_v17 = vld [vmem:[#allocation2 + $0xc0] sm:$0xff]  ;;  %v17886_v18 = vld [vmem:[#allocation2 + $0xc8] sm:$0xff] }
  0x3f   : > { %25141 = vst [vmem:[#allocation25_spill] sm:$0xff] %v17882_v17  ;;  %25142 = vst [vmem:[#allocation26_spill] sm:$0xff] %v17886_v18  ;;  %v17890_v19 = vld [vmem:[#allocation2 + $0xd8] sm:$0xff]  ;;  %v17894_v20 = vld [vmem:[#allocation2 + $0xe0] sm:$0xff] }
  0x40   : > { %25143 = vst [vmem:[#allocation27_spill] sm:$0xff] %v17890_v19  ;;  %25144 = vst [vmem:[#allocation28_spill] sm:$0xff] %v17894_v20  ;;  %v17898_v21 = vld [vmem:[#allocation2 + $0xf0] sm:$0xff]  ;;  %v17902_v22 = vld [vmem:[#allocation2 + $0xf8] sm:$0xff] }
  0x41   : > { %574 = vrot.lane.b32.xlu0 %v17742_v45, %s17534_s27  ;;  %25145 = vst [vmem:[#allocation29_spill] sm:$0xff] %v17898_v21  ;;  %25146 = vst [vmem:[#allocation30_spill] sm:$0xff] %v17902_v22  ;;  %v17906_v23 = vld [vmem:[#allocation2 + $0x108] sm:$0xff]  ;;  %v17910_v24 = vld [vmem:[#allocation2 + $0x110] sm:$0xff] }
  0x42   : > { %576 = vrot.lane.b32.xlu1 %v17746_v46, %s17534_s27  ;;  %25147 = vst [vmem:[#allocation31_spill] sm:$0xff] %v17906_v23  ;;  %25148 = vst [vmem:[#allocation32_spill] sm:$0xff] %v17910_v24  ;;  %v17914_v25 = vld [vmem:[#allocation2 + $0x120] sm:$0xff]  ;;  %v17918_v27 = vld [vmem:[#allocation2 + $0x128] sm:$0xff] }
  0x43   : > { %25149 = vst [vmem:[#allocation33_spill] sm:$0xff] %v17914_v25  ;;  %25150 = vst [vmem:[#allocation34_spill] sm:$0xff] %v17918_v27  ;;  %v17922_v31 = vld [vmem:[#allocation2 + $0x138] sm:$0xff]  ;;  %v17926_v32 = vld [vmem:[#allocation2 + $0x140] sm:$0xff] }
  0x44   : > { %25151 = vst [vmem:[#allocation35_spill] sm:$0xff] %v17922_v31  ;;  %25152 = vst [vmem:[#allocation36_spill] sm:$0xff] %v17926_v32  ;;  %v1000_v34 = vld [vmem:[%s24823_s2] sm:$0xff]  ;;  %v1001_v35 = vld [vmem:[%s24823_s2 + $0x8] sm:$0xff] }
  0x45   : > { %578 = vrot.lane.b32.xlu0 %v17752_v49, %s17534_s27  ;;  %v17936_v36 = vld [vmem:[#allocation2 + $0x150] sm:$0xff]  ;;  %v17318_v37 = vpack.c.bf16 %v1001_v35, %v1000_v34  ;;  %v17942_v39 = vld [vmem:[#allocation2 + $0x158] sm:$0xff]  ;;  %v17948_v48 = vld [vmem:[#allocation2 + $0x168] sm:$0xff] }
  0x46   : > { %580 = vrot.lane.b32.xlu1 %v17758_v50, %s17534_s27  ;;  %25153 = vst [vmem:[#allocation37_spill] sm:$0xff] %v17936_v36  ;;  %25154 = vst [vmem:[#allocation38_spill] sm:$0xff] %v17942_v39  ;;  %v17954_v35 = vld [vmem:[#allocation2 + $0x170] sm:$0xff] }
  0x47   : > { %17319 = vmatprep.subr.bf16.mxu0 %v17318_v37  ;;  %25155 = vst [vmem:[#allocation39_spill] sm:$0xff] %v17948_v48  ;;  %25156 = vst [vmem:[#allocation40_spill] sm:$0xff] %v17954_v35 }
  0x48   : > { %17321 = vmatpush3.bf16.msra.mxu0 %v17318_v37  ;;  %v485_v37 = vld [vmem:[#allocation2 + $0x188] sm:$0xff] }
  0x49   : > { %582 = vrot.lane.b32.xlu0 %v17762_v51, %s17534_s27 }
  0x4a   : > { %584 = vrot.lane.b32.xlu1 %v17766_v52, %s17534_s27 }
  0x4d   : > { %586 = vrot.lane.b32.xlu0 %v17770_v53, %s17534_s27 }
  0x4e   : > { %588 = vrot.lane.b32.xlu1 %v17774_v54, %s17534_s27 }
  0x51   : > { %590 = vrot.lane.b32.xlu0 %v17778_v55, %s17534_s27 }
  0x52   : > { %592 = vrot.lane.b32.xlu1 %v17782_v56, %s17534_s27 }
  0x55   : > { %594 = vrot.lane.b32.xlu0 %v17786_v57, %s17534_s27 }
  0x56   : > { %596 = vrot.lane.b32.xlu1 %v17790_v58, %s17534_s27 }
  0x59   : > { %598 = vrot.lane.b32.xlu0 %v17794_v59, %s17534_s27 }
  0x5a   : > { %600 = vrot.lane.b32.xlu1 %v17798_v60, %s17534_s27 }
  0x5d   : > { %602 = vrot.lane.b32.xlu0 %v17802_v61, %s17534_s27 }
  0x5e   : > { %604 = vrot.lane.b32.xlu1 %v17806_v62, %s17534_s27 }
  0x61   : > { %606 = vrot.lane.b32.xlu0 %v17810_v63, %s17534_s27 }
  0x62   : > { %608 = vrot.lane.b32.xlu1 %v17814_v0, %s17534_s27 }
  0x65   : > { %610 = vrot.lane.b32.xlu0 %v17818_v1, %s17534_s27 }
  0x66   : > { %612 = vrot.lane.b32.xlu1 %v17822_v2, %s17534_s27 }
  0x69   : > { %678 = vrot.lane.b32.xlu0 %v17826_v3, %s17535_s28 }
  0x6a   : > { %680 = vrot.lane.b32.xlu1 %v17830_v4, %s17535_s28 }
  0x6d   : > { %682 = vrot.lane.b32.xlu0 %v17834_v5, %s17535_s28 }
  0x6e   : > { %684 = vrot.lane.b32.xlu1 %v17838_v6, %s17535_s28 }
  0x71   : > { %686 = vrot.lane.b32.xlu0 %v17842_v7, %s17535_s28 }
  0x72   : > { %688 = vrot.lane.b32.xlu1 %v17846_v8, %s17535_s28 }
  0x75   : > { %690 = vrot.lane.b32.xlu0 %v17850_v9, %s17535_s28 }
  0x76   : > { %692 = vrot.lane.b32.xlu1 %v17854_v10, %s17535_s28 }
  0x79   : > { %694 = vrot.lane.b32.xlu0 %v17858_v11, %s17535_s28 }
  0x7a   : > { %696 = vrot.lane.b32.xlu1 %v17862_v12, %s17535_s28 }
  0x7d   : > { %698 = vrot.lane.b32.xlu0 %v17866_v13, %s17535_s28 }
  0x7e   : > { %700 = vrot.lane.b32.xlu1 %v17870_v14, %s17535_s28 }
  0x81   : > { %702 = vrot.lane.b32.xlu0 %v17874_v15, %s17535_s28 }
  0x82   : > { %704 = vrot.lane.b32.xlu1 %v17878_v16, %s17535_s28 }
  0x85   : > { %706 = vrot.lane.b32.xlu0 %v17882_v17, %s17535_s28 }
  0x86   : > { %708 = vrot.lane.b32.xlu1 %v17886_v18, %s17535_s28 }
  0x89   : > { %710 = vrot.lane.b32.xlu0 %v17890_v19, %s17535_s28 }
  0x8a   : > { %712 = vrot.lane.b32.xlu1 %v17894_v20, %s17535_s28 }
  0x8d   : > { %714 = vrot.lane.b32.xlu0 %v17898_v21, %s17535_s28 }
  0x8e   : > { %716 = vrot.lane.b32.xlu1 %v17902_v22, %s17535_s28 }
  0x91   : > { %718 = vrot.lane.b32.xlu0 %v17906_v23, %s17535_s28 }
  0x92   : > { %720 = vrot.lane.b32.xlu1 %v17910_v24, %s17535_s28 }
  0x95   : > { %722 = vrot.lane.b32.xlu0 %v17914_v25, %s17535_s28 }
  0x96   : > { %724 = vrot.lane.b32.xlu1 %v17918_v27, %s17535_s28 }
  0x99   : > { %726 = vrot.lane.b32.xlu0 %v17922_v31, %s17535_s28  ;;  %v484_v31 = vld [vmem:[#allocation2 + $0x180] sm:$0xff] }
  0x9a   : > { %728 = vrot.lane.b32.xlu1 %v17926_v32, %s17535_s28 }
  0x9b   : > { %v17940_v38 = vpop.permute.xlu0 %550 }
  0x9c   : > { %v17944_v47 = vpop.permute.xlu1 %554 }
  0x9d   : > { %730 = vrot.lane.b32.xlu0 %v17936_v36, %s17535_s28 }
  0x9e   : > { %732 = vrot.lane.b32.xlu1 %v17942_v39, %s17535_s28 }
  0x9f   : > { %v17952_v34 = vpop.permute.xlu0 %552 }
  0xa0   : > { %v17956_v32 = vpop.permute.xlu1 %556 }
  0xa1   : > { %734 = vrot.lane.b32.xlu0 %v17948_v48, %s17535_s28 }
  0xa2   : > { %736 = vrot.lane.b32.xlu1 %v17954_v35, %s17535_s28 }
  0xa3   : > { %v17962_v36 = vpop.permute.xlu0 %558 }
  0xa4   : > { %v17964_v27 = vpop.permute.xlu1 %560 }
  0xa5   : > { %738 = vrot.lane.b32.xlu0 %v484_v31, %s17535_s28 }
  0xa6   : > { %740 = vrot.lane.b32.xlu1 %v485_v37, %s17535_s28 }
  0xa7   : > { %v17968_v39 = vpop.permute.xlu0 %562 }
  0xa8   : > { %v17970_v25 = vpop.permute.xlu1 %564 }
  0xa9   : > { %806 = vrot.lane.b32.xlu0 %v17684_v26, %s17536_s7 }
  0xaa   : > { %808 = vrot.lane.b32.xlu1 %v17691_v28, %s17536_s7 }
  0xab   : > { %v17976_v35 = vpop.permute.xlu0 %566 }
  0xac   : > { %v17978_v48 = vpop.permute.xlu1 %568 }
  0xad   : > { %810 = vrot.lane.b32.xlu0 %v17694_v29, %s17536_s7 }
  0xae   : > { %812 = vrot.lane.b32.xlu1 %v17698_v30, %s17536_s7 }
  0xaf   : > { %v17984_v31 = vpop.permute.xlu0 %570 }
  0xb0   : > { %v17986_v37 = vpop.permute.xlu1 %572 }
  0xb1   : > { %814 = vrot.lane.b32.xlu0 %v17704_v33, %s17536_s7 }
  0xb2   : > { %816 = vrot.lane.b32.xlu1 %v17719_v40, %s17536_s7 }
  0xb3   : > { %v17992_v24 = vpop.permute.xlu0 %574 }
  0xb4   : > { %v17994_v23 = vpop.permute.xlu1 %576 }
  0xb5   : > { %818 = vrot.lane.b32.xlu0 %v17726_v41, %s17536_s7 }
  0xb6   : > { %820 = vrot.lane.b32.xlu1 %v17730_v42, %s17536_s7 }
  0xb7   : > { %v18000_v22 = vpop.permute.xlu0 %578 }
  0xb8   : > { %v18002_v21 = vpop.permute.xlu1 %580 }
  0xb9   : > { %822 = vrot.lane.b32.xlu0 %v17734_v43, %s17536_s7 }
  0xba   : > { %824 = vrot.lane.b32.xlu1 %v17738_v44, %s17536_s7 }
  0xbb   : > { %v18008_v20 = vpop.permute.xlu0 %582 }
  0xbc   : > { %25157 = vst [vmem:[#allocation41_spill] sm:$0xff] %v18008_v20  ;;  %v18010_v19 = vpop.permute.xlu1 %584 }
  0xbd   : > { %25158 = vst [vmem:[#allocation42_spill] sm:$0xff] %v18010_v19  ;;  %826 = vrot.lane.b32.xlu0 %v17742_v45, %s17536_s7  ;;  %v18170_v45 = vld [vmem:[#allocation2 + $0x9a] sm:$0xff] }
  0xbe   : > { %828 = vrot.lane.b32.xlu1 %v17746_v46, %s17536_s7  ;;  %25189 = vst [vmem:[#allocation73_spill] sm:$0xff] %v18170_v45 }
  0xbf   : > { %v18016_v18 = vpop.permute.xlu0 %586 }
  0xc0   : > { %25159 = vst [vmem:[#allocation43_spill] sm:$0xff] %v18016_v18  ;;  %v18018_v17 = vpop.permute.xlu1 %588 }
  0xc1   : > { %25160 = vst [vmem:[#allocation44_spill] sm:$0xff] %v18018_v17  ;;  %830 = vrot.lane.b32.xlu0 %v17752_v49, %s17536_s7  ;;  %v18158_v49 = vld [vmem:[#allocation2 + $0x82] sm:$0xff] }
  0xc2   : > { %832 = vrot.lane.b32.xlu1 %v17758_v50, %s17536_s7  ;;  %25185 = vst [vmem:[#allocation69_spill] sm:$0xff] %v18158_v49 }
  0xc3   : > { %v18024_v44 = vpop.permute.xlu0 %590 }
  0xc4   : > { %25161 = vst [vmem:[#allocation45_spill] sm:$0xff] %v18024_v44  ;;  %v18026_v20 = vpop.permute.xlu1 %592 }
  0xc5   : > { %25162 = vst [vmem:[#allocation46_spill] sm:$0xff] %v18026_v20  ;;  %834 = vrot.lane.b32.xlu0 %v17762_v51, %s17536_s7  ;;  %v18146_v51 = vld [vmem:[#allocation2 + $0x6a] sm:$0xff] }
  0xc6   : > { %836 = vrot.lane.b32.xlu1 %v17766_v52, %s17536_s7  ;;  %25182 = vst [vmem:[#allocation66_spill] sm:$0xff] %v18146_v51 }
  0xc7   : > { %v18032_v46 = vpop.permute.xlu0 %594 }
  0xc8   : > { %25163 = vst [vmem:[#allocation47_spill] sm:$0xff] %v18032_v46  ;;  %v18034_v18 = vpop.permute.xlu1 %596 }
  0xc9   : > { %25164 = vst [vmem:[#allocation48_spill] sm:$0xff] %v18034_v18  ;;  %838 = vrot.lane.b32.xlu0 %v17770_v53, %s17536_s7  ;;  %v18134_v53 = vld [vmem:[#allocation2 + $0x52] sm:$0xff] }
  0xca   : > { %840 = vrot.lane.b32.xlu1 %v17774_v54, %s17536_s7  ;;  %25180 = vst [vmem:[#allocation64_spill] sm:$0xff] %v18134_v53 }
  0xcb   : > { %v18040_v50 = vpop.permute.xlu0 %598 }
  0xcc   : > { %25165 = vst [vmem:[#allocation49_spill] sm:$0xff] %v18040_v50  ;;  %v18042_v44 = vpop.permute.xlu1 %600 }
  0xcd   : > { %25166 = vst [vmem:[#allocation50_spill] sm:$0xff] %v18042_v44  ;;  %842 = vrot.lane.b32.xlu0 %v17778_v55, %s17536_s7 }
  0xce   : > { %844 = vrot.lane.b32.xlu1 %v17782_v56, %s17536_s7 }
  0xcf   : > { %v18048_v52 = vpop.permute.xlu0 %602 }
  0xd0   : > { %25167 = vst [vmem:[#allocation51_spill] sm:$0xff] %v18048_v52  ;;  %v18050_v46 = vpop.permute.xlu1 %604 }
  0xd1   : > { %25168 = vst [vmem:[#allocation52_spill] sm:$0xff] %v18050_v46  ;;  %846 = vrot.lane.b32.xlu0 %v17786_v57, %s17536_s7  ;;  %v18110_v46 = vld [vmem:[#allocation2 + $0x22] sm:$0xff] }
  0xd2   : > { %848 = vrot.lane.b32.xlu1 %v17790_v58, %s17536_s7  ;;  %25176 = vst [vmem:[#allocation60_spill] sm:$0xff] %v18110_v46 }
  0xd3   : > { %v18056_v54 = vpop.permute.xlu0 %606 }
  0xd4   : > { %25169 = vst [vmem:[#allocation53_spill] sm:$0xff] %v18056_v54  ;;  %v18058_v50 = vpop.permute.xlu1 %608 }
  0xd5   : > { %25170 = vst [vmem:[#allocation54_spill] sm:$0xff] %v18058_v50  ;;  %850 = vrot.lane.b32.xlu0 %v17794_v59, %s17536_s7 }
  0xd6   : > { %852 = vrot.lane.b32.xlu1 %v17798_v60, %s17536_s7 }
  0xd7   : > { %v18064_v56 = vpop.permute.xlu0 %610 }
  0xd8   : > { %25171 = vst [vmem:[#allocation55_spill] sm:$0xff] %v18064_v56  ;;  %v18066_v52 = vpop.permute.xlu1 %612 }
  0xd9   : > { %25172 = vst [vmem:[#allocation56_spill] sm:$0xff] %v18066_v52  ;;  %854 = vrot.lane.b32.xlu0 %v17802_v61, %s17536_s7  ;;  %v18086_v61 = vld [vmem:[#allocation2 + $0x181] sm:$0xff]  ;;  %v18092_v52 = vld [vmem:[#allocation2 + $0x189] sm:$0xff] }
  0xda   : > { %856 = vrot.lane.b32.xlu1 %v17806_v62, %s17536_s7  ;;  %25173 = vst [vmem:[#allocation57_spill] sm:$0xff] %v18086_v61  ;;  %25174 = vst [vmem:[#allocation58_spill] sm:$0xff] %v18092_v52 }
  0xdb   : > { %v18072_v58 = vpop.permute.xlu0 %678 }
  0xdc   : > { %v18074_v54 = vpop.permute.xlu1 %680 }
  0xdd   : > { %858 = vrot.lane.b32.xlu0 %v17810_v63, %s17536_s7 }
  0xde   : > { %860 = vrot.lane.b32.xlu1 %v17814_v0, %s17536_s7  ;;  %v1330_v0 = vld [vmem:[#allocation2 + $0x2] sm:$0xff] }
  0xdf   : > { %v18080_v60 = vpop.permute.xlu0 %682 }
  0xe0   : > { %v18082_v56 = vpop.permute.xlu1 %684 }
  0xe1   : > { %862 = vrot.lane.b32.xlu0 %v17818_v1, %s17536_s7  ;;  %v1331_v1 = vld [vmem:[#allocation2 + $0xa] sm:$0xff] }
  0xe2   : > { %864 = vrot.lane.b32.xlu1 %v17822_v2, %s17536_s7  ;;  %v18105_v2 = vld [vmem:[#allocation2 + $0x1a] sm:$0xff] }
  0xe3   : > { %v18090_v62 = vpop.permute.xlu0 %686  ;;  %25175 = vst [vmem:[#allocation59_spill] sm:$0xff] %v18105_v2 }
  0xe4   : > { %v18094_v63 = vpop.permute.xlu1 %688 }
  0xe5   : > { %866 = vrot.lane.b32.xlu0 %v18086_v61, %s17536_s7 }
  0xe6   : > { %868 = vrot.lane.b32.xlu1 %v18092_v52, %s17536_s7  ;;  %v18116_v52 = vld [vmem:[#allocation2 + $0x32] sm:$0xff] }
  0xe7   : > { %v18100_v59 = vpop.permute.xlu0 %690  ;;  %25177 = vst [vmem:[#allocation61_spill] sm:$0xff] %v18116_v52 }
  0xe8   : > { %v18102_v50 = vpop.permute.xlu1 %692 }
  0xe9   : > { %1426 = vrot.lane.b32.xlu0 %v1330_v0, %s17534_s27  ;;  %v18122_v0 = vld [vmem:[#allocation2 + $0x3a] sm:$0xff] }
  0xea   : > { %1428 = vrot.lane.b32.xlu1 %v1331_v1, %s17534_s27  ;;  %25178 = vst [vmem:[#allocation62_spill] sm:$0xff] %v18122_v0  ;;  %v18128_v1 = vld [vmem:[#allocation2 + $0x4a] sm:$0xff] }
  0xeb   : > { %v18108_v57 = vpop.permute.xlu0 %694  ;;  %25179 = vst [vmem:[#allocation63_spill] sm:$0xff] %v18128_v1 }
  0xec   : > { %v18112_v61 = vpop.permute.xlu1 %696 }
  0xed   : > { %1430 = vrot.lane.b32.xlu0 %v18105_v2, %s17534_s27 }
  0xee   : > { %1432 = vrot.lane.b32.xlu1 %v18110_v46, %s17534_s27  ;;  %v18140_v46 = vld [vmem:[#allocation2 + $0x62] sm:$0xff] }
  0xef   : > { %v18120_v55 = vpop.permute.xlu0 %698  ;;  %25181 = vst [vmem:[#allocation65_spill] sm:$0xff] %v18140_v46 }
  0xf0   : > { %v18124_v44 = vpop.permute.xlu1 %700 }
  0xf1   : > { %1434 = vrot.lane.b32.xlu0 %v18116_v52, %s17534_s27 }
  0xf2   : > { %1436 = vrot.lane.b32.xlu1 %v18122_v0, %s17534_s27  ;;  %v18152_v0 = vld [vmem:[#allocation2 + $0x7a] sm:$0xff] }
  0xf3   : > { %v18132_v2 = vpop.permute.xlu0 %702  ;;  %25183 = vst [vmem:[#allocation67_spill] sm:$0xff] %v18152_v0 }
  0xf4   : > { %v18136_v18 = vpop.permute.xlu1 %704 }
  0xf5   : > { %1438 = vrot.lane.b32.xlu0 %v18128_v1, %s17534_s27 }
  0xf6   : > { %1440 = vrot.lane.b32.xlu1 %v18134_v53, %s17534_s27  ;;  %v18164_v53 = vld [vmem:[#allocation2 + $0x92] sm:$0xff] }
  0xf7   : > { %v18144_v52 = vpop.permute.xlu0 %706  ;;  %25187 = vst [vmem:[#allocation71_spill] sm:$0xff] %v18164_v53 }
  0xf8   : > { %v18148_v20 = vpop.permute.xlu1 %708 }
  0xf9   : > { %1442 = vrot.lane.b32.xlu0 %v18140_v46, %s17534_s27 }
  0xfa   : > { %1444 = vrot.lane.b32.xlu1 %v18146_v51, %s17534_s27  ;;  %v18176_v51 = vld [vmem:[#allocation2 + $0xaa] sm:$0xff] }
  0xfb   : > { %v18156_v1 = vpop.permute.xlu0 %710  ;;  %25191 = vst [vmem:[#allocation75_spill] sm:$0xff] %v18176_v51 }
  0xfc   : > { %25184 = vst [vmem:[#allocation68_spill] sm:$0xff] %v18156_v1  ;;  %v18160_v17 = vpop.permute.xlu1 %712 }
  0xfd   : > { %25186 = vst [vmem:[#allocation70_spill] sm:$0xff] %v18160_v17  ;;  %1446 = vrot.lane.b32.xlu0 %v18152_v0, %s17534_s27  ;;  %v18182_v17 = vld [vmem:[#allocation2 + $0xb2] sm:$0xff] }
  0xfe   : > { %1448 = vrot.lane.b32.xlu1 %v18158_v49, %s17534_s27  ;;  %25193 = vst [vmem:[#allocation77_spill] sm:$0xff] %v18182_v17  ;;  %v18188_v49 = vld [vmem:[#allocation2 + $0xc2] sm:$0xff] }
  0xff   : > { %v18168_v46 = vpop.permute.xlu0 %714  ;;  %25195 = vst [vmem:[#allocation79_spill] sm:$0xff] %v18188_v49 }
 0x100   : > { %25188 = vst [vmem:[#allocation72_spill] sm:$0xff] %v18168_v46  ;;  %v18172_v19 = vpop.permute.xlu1 %716 }
 0x101   : > { %25190 = vst [vmem:[#allocation74_spill] sm:$0xff] %v18172_v19  ;;  %1450 = vrot.lane.b32.xlu0 %v18164_v53, %s17534_s27  ;;  %v18194_v19 = vld [vmem:[#allocation2 + $0xca] sm:$0xff] }
 0x102   : > { %1452 = vrot.lane.b32.xlu1 %v18170_v45, %s17534_s27  ;;  %25197 = vst [vmem:[#allocation81_spill] sm:$0xff] %v18194_v19  ;;  %v18200_v45 = vld [vmem:[#allocation2 + $0xda] sm:$0xff] }
 0x103   : > { %v18180_v0 = vpop.permute.xlu0 %718  ;;  %25199 = vst [vmem:[#allocation83_spill] sm:$0xff] %v18200_v45 }
 0x104   : > { %25192 = vst [vmem:[#allocation76_spill] sm:$0xff] %v18180_v0  ;;  %v18184_v1 = vpop.permute.xlu1 %720 }
 0x105   : > { %25194 = vst [vmem:[#allocation78_spill] sm:$0xff] %v18184_v1  ;;  %1454 = vrot.lane.b32.xlu0 %v18176_v51, %s17534_s27  ;;  %v18206_v1 = vld [vmem:[#allocation2 + $0xe2] sm:$0xff] }
 0x106   : > { %1456 = vrot.lane.b32.xlu1 %v18182_v17, %s17534_s27  ;;  %25201 = vst [vmem:[#allocation85_spill] sm:$0xff] %v18206_v1  ;;  %v18212_v17 = vld [vmem:[#allocation2 + $0xf2] sm:$0xff] }
 0x107   : > { %v18192_v53 = vpop.permute.xlu0 %722  ;;  %25203 = vst [vmem:[#allocation87_spill] sm:$0xff] %v18212_v17 }
 0x108   : > { %25196 = vst [vmem:[#allocation80_spill] sm:$0xff] %v18192_v53  ;;  %v18196_v46 = vpop.permute.xlu1 %724 }
 0x109   : > { %25198 = vst [vmem:[#allocation82_spill] sm:$0xff] %v18196_v46  ;;  %1458 = vrot.lane.b32.xlu0 %v18188_v49, %s17534_s27  ;;  %v18218_v46 = vld [vmem:[#allocation2 + $0xfa] sm:$0xff] }
 0x10a   : > { %1460 = vrot.lane.b32.xlu1 %v18194_v19, %s17534_s27  ;;  %25205 = vst [vmem:[#allocation89_spill] sm:$0xff] %v18218_v46  ;;  %v18224_v19 = vld [vmem:[#allocation2 + $0x10a] sm:$0xff] }
 0x10b   : > { %v18204_v51 = vpop.permute.xlu0 %726  ;;  %25207 = vst [vmem:[#allocation91_spill] sm:$0xff] %v18224_v19 }
 0x10c   : > { %25200 = vst [vmem:[#allocation84_spill] sm:$0xff] %v18204_v51  ;;  %v18208_v0 = vpop.permute.xlu1 %728 }
 0x10d   : > { %25202 = vst [vmem:[#allocation86_spill] sm:$0xff] %v18208_v0  ;;  %1462 = vrot.lane.b32.xlu0 %v18200_v45, %s17534_s27  ;;  %v18230_v0 = vld [vmem:[#allocation2 + $0x112] sm:$0xff] }
 0x10e   : > { %1464 = vrot.lane.b32.xlu1 %v18206_v1, %s17534_s27  ;;  %25209 = vst [vmem:[#allocation93_spill] sm:$0xff] %v18230_v0  ;;  %v18236_v1 = vld [vmem:[#allocation2 + $0x122] sm:$0xff] }
 0x10f   : > { %v18216_v49 = vpop.permute.xlu0 %730  ;;  %25211 = vst [vmem:[#allocation95_spill] sm:$0xff] %v18236_v1 }
 0x110   : > { %25204 = vst [vmem:[#allocation88_spill] sm:$0xff] %v18216_v49  ;;  %v18220_v53 = vpop.permute.xlu1 %732  ;;  %v18242_v49 = vld [vmem:[#allocation2 + $0x12a] sm:$0xff] }
 0x111   : > { %25206 = vst [vmem:[#allocation90_spill] sm:$0xff] %v18220_v53  ;;  %1466 = vrot.lane.b32.xlu0 %v18212_v17, %s17534_s27  ;;  %v390_v53 = vld [vmem:[#allocation2] sm:$0xff] }
 0x112   : > { %1468 = vrot.lane.b32.xlu1 %v18218_v46, %s17534_s27  ;;  %v391_v46 = vld [vmem:[#allocation2 + $0x8] sm:$0xff] }
 0x113   : > { %v18228_v45 = vpop.permute.xlu0 %734 }
 0x114   : > { %25208 = vst [vmem:[#allocation92_spill] sm:$0xff] %v18228_v45  ;;  %v18232_v51 = vpop.permute.xlu1 %736 }
 0x115   : > { %25210 = vst [vmem:[#allocation94_spill] sm:$0xff] %v18232_v51  ;;  %1470 = vrot.lane.b32.xlu0 %v18224_v19, %s17534_s27  ;;  %v902_v19 = vsel %vm346_vm1, %v390_v53, %v17940_v38  ;;  %v18250_v51 = vld [vmem:[#allocation2 + $0x13a] sm:$0xff] }
 0x116   : > { %1472 = vrot.lane.b32.xlu1 %v18230_v0, %s17534_s27  ;;  %v935_v0 = vsel %vm934_vm2, %v902_v19, %v18072_v58  ;;  %v904_v58 = vsel %vm346_vm1, %v17826_v3, %v17944_v47  ;;  %v18281_v3 = vld [vmem:[#allocation2 + $0x15a] sm:$0xff] }
 0x117   : > { %v18240_v17 = vpop.permute.xlu0 %738 }
 0x118   : > { %25212 = vst [vmem:[#allocation96_spill] sm:$0xff] %v18240_v17  ;;  %v18244_v45 = vpop.permute.xlu1 %740 }
 0x119   : > { %25213 = vst [vmem:[#allocation97_spill] sm:$0xff] %v18244_v45  ;;  %1474 = vrot.lane.b32.xlu0 %v18236_v1, %s17534_s27  ;;  %v903_v45 = vsel %vm346_vm1, %v391_v46, %v17952_v34  ;;  %v18259_v1 = vld [vmem:[#allocation2 + $0x142] sm:$0xff]  ;;  %v18270_v46 = vld [vmem:[#allocation2 + $0x152] sm:$0xff] }
 0x11a   : > { %1476 = vrot.lane.b32.xlu1 %v18242_v49, %s17534_s27  ;;  %v936_v53 = vsel %vm934_vm2, %v903_v45, %v18074_v54 }
 0x11b   : > { %v807_v17 = vpop.permute.xlu0 %806 }
 0x11c   : > { %v968_v43 = vsel %vm967_vm3, %v935_v0, %v807_v17  ;;  %v809_v38 = vpop.permute.xlu1 %808  ;;  %v937_v17 = vsel %vm934_vm2, %v904_v58, %v18080_v60  ;;  %v906_v60 = vsel %vm346_vm1, %v17834_v5, %v17962_v36  ;;  %v18303_v5 = vld [vmem:[#allocation2 + $0x172] sm:$0xff] }
 0x11d   : > { %1478 = vrot.lane.b32.xlu0 %v18250_v51, %s17534_s27  ;;  %17114 = vmatprep.mubr.msk.f32.mxu0 %vm1008_vm4, %v968_v43  ;;  %v969_v19 = vsel %vm967_vm3, %v936_v53, %v809_v38  ;;  %v905_v43 = vsel %vm346_vm1, %v17830_v4, %v17956_v32  ;;  %v18292_v4 = vld [vmem:[#allocation2 + $0x16a] sm:$0xff]  ;;  %v939_v32 = vsel %vm934_vm2, %v906_v60, %v18090_v62 }
 0x11e   : > { %1480 = vrot.lane.b32.xlu1 %v18259_v1, %s17534_s27  ;;  %17115 = vmatmul.mubr.msk.f32.vlgmr.msra.gmra.mrb[0].mxu0 %vm1008_vm4, %v969_v19  ;;  %v938_v47 = vsel %vm934_vm2, %v905_v43, %v18082_v56  ;;  %v907_v53 = vsel %vm346_vm1, %v17838_v6, %v17964_v27  ;;  %v908_v62 = vsel %vm346_vm1, %v17842_v7, %v17968_v39  ;;  %v25214_v43 = vld [vmem:[#allocation3_spill] sm:$0xff]  ;;  %v25219_v60 = vld [vmem:[#allocation42_spill] sm:$0xff] }
 0x11f   : > { %v811_v45 = vpop.permute.xlu0 %810  ;;  %v940_v36 = vsel %vm934_vm2, %v907_v53, %v18094_v63  ;;  %v941_v6 = vsel %vm934_vm2, %v908_v62, %v18100_v59  ;;  %v909_v27 = vsel %vm346_vm1, %v17846_v8, %v17970_v25  ;;  %v910_v59 = vsel %vm346_vm1, %v17850_v9, %v17976_v35  ;;  %v25221_v53 = vld [vmem:[#allocation70_spill] sm:$0xff]  ;;  %v25223_v62 = vld [vmem:[#allocation43_spill] sm:$0xff] }
 0x120   : > { %v970_v54 = vsel %vm967_vm3, %v937_v17, %v811_v45  ;;  %v813_v34 = vpop.permute.xlu1 %812  ;;  %v942_v7 = vsel %vm934_vm2, %v909_v27, %v18102_v50  ;;  %v943_v8 = vsel %vm934_vm2, %v910_v59, %v18108_v57  ;;  %v25225_v27 = vld [vmem:[#allocation72_spill] sm:$0xff] }
 0x121   : > { %1482 = vrot.lane.b32.xlu0 %v18270_v46, %s17534_s27  ;;  %17117 = vmatprep.mubr.msk.f32.mxu0 %vm1008_vm4, %v970_v54  ;;  %v971_v0 = vsel %vm967_vm3, %v938_v47, %v813_v34  ;;  %v25217_v34 = vld [vmem:[#allocation68_spill] sm:$0xff] }
 0x122   : > { %1484 = vrot.lane.b32.xlu1 %v18281_v3, %s17534_s27  ;;  %17118 = vmatmul.mubr.msk.f32.gmra.mrb[2].mxu0 %vm1008_vm4, %v971_v0  ;;  %v25220_v0 = vld [vmem:[#allocation26_spill] sm:$0xff]  ;;  %v25227_v59 = vld [vmem:[#allocation44_spill] sm:$0xff] }
 0x123   : > { %v815_v56 = vpop.permute.xlu0 %814 }
 0x124   : > { %v972_v38 = vsel %vm967_vm3, %v939_v32, %v815_v56  ;;  %v817_v58 = vpop.permute.xlu1 %816  ;;  %v919_v32 = vsel %vm346_vm1, %v25220_v0, %v25219_v60  ;;  %v25248_v60 = vld [vmem:[#allocation33_spill] sm:$0xff] }
 0x125   : > { %1486 = vrot.lane.b32.xlu0 %v18292_v4, %s17534_s27  ;;  %17120 = vmatprep.mubr.msk.f32.mxu0 %vm1008_vm4, %v972_v38  ;;  %v973_v19 = vsel %vm967_vm3, %v940_v36, %v817_v58  ;;  %v952_v38 = vsel %vm934_vm2, %v919_v32, %v25221_v53  ;;  %v25222_v58 = vld [vmem:[#allocation5_spill] sm:$0xff] }
 0x126   : > { %1488 = vrot.lane.b32.xlu1 %v18303_v5, %s17534_s27  ;;  %17121 = vmatmul.mubr.msk.f32.gmra.mrb[4].mxu0 %vm1008_vm4, %v973_v19  ;;  %v25224_v19 = vld [vmem:[#allocation27_spill] sm:$0xff] }
 0x127   : > { %v819_v63 = vpop.permute.xlu0 %818 }
 0x128   : > { %v974_v17 = vsel %vm967_vm3, %v941_v6, %v819_v63  ;;  %v821_v39 = vpop.permute.xlu1 %820  ;;  %v920_v6 = vsel %vm346_vm1, %v25224_v19, %v25223_v62  ;;  %v25252_v62 = vld [vmem:[#allocation34_spill] sm:$0xff] }
 0x129   : > { %1522 = vrot.lane.b32.xlu0 %v17684_v26, %s17535_s28  ;;  %17123 = vmatprep.mubr.msk.f32.mxu0 %vm1008_vm4, %v974_v17  ;;  %v975_v45 = vsel %vm967_vm3, %v942_v7, %v821_v39  ;;  %v911_v26 = vsel %vm346_vm1, %v17854_v10, %v17978_v48  ;;  %v953_v17 = vsel %vm934_vm2, %v920_v6, %v25225_v27  ;;  %v25226_v7 = vld [vmem:[#allocation6_spill] sm:$0xff] }
 0x12a   : > { %1524 = vrot.lane.b32.xlu1 %v17691_v28, %s17535_s28  ;;  %17124 = vmatmul.mubr.msk.f32.gmra.mrb[6].mxu0 %vm1008_vm4, %v975_v45  ;;  %v944_v9 = vsel %vm934_vm2, %v911_v26, %v18112_v61  ;;  %v912_v28 = vsel %vm346_vm1, %v17858_v11, %v17984_v31  ;;  %v25228_v45 = vld [vmem:[#allocation28_spill] sm:$0xff]  ;;  %v25229_v26 = vld [vmem:[#allocation74_spill] sm:$0xff] }
 0x12b   : > { %v823_v50 = vpop.permute.xlu0 %822  ;;  %v945_v10 = vsel %vm934_vm2, %v912_v28, %v18120_v55  ;;  %v25231_v28 = vld [vmem:[#allocation45_spill] sm:$0xff] }
 0x12c   : > { %v976_v25 = vsel %vm967_vm3, %v943_v8, %v823_v50  ;;  %v825_v35 = vpop.permute.xlu1 %824  ;;  %v921_v8 = vsel %vm346_vm1, %v25228_v45, %v25227_v59  ;;  %v25256_v59 = vld [vmem:[#allocation35_spill] sm:$0xff] }
 0x12d   : > { %1526 = vrot.lane.b32.xlu0 %v17694_v29, %s17535_s28  ;;  %17126 = vmatprep.mubr.msk.f32.mxu0 %vm1008_vm4, %v976_v25  ;;  %v977_v57 = vsel %vm967_vm3, %v944_v9, %v825_v35  ;;  %v913_v29 = vsel %vm346_vm1, %v17862_v12, %v17986_v37  ;;  %v954_v25 = vsel %vm934_vm2, %v921_v8, %v25229_v26  ;;  %v25230_v35 = vld [vmem:[#allocation7_spill] sm:$0xff] }
 0x12e   : > { %1528 = vrot.lane.b32.xlu1 %v17698_v30, %s17535_s28  ;;  %17127 = vmatmul.mubr.msk.f32.gmra.mrb[8].mxu0 %vm1008_vm4, %v977_v57  ;;  %v946_v11 = vsel %vm934_vm2, %v913_v29, %v18124_v44  ;;  %v914_v30 = vsel %vm346_vm1, %v17866_v13, %v17992_v24  ;;  %v25232_v57 = vld [vmem:[#allocation29_spill] sm:$0xff]  ;;  %v25233_v29 = vld [vmem:[#allocation76_spill] sm:$0xff] }
 0x12f   : > { %v827_v61 = vpop.permute.xlu0 %826  ;;  %v947_v12 = vsel %vm934_vm2, %v914_v30, %v18132_v2  ;;  %v25235_v30 = vld [vmem:[#allocation46_spill] sm:$0xff] }
 0x130   : > { %v978_v48 = vsel %vm967_vm3, %v945_v10, %v827_v61  ;;  %v829_v31 = vpop.permute.xlu1 %828  ;;  %v922_v10 = vsel %vm346_vm1, %v25232_v57, %v25231_v28  ;;  %v25260_v28 = vld [vmem:[#allocation36_spill] sm:$0xff] }
 0x131   : > { %1530 = vrot.lane.b32.xlu0 %v17704_v33, %s17535_s28  ;;  %17129 = vmatprep.mubr.msk.f32.mxu0 %vm1008_vm4, %v978_v48  ;;  %v979_v55 = vsel %vm967_vm3, %v946_v11, %v829_v31  ;;  %v915_v33 = vsel %vm346_vm1, %v17870_v14, %v17994_v23  ;;  %v955_v48 = vsel %vm934_vm2, %v922_v10, %v25233_v29  ;;  %v25234_v11 = vld [vmem:[#allocation8_spill] sm:$0xff] }
 0x132   : > { %1532 = vrot.lane.b32.xlu1 %v17719_v40, %s17535_s28  ;;  %17130 = vmatmul.mubr.msk.f32.gmra.mrb[10].mxu0 %vm1008_vm4, %v979_v55  ;;  %v948_v13 = vsel %vm934_vm2, %v915_v33, %v18136_v18  ;;  %v916_v40 = vsel %vm346_vm1, %v17874_v15, %v18000_v22  ;;  %v25236_v55 = vld [vmem:[#allocation30_spill] sm:$0xff] }
 0x133   : > { %v831_v44 = vpop.permute.xlu0 %830  ;;  %v949_v14 = vsel %vm934_vm2, %v916_v40, %v18144_v52  ;;  %v25215_v52 = vld [vmem:[#allocation41_spill] sm:$0xff]  ;;  %v25237_v33 = vld [vmem:[#allocation78_spill] sm:$0xff]  ;;  %v25239_v40 = vld [vmem:[#allocation47_spill] sm:$0xff] }
 0x134   : > { %v980_v37 = vsel %vm967_vm3, %v947_v12, %v831_v44  ;;  %v833_v24 = vpop.permute.xlu1 %832  ;;  %v923_v12 = vsel %vm346_vm1, %v25236_v55, %v25235_v30  ;;  %v25264_v30 = vld [vmem:[#allocation37_spill] sm:$0xff] }
 0x135   : > { %1534 = vrot.lane.b32.xlu0 %v17726_v41, %s17535_s28  ;;  %17132 = vmatprep.mubr.msk.f32.mxu0 %vm1008_vm4, %v980_v37  ;;  %v981_v2 = vsel %vm967_vm3, %v948_v13, %v833_v24  ;;  %v917_v41 = vsel %vm346_vm1, %v17878_v16, %v18002_v21  ;;  %v25218_v21 = vld [vmem:[#allocation4_spill] sm:$0xff]  ;;  %v956_v37 = vsel %vm934_vm2, %v923_v12, %v25237_v33  ;;  %v25238_v24 = vld [vmem:[#allocation9_spill] sm:$0xff] }
 0x136   : > { %1536 = vrot.lane.b32.xlu1 %v17730_v42, %s17535_s28  ;;  %17133 = vmatmul.mubr.msk.f32.gmra.mrb[12].mxu0 %vm1008_vm4, %v981_v2  ;;  %v950_v15 = vsel %vm934_vm2, %v917_v41, %v18148_v20  ;;  %v25216_v42 = vld [vmem:[#allocation25_spill] sm:$0xff]  ;;  %v25240_v2 = vld [vmem:[#allocation31_spill] sm:$0xff]  ;;  %v25241_v41 = vld [vmem:[#allocation80_spill] sm:$0xff] }
 0x137   : > { %v835_v18 = vpop.permute.xlu0 %834  ;;  %v918_v54 = vsel %vm346_vm1, %v25216_v42, %v25215_v52  ;;  %v25244_v52 = vld [vmem:[#allocation32_spill] sm:$0xff] }
 0x138   : > { %v982_v23 = vsel %vm967_vm3, %v949_v14, %v835_v18  ;;  %v837_v22 = vpop.permute.xlu1 %836  ;;  %v951_v16 = vsel %vm934_vm2, %v918_v54, %v25217_v34  ;;  %v924_v14 = vsel %vm346_vm1, %v25240_v2, %v25239_v40  ;;  %v25268_v40 = vld [vmem:[#allocation38_spill] sm:$0xff] }
 0x139   : > { %1538 = vrot.lane.b32.xlu0 %v25214_v43, %s17535_s28  ;;  %17135 = vmatprep.mubr.msk.f32.mxu0 %vm1008_vm4, %v982_v23  ;;  %v983_v47 = vsel %vm967_vm3, %v950_v15, %v837_v22  ;;  %v957_v23 = vsel %vm934_vm2, %v924_v14, %v25241_v41  ;;  %v25242_v15 = vld [vmem:[#allocation10_spill] sm:$0xff]  ;;  %v25243_v43 = vld [vmem:[#allocation48_spill] sm:$0xff] }
 0x13a   : > { %1540 = vrot.lane.b32.xlu1 %v25218_v21, %s17535_s28  ;;  %17136 = vmatmul.mubr.msk.f32.gmra.mrb[14].mxu0 %vm1008_vm4, %v983_v47  ;;  %v925_v42 = vsel %vm346_vm1, %v25244_v52, %v25243_v43  ;;  %v25245_v47 = vld [vmem:[#allocation82_spill] sm:$0xff]  ;;  %v25246_v21 = vld [vmem:[#allocation11_spill] sm:$0xff] }
 0x13b   : > { %v839_v20 = vpop.permute.xlu0 %838  ;;  %v958_v34 = vsel %vm934_vm2, %v925_v42, %v25245_v47  ;;  %v25272_v43 = vld [vmem:[#allocation39_spill] sm:$0xff] }
 0x13c   : > { %v984_v56 = vsel %vm967_vm3, %v951_v16, %v839_v20  ;;  %v841_v36 = vpop.permute.xlu1 %840  ;;  %v25247_v20 = vld [vmem:[#allocation49_spill] sm:$0xff] }
 0x13d   : > { %1542 = vrot.lane.b32.xlu0 %v25222_v58, %s17535_s28  ;;  %17138 = vmatprep.mubr.msk.f32.mxu0 %vm1008_vm4, %v984_v56  ;;  %v985_v63 = vsel %vm967_vm3, %v952_v38, %v841_v36  ;;  %v926_v0 = vsel %vm346_vm1, %v25248_v60, %v25247_v20  ;;  %v25249_v56 = vld [vmem:[#allocation84_spill] sm:$0xff]  ;;  %v25251_v58 = vld [vmem:[#allocation50_spill] sm:$0xff] }
 0x13e   : > { %1544 = vrot.lane.b32.xlu1 %v25226_v7, %s17535_s28  ;;  %17139 = vmatmul.mubr.msk.f32.gmra.mrb[16].mxu0 %vm1008_vm4, %v985_v63  ;;  %v959_v53 = vsel %vm934_vm2, %v926_v0, %v25249_v56  ;;  %v25250_v38 = vld [vmem:[#allocation12_spill] sm:$0xff]  ;;  %v927_v19 = vsel %vm346_vm1, %v25252_v62, %v25251_v58  ;;  %v25253_v63 = vld [vmem:[#allocation86_spill] sm:$0xff]  ;;  %v25254_v7 = vld [vmem:[#allocation13_spill] sm:$0xff] }
 0x13f   : > { %v843_v39 = vpop.permute.xlu0 %842  ;;  %v960_v27 = vsel %vm934_vm2, %v927_v19, %v25253_v63  ;;  %v25276_v20 = vld [vmem:[#allocation40_spill] sm:$0xff] }
 0x140   : > { %v986_v50 = vsel %vm967_vm3, %v953_v17, %v843_v39  ;;  %v845_v9 = vpop.permute.xlu1 %844  ;;  %v25255_v39 = vld [vmem:[#allocation51_spill] sm:$0xff]  ;;  %v16868_v58 = vld [vmem:[%s24823_s2 + $0x18] sm:$0xff] }
 0x141   : > { %1546 = vrot.lane.b32.xlu0 %v25230_v35, %s17535_s28  ;;  %17141 = vmatprep.mubr.msk.f32.mxu0 %vm1008_vm4, %v986_v50  ;;  %v987_v61 = vsel %vm967_vm3, %v954_v25, %v845_v9  ;;  %v928_v45 = vsel %vm346_vm1, %v25256_v59, %v25255_v39  ;;  %v25257_v50 = vld [vmem:[#allocation88_spill] sm:$0xff]  ;;  %v25258_v25 = vld [vmem:[#allocation14_spill] sm:$0xff] }
 0x142   : > { %1548 = vrot.lane.b32.xlu1 %v25234_v11, %s17535_s28  ;;  %17142 = vmatmul.mubr.msk.f32.gmra.mrb[18].mxu0 %vm1008_vm4, %v987_v61  ;;  %v961_v26 = vsel %vm934_vm2, %v928_v45, %v25257_v50  ;;  %v25259_v35 = vld [vmem:[#allocation52_spill] sm:$0xff]  ;;  %v25261_v61 = vld [vmem:[#allocation90_spill] sm:$0xff]  ;;  %v25262_v11 = vld [vmem:[#allocation15_spill] sm:$0xff] }
 0x143   : > { %v847_v31 = vpop.permute.xlu0 %846  ;;  %v929_v57 = vsel %vm346_vm1, %v25260_v28, %v25259_v35  ;;  %v25282_v45 = vld [vmem:[#allocation23_spill] sm:$0xff] }
 0x144   : > { %v988_v44 = vsel %vm967_vm3, %v955_v48, %v847_v31  ;;  %v849_v13 = vpop.permute.xlu1 %848  ;;  %v962_v29 = vsel %vm934_vm2, %v929_v57, %v25261_v61  ;;  %v25263_v31 = vld [vmem:[#allocation53_spill] sm:$0xff]  ;;  %v25286_v57 = vld [vmem:[#allocation59_spill] sm:$0xff] }
 0x145   : > { %1550 = vrot.lane.b32.xlu0 %v25238_v24, %s17535_s28  ;;  %17144 = vmatprep.mubr.msk.f32.mxu0 %vm1008_vm4, %v988_v44  ;;  %v989_v18 = vsel %vm967_vm3, %v956_v37, %v849_v13  ;;  %v930_v55 = vsel %vm346_vm1, %v25264_v30, %v25263_v31  ;;  %v25265_v44 = vld [vmem:[#allocation92_spill] sm:$0xff]  ;;  %v25267_v24 = vld [vmem:[#allocation54_spill] sm:$0xff] }
 0x146   : > { %1552 = vrot.lane.b32.xlu1 %v25242_v15, %s17535_s28  ;;  %17145 = vmatmul.mubr.msk.f32.gmra.mrb[20].mxu0 %vm1008_vm4, %v989_v18  ;;  %v963_v33 = vsel %vm934_vm2, %v930_v55, %v25265_v44  ;;  %v25266_v37 = vld [vmem:[#allocation16_spill] sm:$0xff]  ;;  %v931_v2 = vsel %vm346_vm1, %v25268_v40, %v25267_v24  ;;  %v25269_v18 = vld [vmem:[#allocation94_spill] sm:$0xff]  ;;  %v25270_v15 = vld [vmem:[#allocation17_spill] sm:$0xff] }
 0x147   : > { %v851_v22 = vpop.permute.xlu0 %850  ;;  %v964_v41 = vsel %vm934_vm2, %v931_v2, %v25269_v18  ;;  %v25290_v55 = vld [vmem:[#allocation63_spill] sm:$0xff] }
 0x148   : > { %v990_v54 = vsel %vm967_vm3, %v957_v23, %v851_v22  ;;  %v853_v16 = vpop.permute.xlu1 %852  ;;  %v25271_v22 = vld [vmem:[#allocation55_spill] sm:$0xff] }
 0x149   : > { %1554 = vrot.lane.b32.xlu0 %v25246_v21, %s17535_s28  ;;  %17147 = vmatprep.mubr.msk.f32.mxu0 %vm1008_vm4, %v990_v54  ;;  %v991_v32 = vsel %vm967_vm3, %v958_v34, %v853_v16  ;;  %v932_v52 = vsel %vm346_vm1, %v25272_v43, %v25271_v22  ;;  %v25273_v54 = vld [vmem:[#allocation96_spill] sm:$0xff]  ;;  %v25274_v34 = vld [vmem:[#allocation18_spill] sm:$0xff]  ;;  %v25294_v2 = vld [vmem:[#allocation67_spill] sm:$0xff] }
 0x14a   : > { %1556 = vrot.lane.b32.xlu1 %v25250_v38, %s17535_s28  ;;  %17148 = vmatmul.mubr.msk.f32.gmra.mrb[22].mxu0 %vm1008_vm4, %v991_v32  ;;  %v965_v47 = vsel %vm934_vm2, %v932_v52, %v25273_v54  ;;  %v25275_v21 = vld [vmem:[#allocation56_spill] sm:$0xff]  ;;  %v25277_v32 = vld [vmem:[#allocation97_spill] sm:$0xff]  ;;  %v25278_v38 = vld [vmem:[#allocation19_spill] sm:$0xff] }
 0x14b   : > { %v855_v36 = vpop.permute.xlu0 %854  ;;  %v933_v60 = vsel %vm346_vm1, %v25276_v20, %v25275_v21  ;;  %v25300_v52 = vld [vmem:[#allocation75_spill] sm:$0xff] }
 0x14c   : > { %v992_v6 = vsel %vm967_vm3, %v959_v53, %v855_v36  ;;  %v857_v17 = vpop.permute.xlu1 %856  ;;  %v966_v56 = vsel %vm934_vm2, %v933_v60, %v25277_v32  ;;  %v16867_v36 = vld [vmem:[%s24823_s2 + $0x10] sm:$0xff] }
 0x14d   : > { %1558 = vrot.lane.b32.xlu0 %v25254_v7, %s17535_s28  ;;  %17150 = vmatprep.mubr.msk.f32.mxu0 %vm1008_vm4, %v992_v6  ;;  %v993_v8 = vsel %vm967_vm3, %v960_v27, %v857_v17  ;;  %v17322_v19 = vpack.c.bf16 %v16868_v58, %v16867_v36  ;;  %v25279_v6 = vld [vmem:[#allocation20_spill] sm:$0xff]  ;;  %v25280_v17 = vld [vmem:[#allocation21_spill] sm:$0xff]  ;;  %v25281_v7 = vld [vmem:[#allocation22_spill] sm:$0xff] }
 0x14e   : > { %1560 = vrot.lane.b32.xlu1 %v25258_v25, %s17535_s28  ;;  %17151 = vmatmul.mubr.msk.f32.gmra.mrb[24].mxu0 %vm1008_vm4, %v993_v8  ;;  %v25283_v8 = vld [vmem:[#allocation24_spill] sm:$0xff]  ;;  %v25284_v25 = vld [vmem:[#allocation57_spill] sm:$0xff]  ;;  %v25308_v60 = vld [vmem:[#allocation83_spill] sm:$0xff] }
 0x14f   : > { %v859_v9 = vpop.permute.xlu0 %858  ;;  %17323 = vmatprep.subr.bf16.mxu1 %v17322_v19 }
 0x150   : > { %v994_v10 = vsel %vm967_vm3, %v961_v26, %v859_v9  ;;  %v861_v48 = vpop.permute.xlu1 %860  ;;  %17325 = vmatpush3.bf16.msra.mxu1 %v17322_v19  ;;  %v25285_v9 = vld [vmem:[#allocation58_spill] sm:$0xff]  ;;  %v25317_v19 = vld [vmem:[#allocation93_spill] sm:$0xff] }
 0x151   : > { %1562 = vrot.lane.b32.xlu0 %v25262_v11, %s17535_s28  ;;  %17153 = vmatprep.mubr.msk.f32.mxu0 %vm1008_vm4, %v994_v10  ;;  %v995_v12 = vsel %vm967_vm3, %v962_v29, %v861_v48  ;;  %v25287_v10 = vld [vmem:[#allocation60_spill] sm:$0xff]  ;;  %v25288_v48 = vld [vmem:[#allocation61_spill] sm:$0xff]  ;;  %v25289_v11 = vld [vmem:[#allocation62_spill] sm:$0xff] }
 0x152   : > { %1564 = vrot.lane.b32.xlu1 %v25266_v37, %s17535_s28  ;;  %17154 = vmatmul.mubr.msk.f32.gmra.mrb[26].mxu0 %vm1008_vm4, %v995_v12  ;;  %v25291_v12 = vld [vmem:[#allocation64_spill] sm:$0xff]  ;;  %v25292_v37 = vld [vmem:[#allocation65_spill] sm:$0xff] }
 0x153   : > { %v863_v13 = vpop.permute.xlu0 %862 }
 0x154   : > { %v996_v14 = vsel %vm967_vm3, %v963_v33, %v863_v13  ;;  %v865_v23 = vpop.permute.xlu1 %864  ;;  %v25293_v13 = vld [vmem:[#allocation66_spill] sm:$0xff] }
 0x155   : > { %1566 = vrot.lane.b32.xlu0 %v25270_v15, %s17535_s28  ;;  %17156 = vmatprep.mubr.msk.f32.mxu0 %vm1008_vm4, %v996_v14  ;;  %v997_v42 = vsel %vm967_vm3, %v964_v41, %v865_v23  ;;  %v25295_v14 = vld [vmem:[#allocation69_spill] sm:$0xff]  ;;  %v25296_v23 = vld [vmem:[#allocation71_spill] sm:$0xff] }
 0x156   : > { %1568 = vrot.lane.b32.xlu1 %v25274_v34, %s17535_s28  ;;  %17157 = vmatmul.mubr.msk.f32.gmra.mrb[28].mxu0 %vm1008_vm4, %v997_v42  ;;  %v25297_v15 = vld [vmem:[#allocation73_spill] sm:$0xff]  ;;  %v25304_v34 = vld [vmem:[#allocation79_spill] sm:$0xff] }
 0x157   : > { %v867_v16 = vpop.permute.xlu0 %866  ;;  %v25301_v42 = vld [vmem:[#allocation77_spill] sm:$0xff] }
 0x158   : > { %v998_v0 = vsel %vm967_vm3, %v965_v47, %v867_v16  ;;  %v869_v53 = vpop.permute.xlu1 %868  ;;  %v25305_v16 = vld [vmem:[#allocation81_spill] sm:$0xff] }
 0x159   : > { %1570 = vrot.lane.b32.xlu0 %v25278_v38, %s17535_s28  ;;  %17159 = vmatprep.mubr.msk.f32.mxu0 %vm1008_vm4, %v998_v0  ;;  %v999_v62 = vsel %vm967_vm3, %v966_v56, %v869_v53  ;;  %v25309_v0 = vld [vmem:[#allocation85_spill] sm:$0xff]  ;;  %v25312_v53 = vld [vmem:[#allocation87_spill] sm:$0xff] }
 0x15a   : > { %1572 = vrot.lane.b32.xlu1 %v25279_v6, %s17535_s28  ;;  %17160 = vmatmul.mubr.msk.f32.gmra.mrb[30].mxu0 %vm1008_vm4, %v999_v62  ;;  %v25313_v38 = vld [vmem:[#allocation89_spill] sm:$0xff]  ;;  %v25316_v62 = vld [vmem:[#allocation91_spill] sm:$0xff] }
 0x15b   : > { %v18554_v63 = vpop.permute.xlu0 %1426 }
 0x15c   : > { %v18556_v27 = vpop.permute.xlu1 %1428 }
 0x15d   : > { %1574 = vrot.lane.b32.xlu0 %v25280_v17, %s17535_s28 }
 0x15e   : > { %1576 = vrot.lane.b32.xlu1 %v25281_v7, %s17535_s28  ;;  %v25320_v7 = vld [vmem:[#allocation95_spill] sm:$0xff] }
 0x15f   : > { %v18562_v39 = vpop.permute.xlu0 %1430 }
 0x160   : > { %v18564_v59 = vpop.permute.xlu1 %1432 }
 0x161   : > { %1578 = vrot.lane.b32.xlu0 %v25282_v45, %s17535_s28 }
 0x162   : > { %1580 = vrot.lane.b32.xlu1 %v25283_v8, %s17535_s28 }
 0x163   : > { %v18570_v50 = vpop.permute.xlu0 %1434 }
 0x164   : > { %v18572_v26 = vpop.permute.xlu1 %1436 }
 0x165   : > { %1582 = vrot.lane.b32.xlu0 %v25284_v25, %s17535_s28 }
 0x166   : > { %1584 = vrot.lane.b32.xlu1 %v25285_v9, %s17535_s28 }
 0x167   : > { %v18578_v35 = vpop.permute.xlu0 %1438 }
 0x168   : > { %v18580_v28 = vpop.permute.xlu1 %1440 }
 0x169   : > { %1650 = vrot.lane.b32.xlu0 %v25286_v57, %s17536_s7 }
 0x16a   : > { %1652 = vrot.lane.b32.xlu1 %v25287_v10, %s17536_s7 }
 0x16b   : > { %v18586_v61 = vpop.permute.xlu0 %1442 }
 0x16c   : > { %v18588_v29 = vpop.permute.xlu1 %1444 }
 0x16d   : > { %1654 = vrot.lane.b32.xlu0 %v25288_v48, %s17536_s7 }
 0x16e   : > { %1656 = vrot.lane.b32.xlu1 %v25289_v11, %s17536_s7 }
 0x16f   : > { %v18594_v31 = vpop.permute.xlu0 %1446 }
 0x170   : > { %v18596_v30 = vpop.permute.xlu1 %1448 }
 0x171   : > { %1658 = vrot.lane.b32.xlu0 %v25290_v55, %s17536_s7 }
 0x172   : > { %1660 = vrot.lane.b32.xlu1 %v25291_v12, %s17536_s7 }
 0x173   : > { %v18602_v44 = vpop.permute.xlu0 %1450 }
 0x174   : > { %v18604_v33 = vpop.permute.xlu1 %1452 }
 0x175   : > { %1662 = vrot.lane.b32.xlu0 %v25292_v37, %s17536_s7 }
 0x176   : > { %1664 = vrot.lane.b32.xlu1 %v25293_v13, %s17536_s7  ;;  %v1393_v13 = vld [vmem:[#allocation2 + $0x18a] sm:$0xff] }
 0x177   : > { %v18610_v24 = vpop.permute.xlu0 %1454 }
 0x178   : > { %v18612_v40 = vpop.permute.xlu1 %1456 }
 0x179   : > { %1666 = vrot.lane.b32.xlu0 %v25294_v2, %s17536_s7 }
 0x17a   : > { %1668 = vrot.lane.b32.xlu1 %v25295_v14, %s17536_s7  ;;  %v18708_v14 = vld [vmem:[#allocation2 + $0x19] sm:$0xff] }
 0x17b   : > { %v18618_v18 = vpop.permute.xlu0 %1458 }
 0x17c   : > { %v18620_v41 = vpop.permute.xlu1 %1460 }
 0x17d   : > { %1670 = vrot.lane.b32.xlu0 %v25296_v23, %s17536_s7 }
 0x17e   : > { %1672 = vrot.lane.b32.xlu1 %v25297_v15, %s17536_s7  ;;  %v18720_v15 = vld [vmem:[#allocation2 + $0x31] sm:$0xff] }
 0x17f   : > { %v18626_v22 = vpop.permute.xlu0 %1462 }
 0x180   : > { %25298 = vst [vmem:[#allocation3_spill] sm:$0xff] %v18626_v22  ;;  %v18628_v43 = vpop.permute.xlu1 %1464 }
 0x181   : > { %25299 = vst [vmem:[#allocation41_spill] sm:$0xff] %v18628_v43  ;;  %1674 = vrot.lane.b32.xlu0 %v25300_v52, %s17536_s7  ;;  %v18724_v52 = vld [vmem:[#allocation2 + $0x39] sm:$0xff] }
 0x182   : > { %1676 = vrot.lane.b32.xlu1 %v25301_v42, %s17536_s7 }
 0x183   : > { %v18634_v54 = vpop.permute.xlu0 %1466 }
 0x184   : > { %25302 = vst [vmem:[#allocation25_spill] sm:$0xff] %v18634_v54  ;;  %v18636_v47 = vpop.permute.xlu1 %1468 }
 0x185   : > { %25303 = vst [vmem:[#allocation68_spill] sm:$0xff] %v18636_v47  ;;  %1678 = vrot.lane.b32.xlu0 %v25304_v34, %s17536_s7  ;;  %v7192_v47 = vld [vmem:[#allocation2 + $0x31] sm:$0xff] }
 0x186   : > { %1680 = vrot.lane.b32.xlu1 %v25305_v16, %s17536_s7  ;;  %v18732_v16 = vld [vmem:[#allocation2 + $0x49] sm:$0xff] }
 0x187   : > { %v18642_v21 = vpop.permute.xlu0 %1470 }
 0x188   : > { %25306 = vst [vmem:[#allocation4_spill] sm:$0xff] %v18642_v21  ;;  %v18644_v20 = vpop.permute.xlu1 %1472 }
 0x189   : > { %25307 = vst [vmem:[#allocation42_spill] sm:$0xff] %v18644_v20  ;;  %1682 = vrot.lane.b32.xlu0 %v25308_v60, %s17536_s7  ;;  %v18736_v60 = vld [vmem:[#allocation2 + $0x51] sm:$0xff] }
 0x18a   : > { %1684 = vrot.lane.b32.xlu1 %v25309_v0, %s17536_s7 }
 0x18b   : > { %v18650_v32 = vpop.permute.xlu0 %1474 }
 0x18c   : > { %25310 = vst [vmem:[#allocation26_spill] sm:$0xff] %v18650_v32  ;;  %v18652_v56 = vpop.permute.xlu1 %1476  ;;  %v18784_v32 = vld [vmem:[#allocation2 + $0xb1] sm:$0xff] }
 0x18d   : > { %25311 = vst [vmem:[#allocation70_spill] sm:$0xff] %v18652_v56  ;;  %1686 = vrot.lane.b32.xlu0 %v25312_v53, %s17536_s7  ;;  %v18780_v56 = vld [vmem:[#allocation2 + $0xa9] sm:$0xff] }
 0x18e   : > { %1688 = vrot.lane.b32.xlu1 %v25313_v38, %s17536_s7  ;;  %v18744_v38 = vld [vmem:[#allocation2 + $0x61] sm:$0xff] }
 0x18f   : > { %v18658_v36 = vpop.permute.xlu0 %1478 }
 0x190   : > { %25314 = vst [vmem:[#allocation5_spill] sm:$0xff] %v18658_v36  ;;  %v18660_v58 = vpop.permute.xlu1 %1480 }
 0x191   : > { %25315 = vst [vmem:[#allocation43_spill] sm:$0xff] %v18660_v58  ;;  %1690 = vrot.lane.b32.xlu0 %v25316_v62, %s17536_s7  ;;  %v18748_v62 = vld [vmem:[#allocation2 + $0x69] sm:$0xff] }
 0x192   : > { %1692 = vrot.lane.b32.xlu1 %v25317_v19, %s17536_s7 }
 0x193   : > { %v18666_v6 = vpop.permute.xlu0 %1482 }
 0x194   : > { %25318 = vst [vmem:[#allocation27_spill] sm:$0xff] %v18666_v6  ;;  %v18668_v17 = vpop.permute.xlu1 %1484  ;;  %v18772_v6 = vld [vmem:[#allocation2 + $0x99] sm:$0xff] }
 0x195   : > { %25319 = vst [vmem:[#allocation72_spill] sm:$0xff] %v18668_v17  ;;  %1694 = vrot.lane.b32.xlu0 %v25320_v7, %s17536_s7  ;;  %v18768_v17 = vld [vmem:[#allocation2 + $0x91] sm:$0xff] }
 0x196   : > { %1696 = vrot.lane.b32.xlu1 %v18242_v49, %s17536_s7 }
 0x197   : > { %v18674_v45 = vpop.permute.xlu0 %1486 }
 0x198   : > { %25321 = vst [vmem:[#allocation6_spill] sm:$0xff] %v18674_v45  ;;  %v18676_v8 = vpop.permute.xlu1 %1488 }
 0x199   : > { %25322 = vst [vmem:[#allocation44_spill] sm:$0xff] %v18676_v8  ;;  %1698 = vrot.lane.b32.xlu0 %v18250_v51, %s17536_s7  ;;  %v1392_v51 = vld [vmem:[#allocation2 + $0x182] sm:$0xff] }
 0x19a   : > { %1700 = vrot.lane.b32.xlu1 %v18259_v1, %s17536_s7 }
 0x19b   : > { %v18682_v25 = vpop.permute.xlu0 %1522 }
 0x19c   : > { %v18684_v9 = vpop.permute.xlu1 %1524 }
 0x19d   : > { %1702 = vrot.lane.b32.xlu0 %v18270_v46, %s17536_s7 }
 0x19e   : > { %1704 = vrot.lane.b32.xlu1 %v18281_v3, %s17536_s7 }
 0x19f   : > { %v18690_v49 = vpop.permute.xlu0 %1526 }
 0x1a0   : > { %v18692_v37 = vpop.permute.xlu1 %1528 }
 0x1a1   : > { %1706 = vrot.lane.b32.xlu0 %v18292_v4, %s17536_s7  ;;  %v18712_v4 = vld [vmem:[#allocation2 + $0x21] sm:$0xff] }
 0x1a2   : > { %1708 = vrot.lane.b32.xlu1 %v18303_v5, %s17536_s7 }
 0x1a3   : > { %v18698_v1 = vpop.permute.xlu0 %1530 }
 0x1a4   : > { %v18700_v2 = vpop.permute.xlu1 %1532 }
 0x1a5   : > { %1710 = vrot.lane.b32.xlu0 %v1392_v51, %s17536_s7  ;;  %v18756_v51 = vld [vmem:[#allocation2 + $0x79] sm:$0xff] }
 0x1a6   : > { %1712 = vrot.lane.b32.xlu1 %v1393_v13, %s17536_s7  ;;  %v18760_v13 = vld [vmem:[#allocation2 + $0x81] sm:$0xff] }
 0x1a7   : > { %v18704_v46 = vpop.permute.xlu0 %1534 }
 0x1a8   : > { %v18706_v3 = vpop.permute.xlu1 %1536 }
 0x1a9   : > { %7224 = vrot.lane.b32.xlu0 %v18708_v14, %s17534_s27 }
 0x1aa   : > { %7226 = vrot.lane.b32.xlu1 %v18712_v4, %s17534_s27 }
 0x1ab   : > { %v18716_v5 = vpop.permute.xlu0 %1538 }
 0x1ac   : > { %v18718_v23 = vpop.permute.xlu1 %1540 }
 0x1ad   : > { %7228 = vrot.lane.b32.xlu0 %v18720_v15, %s17534_s27 }
 0x1ae   : > { %7230 = vrot.lane.b32.xlu1 %v18724_v52, %s17534_s27 }
 0x1af   : > { %v18728_v42 = vpop.permute.xlu0 %1542 }
 0x1b0   : > { %v18730_v34 = vpop.permute.xlu1 %1544 }
 0x1b1   : > { %7232 = vrot.lane.b32.xlu0 %v18732_v16, %s17534_s27 }
 0x1b2   : > { %7234 = vrot.lane.b32.xlu1 %v18736_v60, %s17534_s27 }
 0x1b3   : > { %v18740_v0 = vpop.permute.xlu0 %1546 }
 0x1b4   : > { %v18742_v53 = vpop.permute.xlu1 %1548 }
 0x1b5   : > { %7236 = vrot.lane.b32.xlu0 %v18744_v38, %s17534_s27 }
 0x1b6   : > { %7238 = vrot.lane.b32.xlu1 %v18748_v62, %s17534_s27 }
 0x1b7   : > { %v18752_v19 = vpop.permute.xlu0 %1550 }
 0x1b8   : > { %v18754_v7 = vpop.permute.xlu1 %1552 }
 0x1b9   : > { %7240 = vrot.lane.b32.xlu0 %v18756_v51, %s17534_s27 }
 0x1ba   : > { %7242 = vrot.lane.b32.xlu1 %v18760_v13, %s17534_s27 }
 0x1bb   : > { %v18764_v8 = vpop.permute.xlu0 %1554 }
 0x1bc   : > { %v18766_v45 = vpop.permute.xlu1 %1556 }
 0x1bd   : > { %7244 = vrot.lane.b32.xlu0 %v18768_v17, %s17534_s27 }
 0x1be   : > { %7246 = vrot.lane.b32.xlu1 %v18772_v6, %s17534_s27 }
 0x1bf   : > { %v18776_v58 = vpop.permute.xlu0 %1558 }
 0x1c0   : > { %25323 = vst [vmem:[#allocation28_spill] sm:$0xff] %v18776_v58  ;;  %v18778_v36 = vpop.permute.xlu1 %1560 }
 0x1c1   : > { %25324 = vst [vmem:[#allocation74_spill] sm:$0xff] %v18778_v36  ;;  %7248 = vrot.lane.b32.xlu0 %v18780_v56, %s17534_s27  ;;  %v7193_v36 = vld [vmem:[#allocation2 + $0x39] sm:$0xff] }
 0x1c2   : > { %7250 = vrot.lane.b32.xlu1 %v18784_v32, %s17534_s27 }
 0x1c3   : > { %v18788_v20 = vpop.permute.xlu0 %1562 }
 0x1c4   : > { %25325 = vst [vmem:[#allocation7_spill] sm:$0xff] %v18788_v20  ;;  %v18790_v21 = vpop.permute.xlu1 %1564  ;;  %v7160_v20 = vld [vmem:[#allocation2 + $0x30] sm:$0xff] }
 0x1c5   : > { %25326 = vst [vmem:[#allocation45_spill] sm:$0xff] %v18790_v21  ;;  %8028 = vrot.lane.b32.xlu0 %v25286_v57, %s17534_s27 }
 0x1c6   : > { %8030 = vrot.lane.b32.xlu1 %v25287_v10, %s17534_s27  ;;  %v7161_v10 = vld [vmem:[#allocation2 + $0x38] sm:$0xff] }
 0x1c7   : > { %v18796_v54 = vpop.permute.xlu0 %1566 }
 0x1c8   : > { %25327 = vst [vmem:[#allocation29_spill] sm:$0xff] %v18796_v54  ;;  %v18798_v43 = vpop.permute.xlu1 %1568 }
 0x1c9   : > { %25328 = vst [vmem:[#allocation76_spill] sm:$0xff] %v18798_v43  ;;  %8124 = vrot.lane.b32.xlu0 %v7192_v47, %s17535_s28 }
 0x1ca   : > { %8126 = vrot.lane.b32.xlu1 %v7193_v36, %s17535_s28 }
 0x1cb   : > { %v18802_v58 = vpop.permute.xlu0 %1570 }
 0x1cc   : > { %25329 = vst [vmem:[#allocation8_spill] sm:$0xff] %v18802_v58  ;;  %v18804_v21 = vpop.permute.xlu1 %1572 }
 0x1cd   : > { %25330 = vst [vmem:[#allocation46_spill] sm:$0xff] %v18804_v21  ;;  %8252 = vrot.lane.b32.xlu0 %v25288_v48, %s17536_s7 }
 0x1ce   : > { %7352 = vrot.lane.b32.xlu1 %v7160_v20, %s17535_s28 }
 0x1cf   : > { %v18809_v57 = vpop.permute.xlu0 %1574 }
 0x1d0   : > { %25331 = vst [vmem:[#allocation30_spill] sm:$0xff] %v18809_v57  ;;  %v18811_v54 = vpop.permute.xlu1 %1576 }
 0x1d1   : > { %25332 = vst [vmem:[#allocation78_spill] sm:$0xff] %v18811_v54  ;;  %8254 = vrot.lane.b32.xlu0 %v25289_v11, %s17536_s7  ;;  %v17378_v54 = vld [vmem:[#allocation2 + $0x1] sm:$0xff] }
 0x1d2   : > { %7354 = vrot.lane.b32.xlu1 %v7161_v10, %s17535_s28  ;;  %v1746_v21 = vsel %vm346_vm1, %v17378_v54, %v18554_v63  ;;  %v7194_v10 = vld [vmem:[#allocation2 + $0x49] sm:$0xff]  ;;  %v1748_v63 = vsel %vm346_vm1, %v18708_v14, %v18562_v39  ;;  %v1749_v54 = vsel %vm346_vm1, %v18712_v4, %v18564_v59 }
 0x1d3   : > { %v18816_v43 = vpop.permute.xlu0 %1578  ;;  %v1781_v39 = vsel %vm934_vm2, %v1749_v54, %v18692_v37  ;;  %v1751_v37 = vsel %vm346_vm1, %v18724_v52, %v18572_v26  ;;  %v7163_v4 = vld [vmem:[#allocation2 + $0x50] sm:$0xff]  ;;  %v1753_v52 = vsel %vm346_vm1, %v18736_v60, %v18580_v28  ;;  %v8000_v54 = vld [vmem:[#allocation2 + $0x62] sm:$0xff] }
 0x1d4   : > { %25333 = vst [vmem:[#allocation9_spill] sm:$0xff] %v18816_v43  ;;  %v18818_v58 = vpop.permute.xlu1 %1580  ;;  %v1778_v43 = vsel %vm934_vm2, %v1746_v21, %v18682_v25 }
 0x1d5   : > { %25334 = vst [vmem:[#allocation47_spill] sm:$0xff] %v18818_v58  ;;  %7480 = vrot.lane.b32.xlu0 %v7192_v47, %s17536_s7  ;;  %v17379_v58 = vld [vmem:[#allocation2 + $0x9] sm:$0xff] }
 0x1d6   : > { %8032 = vrot.lane.b32.xlu1 %v25288_v48, %s17534_s27  ;;  %v1747_v48 = vsel %vm346_vm1, %v17379_v58, %v18556_v27  ;;  %v1780_v27 = vsel %vm934_vm2, %v1748_v63, %v18690_v49  ;;  %v7162_v58 = vld [vmem:[#allocation2 + $0x48] sm:$0xff] }
 0x1d7   : > { %v18823_v20 = vpop.permute.xlu0 %1582 }
 0x1d8   : > { %25335 = vst [vmem:[#allocation31_spill] sm:$0xff] %v18823_v20  ;;  %v18825_v57 = vpop.permute.xlu1 %1584  ;;  %v7195_v20 = vld [vmem:[#allocation2 + $0x51] sm:$0xff] }
 0x1d9   : > { %25336 = vst [vmem:[#allocation80_spill] sm:$0xff] %v18825_v57  ;;  %7482 = vrot.lane.b32.xlu0 %v7193_v36, %s17536_s7  ;;  %v1779_v36 = vsel %vm934_vm2, %v1747_v48, %v18684_v9  ;;  %v1785_v48 = vsel %vm934_vm2, %v1753_v52, %v18706_v3  ;;  %v1755_v3 = vsel %vm346_vm1, %v18748_v62, %v18588_v29  ;;  %v16935_v62 = vld [vmem:[%s24823_s2 + $0x30] sm:$0xff] }
 0x1da   : > { %8034 = vrot.lane.b32.xlu1 %v25289_v11, %s17534_s27 }
 0x1db   : > { %v1651_v47 = vpop.permute.xlu0 %1650 }
 0x1dc   : > { %v1810_v57 = vsel %vm967_vm3, %v1778_v43, %v1651_v47  ;;  %v1653_v22 = vpop.permute.xlu1 %1652 }
 0x1dd   : > { %8128 = vrot.lane.b32.xlu0 %v7194_v10, %s17535_s28  ;;  %17166 = vmatprep.mubr.msk.f32.mxu1 %vm1008_vm4, %v1810_v57  ;;  %v1811_v11 = vsel %vm967_vm3, %v1779_v36, %v1653_v22  ;;  %v1750_v22 = vsel %vm346_vm1, %v18720_v15, %v18570_v50  ;;  %v1783_v50 = vsel %vm934_vm2, %v1751_v37, %v18700_v2  ;;  %v8001_v37 = vld [vmem:[#allocation2 + $0x6a] sm:$0xff] }
 0x1de   : > { %8130 = vrot.lane.b32.xlu1 %v7195_v20, %s17535_s28  ;;  %17167 = vmatmul.mubr.msk.f32.vlgmr.msra.gmra.mrb[0].mxu1 %vm1008_vm4, %v1811_v11  ;;  %v1782_v59 = vsel %vm934_vm2, %v1750_v22, %v18698_v1  ;;  %v1752_v1 = vsel %vm346_vm1, %v18732_v16, %v18578_v35  ;;  %v7164_v22 = vld [vmem:[#allocation2 + $0x60] sm:$0xff] }
 0x1df   : > { %v1655_v43 = vpop.permute.xlu0 %1654  ;;  %v1784_v26 = vsel %vm934_vm2, %v1752_v1, %v18704_v46  ;;  %v1754_v46 = vsel %vm346_vm1, %v18744_v38, %v18586_v61  ;;  %v1787_v61 = vsel %vm934_vm2, %v1755_v3, %v18718_v23  ;;  %v1760_v1 = vsel %vm346_vm1, %v18780_v56, %v18610_v24 }
 0x1e0   : > { %v1812_v21 = vsel %vm967_vm3, %v1780_v27, %v1655_v43  ;;  %v1657_v25 = vpop.permute.xlu1 %1656  ;;  %v1786_v36 = vsel %vm934_vm2, %v1754_v46, %v18716_v5  ;;  %v16901_v27 = vld [vmem:[%s24823_s2 + $0x20] sm:$0xff] }
 0x1e1   : > { %8256 = vrot.lane.b32.xlu0 %v25290_v55, %s17536_s7  ;;  %17169 = vmatprep.mubr.msk.f32.mxu1 %vm1008_vm4, %v1812_v21  ;;  %v1813_v9 = vsel %vm967_vm3, %v1781_v39, %v1657_v25 }
 0x1e2   : > { %7356 = vrot.lane.b32.xlu1 %v7162_v58, %s17535_s28  ;;  %17170 = vmatmul.mubr.msk.f32.gmra.mrb[2].mxu1 %vm1008_vm4, %v1813_v9 }
 0x1e3   : > { %v1659_v49 = vpop.permute.xlu0 %1658 }
 0x1e4   : > { %v1814_v14 = vsel %vm967_vm3, %v1782_v59, %v1659_v49  ;;  %v1661_v15 = vpop.permute.xlu1 %1660 }
 0x1e5   : > { %8258 = vrot.lane.b32.xlu0 %v25291_v12, %s17536_s7  ;;  %17172 = vmatprep.mubr.msk.f32.mxu1 %vm1008_vm4, %v1814_v14  ;;  %v1815_v57 = vsel %vm967_vm3, %v1783_v50, %v1661_v15  ;;  %v7165_v14 = vld [vmem:[#allocation2 + $0x68] sm:$0xff] }
 0x1e6   : > { %7358 = vrot.lane.b32.xlu1 %v7163_v4, %s17535_s28  ;;  %17173 = vmatmul.mubr.msk.f32.gmra.mrb[4].mxu1 %vm1008_vm4, %v1815_v57  ;;  %v1792_v57 = vsel %vm934_vm2, %v1760_v1, %v18752_v19  ;;  %v17387_v1 = vld [vmem:[#allocation2 + $0xf9] sm:$0xff] }
 0x1e7   : > { %v1663_v2 = vpop.permute.xlu0 %1662 }
 0x1e8   : > { %v1816_v47 = vsel %vm967_vm3, %v1784_v26, %v1663_v2  ;;  %v1665_v35 = vpop.permute.xlu1 %1664  ;;  %v1761_v2 = vsel %vm346_vm1, %v18784_v32, %v18612_v40  ;;  %v18990_v32 = vld [vmem:[#allocation2 + $0xc1] sm:$0xff] }
 0x1e9   : > { %7484 = vrot.lane.b32.xlu0 %v7194_v10, %s17536_s7  ;;  %17175 = vmatprep.mubr.msk.f32.mxu1 %vm1008_vm4, %v1816_v47  ;;  %v1817_v16 = vsel %vm967_vm3, %v1785_v48, %v1665_v35  ;;  %v7196_v10 = vld [vmem:[#allocation2 + $0x61] sm:$0xff]  ;;  %v1793_v48 = vsel %vm934_vm2, %v1761_v2, %v18754_v7  ;;  %v1762_v46 = vsel %vm346_vm1, %v18990_v32, %v18618_v18  ;;  %v25343_v2 = vld [vmem:[#allocation7_spill] sm:$0xff] }
 0x1ea   : > { %8036 = vrot.lane.b32.xlu1 %v25290_v55, %s17534_s27  ;;  %17176 = vmatmul.mubr.msk.f32.gmra.mrb[6].mxu1 %vm1008_vm4, %v1817_v16  ;;  %v1756_v55 = vsel %vm346_vm1, %v18756_v51, %v18594_v31  ;;  %v16936_v31 = vld [vmem:[%s24823_s2 + $0x38] sm:$0xff]  ;;  %v1757_v51 = vsel %vm346_vm1, %v18760_v13, %v18596_v30  ;;  %v16902_v30 = vld [vmem:[%s24823_s2 + $0x28] sm:$0xff]  ;;  %v1758_v13 = vsel %vm346_vm1, %v18768_v17, %v18602_v44 }
 0x1eb   : > { %v1667_v28 = vpop.permute.xlu0 %1666  ;;  %v1788_v29 = vsel %vm934_vm2, %v1756_v55, %v18728_v42  ;;  %v17330_v63 = vpack.c.bf16 %v16936_v31, %v16935_v62  ;;  %v17326_v21 = vpack.c.bf16 %v16902_v30, %v16901_v27  ;;  %v1790_v58 = vsel %vm934_vm2, %v1758_v13, %v18740_v0  ;;  %v17380_v35 = vld [vmem:[#allocation2 + $0x62] sm:$0xff]  ;;  %v7198_v55 = vld [vmem:[#allocation2 + $0x79] sm:$0xff] }
 0x1ec   : > { %v1818_v60 = vsel %vm967_vm3, %v1786_v36, %v1667_v28  ;;  %v1669_v38 = vpop.permute.xlu1 %1668  ;;  %v1759_v44 = vsel %vm346_vm1, %v18772_v6, %v18604_v33  ;;  %v18998_v16 = vld [vmem:[#allocation2 + $0xc9] sm:$0xff]  ;;  %v1794_v28 = vsel %vm934_vm2, %v1762_v46, %v18764_v8  ;;  %v7166_v31 = vld [vmem:[#allocation2 + $0x78] sm:$0xff] }
 0x1ed   : > { %7486 = vrot.lane.b32.xlu0 %v7195_v20, %s17536_s7  ;;  %17178 = vmatprep.mubr.msk.f32.mxu1 %vm1008_vm4, %v1818_v60  ;;  %v1819_v5 = vsel %vm967_vm3, %v1787_v61, %v1669_v38  ;;  %v7197_v20 = vld [vmem:[#allocation2 + $0x69] sm:$0xff]  ;;  %v1791_v9 = vsel %vm934_vm2, %v1759_v44, %v18742_v53  ;;  %v1763_v36 = vsel %vm346_vm1, %v18998_v16, %v18620_v41  ;;  %v25338_v27 = vld [vmem:[#allocation28_spill] sm:$0xff] }
 0x1ee   : > { %8038 = vrot.lane.b32.xlu1 %v25291_v12, %s17534_s27  ;;  %17179 = vmatmul.mubr.msk.f32.gmra.mrb[8].mxu1 %vm1008_vm4, %v1819_v5  ;;  %v1789_v12 = vsel %vm934_vm2, %v1757_v51, %v18730_v34  ;;  %v1795_v61 = vsel %vm934_vm2, %v1763_v36, %v18766_v45  ;;  %v17383_v38 = vld [vmem:[#allocation2 + $0x6a] sm:$0xff]  ;;  %v8003_v13 = vld [vmem:[#allocation2 + $0x82] sm:$0xff] }
 0x1ef   : > { %v1671_v23 = vpop.permute.xlu0 %1670  ;;  %17331 = vmatprep.subr.bf16.mxu1 %v17330_v63  ;;  %17327 = vmatprep.subr.bf16.mxu0 %v17326_v21  ;;  %v25340_v44 = vld [vmem:[#allocation74_spill] sm:$0xff] }
 0x1f0   : > { %v1820_v42 = vsel %vm967_vm3, %v1788_v29, %v1671_v23  ;;  %v1673_v11 = vpop.permute.xlu1 %1672  ;;  %17333 = vmatpush3.bf16.msra.mxu1 %v17330_v63  ;;  %17329 = vmatpush3.bf16.msra.mxu0 %v17326_v21  ;;  %v8002_v23 = vld [vmem:[#allocation2 + $0x7a] sm:$0xff] }
 0x1f1   : > { %8132 = vrot.lane.b32.xlu0 %v7196_v10, %s17535_s28  ;;  %17181 = vmatprep.mubr.msk.f32.mxu1 %vm1008_vm4, %v1820_v42  ;;  %v1821_v43 = vsel %vm967_vm3, %v1789_v12, %v1673_v11  ;;  %v18941_v34 = vpop.f32.mrb[0].mxu0  ;;  %v17384_v42 = vld [vmem:[#allocation2 + $0xd9] sm:$0xff] }
 0x1f2   : > { %8134 = vrot.lane.b32.xlu1 %v7197_v20, %s17535_s28  ;;  %v18946_v39 = vpop.f32.mrb[1].mxu0  ;;  %17182 = vmatmul.mubr.msk.f32.gmra.mrb[10].mxu1 %vm1008_vm4, %v1821_v43  ;;  %v17385_v43 = vld [vmem:[#allocation2 + $0xe1] sm:$0xff] }
 0x1f3   : > { %v1675_v25 = vpop.permute.xlu0 %1674 }
 0x1f4   : > { %v1822_v17 = vsel %vm967_vm3, %v1790_v58, %v1675_v25  ;;  %v1677_v0 = vpop.permute.xlu1 %1676 }
 0x1f5   : > { %8260 = vrot.lane.b32.xlu0 %v8000_v54, %s17536_s7  ;;  %17184 = vmatprep.mubr.msk.f32.mxu1 %vm1008_vm4, %v1822_v17  ;;  %v1823_v59 = vsel %vm967_vm3, %v1791_v9, %v1677_v0  ;;  %v18958_v49 = vpop.f32.mrb[2].mxu0  ;;  %v25339_v54 = vld [vmem:[#allocation41_spill] sm:$0xff] }
 0x1f6   : > { %7360 = vrot.lane.b32.xlu1 %v7164_v22, %s17535_s28  ;;  %v18961_v33 = vpop.f32.mrb[3].mxu0  ;;  %17185 = vmatmul.mubr.msk.f32.gmra.mrb[12].mxu1 %vm1008_vm4, %v1823_v59  ;;  %v1765_v21 = vsel %vm346_vm1, %v17385_v43, %v25339_v54  ;;  %v7167_v22 = vld [vmem:[#allocation2 + $0x80] sm:$0xff] }
 0x1f7   : > { %v1679_v6 = vpop.permute.xlu0 %1678  ;;  %v1797_v17 = vsel %vm934_vm2, %v1765_v21, %v25340_v44  ;;  %v19098_v43 = vld [vmem:[#allocation2 + $0x99] sm:$0xff]  ;;  %v25347_v44 = vld [vmem:[#allocation42_spill] sm:$0xff] }
 0x1f8   : > { %v1681_v53 = vpop.permute.xlu1 %1680  ;;  %v1824_v52 = vsel %vm967_vm3, %v1792_v57, %v1679_v6  ;;  %v17386_v6 = vld [vmem:[#allocation2 + $0xf1] sm:$0xff] }
 0x1f9   : > { %8262 = vrot.lane.b32.xlu0 %v8001_v37, %s17536_s7  ;;  %v18965_v4 = vpop.f32.mrb[4].mxu0  ;;  %17187 = vmatprep.mubr.msk.f32.mxu1 %vm1008_vm4, %v1824_v52  ;;  %v1825_v19 = vsel %vm967_vm3, %v1793_v48, %v1681_v53  ;;  %v25342_v57 = vld [vmem:[#allocation68_spill] sm:$0xff] }
 0x1fa   : > { %7362 = vrot.lane.b32.xlu1 %v7165_v14, %s17535_s28  ;;  %v18968_v50 = vpop.f32.mrb[5].mxu0  ;;  %17188 = vmatmul.mubr.msk.f32.gmra.mrb[14].mxu1 %vm1008_vm4, %v1825_v19  ;;  %v25341_v14 = vld [vmem:[#allocation25_spill] sm:$0xff] }
 0x1fb   : > { %v1683_v15 = vpop.permute.xlu0 %1682  ;;  %v1766_v53 = vsel %vm346_vm1, %v17386_v6, %v25341_v14 }
 0x1fc   : > { %v1685_v26 = vpop.permute.xlu1 %1684  ;;  %v1826_v18 = vsel %vm967_vm3, %v1794_v28, %v1683_v15  ;;  %v1798_v52 = vsel %vm934_vm2, %v1766_v53, %v25343_v2  ;;  %v8004_v53 = vld [vmem:[#allocation2 + $0x92] sm:$0xff] }
 0x1fd   : > { %7488 = vrot.lane.b32.xlu0 %v7196_v10, %s17536_s7  ;;  %v18980_v47 = vpop.f32.mrb[6].mxu0  ;;  %v1827_v5 = vsel %vm967_vm3, %v1795_v61, %v1685_v26  ;;  %17190 = vmatprep.mubr.msk.f32.mxu1 %vm1008_vm4, %v1826_v18  ;;  %v7199_v10 = vld [vmem:[#allocation2 + $0x81] sm:$0xff]  ;;  %v1767_v26 = vsel %vm346_vm1, %v17387_v1, %v25342_v57 }
 0x1fe   : > { %v18985_v24 = vpop.f32.mrb[7].mxu0  ;;  %8040 = vrot.lane.b32.xlu1 %v17380_v35, %s17534_s27  ;;  %17191 = vmatmul.mubr.msk.f32.gmra.mrb[16].mxu1 %vm1008_vm4, %v1827_v5  ;;  %v17388_v61 = vld [vmem:[#allocation2 + $0x7a] sm:$0xff] }
 0x1ff   : > { %v1687_v56 = vpop.permute.xlu0 %1686 }
 0x200   : > { %v1689_v40 = vpop.permute.xlu1 %1688 }
 0x201   : > { %7490 = vrot.lane.b32.xlu0 %v7197_v20, %s17536_s7  ;;  %v18996_v7 = vpop.f32.mrb[8].mxu0  ;;  %v25337_v20 = vld [vmem:[#allocation3_spill] sm:$0xff]  ;;  %v1829_v0 = vsel %vm967_vm3, %v1797_v17, %v1689_v40 }
 0x202   : > { %v19005_v3 = vpop.f32.mrb[9].mxu0  ;;  %8042 = vrot.lane.b32.xlu1 %v17383_v38, %s17534_s27  ;;  %v1764_v63 = vsel %vm346_vm1, %v17384_v42, %v25337_v20  ;;  %v17390_v42 = vld [vmem:[#allocation2 + $0x82] sm:$0xff] }
 0x203   : > { %v1691_v60 = vpop.permute.xlu0 %1690  ;;  %v1796_v30 = vsel %vm934_vm2, %v1764_v63, %v25338_v27  ;;  %v25346_v63 = vld [vmem:[#allocation29_spill] sm:$0xff]  ;;  %v17537_v27 = vmov 1966171168  }
 0x204   : > { %v1693_v41 = vpop.permute.xlu1 %1692  ;;  %v1828_v58 = vsel %vm967_vm3, %v1796_v30, %v1687_v56  ;;  %v25344_v56 = vld [vmem:[#allocation45_spill] sm:$0xff]  ;;  %v1830_v35 = vsel %vm967_vm3, %v1798_v52, %v1691_v60  ;;  %v2200_v30 = vunpack.c.l.s4 %v17537_v27  ;;  %v7168_v52 = vld [vmem:[#allocation2 + $0x90] sm:$0xff] }
 0x205   : > { %v19014_v8 = vpop.f32.mrb[10].mxu0  ;;  %8136 = vrot.lane.b32.xlu0 %v7198_v55, %s17535_s28  ;;  %17193 = vmatprep.mubr.msk.f32.mxu1 %vm1008_vm4, %v1828_v58  ;;  %v1799_v19 = vsel %vm934_vm2, %v1767_v26, %v25344_v56  ;;  %v17391_v58 = vld [vmem:[#allocation2 + $0x111] sm:$0xff] }
 0x206   : > { %v19017_v29 = vpop.f32.mrb[11].mxu0  ;;  %8138 = vrot.lane.b32.xlu1 %v7199_v10, %s17535_s28  ;;  %17194 = vmatmul.mubr.msk.f32.gmra.mrb[18].mxu1 %vm1008_vm4, %v1829_v0  ;;  %v1831_v36 = vsel %vm967_vm3, %v1799_v19, %v1693_v41  ;;  %v17389_v41 = vld [vmem:[#allocation2 + $0x109] sm:$0xff]  ;;  %v1769_v17 = vsel %vm346_vm1, %v17391_v58, %v25347_v44  ;;  %v25348_v0 = vld [vmem:[#allocation76_spill] sm:$0xff]  ;;  %v2201_v26 = vunpack.c.0.s8 %v2200_v30 }
 0x207   : > { %v19019_v45 = vpop.permute.xlu0 %1694  ;;  %17196 = vmatprep.mubr.msk.f32.mxu1 %vm1008_vm4, %v1830_v35  ;;  %v1801_v6 = vsel %vm934_vm2, %v1769_v17, %v25348_v0  ;;  %v25350_v35 = vld [vmem:[#allocation26_spill] sm:$0xff]  ;;  %v8005_v58 = vld [vmem:[#allocation2 + $0x9a] sm:$0xff] }
 0x208   : > { %v19022_v62 = vpop.permute.xlu1 %1696  ;;  %v7169_v0 = vld [vmem:[#allocation2 + $0x98] sm:$0xff] }
 0x209   : > { %v19024_v51 = vpop.f32.mrb[12].mxu0  ;;  %8264 = vrot.lane.b32.xlu0 %v8002_v23, %s17536_s7  ;;  %v25345_v23 = vld [vmem:[#allocation4_spill] sm:$0xff]  ;;  %v1833_v1 = vsel %vm967_vm3, %v1801_v6, %v19022_v62  ;;  %v17392_v62 = vld [vmem:[#allocation2 + $0x121] sm:$0xff] }
 0x20a   : > { %v19029_v12 = vpop.f32.mrb[13].mxu0  ;;  %7364 = vrot.lane.b32.xlu1 %v7166_v31, %s17535_s28  ;;  %17197 = vmatmul.mubr.msk.f32.gmra.mrb[20].mxu1 %vm1008_vm4, %v1831_v36  ;;  %v1768_v31 = vsel %vm346_vm1, %v17389_v41, %v25345_v23  ;;  %v1770_v36 = vsel %vm346_vm1, %v17392_v62, %v25350_v35  ;;  %v25351_v41 = vld [vmem:[#allocation70_spill] sm:$0xff] }
 0x20b   : > { %v19031_v11 = vpop.permute.xlu0 %1698 }
 0x20c   : > { %v19039_v25 = vpop.permute.xlu1 %1700 }
 0x20d   : > { %v19044_v9 = vpop.f32.mrb[14].mxu0  ;;  %8266 = vrot.lane.b32.xlu0 %v8003_v13, %s17536_s7  ;;  %v2202_v13 = vlaneseq }
 0x20e   : > { %v19048_v59 = vpop.f32.mrb[15].mxu0  ;;  %7366 = vrot.lane.b32.xlu1 %v7167_v22, %s17535_s28 }
 0x20f   : > { %v19050_v37 = vpop.permute.xlu0 %1702  ;;  %v19124_v2 = vshrl.u32 %v2202_v13, 7 }
 0x210   : > { %v19056_v15 = vpop.permute.xlu1 %1704 }
 0x211   : > { %v19062_v48 = vpop.f32.mrb[16].mxu0  ;;  %7492 = vrot.lane.b32.xlu0 %v7198_v55, %s17536_s7  ;;  %v19085_v55 = vld [vmem:[#allocation2 + $0x91] sm:$0xff]  ;;  %25349 = vst [vmem:[#allocation10_spill] sm:$0xff] %v19124_v2  ;;  %v19150_v17 = vsub.s32 %v2201_v26, %v19124_v2 }
 0x212   : > { %v19068_v40 = vpop.f32.mrb[17].mxu0  ;;  %8044 = vrot.lane.b32.xlu1 %v17388_v61, %s17534_s27  ;;  %v17393_v61 = vld [vmem:[#allocation2 + $0x129] sm:$0xff] }
 0x213   : > { %v19070_v46 = vpop.permute.xlu0 %1706  ;;  %v1771_v23 = vsel %vm346_vm1, %v17393_v61, %v25351_v41  ;;  %v25358_v61 = vld [vmem:[#allocation5_spill] sm:$0xff] }
 0x214   : > { %v19075_v28 = vpop.permute.xlu1 %1708 }
 0x215   : > { %v19078_v18 = vpop.f32.mrb[18].mxu0  ;;  %7494 = vrot.lane.b32.xlu0 %v7199_v10, %s17536_s7  ;;  %v1800_v10 = vsel %vm934_vm2, %v1768_v31, %v25346_v63  ;;  %v25352_v31 = vld [vmem:[#allocation8_spill] sm:$0xff] }
 0x216   : > { %v19081_v60 = vpop.f32.mrb[19].mxu0  ;;  %8046 = vrot.lane.b32.xlu1 %v17390_v42, %s17534_s27  ;;  %v1832_v22 = vsel %vm967_vm3, %v1800_v10, %v19019_v45  ;;  %v19122_v45 = vld [vmem:[%s24824_s3] ss:$0 sm:$0xff]  ;;  %v1802_v42 = vsel %vm934_vm2, %v1770_v36, %v25352_v31  ;;  %v25353_v10 = vld [vmem:[#allocation46_spill] sm:$0xff]  ;;  %v25359_v31 = vld [vmem:[#allocation43_spill] sm:$0xff] }
 0x217   : > { %v19083_v38 = vpop.permute.xlu0 %1710  ;;  %17199 = vmatprep.mubr.msk.f32.mxu1 %vm1008_vm4, %v1832_v22  ;;  %v1803_v27 = vsel %vm934_vm2, %v1771_v23, %v25353_v10  ;;  %v1177_v30 = vadd.f32 %v18941_v34, %v19122_v45  ;;  %v1834_v13 = vsel %vm967_vm3, %v1802_v42, %v19031_v11  ;;  %v1172_v11 = vadd.f32 %v19122_v45, %v18946_v39  ;;  %v17394_v36 = vld [vmem:[#allocation2 + $0x139] sm:$0xff]  ;;  %v17395_v23 = vld [vmem:[#allocation2 + $0x141] sm:$0xff]  ;;  %v17396_v10 = vld [vmem:[#allocation2 + $0x151] sm:$0xff] }
 0x218   : > { %v19087_v5 = vpop.permute.xlu1 %1712  ;;  %17200 = vmatmul.mubr.msk.f32.gmra.mrb[22].mxu1 %vm1008_vm4, %v1833_v1  ;;  %v1835_v22 = vsel %vm967_vm3, %v1803_v27, %v19039_v25  ;;  %v1772_v41 = vsel %vm346_vm1, %v17394_v36, %v25358_v61  ;;  %v1773_v42 = vsel %vm346_vm1, %v17395_v23, %v25359_v31  ;;  %v25360_v27 = vld [vmem:[#allocation27_spill] sm:$0xff]  ;;  %v25363_v61 = vld [vmem:[#allocation6_spill] sm:$0xff] }
 0x219   : > { %v19092_v20 = vpop.f32.mrb[20].mxu0  ;;  %8140 = vrot.lane.b32.xlu0 %v19085_v55, %s17535_s28  ;;  %17202 = vmatprep.mubr.msk.f32.mxu1 %vm1008_vm4, %v1834_v13  ;;  %v2247_v1 = vcombine.high %v1177_v30, %v1177_v30  ;;  %v2254_v26 = vrot.slane %v1177_v30, %v19150_v17  ;;  %v2198_v39 = vcombine.high %v1172_v11, %v1172_v11  ;;  %v17398_v36 = vld [vmem:[#allocation2 + $0x169] sm:$0xff] }
 0x21a   : > { %v19100_v54 = vpop.f32.mrb[21].mxu0  ;;  %8142 = vrot.lane.b32.xlu1 %v19098_v43, %s17535_s28  ;;  %v1774_v30 = vsel %vm346_vm1, %v17396_v10, %v25360_v27  ;;  %v2205_v13 = vrot.slane %v1172_v11, %v19150_v17  ;;  %v1776_v2 = vsel %vm346_vm1, %v17398_v36, %v25363_v61  ;;  %v25364_v23 = vld [vmem:[#allocation30_spill] sm:$0xff]  ;;  %v17399_v27 = vld [vmem:[#allocation2 + $0x92] sm:$0xff] }
 0x21b   : > { %v19102_v21 = vpop.permute.xlu0 %7224  ;;  %v1804_v31 = vsel %vm934_vm2, %v1772_v41, %v25364_v23  ;;  %v2261_v10 = vrot.slane %v2247_v1, %v19150_v17  ;;  %v25369_v41 = vld [vmem:[#allocation78_spill] sm:$0xff]  ;;  %v19207_v23 = vrot.slane %v2254_v26, %v19150_v17 }
 0x21c   : > { %v19111_v14 = vpop.permute.xlu1 %7226  ;;  %17203 = vmatmul.mubr.msk.f32.gmra.mrb[24].mxu1 %vm1008_vm4, %v1835_v22  ;;  %v25362_v22 = vld [vmem:[#allocation72_spill] sm:$0xff]  ;;  %v1805_v1 = vsel %vm934_vm2, %v1773_v42, %v25369_v41 }
 0x21d   : > { %v19117_v57 = vpop.f32.mrb[22].mxu0  ;;  %8268 = vrot.lane.b32.xlu0 %v8004_v53, %s17536_s7  ;;  %25370 = vst [vmem:[#allocation50_spill] sm:$0xff] %v19207_v23  ;;  %v2263_v41 = vcombine.high %v2261_v10, %v2261_v10  ;;  %v1192_v23 = vadd.f32 %v19122_v45, %v18968_v50 }
 0x21e   : > { %v19127_v56 = vpop.f32.mrb[23].mxu0  ;;  %7368 = vrot.lane.b32.xlu1 %v7168_v52, %s17535_s28  ;;  %v1187_v52 = vadd.f32 %v18958_v49, %v19122_v45 }
 0x21f   : > { %v19129_v19 = vpop.permute.xlu0 %7228 }
 0x220   : > { %v19138_v63 = vpop.permute.xlu1 %7230 }
 0x221   : > { %v19147_v44 = vpop.f32.mrb[24].mxu0  ;;  %8270 = vrot.lane.b32.xlu0 %v8005_v58, %s17536_s7  ;;  %v17397_v58 = vld [vmem:[#allocation2 + $0x159] sm:$0xff] }
 0x222   : > { %25354 = vst [vmem:[#allocation48_spill] sm:$0xff] %v19147_v44  ;;  %v19155_v6 = vpop.f32.mrb[25].mxu0  ;;  %7370 = vrot.lane.b32.xlu1 %v7169_v0, %s17535_s28  ;;  %v1775_v0 = vsel %vm346_vm1, %v17397_v58, %v25362_v22  ;;  %v2345_v58 = vcombine.high %v1187_v52, %v1187_v52  ;;  %v1836_v22 = vsel %vm967_vm3, %v1804_v31, %v19050_v37 }
 0x223   : > { %25355 = vst [vmem:[#allocation32_spill] sm:$0xff] %v19155_v6  ;;  %v19157_v34 = vpop.permute.xlu0 %7232  ;;  %17205 = vmatprep.mubr.msk.f32.mxu1 %vm1008_vm4, %v1836_v22  ;;  %v2213_v31 = vcombine.high %v2205_v13, %v2205_v13  ;;  %v7174_v6 = vld [vmem:[#allocation2 + $0xd8] sm:$0xff] }
 0x224   : > { %v19163_v53 = vpop.permute.xlu1 %7234 }
 0x225   : > { %v19166_v25 = vpop.f32.mrb[26].mxu0  ;;  %7496 = vrot.lane.b32.xlu0 %v19085_v55, %s17536_s7  ;;  %v17400_v55 = vld [vmem:[#allocation2 + $0x171] sm:$0xff] }
 0x226   : > { %25356 = vst [vmem:[#allocation82_spill] sm:$0xff] %v19166_v25  ;;  %v19171_v62 = vpop.f32.mrb[27].mxu0  ;;  %8048 = vrot.lane.b32.xlu1 %v17399_v27, %s17534_s27  ;;  %v2212_v27 = vrot.slane %v2198_v39, %v19150_v17  ;;  %v25373_v39 = vld [vmem:[#allocation47_spill] sm:$0xff] }
 0x227   : > { %25357 = vst [vmem:[#allocation11_spill] sm:$0xff] %v19171_v62  ;;  %v19173_v35 = vpop.permute.xlu0 %7236  ;;  %v25366_v62 = vld [vmem:[#allocation44_spill] sm:$0xff]  ;;  %v1807_v42 = vsel %vm934_vm2, %v1775_v0, %v25373_v39  ;;  %v19241_v0 = vrot.slane %v2261_v10, %v19150_v17 }
 0x228   : > { %v19184_v49 = vpop.permute.xlu1 %7238  ;;  %v1777_v25 = vsel %vm346_vm1, %v17400_v55, %v25366_v62  ;;  %v1182_v62 = vadd.f32 %v19122_v45, %v18961_v33  ;;  %v25371_v55 = vld [vmem:[#allocation9_spill] sm:$0xff]  ;;  %v25374_v33 = vld [vmem:[#allocation31_spill] sm:$0xff] }
 0x229   : > { %25361 = vst [vmem:[#allocation49_spill] sm:$0xff] %v19184_v49  ;;  %v19194_v11 = vpop.f32.mrb[28].mxu0  ;;  %v2262_v49 = vcombine.high %v2254_v26, %v2254_v26  ;;  %v1806_v37 = vsel %vm934_vm2, %v1774_v30, %v25371_v55  ;;  %7498 = vrot.lane.b32.xlu0 %v19098_v43, %s17536_s7  ;;  %v19226_v22 = vsel %vm934_vm2, %v1776_v2, %v25374_v33  ;;  %v25377_v43 = vld [vmem:[#allocation80_spill] sm:$0xff]  ;;  %25378 = vst [vmem:[#allocation51_spill] sm:$0xff] %v19241_v0 }
 0x22a   : > { %25365 = vst [vmem:[#allocation33_spill] sm:$0xff] %v19194_v11  ;;  %v19200_v36 = vpop.f32.mrb[29].mxu0  ;;  %v19229_v30 = vrot.slane %v2205_v13, %v19150_v17  ;;  %v2359_v55 = vrot.slane %v2345_v58, %v19150_v17  ;;  %v17401_v13 = vld [vmem:[#allocation2 + $0x9a] sm:$0xff]  ;;  %v2296_v10 = vcombine.high %v1182_v62, %v1182_v62  ;;  %v1197_v58 = vadd.f32 %v18965_v4, %v19122_v45 }
 0x22b   : > { %25367 = vst [vmem:[#allocation84_spill] sm:$0xff] %v19200_v36  ;;  %v19202_v61 = vpop.permute.xlu0 %7240  ;;  %v2352_v36 = vrot.slane %v1187_v52, %v19150_v17  ;;  %v19232_v52 = vld [vmem:[#allocation2 + $0xa9] sm:$0xff]  ;;  %v19244_v2 = vrot.slane %v2262_v49, %v19150_v17  ;;  %8050 = vrot.lane.b32.xlu1 %v17401_v13, %s17534_s27  ;;  %v19258_v49 = vrot.slane %v2213_v31, %v19150_v17 }
 0x22c   : > { %25368 = vst [vmem:[#allocation12_spill] sm:$0xff] %v19202_v61  ;;  %v1837_v61 = vsel %vm967_vm3, %v1805_v1, %v19056_v15  ;;  %v19220_v26 = vpop.permute.xlu1 %7242  ;;  %25375 = vst [vmem:[#allocation86_spill] sm:$0xff] %v19229_v30  ;;  %v19238_v1 = vsel %vm934_vm2, %v1777_v25, %v25377_v43  ;;  %v2214_v25 = vcombine.high %v2212_v27, %v2212_v27 }
 0x22d   : > { %25372 = vst [vmem:[#allocation34_spill] sm:$0xff] %v19220_v26  ;;  %17206 = vmatmul.mubr.msk.f32.gmra.mrb[26].mxu1 %vm1008_vm4, %v1837_v61  ;;  %v19234_v15 = vpop.f32.mrb[30].mxu0  ;;  %25379 = vst [vmem:[#allocation35_spill] sm:$0xff] %v19244_v2  ;;  %v19255_v43 = vrot.slane %v2212_v27, %v19150_v17  ;;  %v1838_v13 = vsel %vm967_vm3, %v1806_v37, %v19070_v46  ;;  %8144 = vrot.lane.b32.xlu0 %v19232_v52, %s17535_s28  ;;  %v8006_v46 = vld [vmem:[#allocation2 + $0xaa] sm:$0xff] }
 0x22e   : > { %25376 = vst [vmem:[#allocation13_spill] sm:$0xff] %v19234_v15  ;;  %v19248_v61 = vpop.f32.mrb[31].mxu0  ;;  %25383 = vst [vmem:[#allocation36_spill] sm:$0xff] %v19258_v49  ;;  %v2360_v15 = vcombine.high %v2352_v36, %v2352_v36  ;;  %v19271_v27 = vrot.slane %v2263_v41, %v19150_v17  ;;  %v1839_v4 = vsel %vm967_vm3, %v1807_v42, %v19075_v28  ;;  %17208 = vmatprep.mubr.msk.f32.mxu1 %vm1008_vm4, %v1838_v13 }
 0x22f   : > { %25380 = vst [vmem:[#allocation88_spill] sm:$0xff] %v19248_v61  ;;  %v19250_v39 = vpop.permute.xlu0 %7244  ;;  %25382 = vst [vmem:[#allocation52_spill] sm:$0xff] %v19255_v43  ;;  %v2361_v41 = vcombine.high %v2359_v55, %v2359_v55  ;;  %v2303_v61 = vrot.slane %v1182_v62, %v19150_v17  ;;  %v19289_v50 = vrot.slane %v2214_v25, %v19150_v17 }
 0x230   : > { %25381 = vst [vmem:[#allocation14_spill] sm:$0xff] %v19250_v39  ;;  %v19266_v39 = vld [vmem:[#allocation2 + $0xb1] sm:$0xff]  ;;  %v19268_v33 = vpop.permute.xlu1 %7246  ;;  %25385 = vst [vmem:[#allocation15_spill] sm:$0xff] %v19271_v27  ;;  %v19292_v28 = vrot.slane %v2352_v36, %v19150_v17  ;;  %v19295_v42 = vrot.slane %v2359_v55, %v19150_v17  ;;  %v2310_v13 = vrot.slane %v2296_v10, %v19150_v17  ;;  %v7170_v36 = vld [vmem:[#allocation2 + $0xa8] sm:$0xff] }
 0x231   : > { %25384 = vst [vmem:[#allocation90_spill] sm:$0xff] %v19268_v33  ;;  %17209 = vmatmul.mubr.msk.f32.gmra.mrb[28].mxu1 %vm1008_vm4, %v1839_v4  ;;  %25387 = vst [vmem:[#allocation37_spill] sm:$0xff] %v19289_v50  ;;  %8146 = vrot.lane.b32.xlu1 %v19266_v39, %s17535_s28  ;;  %v19303_v4 = vrot.slane %v2360_v15, %v19150_v17  ;;  %v2443_v37 = vcombine.high %v1197_v58, %v1197_v58  ;;  %v8007_v15 = vld [vmem:[#allocation2 + $0xb2] sm:$0xff] }
 0x232   : > { %25388 = vst [vmem:[#allocation92_spill] sm:$0xff] %v19292_v28  ;;  %25389 = vst [vmem:[#allocation16_spill] sm:$0xff] %v19295_v42  ;;  %v2450_v25 = vrot.slane %v1197_v58, %v19150_v17  ;;  %8272 = vrot.lane.b32.xlu0 %v8006_v46, %s17536_s7  ;;  %v2394_v30 = vcombine.high %v1192_v23, %v1192_v23  ;;  %v1207_v62 = vadd.f32 %v18980_v47, %v19122_v45  ;;  %v7171_v55 = vld [vmem:[#allocation2 + $0xb0] sm:$0xff] }
 0x233   : > { %v19286_v31 = vpop.permute.xlu0 %7248  ;;  %25390 = vst [vmem:[#allocation54_spill] sm:$0xff] %v19303_v4  ;;  %v19316_v43 = vrot.slane %v2361_v41, %v19150_v17  ;;  %v2311_v58 = vcombine.high %v2303_v61, %v2303_v61  ;;  %v19319_v46 = vrot.slane %v2303_v61, %v19150_v17  ;;  %v2401_v0 = vrot.slane %v1192_v23, %v19150_v17 }
 0x234   : > { %25386 = vst [vmem:[#allocation53_spill] sm:$0xff] %v19286_v31  ;;  %v19307_v33 = vpop.permute.xlu1 %7250  ;;  %v2312_v49 = vcombine.high %v2310_v13, %v2310_v13  ;;  %v19334_v41 = vrot.slane %v2310_v13, %v19150_v17  ;;  %v2457_v23 = vrot.slane %v2443_v37, %v19150_v17  ;;  %v2458_v27 = vcombine.high %v2450_v25, %v2450_v25 }
 0x235   : > { %25391 = vst [vmem:[#allocation38_spill] sm:$0xff] %v19307_v33  ;;  %25392 = vst [vmem:[#allocation94_spill] sm:$0xff] %v19316_v43  ;;  %7372 = vrot.lane.b32.xlu1 %v7170_v36, %s17535_s28  ;;  %v2408_v10 = vrot.slane %v2394_v30, %v19150_v17  ;;  %v2541_v47 = vcombine.high %v1207_v62, %v1207_v62  ;;  %v1202_v36 = vadd.f32 %v19122_v45, %v18985_v24  ;;  %v8009_v33 = vld [vmem:[#allocation2 + $0xca] sm:$0xff] }
 0x236   : > { %25393 = vst [vmem:[#allocation17_spill] sm:$0xff] %v19319_v46  ;;  %25394 = vst [vmem:[#allocation55_spill] sm:$0xff] %v19334_v41  ;;  %8274 = vrot.lane.b32.xlu0 %v8007_v15, %s17536_s7  ;;  %v1840_v61 = vsel %vm967_vm3, %v19226_v22, %v19083_v38  ;;  %v19349_v37 = vrot.slane %v2311_v58, %v19150_v17  ;;  %v2409_v42 = vcombine.high %v2401_v0, %v2401_v0  ;;  %v19428_v58 = vld [vmem:[#allocation2 + $0xc1] sm:$0xff] }
 0x237   : > { %v19322_v2 = vpop.permute.xlu0 %8028  ;;  %17211 = vmatprep.mubr.msk.f32.mxu1 %vm1008_vm4, %v1840_v61  ;;  %v19357_v24 = vrot.slane %v2312_v49, %v19150_v17  ;;  %v19360_v4 = vrot.slane %v2450_v25, %v19150_v17  ;;  %v19363_v38 = vrot.slane %v2401_v0, %v19150_v17  ;;  %v1841_v22 = vsel %vm967_vm3, %v19238_v1, %v19087_v5 }
 0x238   : > { %v19338_v50 = vpop.permute.xlu1 %8030  ;;  %25395 = vst [vmem:[#allocation39_spill] sm:$0xff] %v19349_v37  ;;  %v2459_v61 = vcombine.high %v2457_v23, %v2457_v23  ;;  %v19372_v15 = vrot.slane %v2457_v23, %v19150_v17  ;;  %v2548_v49 = vrot.slane %v1207_v62, %v19150_v17  ;;  %17212 = vmatmul.mubr.msk.f32.gmra.mrb[30].mxu1 %vm1008_vm4, %v1841_v22 }
 0x239   : > { %25396 = vst [vmem:[#allocation96_spill] sm:$0xff] %v19357_v24  ;;  %25397 = vst [vmem:[#allocation18_spill] sm:$0xff] %v19360_v4  ;;  %7374 = vrot.lane.b32.xlu1 %v7171_v55, %s17535_s28  ;;  %v19379_v0 = vrot.slane %v2458_v27, %v19150_v17  ;;  %v2410_v13 = vcombine.high %v2408_v10, %v2408_v10  ;;  %v2555_v5 = vrot.slane %v2541_v47, %v19150_v17  ;;  %v17402_v55 = vld [vmem:[#allocation2 + $0xaa] sm:$0xff] }
 0x23a   : > { %25398 = vst [vmem:[#allocation56_spill] sm:$0xff] %v19363_v38  ;;  %25399 = vst [vmem:[#allocation40_spill] sm:$0xff] %v19372_v15  ;;  %v2492_v1 = vcombine.high %v1202_v36, %v1202_v36  ;;  %7500 = vrot.lane.b32.xlu0 %v19232_v52, %s17536_s7  ;;  %v19387_v23 = vrot.slane %v2408_v10, %v19150_v17  ;;  %v19390_v62 = vrot.slane %v2409_v42, %v19150_v17 }
 0x23b   : > { %v19354_v30 = vpop.permute.xlu0 %8124  ;;  %25400 = vst [vmem:[#allocation97_spill] sm:$0xff] %v19379_v0  ;;  %v1217_v27 = vadd.f32 %v18996_v7, %v19122_v45  ;;  %v1212_v10 = vadd.f32 %v19122_v45, %v19005_v3  ;;  %v19406_v42 = vrot.slane %v2459_v61, %v19150_v17  ;;  %v2556_v41 = vcombine.high %v2548_v49, %v2548_v49 }
 0x23c   : > { %v19376_v25 = vpop.permute.xlu1 %8126  ;;  %25401 = vst [vmem:[#allocation19_spill] sm:$0xff] %v19387_v23  ;;  %25402 = vst [vmem:[#allocation20_spill] sm:$0xff] %v19390_v62  ;;  %v2499_v47 = vrot.slane %v1202_v36, %v19150_v17  ;;  %v19416_v52 = vrot.slane %v2410_v13, %v19150_v17  ;;  %v2557_v3 = vcombine.high %v2555_v5, %v2555_v5  ;;  %v17403_v23 = vld [vmem:[#allocation2 + $0xb2] sm:$0xff] }
 0x23d   : > { %8052 = vrot.lane.b32.xlu1 %v17402_v55, %s17534_s27  ;;  %25403 = vst [vmem:[#allocation21_spill] sm:$0xff] %v19406_v42  ;;  %v2506_v55 = vrot.slane %v2492_v1, %v19150_v17  ;;  %v19426_v7 = vrot.slane %v2548_v49, %v19150_v17  ;;  %v2639_v38 = vcombine.high %v1217_v27, %v1217_v27 }
 0x23e   : > { %25404 = vst [vmem:[#allocation22_spill] sm:$0xff] %v19416_v52  ;;  %7502 = vrot.lane.b32.xlu0 %v19266_v39, %s17536_s7  ;;  %v19433_v0 = vrot.slane %v2555_v5, %v19150_v17  ;;  %v2646_v1 = vrot.slane %v1217_v27, %v19150_v17  ;;  %v2590_v39 = vcombine.high %v1212_v10, %v1212_v10  ;;  %v19446_v5 = vld [vmem:[#allocation2 + $0xc9] sm:$0xff] }
 0x23f   : > { %v19394_v22 = vpop.permute.xlu0 %8252  ;;  %25405 = vst [vmem:[#allocation23_spill] sm:$0xff] %v19426_v7  ;;  %v1227_v61 = vadd.f32 %v19014_v8, %v19122_v45  ;;  %v19440_v49 = vrot.slane %v2556_v41, %v19150_v17  ;;  %v2507_v36 = vcombine.high %v2499_v47, %v2499_v47  ;;  %v19443_v62 = vrot.slane %v2499_v47, %v19150_v17  ;;  %v7172_v7 = vld [vmem:[#allocation2 + $0xc0] sm:$0xff] }
 0x240   : > { %v19411_v24 = vpop.permute.xlu1 %7352  ;;  %25406 = vst [vmem:[#allocation24_spill] sm:$0xff] %v19433_v0  ;;  %v2597_v15 = vrot.slane %v1212_v10, %v19150_v17  ;;  %v19453_v8 = vrot.slane %v2557_v3, %v19150_v17  ;;  %v19456_v41 = vrot.slane %v2506_v55, %v19150_v17  ;;  %v2653_v37 = vrot.slane %v2639_v38, %v19150_v17  ;;  %v8008_v3 = vld [vmem:[#allocation2 + $0xc2] sm:$0xff] }
 0x241   : > { %8054 = vrot.lane.b32.xlu1 %v17403_v23, %s17534_s27  ;;  %25407 = vst [vmem:[#allocation57_spill] sm:$0xff] %v19440_v49  ;;  %25408 = vst [vmem:[#allocation58_spill] sm:$0xff] %v19443_v62  ;;  %v2508_v23 = vcombine.high %v2506_v55, %v2506_v55  ;;  %v1222_v27 = vadd.f32 %v19122_v45, %v19017_v29  ;;  %v2654_v46 = vcombine.high %v2646_v1, %v2646_v1 }
 0x242   : > { %25409 = vst [vmem:[#allocation59_spill] sm:$0xff] %v19453_v8  ;;  %25410 = vst [vmem:[#allocation60_spill] sm:$0xff] %v19456_v41  ;;  %8148 = vrot.lane.b32.xlu0 %v19428_v58, %s17535_s28  ;;  %v2604_v43 = vrot.slane %v2590_v39, %v19150_v17  ;;  %v2737_v28 = vcombine.high %v1227_v61, %v1227_v61  ;;  %v19477_v38 = vrot.slane %v2507_v36, %v19150_v17  ;;  %v7173_v8 = vld [vmem:[#allocation2 + $0xc8] sm:$0xff] }
 0x243   : > { %v19430_v13 = vpop.permute.xlu0 %8254  ;;  %v2605_v47 = vcombine.high %v2597_v15, %v2597_v15  ;;  %v19486_v55 = vrot.slane %v2508_v23, %v19150_v17  ;;  %v2744_v10 = vrot.slane %v1227_v61, %v19150_v17  ;;  %v2655_v36 = vcombine.high %v2653_v37, %v2653_v37 }
 0x244   : > { %v19448_v4 = vpop.permute.xlu1 %7354  ;;  %25411 = vst [vmem:[#allocation61_spill] sm:$0xff] %v19477_v38  ;;  %v19493_v29 = vrot.slane %v2646_v1, %v19150_v17  ;;  %v19496_v62 = vrot.slane %v2597_v15, %v19150_v17  ;;  %v2688_v49 = vcombine.high %v1222_v27, %v1222_v27  ;;  %v19501_v23 = vrot.slane %v2653_v37, %v19150_v17 }
 0x245   : > { %8150 = vrot.lane.b32.xlu1 %v19446_v5, %s17535_s28  ;;  %25412 = vst [vmem:[#allocation62_spill] sm:$0xff] %v19486_v55  ;;  %v19504_v0 = vrot.slane %v2654_v46, %v19150_v17  ;;  %v2606_v61 = vcombine.high %v2604_v43, %v2604_v43  ;;  %v19511_v15 = vrot.slane %v2604_v43, %v19150_v17 }
 0x246   : > { %8276 = vrot.lane.b32.xlu0 %v8008_v3, %s17536_s7  ;;  %25413 = vst [vmem:[#allocation63_spill] sm:$0xff] %v19493_v29  ;;  %25414 = vst [vmem:[#allocation64_spill] sm:$0xff] %v19496_v62  ;;  %v2751_v3 = vrot.slane %v2737_v28, %v19150_v17  ;;  %v19514_v41 = vrot.slane %v2605_v47, %v19150_v17  ;;  %v1237_v37 = vadd.f32 %v19024_v51, %v19122_v45 }
 0x247   : > { %v19467_v42 = vpop.permute.xlu0 %7480  ;;  %25415 = vst [vmem:[#allocation65_spill] sm:$0xff] %v19501_v23  ;;  %25416 = vst [vmem:[#allocation66_spill] sm:$0xff] %v19504_v0  ;;  %v2752_v31 = vcombine.high %v2744_v10, %v2744_v10  ;;  %v1232_v1 = vadd.f32 %v19122_v45, %v19029_v12  ;;  %v19527_v43 = vrot.slane %v2655_v36, %v19150_v17 }
 0x248   : > { %v19481_v52 = vpop.permute.xlu1 %8032  ;;  %25417 = vst [vmem:[#allocation67_spill] sm:$0xff] %v19511_v15  ;;  %25418 = vst [vmem:[#allocation69_spill] sm:$0xff] %v19514_v41  ;;  %v2702_v38 = vrot.slane %v2688_v49, %v19150_v17  ;;  %v2753_v36 = vcombine.high %v2751_v3, %v2751_v3  ;;  %v19549_v47 = vrot.slane %v2744_v10, %v19150_v17 }
 0x249   : > { %7376 = vrot.lane.b32.xlu1 %v7172_v7, %s17535_s28  ;;  %v2695_v7 = vrot.slane %v1222_v27, %v19150_v17  ;;  %25419 = vst [vmem:[#allocation71_spill] sm:$0xff] %v19527_v43  ;;  %v2835_v62 = vcombine.high %v1237_v37, %v1237_v37  ;;  %v19554_v12 = vrot.slane %v2751_v3, %v19150_v17 }
 0x24a   : > { %8278 = vrot.lane.b32.xlu0 %v8009_v33, %s17536_s7  ;;  %v19541_v33 = vrot.slane %v2606_v61, %v19150_v17  ;;  %25421 = vst [vmem:[#allocation75_spill] sm:$0xff] %v19549_v47  ;;  %v19557_v61 = vrot.slane %v2752_v31, %v19150_v17  ;;  %v2704_v51 = vcombine.high %v2702_v38, %v2702_v38 }
 0x24b   : > { %v19498_v39 = vpop.permute.xlu0 %7482  ;;  %25422 = vst [vmem:[#allocation77_spill] sm:$0xff] %v19554_v12  ;;  %v2703_v23 = vcombine.high %v2695_v7, %v2695_v7  ;;  %v19562_v49 = vrot.slane %v2695_v7, %v19150_v17  ;;  %v2842_v10 = vrot.slane %v1237_v37, %v19150_v17  ;;  %v1247_v15 = vadd.f32 %v19044_v9, %v19122_v45  ;;  %v17404_v7 = vld [vmem:[#allocation2 + $0xc2] sm:$0xff] }
 0x24c   : > { %v19518_v46 = vpop.permute.xlu1 %8034  ;;  %25420 = vst [vmem:[#allocation73_spill] sm:$0xff] %v19541_v33  ;;  %25423 = vst [vmem:[#allocation79_spill] sm:$0xff] %v19557_v61  ;;  %v19572_v3 = vrot.slane %v2753_v36, %v19150_v17  ;;  %v19575_v0 = vrot.slane %v2702_v38, %v19150_v17  ;;  %v2849_v29 = vrot.slane %v2835_v62, %v19150_v17  ;;  %v19603_v38 = vld [vmem:[#allocation2 + $0xd9] sm:$0xff] }
 0x24d   : > { %7378 = vrot.lane.b32.xlu1 %v7173_v8, %s17535_s28  ;;  %v2786_v8 = vcombine.high %v1232_v1, %v1232_v1  ;;  %25424 = vst [vmem:[#allocation81_spill] sm:$0xff] %v19562_v49  ;;  %v1242_v36 = vadd.f32 %v19122_v45, %v19048_v59  ;;  %v19599_v62 = vrot.slane %v2704_v51, %v19150_v17 }
 0x24e   : > { %7504 = vrot.lane.b32.xlu0 %v19428_v58, %s17536_s7  ;;  %25425 = vst [vmem:[#allocation83_spill] sm:$0xff] %v19572_v3  ;;  %25426 = vst [vmem:[#allocation85_spill] sm:$0xff] %v19575_v0  ;;  %v2793_v58 = vrot.slane %v1232_v1, %v19150_v17  ;;  %v2850_v9 = vcombine.high %v2842_v10, %v2842_v10  ;;  %v2933_v47 = vcombine.high %v1247_v15, %v1247_v15  ;;  %v17405_v1 = vld [vmem:[#allocation2 + $0xca] sm:$0xff] }
 0x24f   : > { %v19534_v28 = vpop.permute.xlu0 %8128  ;;  %v2800_v37 = vrot.slane %v2786_v8, %v19150_v17  ;;  %25428 = vst [vmem:[#allocation89_spill] sm:$0xff] %v19599_v62  ;;  %v2851_v59 = vcombine.high %v2849_v29, %v2849_v29  ;;  %v2940_v61 = vrot.slane %v1247_v15, %v19150_v17  ;;  %v2884_v33 = vcombine.high %v1242_v36, %v1242_v36 }
 0x250   : > { %v19551_v27 = vpop.permute.xlu1 %8130  ;;  %v2801_v51 = vcombine.high %v2793_v58, %v2793_v58  ;;  %v19616_v49 = vrot.slane %v2793_v58, %v19150_v17  ;;  %v19624_v8 = vrot.slane %v2849_v29, %v19150_v17  ;;  %v1257_v0 = vadd.f32 %v19062_v48, %v19122_v45  ;;  %v19638_v29 = vld [vmem:[#allocation2 + $0xe1] sm:$0xff] }
 0x251   : > { %8056 = vrot.lane.b32.xlu1 %v17404_v7, %s17534_s27  ;;  %v19593_v7 = vrot.slane %v2703_v23, %v19150_v17  ;;  %v19633_v15 = vrot.slane %v2850_v9, %v19150_v17  ;;  %v1252_v23 = vadd.f32 %v19122_v45, %v19068_v40  ;;  %v19645_v3 = vrot.slane %v2800_v37, %v19150_v17 }
 0x252   : > { %7506 = vrot.lane.b32.xlu0 %v19446_v5, %s17536_s7  ;;  %v19612_v5 = vrot.slane %v2842_v10, %v19150_v17  ;;  %25430 = vst [vmem:[#allocation93_spill] sm:$0xff] %v19616_v49  ;;  %25431 = vst [vmem:[#allocation95_spill] sm:$0xff] %v19624_v8  ;;  %v2802_v10 = vcombine.high %v2800_v37, %v2800_v37  ;;  %v19648_v58 = vrot.slane %v2801_v51, %v19150_v17 }
 0x253   : > { %v19567_v41 = vpop.permute.xlu0 %8256  ;;  %25427 = vst [vmem:[#allocation87_spill] sm:$0xff] %v19593_v7  ;;  %25432 = vst [vmem:[#allocation3_spill] sm:$0xff] %v19633_v15  ;;  %v2891_v9 = vrot.slane %v1242_v36, %v19150_v17  ;;  %v19654_v40 = vrot.slane %v2851_v59, %v19150_v17  ;;  %v2948_v62 = vcombine.high %v2940_v61, %v2940_v61 }
 0x254   : > { %v19586_v31 = vpop.permute.xlu1 %7356  ;;  %25429 = vst [vmem:[#allocation91_spill] sm:$0xff] %v19612_v5  ;;  %25433 = vst [vmem:[#allocation28_spill] sm:$0xff] %v19645_v3  ;;  %v2898_v48 = vrot.slane %v2884_v33, %v19150_v17  ;;  %v8010_v5 = vld [vmem:[#allocation2 + $0xda] sm:$0xff]  ;;  %v19664_v36 = vrot.slane %v2802_v10, %v19150_v17  ;;  %v3031_v59 = vcombine.high %v1257_v0, %v1257_v0 }
 0x255   : > { %8058 = vrot.lane.b32.xlu1 %v17405_v1, %s17534_s27  ;;  %v2947_v1 = vrot.slane %v2933_v47, %v19150_v17  ;;  %25434 = vst [vmem:[#allocation41_spill] sm:$0xff] %v19648_v58  ;;  %25435 = vst [vmem:[#allocation74_spill] sm:$0xff] %v19654_v40  ;;  %v2982_v55 = vcombine.high %v1252_v23, %v1252_v23  ;;  %v2899_v51 = vcombine.high %v2891_v9, %v2891_v9 }
 0x256   : > { %8152 = vrot.lane.b32.xlu0 %v19603_v38, %s17535_s28  ;;  %25436 = vst [vmem:[#allocation25_spill] sm:$0xff] %v19664_v36  ;;  %v1267_v8 = vadd.f32 %v19078_v18, %v19122_v45  ;;  %v2900_v15 = vcombine.high %v2898_v48, %v2898_v48  ;;  %v3038_v11 = vrot.slane %v1257_v0, %v19150_v17  ;;  %v8011_v36 = vld [vmem:[#allocation2 + $0xe2] sm:$0xff] }
 0x257   : > { %v19605_v12 = vpop.permute.xlu0 %8258  ;;  %v2949_v33 = vcombine.high %v2947_v1, %v2947_v1  ;;  %v19674_v49 = vrot.slane %v2947_v1, %v19150_v17  ;;  %v19688_v1 = vrot.slane %v2948_v62, %v19150_v17  ;;  %v2989_v3 = vrot.slane %v1252_v23, %v19150_v17 }
 0x258   : > { %v19619_v43 = vpop.permute.xlu1 %7358  ;;  %v19707_v47 = vrot.slane %v2891_v9, %v19150_v17  ;;  %v19716_v23 = vrot.slane %v2899_v51, %v19150_v17  ;;  %v3046_v0 = vcombine.high %v3038_v11, %v3038_v11 }
 0x259   : > { %7252 = vrot.lane.b32.xlu1 %v18990_v32, %s17534_s27  ;;  %v19667_v32 = vrot.slane %v2940_v61, %v19150_v17  ;;  %25438 = vst [vmem:[#allocation7_spill] sm:$0xff] %v19674_v49  ;;  %25439 = vst [vmem:[#allocation45_spill] sm:$0xff] %v19688_v1  ;;  %v19702_v62 = vrot.slane %v2949_v33, %v19150_v17  ;;  %v2996_v61 = vrot.slane %v2982_v55, %v19150_v17 }
 0x25a   : > { %8154 = vrot.lane.b32.xlu0 %v19638_v29, %s17535_s28  ;;  %25441 = vst [vmem:[#allocation29_spill] sm:$0xff] %v19716_v23  ;;  %v1262_v33 = vadd.f32 %v19122_v45, %v19081_v60  ;;  %v19724_v55 = vrot.slane %v2900_v15, %v19150_v17  ;;  %v19727_v49 = vrot.slane %v3038_v11, %v19150_v17  ;;  %v17407_v15 = vld [vmem:[#allocation2 + $0x20] sm:$0xff] }
 0x25b   : > { %v19640_v7 = vpop.permute.xlu0 %7484  ;;  %25437 = vst [vmem:[#allocation68_spill] sm:$0xff] %v19667_v32  ;;  %v2997_v60 = vcombine.high %v2989_v3, %v2989_v3  ;;  %v2998_v9 = vcombine.high %v2996_v61, %v2996_v61  ;;  %v19743_v1 = vrot.slane %v1267_v8, %v19150_v17 }
 0x25c   : > { %v19659_v37 = vpop.permute.xlu1 %8036  ;;  %25442 = vst [vmem:[#allocation42_spill] sm:$0xff] %v19724_v55  ;;  %25443 = vst [vmem:[#allocation76_spill] sm:$0xff] %v19727_v49  ;;  %v3080_v44 = vcombine.high %v1262_v33, %v1262_v33  ;;  %v17410_v55 = vld [vmem:[#allocation2 + $0x38] sm:$0xff] }
 0x25d   : > { %8280 = vrot.lane.b32.xlu1 %v8010_v5, %s17536_s7  ;;  %v3045_v5 = vrot.slane %v3031_v59, %v19150_v17  ;;  %v19713_v59 = vrot.slane %v2898_v48, %v19150_v17  ;;  %v7175_v48 = vld [vmem:[#allocation2 + $0xe0] sm:$0xff] }
 0x25e   : > { %7254 = vrot.lane.b32.xlu0 %v18998_v16, %s17534_s27  ;;  %v3129_v16 = vcombine.high %v1267_v8, %v1267_v8  ;;  %v19758_v8 = vrot.slane %v3046_v0, %v19150_v17  ;;  %v17411_v0 = vld [vmem:[#allocation2 + $0x19] sm:$0xff] }
 0x25f   : > { %v19676_v26 = vpop.permute.xlu0 %7486  ;;  %25440 = vst [vmem:[#allocation4_spill] sm:$0xff] %v19713_v59  ;;  %v3047_v51 = vcombine.high %v3045_v5, %v3045_v5  ;;  %v19732_v58 = vrot.slane %v3045_v5, %v19150_v17  ;;  %v19763_v5 = vrot.slane %v2996_v61, %v19150_v17  ;;  %v19780_v61 = vrot.slane %v2998_v9, %v19150_v17  ;;  %v17406_v9 = vld [vmem:[#allocation2 + $0x18] sm:$0xff] }
 0x260   : > { %v19691_v10 = vpop.permute.xlu1 %8038  ;;  %v7576_v11 = vsel %vm346_vm1, %v17406_v9, %v19102_v21  ;;  %v8348_v23 = vsel %vm346_vm1, %v17411_v0, %v19322_v2  ;;  %v17412_v21 = vld [vmem:[#allocation2 + $0x21] sm:$0xff] }
 0x261   : > { %7380 = vrot.lane.b32.xlu1 %v7174_v6, %s17535_s28  ;;  %25444 = vst [vmem:[#allocation26_spill] sm:$0xff] %v19732_v58  ;;  %v19735_v6 = vrot.slane %v2989_v3, %v19150_v17  ;;  %v19773_v3 = vrot.slane %v2997_v60, %v19150_v17  ;;  %v17408_v58 = vld [vmem:[#allocation2 + $0xda] sm:$0xff]  ;;  %v8349_v9 = vsel %vm346_vm1, %v17412_v21, %v19338_v50  ;;  %v17416_v0 = vld [vmem:[#allocation2 + $0x48] sm:$0xff] }
 0x262   : > { %8282 = vrot.lane.b32.xlu0 %v8011_v36, %s17536_s7  ;;  %v19752_v36 = vrot.slane %v3129_v16, %v19150_v17  ;;  %v19768_v16 = vrot.slane %v3047_v51, %v19150_v17  ;;  %v19786_v51 = vrot.slane %v19743_v1, %v19150_v17  ;;  %v17419_v21 = vld [vmem:[#allocation2 + $0xe2] sm:$0xff] }
 0x263   : > { %v19710_v18 = vpop.permute.xlu0 %8132  ;;  %25445 = vst [vmem:[#allocation70_spill] sm:$0xff] %v19735_v6  ;;  %v7577_v6 = vsel %vm346_vm1, %v17407_v15, %v19111_v14  ;;  %v8381_v15 = vsel %vm934_vm2, %v8349_v9, %v19376_v25 }
 0x264   : > { %v19729_v32 = vpop.permute.xlu1 %8134  ;;  %v8413_v50 = vsel %vm967_vm3, %v8381_v15, %v19430_v13 }
 0x265   : > { %7382 = vrot.lane.b32.xlu1 %v7175_v48, %s17535_s28  ;;  %v19789_v48 = vrot.slane %v1262_v33, %v19150_v17  ;;  %v17409_v33 = vld [vmem:[#allocation2 + $0x30] sm:$0xff] }
 0x266   : > { %7508 = vrot.lane.b32.xlu0 %v19603_v38, %s17536_s7  ;;  %v19796_v38 = vrot.slane %v3080_v44, %v19150_v17  ;;  %v7578_v49 = vsel %vm346_vm1, %v17409_v33, %v19129_v19  ;;  %v7579_v44 = vsel %vm346_vm1, %v17410_v55, %v19138_v63  ;;  %v7608_v19 = vsel %vm934_vm2, %v7576_v11, %v19411_v24  ;;  %v19845_v55 = vld [vmem:[#allocation2 + $0xf1] sm:$0xff] }
 0x267   : > { %v19745_v40 = vpop.permute.xlu0 %8260  ;;  %v7609_v63 = vsel %vm934_vm2, %v7577_v6, %v19448_v4 }
 0x268   : > { %v19765_v59 = vpop.permute.xlu1 %7360  ;;  %v7641_v4 = vsel %vm967_vm3, %v7609_v63, %v19498_v39  ;;  %v7610_v39 = vsel %vm934_vm2, %v7578_v49, %v19586_v31  ;;  %v7580_v49 = vsel %vm346_vm1, %v17416_v0, %v19157_v34  ;;  %v17417_v31 = vld [vmem:[#allocation2 + $0x50] sm:$0xff]  ;;  %v17422_v0 = vld [vmem:[#allocation2 + $0xe1] sm:$0xff] }
 0x269   : > { %8060 = vrot.lane.b32.xlu1 %v17408_v58, %s17534_s27  ;;  %v8380_v58 = vsel %vm934_vm2, %v8348_v23, %v19354_v30  ;;  %v7640_v30 = vsel %vm967_vm3, %v7608_v19, %v19467_v42  ;;  %v17413_v23 = vld [vmem:[#allocation2 + $0x31] sm:$0xff]  ;;  %v7642_v6 = vsel %vm967_vm3, %v7610_v39, %v19640_v7  ;;  %v7581_v33 = vsel %vm346_vm1, %v17417_v31, %v19163_v53 }
 0x26a   : > { %7510 = vrot.lane.b32.xlu0 %v19638_v29, %s17536_s7  ;;  %v8412_v2 = vsel %vm967_vm3, %v8380_v58, %v19394_v22  ;;  %v8350_v25 = vsel %vm346_vm1, %v17413_v23, %v19481_v52  ;;  %17218 = vmatprep.mubr.msk.f32.mxu0 %vm1008_vm4, %v7640_v30  ;;  %v17414_v29 = vld [vmem:[#allocation2 + $0x39] sm:$0xff]  ;;  %v17418_v7 = vld [vmem:[#allocation2 + $0x51] sm:$0xff]  ;;  %v7612_v34 = vsel %vm934_vm2, %v7580_v49, %v19765_v59 }
 0x26b   : > { %v19791_v60 = vpop.permute.xlu0 %8262  ;;  %17270 = vmatprep.mubr.msk.f32.mxu1 %vm1008_vm4, %v8412_v2  ;;  %v8351_v22 = vsel %vm346_vm1, %v17414_v29, %v19518_v46  ;;  %v8382_v13 = vsel %vm934_vm2, %v8350_v25, %v19534_v28  ;;  %17219 = vmatmul.mubr.msk.f32.vlgmr.msra.gmra.mrb[32].mxu0 %vm1008_vm4, %v7641_v4  ;;  %v7611_v28 = vsel %vm934_vm2, %v7579_v44, %v19619_v43  ;;  %v17420_v30 = vld [vmem:[#allocation2 + $0xd9] sm:$0xff] }
 0x26c   : > { %v7363_v14 = vpop.permute.xlu1 %7362  ;;  %17271 = vmatmul.mubr.msk.f32.vlgmr.msra.gmra.mrb[32].mxu1 %vm1008_vm4, %v8413_v50  ;;  %v8383_v52 = vsel %vm934_vm2, %v8351_v22, %v19551_v27  ;;  %v8414_v42 = vsel %vm967_vm3, %v8382_v13, %v19567_v41  ;;  %v17415_v27 = vld [vmem:[#allocation2 + $0x49] sm:$0xff]  ;;  %17221 = vmatprep.mubr.msk.f32.mxu0 %vm1008_vm4, %v7642_v6  ;;  %v7643_v43 = vsel %vm967_vm3, %v7611_v28, %v19676_v26  ;;  %v8015_v22 = vld [vmem:[#allocation2 + $0x112] sm:$0xff] }
 0x26d   : > { %17273 = vmatprep.mubr.msk.f32.mxu1 %vm1008_vm4, %v8414_v42  ;;  %v8415_v46 = vsel %vm967_vm3, %v8383_v52, %v19605_v12  ;;  %v8352_v41 = vsel %vm346_vm1, %v17415_v27, %v19659_v37  ;;  %v8353_v37 = vsel %vm346_vm1, %v17418_v7, %v19691_v10  ;;  %8062 = vrot.lane.b32.xlu1 %v17419_v21, %s17534_s27  ;;  %v17421_v27 = vld [vmem:[#allocation2 + $0x61] sm:$0xff]  ;;  %v8014_v21 = vld [vmem:[#allocation2 + $0x10a] sm:$0xff] }
 0x26e   : > { %v8384_v12 = vsel %vm934_vm2, %v8352_v41, %v19710_v18  ;;  %8156 = vrot.lane.b32.xlu0 %v19845_v55, %s17535_s28  ;;  %v8385_v26 = vsel %vm934_vm2, %v8353_v37, %v19729_v32  ;;  %v7613_v10 = vsel %vm934_vm2, %v7581_v33, %v7363_v14  ;;  %v19880_v18 = vld [vmem:[#allocation2 + $0xf9] sm:$0xff]  ;;  %v1277_v59 = vadd.f32 %v19092_v20, %v19122_v45  ;;  %v7176_v33 = vld [vmem:[#allocation2 + $0xf0] sm:$0xff] }
 0x26f   : > { %v7489_v24 = vpop.permute.xlu0 %7488  ;;  %v8416_v44 = vsel %vm967_vm3, %v8384_v12, %v19745_v40  ;;  %17222 = vmatmul.mubr.msk.f32.gmra.mrb[34].mxu0 %vm1008_vm4, %v7643_v43  ;;  %v8417_v9 = vsel %vm967_vm3, %v8385_v26, %v19791_v60  ;;  %v19895_v19 = vrot.slane %v19752_v36, %v19150_v17  ;;  %v1272_v20 = vadd.f32 %v19122_v45, %v19100_v54  ;;  %v17432_v54 = vld [vmem:[#allocation2 + $0x81] sm:$0xff]  ;;  %v25477_v60 = vld [vmem:[#allocation84_spill] sm:$0xff] }
 0x270   : > { %v8041_v11 = vpop.permute.xlu1 %8040  ;;  %17274 = vmatmul.mubr.msk.f32.gmra.mrb[34].mxu1 %vm1008_vm4, %v8415_v46  ;;  %v7644_v40 = vsel %vm967_vm3, %v7612_v34, %v7489_v24  ;;  %v25446_v2 = vcombine.high %v19743_v1, %v19743_v1  ;;  %v3095_v23 = vcombine.high %v19789_v48, %v19789_v48  ;;  %v19918_v25 = vrot.slane %v19789_v48, %v19150_v17  ;;  %v8012_v1 = vld [vmem:[#allocation2 + $0xf2] sm:$0xff] }
 0x271   : > { %17276 = vmatprep.mubr.msk.f32.mxu1 %vm1008_vm4, %v8416_v44  ;;  %17224 = vmatprep.mubr.msk.f32.mxu0 %vm1008_vm4, %v7644_v40  ;;  %v25447_v4 = vcombine.high %v19752_v36, %v19752_v36  ;;  %v3096_v13 = vcombine.high %v19796_v38, %v19796_v38  ;;  %v3227_v48 = vcombine.high %v1277_v59, %v1277_v59 }
 0x272   : > { %v19907_v50 = vrot.slane %v25446_v2, %v19150_v17  ;;  %7256 = vrot.lane.b32.xlu1 %v17420_v30, %s17534_s27  ;;  %8158 = vrot.lane.b32.xlu0 %v19880_v18, %s17535_s28  ;;  %v19936_v39 = vrot.slane %v19796_v38, %v19150_v17  ;;  %v3234_v46 = vrot.slane %v1277_v59, %v19150_v17 }
 0x273   : > { %v7491_v53 = vpop.permute.xlu0 %7490  ;;  %v19926_v29 = vrot.slane %v25447_v4, %v19150_v17  ;;  %v3178_v36 = vcombine.high %v1272_v20, %v1272_v20  ;;  %v1287_v6 = vadd.f32 %v19117_v57, %v19122_v45  ;;  %v8354_v41 = vsel %vm346_vm1, %v17421_v27, %v8041_v11  ;;  %v8013_v57 = vld [vmem:[#allocation2 + $0xfa] sm:$0xff] }
 0x274   : > { %v7645_v58 = vsel %vm967_vm3, %v7613_v10, %v7491_v53  ;;  %v8043_v15 = vpop.permute.xlu1 %8042  ;;  %17277 = vmatmul.mubr.msk.f32.gmra.mrb[36].mxu1 %vm1008_vm4, %v8417_v9  ;;  %v19947_v38 = vrot.slane %v3095_v23, %v19150_v17  ;;  %v3185_v31 = vrot.slane %v1272_v20, %v19150_v17  ;;  %v19956_v7 = vrot.slane %v3096_v13, %v19150_v17  ;;  %v17423_v9 = vld [vmem:[#allocation2 + $0x69] sm:$0xff] }
 0x275   : > { %17225 = vmatmul.mubr.msk.f32.gmra.mrb[36].mxu0 %vm1008_vm4, %v7645_v58  ;;  %v3241_v37 = vrot.slane %v3227_v48, %v19150_v17  ;;  %v3242_v53 = vcombine.high %v3234_v46, %v3234_v46  ;;  %v19963_v26 = vrot.slane %v3234_v46, %v19150_v17  ;;  %v3192_v10 = vrot.slane %v3178_v36, %v19150_v17 }
 0x276   : > { %8284 = vrot.lane.b32.xlu1 %v8012_v1, %s17536_s7  ;;  %7258 = vrot.lane.b32.xlu0 %v17422_v0, %s17534_s27  ;;  %v3325_v40 = vcombine.high %v1287_v6, %v1287_v6  ;;  %v1282_v59 = vadd.f32 %v19122_v45, %v19127_v56  ;;  %v8355_v58 = vsel %vm346_vm1, %v17423_v9, %v8043_v15  ;;  %v7177_v1 = vld [vmem:[#allocation2 + $0xf8] sm:$0xff]  ;;  %v17424_v0 = vld [vmem:[#allocation2 + $0x60] sm:$0xff] }
 0x277   : > { %v8137_v24 = vpop.permute.xlu0 %8136  ;;  %v3193_v2 = vcombine.high %v3185_v31, %v3185_v31  ;;  %v19975_v30 = vrot.slane %v3185_v31, %v19150_v17  ;;  %v3243_v56 = vcombine.high %v3241_v37, %v3241_v37  ;;  %v19981_v15 = vrot.slane %v3241_v37, %v19150_v17  ;;  %v17429_v45 = vld [vmem:[#allocation2 + $0xf1] sm:$0xff] }
 0x278   : > { %v8139_v52 = vpop.permute.xlu1 %8138  ;;  %v8386_v43 = vsel %vm934_vm2, %v8354_v41, %v8137_v24  ;;  %v19985_v13 = vrot.slane %v3242_v53, %v19150_v17  ;;  %v3194_v46 = vcombine.high %v3192_v10, %v3192_v10  ;;  %v3339_v27 = vrot.slane %v3325_v40, %v19150_v17 }
 0x279   : > { %25448 = vst [vmem:[#allocation8_spill] sm:$0xff] %v19975_v30  ;;  %v8387_v23 = vsel %vm934_vm2, %v8355_v58, %v8139_v52  ;;  %25449 = vst [vmem:[#allocation46_spill] sm:$0xff] %v19981_v15  ;;  %v3332_v52 = vrot.slane %v1287_v6, %v19150_v17  ;;  %v3276_v41 = vcombine.high %v1282_v59, %v1282_v59  ;;  %v25454_v58 = vld [vmem:[#allocation32_spill] sm:$0xff] }
 0x27a   : > { %7384 = vrot.lane.b32.xlu1 %v7176_v33, %s17535_s28  ;;  %8286 = vrot.lane.b32.xlu0 %v8013_v57, %s17536_s7  ;;  %v7582_v31 = vsel %vm346_vm1, %v17424_v0, %v19173_v35  ;;  %v19998_v33 = vrot.slane %v3192_v10, %v19150_v17  ;;  %v20001_v6 = vrot.slane %v3193_v2, %v19150_v17  ;;  %v17427_v0 = vld [vmem:[#allocation2 + $0xf2] sm:$0xff] }
 0x27b   : > { %v8265_v12 = vpop.permute.xlu0 %8264  ;;  %v20007_v37 = vrot.slane %v3243_v56, %v19150_v17  ;;  %v3340_v40 = vcombine.high %v3332_v52, %v3332_v52  ;;  %v3283_v9 = vrot.slane %v1282_v59, %v19150_v17  ;;  %v25455_v56 = vld [vmem:[#allocation49_spill] sm:$0xff]  ;;  %v20032_v59 = vrot.slane %v3194_v46, %v19150_v17 }
 0x27c   : > { %v8418_v44 = vsel %vm967_vm3, %v8386_v43, %v8265_v12  ;;  %v7365_v34 = vpop.permute.xlu1 %7364  ;;  %25450 = vst [vmem:[#allocation5_spill] sm:$0xff] %v19998_v33  ;;  %25451 = vst [vmem:[#allocation43_spill] sm:$0xff] %v20001_v6 }
 0x27d   : > { %17279 = vmatprep.mubr.msk.f32.mxu1 %vm1008_vm4, %v8418_v44  ;;  %v7614_v57 = vsel %vm934_vm2, %v7582_v31, %v7365_v34  ;;  %25452 = vst [vmem:[#allocation27_spill] sm:$0xff] %v20007_v37  ;;  %v25453_v44 = vld [vmem:[#allocation48_spill] sm:$0xff]  ;;  %25456 = vst [vmem:[#allocation72_spill] sm:$0xff] %v20032_v59  ;;  %v25463_v34 = vld [vmem:[#allocation82_spill] sm:$0xff] }
 0x27e   : > { %7386 = vrot.lane.b32.xlu1 %v7177_v1, %s17535_s28  ;;  %7512 = vrot.lane.b32.xlu0 %v19845_v55, %s17536_s7  ;;  %v20014_v55 = vld [vmem:[%s24824_s3] ss:$0 sm:$0xff]  ;;  %v3290_v1 = vrot.slane %v3276_v41, %v19150_v17  ;;  %v17449_v59 = vld [vmem:[#allocation2 + $0x121] sm:$0xff] }
 0x27f   : > { %v8267_v24 = vpop.permute.xlu0 %8266  ;;  %v1297_v53 = vadd.f32 %v20014_v55, %v25453_v44  ;;  %v1292_v2 = vadd.f32 %v20014_v55, %v25454_v58  ;;  %v20040_v44 = vld [vmem:[#allocation2 + $0x109] sm:$0xff]  ;;  %v17428_v58 = vld [vmem:[#allocation2 + $0xfa] sm:$0xff] }
 0x280   : > { %v8419_v4 = vsel %vm967_vm3, %v8387_v23, %v8267_v24  ;;  %v7367_v36 = vpop.permute.xlu1 %7366  ;;  %v3341_v23 = vcombine.high %v3339_v27, %v3339_v27  ;;  %v17426_v24 = vld [vmem:[#allocation2 + $0x68] sm:$0xff] }
 0x281   : > { %17280 = vmatmul.mubr.msk.f32.gmra.mrb[38].mxu1 %vm1008_vm4, %v8419_v4  ;;  %v7583_v4 = vsel %vm346_vm1, %v17426_v24, %v25455_v56  ;;  %v3423_v24 = vcombine.high %v1297_v53, %v1297_v53  ;;  %v20049_v56 = vrot.slane %v3340_v40, %v19150_v17  ;;  %v3381_v35 = vrot.slane %v1292_v2, %v19150_v17 }
 0x282   : > { %8064 = vrot.lane.b32.xlu1 %v17427_v0, %s17534_s27  ;;  %7514 = vrot.lane.b32.xlu0 %v19880_v18, %s17536_s7  ;;  %v7615_v41 = vsel %vm934_vm2, %v7583_v4, %v7367_v36  ;;  %v20045_v18 = vrot.slane %v3339_v27, %v19150_v17  ;;  %v3291_v0 = vcombine.high %v3283_v9, %v3283_v9 }
 0x283   : > { %v7493_v12 = vpop.permute.xlu0 %7492  ;;  %25459 = vst [vmem:[#allocation44_spill] sm:$0xff] %v20049_v56  ;;  %v3374_v36 = vcombine.high %v1292_v2, %v1292_v2  ;;  %v3292_v27 = vcombine.high %v3290_v1, %v3290_v1  ;;  %v3437_v4 = vrot.slane %v3423_v24, %v19150_v17  ;;  %v25466_v2 = vld [vmem:[#allocation11_spill] sm:$0xff] }
 0x284   : > { %v7646_v10 = vsel %vm967_vm3, %v7614_v57, %v7493_v12  ;;  %v8045_v31 = vpop.permute.xlu1 %8044  ;;  %v20037_v12 = vrot.slane %v3332_v52, %v19150_v17  ;;  %25458 = vst [vmem:[#allocation30_spill] sm:$0xff] %v20045_v18  ;;  %v20052_v52 = vrot.slane %v3283_v9, %v19150_v17  ;;  %v20058_v57 = vrot.slane %v3341_v23, %v19150_v17 }
 0x285   : > { %17227 = vmatprep.mubr.msk.f32.mxu0 %vm1008_vm4, %v7646_v10  ;;  %v3430_v23 = vrot.slane %v1297_v53, %v19150_v17  ;;  %v1307_v9 = vadd.f32 %v20014_v55, %v25463_v34  ;;  %v3388_v48 = vrot.slane %v3374_v36, %v19150_v17  ;;  %v20090_v24 = vrot.slane %v3292_v27, %v19150_v17 }
 0x286   : > { %25457 = vst [vmem:[#allocation6_spill] sm:$0xff] %v20037_v12  ;;  %25460 = vst [vmem:[#allocation78_spill] sm:$0xff] %v20052_v52  ;;  %8066 = vrot.lane.b32.xlu1 %v17428_v58, %s17534_s27  ;;  %8160 = vrot.lane.b32.xlu0 %v20040_v44, %s17535_s28  ;;  %v1302_v34 = vadd.f32 %v20014_v55, %v25466_v2  ;;  %v17430_v58 = vld [vmem:[#allocation2 + $0x79] sm:$0xff]  ;;  %v3439_v20 = vcombine.high %v3437_v4, %v3437_v4 }
 0x287   : > { %v7495_v10 = vpop.permute.xlu0 %7494  ;;  %25461 = vst [vmem:[#allocation9_spill] sm:$0xff] %v20058_v57  ;;  %25465 = vst [vmem:[#allocation80_spill] sm:$0xff] %v20090_v24  ;;  %v3438_v36 = vcombine.high %v3430_v23, %v3430_v23  ;;  %v8356_v27 = vsel %vm346_vm1, %v17430_v58, %v8045_v31  ;;  %v3389_v2 = vcombine.high %v3381_v35, %v3381_v35 }
 0x288   : > { %v7647_v46 = vsel %vm967_vm3, %v7615_v41, %v7495_v10  ;;  %v8047_v40 = vpop.permute.xlu1 %8046  ;;  %v20068_v10 = vrot.slane %v3290_v1, %v19150_v17  ;;  %v20082_v1 = vrot.slane %v3291_v0, %v19150_v17  ;;  %v20100_v41 = vrot.slane %v3430_v23, %v19150_v17 }
 0x289   : > { %17228 = vmatmul.mubr.msk.f32.gmra.mrb[38].mxu0 %vm1008_vm4, %v7647_v46  ;;  %v20071_v46 = vld [vmem:[#allocation2 + $0x111] sm:$0xff]  ;;  %v3521_v49 = vcombine.high %v1307_v9, %v1307_v9  ;;  %v3390_v28 = vcombine.high %v3388_v48, %v3388_v48  ;;  %v20107_v53 = vrot.slane %v3381_v35, %v19150_v17  ;;  %v20113_v31 = vrot.slane %v3437_v4, %v19150_v17  ;;  %v7178_v4 = vld [vmem:[#allocation2 + $0x108] sm:$0xff] }
 0x28a   : > { %25462 = vst [vmem:[#allocation47_spill] sm:$0xff] %v20068_v10  ;;  %25464 = vst [vmem:[#allocation31_spill] sm:$0xff] %v20082_v1  ;;  %7260 = vrot.lane.b32.xlu1 %v17429_v45, %s17534_s27  ;;  %8162 = vrot.lane.b32.xlu0 %v20071_v46, %s17535_s28  ;;  %v3472_v58 = vcombine.high %v1302_v34, %v1302_v34  ;;  %v20118_v42 = vrot.slane %v3438_v36, %v19150_v17 }
 0x28b   : > { %v8141_v43 = vpop.permute.xlu0 %8140  ;;  %25467 = vst [vmem:[#allocation48_spill] sm:$0xff] %v20100_v41  ;;  %25468 = vst [vmem:[#allocation32_spill] sm:$0xff] %v20107_v53  ;;  %v3535_v36 = vrot.slane %v3521_v49, %v19150_v17  ;;  %v8357_v35 = vsel %vm346_vm1, %v17432_v54, %v8047_v40  ;;  %v3479_v63 = vrot.slane %v1302_v34, %v19150_v17 }
 0x28c   : > { %v8143_v0 = vpop.permute.xlu1 %8142  ;;  %v8388_v45 = vsel %vm934_vm2, %v8356_v27, %v8141_v43  ;;  %25469 = vst [vmem:[#allocation49_spill] sm:$0xff] %v20113_v31  ;;  %v17431_v43 = vld [vmem:[#allocation2 + $0xf9] sm:$0xff]  ;;  %25470 = vst [vmem:[#allocation82_spill] sm:$0xff] %v20118_v42  ;;  %v3486_v14 = vrot.slane %v3472_v58, %v19150_v17  ;;  %v17448_v31 = vld [vmem:[#allocation2 + $0x12a] sm:$0xff] }
 0x28d   : > { %v3487_v49 = vcombine.high %v3479_v63, %v3479_v63  ;;  %v20174_v40 = vrot.slane %v3535_v36, %v19150_v17 }
 0x28e   : > { %8288 = vrot.lane.b32.xlu1 %v8014_v21, %s17536_s7  ;;  %7262 = vrot.lane.b32.xlu0 %v17431_v43, %s17534_s27  ;;  %v20128_v21 = vrot.slane %v3439_v20, %v19150_v17  ;;  %v20131_v43 = vrot.slane %v3389_v2, %v19150_v17 }
 0x28f   : > { %v8269_v11 = vpop.permute.xlu0 %8268 }
 0x290   : > { %v8420_v23 = vsel %vm967_vm3, %v8388_v45, %v8269_v11  ;;  %v7369_v27 = vpop.permute.xlu1 %7368  ;;  %v20123_v11 = vrot.slane %v3388_v48, %v19150_v17  ;;  %v3528_v45 = vrot.slane %v1307_v9, %v19150_v17  ;;  %25472 = vst [vmem:[#allocation98_spill] sm:$0xff] %v20128_v21  ;;  %25473 = vst [vmem:[#allocation99_spill] sm:$0xff] %v20131_v43  ;;  %v7179_v9 = vld [vmem:[#allocation2 + $0x110] sm:$0xff] }
 0x291   : > { %17282 = vmatprep.mubr.msk.f32.mxu1 %vm1008_vm4, %v8420_v23  ;;  %v20136_v48 = vrot.slane %v3390_v28, %v19150_v17  ;;  %v8389_v23 = vsel %vm934_vm2, %v8357_v35, %v8143_v0  ;;  %v25475_v0 = vld [vmem:[#allocation33_spill] sm:$0xff]  ;;  %v17438_v21 = vld [vmem:[#allocation2 + $0x109] sm:$0xff] }
 0x292   : > { %25471 = vst [vmem:[#allocation11_spill] sm:$0xff] %v20123_v11  ;;  %7388 = vrot.lane.b32.xlu1 %v7178_v4, %s17535_s28  ;;  %8290 = vrot.lane.b32.xlu0 %v8015_v22, %s17536_s7  ;;  %v3536_v34 = vcombine.high %v3528_v45, %v3528_v45  ;;  %v1317_v35 = vadd.f32 %v20014_v55, %v25475_v0 }
 0x293   : > { %25474 = vst [vmem:[#allocation100_spill] sm:$0xff] %v20136_v48  ;;  %v8271_v20 = vpop.permute.xlu0 %8270  ;;  %v3537_v4 = vcombine.high %v3535_v36, %v3535_v36  ;;  %v1312_v0 = vadd.f32 %v20014_v55, %v25477_v60  ;;  %v20167_v58 = vrot.slane %v3528_v45, %v19150_v17  ;;  %v3488_v11 = vcombine.high %v3486_v14, %v3486_v14  ;;  %v25484_v36 = vld [vmem:[#allocation13_spill] sm:$0xff] }
 0x294   : > { %v8421_v54 = vsel %vm967_vm3, %v8389_v23, %v8271_v20  ;;  %v7371_v28 = vpop.permute.xlu1 %7370  ;;  %v17433_v23 = vld [vmem:[#allocation2 + $0x78] sm:$0xff]  ;;  %v20177_v60 = vrot.slane %v3536_v34, %v19150_v17  ;;  %v3619_v45 = vcombine.high %v1317_v35, %v1317_v35  ;;  %v1327_v22 = vadd.f32 %v20014_v55, %v25484_v36  ;;  %v20213_v36 = vld [vmem:[#allocation2 + $0x121] sm:$0xff] }
 0x295   : > { %17283 = vmatmul.mubr.msk.f32.gmra.mrb[40].mxu1 %vm1008_vm4, %v8421_v54  ;;  %v25476_v20 = vld [vmem:[#allocation12_spill] sm:$0xff]  ;;  %25478 = vst [vmem:[#allocation33_spill] sm:$0xff] %v20167_v58  ;;  %v20192_v34 = vrot.slane %v3486_v14, %v19150_v17  ;;  %v3570_v48 = vcombine.high %v1312_v0, %v1312_v0  ;;  %v20199_v43 = vrot.slane %v3488_v11, %v19150_v17 }
 0x296   : > { %v7584_v2 = vsel %vm346_vm1, %v17433_v23, %v25476_v20  ;;  %7390 = vrot.lane.b32.xlu1 %v7179_v9, %s17535_s28  ;;  %7516 = vrot.lane.b32.xlu0 %v20040_v44, %s17536_s7  ;;  %25479 = vst [vmem:[#allocation12_spill] sm:$0xff] %v20174_v40  ;;  %25480 = vst [vmem:[#allocation84_spill] sm:$0xff] %v20177_v60  ;;  %v20184_v9 = vrot.slane %v3537_v4, %v19150_v17 }
 0x297   : > { %v7616_v54 = vsel %vm934_vm2, %v7584_v2, %v7369_v27  ;;  %v7497_v32 = vpop.permute.xlu0 %7496  ;;  %v20180_v27 = vrot.slane %v3479_v63, %v19150_v17  ;;  %v3626_v44 = vrot.slane %v1317_v35, %v19150_v17  ;;  %v17434_v2 = vld [vmem:[#allocation2 + $0x80] sm:$0xff]  ;;  %v20195_v63 = vrot.slane %v3487_v49, %v19150_v17  ;;  %25487 = vst [vmem:[#allocation103_spill] sm:$0xff] %v20199_v43  ;;  %v25488_v35 = vld [vmem:[#allocation88_spill] sm:$0xff] }
 0x298   : > { %v7648_v23 = vsel %vm967_vm3, %v7616_v54, %v7497_v32  ;;  %v8049_v20 = vpop.permute.xlu1 %8048  ;;  %25482 = vst [vmem:[#allocation102_spill] sm:$0xff] %v20184_v9  ;;  %v25483_v32 = vld [vmem:[#allocation34_spill] sm:$0xff]  ;;  %v1322_v53 = vadd.f32 %v20014_v55, %v25488_v35  ;;  %v3633_v11 = vrot.slane %v3619_v45, %v19150_v17  ;;  %v3717_v35 = vcombine.high %v1327_v22, %v1327_v22  ;;  %v17437_v43 = vld [vmem:[#allocation2 + $0x91] sm:$0xff] }
 0x299   : > { %25481 = vst [vmem:[#allocation101_spill] sm:$0xff] %v20180_v27  ;;  %17230 = vmatprep.mubr.msk.f32.mxu0 %vm1008_vm4, %v7648_v23  ;;  %v7585_v54 = vsel %vm346_vm1, %v17434_v2, %v25483_v32  ;;  %25485 = vst [vmem:[#allocation34_spill] sm:$0xff] %v20192_v34  ;;  %v17435_v2 = vld [vmem:[#allocation2 + $0x10a] sm:$0xff]  ;;  %v3577_v32 = vrot.slane %v1312_v0, %v19150_v17  ;;  %v20225_v0 = vrot.slane %v3626_v44, %v19150_v17  ;;  %v17436_v27 = vld [vmem:[#allocation2 + $0x112] sm:$0xff] }
 0x29a   : > { %25486 = vst [vmem:[#allocation13_spill] sm:$0xff] %v20195_v63  ;;  %v7617_v23 = vsel %vm934_vm2, %v7585_v54, %v7371_v28  ;;  %8068 = vrot.lane.b32.xlu1 %v17435_v2, %s17534_s27  ;;  %7518 = vrot.lane.b32.xlu0 %v20071_v46, %s17536_s7  ;;  %v3584_v28 = vrot.slane %v3570_v48, %v19150_v17  ;;  %v20239_v34 = vld [vmem:[#allocation2 + $0x129] sm:$0xff] }
 0x29b   : > { %v7499_v4 = vpop.permute.xlu0 %7498  ;;  %25489 = vst [vmem:[#allocation88_spill] sm:$0xff] %v20225_v0  ;;  %v3668_v49 = vcombine.high %v1322_v53, %v1322_v53  ;;  %v3635_v45 = vcombine.high %v3633_v11, %v3633_v11  ;;  %v3585_v2 = vcombine.high %v3577_v32, %v3577_v32  ;;  %v3724_v48 = vrot.slane %v1327_v22, %v19150_v17 }
 0x29c   : > { %v7649_v14 = vsel %vm967_vm3, %v7617_v23, %v7499_v4  ;;  %v3634_v4 = vcombine.high %v3626_v44, %v3626_v44  ;;  %v20236_v44 = vrot.slane %v3577_v32, %v19150_v17  ;;  %v20242_v46 = vrot.slane %v3633_v11, %v19150_v17 }
 0x29d   : > { %v8051_v54 = vpop.permute.xlu1 %8050  ;;  %17231 = vmatmul.mubr.msk.f32.gmra.mrb[40].mxu0 %vm1008_vm4, %v7649_v14  ;;  %v8358_v63 = vsel %vm346_vm1, %v17437_v43, %v8049_v20  ;;  %v3586_v40 = vcombine.high %v3584_v28, %v3584_v28  ;;  %v3675_v22 = vrot.slane %v1322_v53, %v19150_v17  ;;  %v20254_v11 = vrot.slane %v3584_v28, %v19150_v17 }
 0x29e   : > { %8070 = vrot.lane.b32.xlu1 %v17436_v27, %s17534_s27  ;;  %8164 = vrot.lane.b32.xlu0 %v20213_v36, %s17535_s28  ;;  %25490 = vst [vmem:[#allocation104_spill] sm:$0xff] %v20236_v44  ;;  %25491 = vst [vmem:[#allocation105_spill] sm:$0xff] %v20242_v46  ;;  %v20245_v23 = vrot.slane %v3634_v4, %v19150_v17  ;;  %v3731_v27 = vrot.slane %v3717_v35, %v19150_v17  ;;  %v8016_v35 = vld [vmem:[#allocation2 + $0x122] sm:$0xff] }
 0x29f   : > { %v8145_v14 = vpop.permute.xlu0 %8144  ;;  %25493 = vst [vmem:[#allocation107_spill] sm:$0xff] %v20254_v11  ;;  %v3682_v4 = vrot.slane %v3668_v49, %v19150_v17  ;;  %v20262_v20 = vrot.slane %v3635_v45, %v19150_v17  ;;  %v20265_v53 = vrot.slane %v3585_v2, %v19150_v17  ;;  %v3732_v28 = vcombine.high %v3724_v48, %v3724_v48  ;;  %v17441_v11 = vld [vmem:[#allocation2 + $0x90] sm:$0xff]  ;;  %v25510_v46 = vld [vmem:[#allocation50_spill] sm:$0xff] }
 0x2a0   : > { %25492 = vst [vmem:[#allocation106_spill] sm:$0xff] %v20245_v23  ;;  %v8390_v60 = vsel %vm934_vm2, %v8358_v63, %v8145_v14  ;;  %v20276_v2 = vrot.slane %v3586_v40, %v19150_v17  ;;  %v3683_v32 = vcombine.high %v3675_v22, %v3675_v22  ;;  %v17538_v40 = vmov 1983009808  }
 0x2a1   : > { %25494 = vst [vmem:[#allocation108_spill] sm:$0xff] %v20262_v20  ;;  %25495 = vst [vmem:[#allocation109_spill] sm:$0xff] %v20265_v53  ;;  %v3684_v0 = vcombine.high %v3682_v4, %v3682_v4 }
 0x2a2   : > { %7264 = vrot.lane.b32.xlu1 %v17438_v21, %s17534_s27  ;;  %8166 = vrot.lane.b32.xlu0 %v20239_v34, %s17535_s28  ;;  %25496 = vst [vmem:[#allocation110_spill] sm:$0xff] %v20276_v2  ;;  %v17440_v21 = vld [vmem:[#allocation2 + $0x111] sm:$0xff] }
 0x2a3   : > { %v8147_v9 = vpop.permute.xlu1 %8146  ;;  %v20317_v53 = vrot.slane %v3684_v0, %v19150_v17 }
 0x2a4   : > { %v8273_v58 = vpop.permute.xlu0 %8272 }
 0x2a5   : > { %v8422_v43 = vsel %vm967_vm3, %v8390_v60, %v8273_v58  ;;  %v3733_v58 = vcombine.high %v3731_v27, %v3731_v27  ;;  %v17439_v60 = vld [vmem:[#allocation2 + $0x99] sm:$0xff] }
 0x2a6   : > { %17285 = vmatprep.mubr.msk.f32.mxu1 %vm1008_vm4, %v8422_v43  ;;  %v8359_v45 = vsel %vm346_vm1, %v17439_v60, %v8051_v54  ;;  %v20280_v43 = vrot.slane %v3724_v48, %v19150_v17  ;;  %8292 = vrot.lane.b32.xlu1 %v8016_v35, %s17536_s7  ;;  %v20293_v48 = vrot.slane %v3732_v28, %v19150_v17  ;;  %v7180_v60 = vld [vmem:[#allocation2 + $0x120] sm:$0xff]  ;;  %v25504_v35 = vld [vmem:[#allocation14_spill] sm:$0xff] }
 0x2a7   : > { %v7373_v14 = vpop.permute.xlu1 %7372  ;;  %v8391_v63 = vsel %vm934_vm2, %v8359_v45, %v8147_v9  ;;  %7266 = vrot.lane.b32.xlu0 %v17440_v21, %s17534_s27  ;;  %v20290_v9 = vrot.slane %v3731_v27, %v19150_v17  ;;  %v8017_v45 = vld [vmem:[#allocation2 + $0x12a] sm:$0xff]  ;;  %v14275_v27 = vunpack.c.l.s4 %v17538_v40  ;;  %v20307_v54 = vrot.slane %v3682_v4, %v19150_v17  ;;  %25505 = vst [vmem:[#allocation14_spill] sm:$0xff] %v20317_v53 }
 0x2a8   : > { %v8275_v44 = vpop.permute.xlu0 %8274  ;;  %25497 = vst [vmem:[#allocation111_spill] sm:$0xff] %v20280_v43  ;;  %25499 = vst [vmem:[#allocation113_spill] sm:$0xff] %v20293_v48  ;;  %v7181_v43 = vld [vmem:[#allocation2 + $0x128] sm:$0xff] }
 0x2a9   : > { %v8423_v49 = vsel %vm967_vm3, %v8391_v63, %v8275_v44  ;;  %25498 = vst [vmem:[#allocation112_spill] sm:$0xff] %v20290_v9  ;;  %v20299_v44 = vrot.slane %v3733_v58, %v19150_v17  ;;  %v20302_v63 = vrot.slane %v3675_v22, %v19150_v17  ;;  %25502 = vst [vmem:[#allocation116_spill] sm:$0xff] %v20307_v54  ;;  %v14276_v48 = vunpack.c.0.s8 %v14275_v27 }
 0x2aa   : > { %17286 = vmatmul.mubr.msk.f32.gmra.mrb[42].mxu1 %vm1008_vm4, %v8423_v49  ;;  %v20310_v49 = vrot.slane %v3683_v32, %v19150_v17  ;;  %v7586_v58 = vsel %vm346_vm1, %v17441_v11, %v25504_v35  ;;  %7392 = vrot.lane.b32.xlu1 %v7180_v60, %s17535_s28  ;;  %v17442_v11 = vld [vmem:[#allocation2 + $0x98] sm:$0xff]  ;;  %v25506_v35 = vld [vmem:[#allocation90_spill] sm:$0xff] }
 0x2ab   : > { %25500 = vst [vmem:[#allocation114_spill] sm:$0xff] %v20299_v44  ;;  %25501 = vst [vmem:[#allocation115_spill] sm:$0xff] %v20302_v63  ;;  %v7375_v21 = vpop.permute.xlu1 %7374  ;;  %v7618_v40 = vsel %vm934_vm2, %v7586_v58, %v7373_v14  ;;  %8294 = vrot.lane.b32.xlu0 %v8017_v45, %s17536_s7  ;;  %v7587_v22 = vsel %vm346_vm1, %v17442_v11, %v25506_v35  ;;  %v17443_v45 = vld [vmem:[#allocation2 + $0xa8] sm:$0xff]  ;;  %v25507_v58 = vld [vmem:[#allocation53_spill] sm:$0xff] }
 0x2ac   : > { %25503 = vst [vmem:[#allocation117_spill] sm:$0xff] %v20310_v49  ;;  %v7501_v4 = vpop.permute.xlu0 %7500  ;;  %v20335_v32 = vsel %vm346_vm1, %v17443_v45, %v25507_v58  ;;  %v25508_v35 = vld [vmem:[#allocation38_spill] sm:$0xff] }
 0x2ad   : > { %v7650_v0 = vsel %vm967_vm3, %v7618_v40, %v7501_v4  ;;  %v17444_v4 = vld [vmem:[#allocation2 + $0xb0] sm:$0xff] }
 0x2ae   : > { %17233 = vmatprep.mubr.msk.f32.mxu0 %vm1008_vm4, %v7650_v0  ;;  %v20344_v60 = vsel %vm346_vm1, %v17444_v4, %v25508_v35  ;;  %v7619_v0 = vsel %vm934_vm2, %v7587_v22, %v7375_v21  ;;  %7394 = vrot.lane.b32.xlu1 %v7181_v43, %s17535_s28  ;;  %v17445_v49 = vld [vmem:[#allocation2 + $0xa9] sm:$0xff] }
 0x2af   : > { %v8053_v9 = vpop.permute.xlu1 %8052  ;;  %7520 = vrot.lane.b32.xlu0 %v20213_v36, %s17536_s7 }
 0x2b0   : > { %v7503_v27 = vpop.permute.xlu0 %7502  ;;  %v20360_v58 = vsel %vm346_vm1, %v17445_v49, %v8053_v9 }
 0x2b1   : > { %v17168_v28 = vpop.f32.mrb[0].mxu1  ;;  %v7651_v40 = vsel %vm967_vm3, %v7619_v0, %v7503_v27  ;;  %v17446_v0 = vld [vmem:[#allocation2 + $0xb1] sm:$0xff] }
 0x2b2   : > { %v2013_v14 = vadd.f32 %v20014_v55, %v17168_v28  ;;  %v2007_v45 = vpop.f32.mrb[1].mxu1  ;;  %v25509_v28 = vld [vmem:[#allocation10_spill] sm:$0xff]  ;;  %17234 = vmatmul.mubr.msk.f32.gmra.mrb[42].mxu0 %vm1008_vm4, %v7651_v40 }
 0x2b3   : > { %v2008_v11 = vadd.f32 %v20014_v55, %v2007_v45  ;;  %v20357_v54 = vsub.s32 0, %v25509_v28  ;;  %v8055_v21 = vpop.permute.xlu1 %8054  ;;  %v20363_v43 = vsub.s32 %v14276_v48, %v25509_v28  ;;  %v17447_v48 = vld [vmem:[#allocation2 + $0x122] sm:$0xff]  ;;  %7522 = vrot.lane.b32.xlu0 %v20239_v34, %s17536_s7 }
 0x2b4   : > { %v4103_v4 = vcombine.high %v2013_v14, %v2013_v14  ;;  %v4110_v35 = vrot.slane %v2013_v14, %v19150_v17  ;;  %v20370_v14 = vsel %vm346_vm1, %v17446_v0, %v8055_v21  ;;  %8072 = vrot.lane.b32.xlu1 %v17447_v48, %s17534_s27 }
 0x2b5   : > { %v4054_v36 = vcombine.high %v2008_v11, %v2008_v11  ;;  %v4061_v22 = vrot.slane %v2008_v11, %v19150_v17  ;;  %v20367_v45 = vpop.f32.mrb[2].mxu1 }
 0x2b6   : > { %v4117_v27 = vrot.slane %v4103_v4, %v19150_v17  ;;  %v4118_v53 = vcombine.high %v4110_v35, %v4110_v35  ;;  %v4126_v9 = vrot.slane %v4110_v35, %v19150_v17  ;;  %v20374_v49 = vpop.f32.mrb[3].mxu1 }
 0x2b7   : > { %v4068_v11 = vrot.slane %v4054_v36, %v19150_v17  ;;  %v4069_v40 = vcombine.high %v4061_v22, %v4061_v22  ;;  %v20381_v28 = vrot.slane %v4061_v22, %v19150_v17  ;;  %v20392_v36 = vld [vmem:[#allocation2 + $0x139] sm:$0xff] }
 0x2b8   : > { %v4119_v21 = vcombine.high %v4117_v27, %v4117_v27  ;;  %v4133_v4 = vrot.slane %v4117_v27, %v19150_v17  ;;  %v4140_v35 = vrot.slane %v4118_v53, %v19150_v17  ;;  %v4148_v0 = vcombine.high %v4126_v9, %v4126_v9  ;;  %8074 = vrot.lane.b32.xlu1 %v17448_v31, %s17534_s27 }
 0x2b9   : > { %v5657_v63 = vrot.slane %v4126_v9, %v20357_v54  ;;  %v4070_v44 = vcombine.high %v4068_v11, %v4068_v11  ;;  %v20387_v48 = vrot.slane %v4068_v11, %v19150_v17  ;;  %v20390_v34 = vrot.slane %v4069_v40, %v19150_v17  ;;  %v20394_v2 = vpop.f32.mrb[4].mxu1  ;;  %8168 = vrot.lane.b32.xlu0 %v20392_v36, %s17535_s28 }
 0x2ba   : > { %v4147_v22 = vrot.slane %v4119_v21, %v19150_v17  ;;  %v4149_v20 = vcombine.high %v4133_v4, %v4133_v4  ;;  %v4150_v27 = vcombine.high %v4140_v35, %v4140_v35  ;;  %v5661_v53 = vrot.slane %v4140_v35, %v20357_v54  ;;  %v20398_v23 = vpop.f32.mrb[5].mxu1 }
 0x2bb   : > { %v5665_v9 = vrot.slane %v4148_v0, %v20357_v54  ;;  %v5673_v11 = vrot.slane %v4133_v4, %v20357_v54  ;;  %v6911_v40 = vsel %vm6902_vm5, %v25510_v46, %v5657_v63  ;;  %v4098_v42 = vrot.slane %v4070_v44, %v19150_v17  ;;  %v25511_v4 = vld [vmem:[#allocation35_spill] sm:$0xff] }
 0x2bc   : > { %v4151_v41 = vcombine.high %v4147_v22, %v4147_v22  ;;  %v5669_v21 = vrot.slane %v4150_v27, %v20357_v54  ;;  %v5677_v35 = vrot.slane %v4147_v22, %v20357_v54  ;;  %v5681_v24 = vrot.slane %v4149_v20, %v20357_v54  ;;  %v25513_v44 = vld [vmem:[#allocation51_spill] sm:$0xff]  ;;  %v20421_v22 = vld [vmem:[#allocation2 + $0x141] sm:$0xff]  ;;  %7268 = vrot.lane.b32.xlu1 %v17449_v59, %s17534_s27 }
 0x2bd   : > { %v6912_v0 = vsel %vm6902_vm5, %v25511_v4, %v5661_v53  ;;  %v25512_v63 = vcombine.high %v25510_v46, %v25510_v46  ;;  %v6915_v10 = vsel %vm6902_vm5, %v25513_v44, %v5673_v11  ;;  %v4099_v27 = vcombine.high %v20381_v28, %v20381_v28  ;;  %v20423_v20 = vpop.f32.mrb[6].mxu1  ;;  %v25515_v46 = vld [vmem:[#allocation15_spill] sm:$0xff]  ;;  %8170 = vrot.lane.b32.xlu0 %v20421_v22, %s17535_s28 }
 0x2be   : > { %v5685_v1 = vrot.slane %v4151_v41, %v20357_v54  ;;  %v25514_v53 = vcombine.high %v25511_v4, %v25511_v4  ;;  %v25516_v11 = vcombine.high %v25513_v44, %v25513_v44  ;;  %v20436_v57 = vpop.f32.mrb[7].mxu1  ;;  %v14306_v56 = vcombine.low %v6911_v40, %v6912_v0  ;;  %v8149_v4 = vpop.permute.xlu0 %8148  ;;  %v8018_v40 = vld [vmem:[#allocation2 + $0x13a] sm:$0xff] }
 0x2bf   : > { %v6913_v31 = vsel %vm6902_vm5, %v25512_v63, %v5665_v9  ;;  %v6916_v9 = vsel %vm6902_vm5, %v25515_v46, %v5677_v35  ;;  %v4100_v41 = vcombine.high %v20387_v48, %v20387_v48  ;;  %v4102_v44 = vcombine.high %v4098_v42, %v4098_v42 }
 0x2c0   : > { %v6914_v52 = vsel %vm6902_vm5, %v25514_v53, %v5669_v21  ;;  %v6917_v63 = vsel %vm6902_vm5, %v25516_v11, %v5681_v24  ;;  %v14323_v12 = vcombine.low %v6915_v10, %v6916_v9  ;;  %v25517_v21 = vcombine.high %v25515_v46, %v25515_v46  ;;  %v8151_v10 = vpop.permute.xlu1 %8150  ;;  %8296 = vrot.lane.b32.xlu1 %v8018_v40, %s17536_s7  ;;  %v25522_v40 = vld [vmem:[#allocation52_spill] sm:$0xff] }
 0x2c1   : > { %v14307_v18 = vcombine.low %v6913_v31, %v6914_v52  ;;  %v4101_v24 = vcombine.high %v20390_v34, %v20390_v34  ;;  %v5625_v52 = vrot.slane %v20381_v28, %v20357_v54  ;;  %v14314_v0 = vrot.slane %v14306_v56, %v20363_v43 }
 0x2c2   : > { %v6918_v35 = vsel %vm6902_vm5, %v25517_v21, %v5685_v1  ;;  %v14331_v53 = vrot.slane %v14323_v12, %v20363_v43  ;;  %v20455_v1 = vpop.f32.mrb[8].mxu1  ;;  %v5629_v28 = vrot.slane %v20390_v34, %v20357_v54  ;;  %v5633_v46 = vrot.slane %v4099_v27, %v20357_v54  ;;  %v25518_v27 = vld [vmem:[#allocation86_spill] sm:$0xff] }
 0x2c3   : > { %v14321_v59 = vrot.slane %v14307_v18, %v20363_v43  ;;  %v14324_v31 = vcombine.low %v6917_v63, %v6918_v35  ;;  %v5637_v9 = vrot.slane %v4101_v24, %v20357_v54  ;;  %v5641_v18 = vrot.slane %v20387_v48, %v20357_v54  ;;  %v20468_v56 = vpop.f32.mrb[9].mxu1  ;;  %v25519_v24 = vld [vmem:[#allocation36_spill] sm:$0xff] }
 0x2c4   : > { %v5645_v63 = vrot.slane %v4098_v42, %v20357_v54  ;;  %v5649_v21 = vrot.slane %v4100_v41, %v20357_v54  ;;  %v5653_v34 = vrot.slane %v4102_v44, %v20357_v54  ;;  %v6903_v35 = vsel %vm6902_vm5, %v25518_v27, %v5625_v52  ;;  %v7182_v42 = vld [vmem:[#allocation2 + $0x138] sm:$0xff] }
 0x2c5   : > { %v14322_v12 = vcombine.low %v14314_v0, %v14321_v59  ;;  %v14338_v11 = vrot.slane %v14324_v31, %v20363_v43  ;;  %v6904_v33 = vsel %vm6902_vm5, %v25519_v24, %v5629_v28  ;;  %v25520_v48 = vcombine.high %v25518_v27, %v25518_v27  ;;  %v17450_v59 = vld [vmem:[#allocation2 + $0x129] sm:$0xff]  ;;  %v25523_v28 = vld [vmem:[#allocation37_spill] sm:$0xff]  ;;  %v20494_v6 = vpop.f32.mrb[10].mxu1  ;;  %7396 = vrot.lane.b32.xlu1 %v7182_v42, %s17535_s28 }
 0x2c6   : > { %7270 = vrot.lane.b32.xlu0 %v17450_v59, %s17534_s27  ;;  %v25521_v44 = vcombine.high %v25519_v24, %v25519_v24  ;;  %v6907_v31 = vsel %vm6902_vm5, %v25522_v40, %v5641_v18  ;;  %v6908_v27 = vsel %vm6902_vm5, %v25523_v28, %v5645_v63  ;;  %v14272_v24 = vcombine.low %v6903_v35, %v6904_v33  ;;  %v7377_v18 = vpop.permute.xlu1 %7376 }
 0x2c7   : > { %v6905_v0 = vsel %vm6902_vm5, %v25520_v48, %v5633_v46  ;;  %v14339_v41 = vcombine.low %v14331_v53, %v14338_v11  ;;  %16578 = vst.msk [vmem:[%s20460_s8 + $0x10] sm:$0xff] %vm346_vm1, %v14322_v12  ;;  %v8277_v46 = vpop.permute.xlu0 %8276  ;;  %v8019_v48 = vld [vmem:[#allocation2 + $0x142] sm:$0xff]  ;;  %v25524_v53 = vcombine.high %v25522_v40, %v25522_v40  ;;  %v25525_v11 = vcombine.high %v25523_v28, %v25523_v28 }
 0x2c8   : > { %v6906_v52 = vsel %vm6902_vm5, %v25521_v44, %v5637_v9  ;;  %v20504_v44 = vpop.f32.mrb[11].mxu1  ;;  %v14289_v63 = vcombine.low %v6907_v31, %v6908_v27  ;;  %v8392_v37 = vsel %vm934_vm2, %v20360_v58, %v8149_v4  ;;  %v2023_v35 = vadd.f32 %v20014_v55, %v20367_v45 }
 0x2c9   : > { %v6909_v12 = vsel %vm6902_vm5, %v25524_v53, %v5649_v21  ;;  %v6910_v9 = vsel %vm6902_vm5, %v25525_v11, %v5653_v34  ;;  %v14273_v59 = vcombine.low %v6905_v0, %v6906_v52  ;;  %16579 = vst.msk [vmem:[%s20460_s8 + $0x18] sm:$0xff] %vm346_vm1, %v14339_v41  ;;  %v20512_v21 = vsel %vm934_vm2, %v20370_v14, %v8151_v10  ;;  %v7183_v41 = vld [vmem:[#allocation2 + $0x140] sm:$0xff]  ;;  %v20531_v40 = vpop.f32.mrb[12].mxu1 }
 0x2ca   : > { %v14290_v30 = vcombine.low %v6909_v12, %v6910_v9  ;;  %v14280_v34 = vrot.slane %v14272_v24, %v20363_v43  ;;  %v2018_v0 = vadd.f32 %v20014_v55, %v20374_v49  ;;  %8298 = vrot.lane.b32.xlu0 %v8019_v48, %s17536_s7  ;;  %v14297_v58 = vrot.slane %v14289_v63, %v20363_v43 }
 0x2cb   : > { %v14287_v33 = vrot.slane %v14273_v59, %v20363_v43  ;;  %v8424_v4 = vsel %vm967_vm3, %v8392_v37, %v8277_v46  ;;  %v20527_v10 = vsel %vm934_vm2, %v20335_v32, %v7377_v18  ;;  %v4201_v52 = vcombine.high %v2023_v35, %v2023_v35  ;;  %7398 = vrot.lane.b32.xlu1 %v7183_v41, %s17535_s28  ;;  %v20543_v32 = vpop.f32.mrb[13].mxu1 }
 0x2cc   : > { %v14304_v14 = vrot.slane %v14290_v30, %v20363_v43  ;;  %v4208_v45 = vrot.slane %v2023_v35, %v19150_v17  ;;  %v4152_v49 = vcombine.high %v2018_v0, %v2018_v0  ;;  %17288 = vmatprep.mubr.msk.f32.mxu1 %vm1008_vm4, %v8424_v4  ;;  %v4159_v28 = vrot.slane %v2018_v0, %v19150_v17 }
 0x2cd   : > { %v14288_v42 = vcombine.low %v14280_v34, %v14287_v33  ;;  %v20536_v30 = vadd.f32 %v20014_v55, %v20394_v2  ;;  %v20540_v37 = vadd.f32 %v20014_v55, %v20398_v23  ;;  %v4215_v27 = vrot.slane %v4201_v52, %v19150_v17  ;;  %v17451_v33 = vld [vmem:[#allocation2 + $0x13a] sm:$0xff] }
 0x2ce   : > { %v14305_v31 = vcombine.low %v14297_v58, %v14304_v14  ;;  %v4216_v46 = vcombine.high %v4208_v45, %v4208_v45  ;;  %v4224_v48 = vrot.slane %v4208_v45, %v19150_v17  ;;  %v4166_v53 = vrot.slane %v4152_v49, %v19150_v17  ;;  %7524 = vrot.lane.b32.xlu0 %v20392_v36, %s17536_s7  ;;  %v20580_v49 = vld [vmem:[#allocation2 + $0x151] sm:$0xff] }
 0x2cf   : > { %16576 = vst.msk [vmem:[%s20460_s8] sm:$0xff] %vm346_vm1, %v14288_v42  ;;  %v4167_v55 = vcombine.high %v4159_v28, %v4159_v28  ;;  %v20555_v23 = vrot.slane %v4159_v28, %v19150_v17  ;;  %v20561_v12 = vrot.slane %v20536_v30, %v19150_v17  ;;  %v4217_v11 = vcombine.high %v4215_v27, %v4215_v27  ;;  %v25526_v42 = vld [vmem:[#allocation92_spill] sm:$0xff] }
 0x2d0   : > { %16577 = vst.msk [vmem:[%s20460_s8 + $0x8] sm:$0xff] %vm346_vm1, %v14305_v31  ;;  %v4231_v9 = vrot.slane %v4215_v27, %v19150_v17  ;;  %v4238_v24 = vrot.slane %v4216_v46, %v19150_v17  ;;  %v4246_v59 = vcombine.high %v4224_v48, %v4224_v48  ;;  %v5721_v36 = vrot.slane %v4224_v48, %v20357_v54  ;;  %v25527_v48 = vld [vmem:[#allocation54_spill] sm:$0xff] }
 0x2d1   : > { %v4168_v18 = vcombine.high %v4166_v53, %v4166_v53  ;;  %v20567_v63 = vrot.slane %v4166_v53, %v19150_v17  ;;  %v4189_v34 = vrot.slane %v4167_v55, %v19150_v17  ;;  %8076 = vrot.lane.b32.xlu1 %v17451_v33, %s17534_s27  ;;  %v4245_v35 = vrot.slane %v4217_v11, %v19150_v17  ;;  %v25529_v11 = vld [vmem:[#allocation16_spill] sm:$0xff] }
 0x2d2   : > { %v4247_v0 = vcombine.high %v4231_v9, %v4231_v9  ;;  %v4248_v41 = vcombine.high %v4238_v24, %v4238_v24  ;;  %v5725_v58 = vrot.slane %v4238_v24, %v20357_v54  ;;  %7526 = vrot.lane.b32.xlu0 %v20421_v22, %s17536_s7  ;;  %v5729_v14 = vrot.slane %v4246_v59, %v20357_v54  ;;  %v17452_v59 = vld [vmem:[#allocation2 + $0x142] sm:$0xff] }
 0x2d3   : > { %v5737_v4 = vrot.slane %v4231_v9, %v20357_v54  ;;  %v6927_v52 = vsel %vm6902_vm5, %v25526_v42, %v5721_v36  ;;  %v4196_v45 = vrot.slane %v4168_v18, %v19150_v17  ;;  %v4249_v31 = vcombine.high %v4245_v35, %v4245_v35  ;;  %v20596_v36 = vpop.f32.mrb[14].mxu1 }
 0x2d4   : > { %v5733_v28 = vrot.slane %v4248_v41, %v20357_v54  ;;  %v5741_v27 = vrot.slane %v4245_v35, %v20357_v54  ;;  %v5745_v46 = vrot.slane %v4247_v0, %v20357_v54  ;;  %v6928_v22 = vsel %vm6902_vm5, %v25527_v48, %v5725_v58  ;;  %v25531_v0 = vld [vmem:[#allocation94_spill] sm:$0xff] }
 0x2d5   : > { %v25528_v53 = vcombine.high %v25526_v42, %v25526_v42  ;;  %v6931_v9 = vsel %vm6902_vm5, %v25529_v11, %v5737_v4  ;;  %v4197_v24 = vcombine.high %v20555_v23, %v20555_v23  ;;  %8078 = vrot.lane.b32.xlu1 %v17452_v59, %s17534_s27  ;;  %v5749_v18 = vrot.slane %v4249_v31, %v20357_v54  ;;  %v20611_v4 = vpop.f32.mrb[15].mxu1 }
 0x2d6   : > { %v25530_v33 = vcombine.high %v25527_v48, %v25527_v48  ;;  %v6932_v41 = vsel %vm6902_vm5, %v25531_v0, %v5741_v27  ;;  %v25532_v58 = vcombine.high %v25529_v11, %v25529_v11  ;;  %8172 = vrot.lane.b32.xlu0 %v20580_v49, %s17535_s28  ;;  %v14442_v42 = vcombine.low %v6927_v52, %v6928_v22 }
 0x2d7   : > { %v6929_v55 = vsel %vm6902_vm5, %v25528_v53, %v5729_v14  ;;  %v14459_v53 = vcombine.low %v6931_v9, %v6932_v41  ;;  %v4198_v48 = vcombine.high %v20567_v63, %v20567_v63  ;;  %v25533_v27 = vcombine.high %v25531_v0, %v25531_v0  ;;  %v17453_v9 = vld [vmem:[#allocation2 + $0x139] sm:$0xff] }
 0x2d8   : > { %v6930_v35 = vsel %vm6902_vm5, %v25530_v33, %v5733_v28  ;;  %v6933_v14 = vsel %vm6902_vm5, %v25532_v58, %v5745_v46  ;;  %v20615_v28 = vld [vmem:[#allocation2 + $0x159] sm:$0xff]  ;;  %v4199_v59 = vcombine.high %v4189_v34, %v4189_v34  ;;  %v4200_v46 = vcombine.high %v4196_v45, %v4196_v45 }
 0x2d9   : > { %v14443_v31 = vcombine.low %v6929_v55, %v6930_v35  ;;  %v6934_v11 = vsel %vm6902_vm5, %v25533_v27, %v5749_v18  ;;  %v5689_v33 = vrot.slane %v20555_v23, %v20357_v54  ;;  %v14450_v58 = vrot.slane %v14442_v42, %v20363_v43  ;;  %7272 = vrot.lane.b32.xlu1 %v17453_v9, %s17534_s27  ;;  %v8020_v41 = vld [vmem:[#allocation2 + $0x152] sm:$0xff] }
 0x2da   : > { %v14460_v22 = vcombine.low %v6933_v14, %v6934_v11  ;;  %v14467_v55 = vrot.slane %v14459_v53, %v20363_v43  ;;  %v5693_v35 = vrot.slane %v4189_v34, %v20357_v54  ;;  %v5697_v0 = vrot.slane %v4197_v24, %v20357_v54  ;;  %8174 = vrot.lane.b32.xlu0 %v20615_v28, %s17535_s28  ;;  %v20634_v14 = vpop.f32.mrb[16].mxu1  ;;  %v25534_v11 = vld [vmem:[#allocation17_spill] sm:$0xff] }
 0x2db   : > { %v14457_v52 = vrot.slane %v14443_v31, %v20363_v43  ;;  %v5701_v18 = vrot.slane %v4199_v59, %v20357_v54  ;;  %v5705_v23 = vrot.slane %v20567_v63, %v20357_v54  ;;  %v5709_v53 = vrot.slane %v4196_v45, %v20357_v54  ;;  %v20639_v24 = vpop.f32.mrb[17].mxu1  ;;  %v25535_v59 = vld [vmem:[#allocation39_spill] sm:$0xff] }
 0x2dc   : > { %v14474_v31 = vrot.slane %v14460_v22, %v20363_v43  ;;  %v5713_v34 = vrot.slane %v4198_v48, %v20357_v54  ;;  %v5717_v27 = vrot.slane %v4200_v46, %v20357_v54  ;;  %v6919_v63 = vsel %vm6902_vm5, %v25534_v11, %v5689_v33  ;;  %v25538_v46 = vld [vmem:[#allocation55_spill] sm:$0xff]  ;;  %v25539_v33 = vld [vmem:[#allocation96_spill] sm:$0xff] }
 0x2dd   : > { %v14458_v42 = vcombine.low %v14450_v58, %v14457_v52  ;;  %v6920_v9 = vsel %vm6902_vm5, %v25535_v59, %v5693_v35  ;;  %v25536_v58 = vcombine.high %v25534_v11, %v25534_v11  ;;  %v25537_v45 = vcombine.high %v25535_v59, %v25535_v59  ;;  %8300 = vrot.lane.b32.xlu1 %v8020_v41, %s17536_s7  ;;  %v17454_v11 = vld [vmem:[#allocation2 + $0x141] sm:$0xff] }
 0x2de   : > { %v14475_v22 = vcombine.low %v14467_v55, %v14474_v31  ;;  %v6923_v2 = vsel %vm6902_vm5, %v25538_v46, %v5705_v23  ;;  %v6924_v15 = vsel %vm6902_vm5, %v25539_v33, %v5709_v53  ;;  %v25540_v35 = vcombine.high %v25538_v46, %v25538_v46  ;;  %7274 = vrot.lane.b32.xlu0 %v17454_v11, %s17534_s27 }
 0x2df   : > { %v6921_v52 = vsel %vm6902_vm5, %v25536_v58, %v5697_v0  ;;  %16586 = vst.msk [vmem:[%s20460_s8 + $0x50] sm:$0xff] %vm346_vm1, %v14458_v42  ;;  %v6922_v48 = vsel %vm6902_vm5, %v25537_v45, %v5701_v18  ;;  %v25541_v0 = vcombine.high %v25539_v33, %v25539_v33  ;;  %v14408_v31 = vcombine.low %v6919_v63, %v6920_v9 }
 0x2e0   : > { %v6925_v55 = vsel %vm6902_vm5, %v25540_v35, %v5713_v34  ;;  %v14409_v18 = vcombine.low %v6921_v52, %v6922_v48  ;;  %16587 = vst.msk [vmem:[%s20460_s8 + $0x58] sm:$0xff] %vm346_vm1, %v14475_v22  ;;  %v14425_v23 = vcombine.low %v6923_v2, %v6924_v15  ;;  %v25542_v41 = vcombine.high %v20536_v30, %v20536_v30 }
 0x2e1   : > { %v6926_v42 = vsel %vm6902_vm5, %v25541_v0, %v5717_v27  ;;  %v4314_v34 = vcombine.high %v20561_v12, %v20561_v12  ;;  %v14416_v58 = vrot.slane %v14408_v31, %v20363_v43  ;;  %v4322_v63 = vrot.slane %v20561_v12, %v19150_v17 }
 0x2e2   : > { %v14426_v53 = vcombine.low %v6925_v55, %v6926_v42  ;;  %v4313_v59 = vrot.slane %v25542_v41, %v19150_v17  ;;  %v14423_v27 = vrot.slane %v14409_v18, %v20363_v43  ;;  %v4250_v15 = vcombine.high %v20540_v37, %v20540_v37  ;;  %v25543_v18 = vld [vmem:[#allocation18_spill] sm:$0xff] }
 0x2e3   : > { %v14433_v2 = vrot.slane %v14425_v23, %v20363_v43  ;;  %v4336_v45 = vrot.slane %v4314_v34, %v19150_v17  ;;  %v4344_v48 = vcombine.high %v4322_v63, %v4322_v63  ;;  %v5785_v46 = vrot.slane %v4322_v63, %v20357_v54 }
 0x2e4   : > { %v14440_v9 = vrot.slane %v14426_v53, %v20363_v43  ;;  %v4315_v30 = vcombine.high %v4313_v59, %v4313_v59  ;;  %v4329_v52 = vrot.slane %v4313_v59, %v19150_v17  ;;  %v14424_v22 = vcombine.low %v14416_v58, %v14423_v27  ;;  %v25544_v59 = vld [vmem:[#allocation40_spill] sm:$0xff]  ;;  %v25545_v27 = vld [vmem:[#allocation97_spill] sm:$0xff] }
 0x2e5   : > { %v4346_v0 = vcombine.high %v4336_v45, %v4336_v45  ;;  %v5789_v42 = vrot.slane %v4336_v45, %v20357_v54  ;;  %v5793_v31 = vrot.slane %v4344_v48, %v20357_v54  ;;  %v6943_v11 = vsel %vm6902_vm5, %v25543_v18, %v5785_v46 }
 0x2e6   : > { %v14441_v33 = vcombine.low %v14433_v2, %v14440_v9  ;;  %v4343_v12 = vrot.slane %v4315_v30, %v19150_v17  ;;  %v4345_v35 = vcombine.high %v4329_v52, %v4329_v52  ;;  %v5801_v55 = vrot.slane %v4329_v52, %v20357_v54  ;;  %16584 = vst.msk [vmem:[%s20460_s8 + $0x40] sm:$0xff] %vm346_vm1, %v14424_v22  ;;  %v25547_v22 = vld [vmem:[#allocation21_spill] sm:$0xff] }
 0x2e7   : > { %v5797_v58 = vrot.slane %v4346_v0, %v20357_v54  ;;  %v6944_v63 = vsel %vm6902_vm5, %v25545_v27, %v5789_v42  ;;  %v25546_v2 = vcombine.high %v25543_v18, %v25543_v18  ;;  %v4257_v30 = vrot.slane %v20540_v37, %v19150_v17 }
 0x2e8   : > { %16585 = vst.msk [vmem:[%s20460_s8 + $0x48] sm:$0xff] %vm346_vm1, %v14441_v33  ;;  %v4347_v23 = vcombine.high %v4343_v12, %v4343_v12  ;;  %v5805_v53 = vrot.slane %v4343_v12, %v20357_v54  ;;  %v5809_v41 = vrot.slane %v4345_v35, %v20357_v54  ;;  %v6947_v34 = vsel %vm6902_vm5, %v25544_v59, %v5801_v55 }
 0x2e9   : > { %v6945_v9 = vsel %vm6902_vm5, %v25546_v2, %v5793_v31  ;;  %v25548_v48 = vcombine.high %v25544_v59, %v25544_v59  ;;  %v14578_v33 = vcombine.low %v6943_v11, %v6944_v63  ;;  %v25549_v12 = vcombine.high %v25545_v27, %v25545_v27  ;;  %v8279_v2 = vpop.permute.xlu0 %8278 }
 0x2ea   : > { %v5813_v52 = vrot.slane %v4347_v23, %v20357_v54  ;;  %v6948_v45 = vsel %vm6902_vm5, %v25547_v22, %v5805_v53  ;;  %v4264_v0 = vrot.slane %v4250_v15, %v19150_v17  ;;  %v4265_v37 = vcombine.high %v4257_v30, %v4257_v30 }
 0x2eb   : > { %v6949_v46 = vsel %vm6902_vm5, %v25548_v48, %v5809_v41  ;;  %v6946_v35 = vsel %vm6902_vm5, %v25549_v12, %v5797_v58  ;;  %v14595_v55 = vcombine.low %v6947_v34, %v6948_v45  ;;  %v25550_v42 = vcombine.high %v25547_v22, %v25547_v22  ;;  %v7379_v45 = vpop.permute.xlu1 %7378 }
 0x2ec   : > { %v14579_v18 = vcombine.low %v6945_v9, %v6946_v35  ;;  %v14586_v23 = vrot.slane %v14578_v33, %v20363_v43  ;;  %v4273_v53 = vrot.slane %v4257_v30, %v19150_v17  ;;  %v4266_v59 = vcombine.high %v4264_v0, %v4264_v0  ;;  %v7184_v35 = vld [vmem:[#allocation2 + $0x150] sm:$0xff] }
 0x2ed   : > { %v6950_v31 = vsel %vm6902_vm5, %v25550_v42, %v5813_v52  ;;  %v14603_v41 = vrot.slane %v14595_v55, %v20363_v43  ;;  %v4280_v58 = vrot.slane %v4264_v0, %v19150_v17  ;;  %v4287_v15 = vrot.slane %v4265_v37, %v19150_v17  ;;  %7400 = vrot.lane.b32.xlu1 %v7184_v35, %s17535_s28 }
 0x2ee   : > { %v14596_v11 = vcombine.low %v6949_v46, %v6950_v31  ;;  %v14593_v34 = vrot.slane %v14579_v18, %v20363_v43  ;;  %v4295_v27 = vcombine.high %v4273_v53, %v4273_v53  ;;  %v5753_v63 = vrot.slane %v4273_v53, %v20357_v54  ;;  %v20743_v31 = vpop.f32.mrb[18].mxu1 }
 0x2ef   : > { %v4294_v52 = vrot.slane %v4266_v59, %v19150_v17  ;;  %v4296_v30 = vcombine.high %v4280_v58, %v4280_v58  ;;  %v5769_v22 = vrot.slane %v4280_v58, %v20357_v54  ;;  %v4297_v46 = vcombine.high %v4287_v15, %v4287_v15 }
 0x2f0   : > { %v14610_v9 = vrot.slane %v14596_v11, %v20363_v43  ;;  %v14594_v48 = vcombine.low %v14586_v23, %v14593_v34  ;;  %v5757_v33 = vrot.slane %v4287_v15, %v20357_v54  ;;  %v5761_v12 = vrot.slane %v4295_v27, %v20357_v54  ;;  %v25551_v23 = vld [vmem:[#allocation56_spill] sm:$0xff]  ;;  %v20756_v34 = vpop.f32.mrb[19].mxu1  ;;  %v25554_v27 = vld [vmem:[#allocation19_spill] sm:$0xff] }
 0x2f1   : > { %v4298_v0 = vcombine.high %v4294_v52, %v4294_v52  ;;  %v5773_v37 = vrot.slane %v4294_v52, %v20357_v54  ;;  %v5777_v42 = vrot.slane %v4296_v30, %v20357_v54  ;;  %v5765_v18 = vrot.slane %v4297_v46, %v20357_v54  ;;  %v25552_v11 = vld [vmem:[#allocation20_spill] sm:$0xff]  ;;  %v25555_v52 = vld [vmem:[#allocation22_spill] sm:$0xff] }
 0x2f2   : > { %v14611_v55 = vcombine.low %v14603_v41, %v14610_v9  ;;  %16594 = vst.msk [vmem:[%s20460_s8 + $0x90] sm:$0xff] %vm346_vm1, %v14594_v48  ;;  %v6935_v53 = vsel %vm6902_vm5, %v25551_v23, %v5753_v63  ;;  %v6936_v59 = vsel %vm6902_vm5, %v25552_v11, %v5757_v33  ;;  %v25553_v41 = vcombine.high %v25551_v23, %v25551_v23 }
 0x2f3   : > { %v5781_v15 = vrot.slane %v4298_v0, %v20357_v54  ;;  %v6939_v9 = vsel %vm6902_vm5, %v25554_v27, %v5769_v22  ;;  %v6940_v63 = vsel %vm6902_vm5, %v25555_v52, %v5773_v37  ;;  %v25556_v30 = vcombine.high %v25554_v27, %v25554_v27  ;;  %v7505_v0 = vpop.permute.xlu0 %7504 }
 0x2f4   : > { %v6937_v58 = vsel %vm6902_vm5, %v25553_v41, %v5761_v12  ;;  %16595 = vst.msk [vmem:[%s20460_s8 + $0x98] sm:$0xff] %vm346_vm1, %v14611_v55  ;;  %v25557_v46 = vcombine.high %v25552_v11, %v25552_v11  ;;  %v14544_v12 = vcombine.low %v6935_v53, %v6936_v59  ;;  %v14561_v35 = vcombine.low %v6939_v9, %v6940_v63 }
 0x2f5   : > { %v6941_v48 = vsel %vm6902_vm5, %v25556_v30, %v5777_v42  ;;  %v8425_v55 = vsel %vm967_vm3, %v20512_v21, %v8279_v2  ;;  %v25558_v22 = vcombine.high %v25555_v52, %v25555_v52  ;;  %v20781_v42 = vsel %vm934_vm2, %v20344_v60, %v7379_v45  ;;  %v8057_v21 = vpop.permute.xlu1 %8056  ;;  %v17456_v52 = vld [vmem:[#allocation2 + $0xc1] sm:$0xff] }
 0x2f6   : > { %v6938_v33 = vsel %vm6902_vm5, %v25557_v46, %v5765_v18  ;;  %v20786_v18 = vld [vmem:[%s24824_s3] ss:$0 sm:$0xff]  ;;  %17289 = vmatmul.mubr.msk.f32.gmra.mrb[44].mxu1 %vm1008_vm4, %v8425_v55  ;;  %v14552_v2 = vrot.slane %v14544_v12, %v20363_v43  ;;  %v14569_v59 = vrot.slane %v14561_v35, %v20363_v43  ;;  %v20802_v63 = vsel %vm346_vm1, %v17456_v52, %v8057_v21 }
 0x2f7   : > { %v6942_v37 = vsel %vm6902_vm5, %v25558_v22, %v5781_v15  ;;  %v14545_v23 = vcombine.low %v6937_v58, %v6938_v33  ;;  %v2043_v53 = vadd.f32 %v20786_v18, %v20423_v20  ;;  %v2038_v60 = vadd.f32 %v20786_v18, %v20436_v57 }
 0x2f8   : > { %v14562_v11 = vcombine.low %v6941_v48, %v6942_v37  ;;  %v7652_v20 = vsel %vm967_vm3, %v20527_v10, %v7505_v0 }
 0x2f9   : > { %v14559_v45 = vrot.slane %v14545_v23, %v20363_v43  ;;  %v4397_v41 = vcombine.high %v2043_v53, %v2043_v53  ;;  %v4404_v58 = vrot.slane %v2043_v53, %v19150_v17  ;;  %v4348_v27 = vcombine.high %v2038_v60, %v2038_v60  ;;  %17236 = vmatprep.mubr.msk.f32.mxu0 %vm1008_vm4, %v7652_v20  ;;  %v8021_v23 = vld [vmem:[#allocation2 + $0x15a] sm:$0xff] }
 0x2fa   : > { %v14576_v15 = vrot.slane %v14562_v11, %v20363_v43  ;;  %v4355_v9 = vrot.slane %v2038_v60, %v19150_v17  ;;  %v7185_v53 = vld [vmem:[#allocation2 + $0x158] sm:$0xff]  ;;  %8302 = vrot.lane.b32.xlu0 %v8021_v23, %s17536_s7  ;;  %v20821_v60 = vpop.f32.mrb[20].mxu1 }
 0x2fb   : > { %v14560_v57 = vcombine.low %v14552_v2, %v14559_v45  ;;  %v4411_v30 = vrot.slane %v4397_v41, %v19150_v17  ;;  %v4412_v48 = vcombine.high %v4404_v58, %v4404_v58  ;;  %v4420_v46 = vrot.slane %v4404_v58, %v19150_v17  ;;  %7402 = vrot.lane.b32.xlu1 %v7185_v53, %s17535_s28 }
 0x2fc   : > { %v14577_v33 = vcombine.low %v14569_v59, %v14576_v15  ;;  %v4362_v10 = vrot.slane %v4348_v27, %v19150_v17  ;;  %v4363_v12 = vcombine.high %v4355_v9, %v4355_v9  ;;  %v20809_v35 = vrot.slane %v4355_v9, %v19150_v17  ;;  %v25559_v9 = vld [vmem:[#allocation23_spill] sm:$0xff] }
 0x2fd   : > { %16592 = vst.msk [vmem:[%s20460_s8 + $0x80] sm:$0xff] %vm346_vm1, %v14560_v57  ;;  %v4413_v55 = vcombine.high %v4411_v30, %v4411_v30  ;;  %v4427_v0 = vrot.slane %v4411_v30, %v19150_v17  ;;  %v4434_v22 = vrot.slane %v4412_v48, %v19150_v17  ;;  %v4442_v37 = vcombine.high %v4420_v46, %v4420_v46 }
 0x2fe   : > { %16593 = vst.msk [vmem:[%s20460_s8 + $0x88] sm:$0xff] %vm346_vm1, %v14577_v33  ;;  %v5849_v21 = vrot.slane %v4420_v46, %v20357_v54  ;;  %v4364_v2 = vcombine.high %v4362_v10, %v4362_v10  ;;  %v4378_v11 = vrot.slane %v4362_v10, %v19150_v17  ;;  %v4385_v59 = vrot.slane %v4363_v12, %v19150_v17  ;;  %v25560_v10 = vld [vmem:[#allocation57_spill] sm:$0xff] }
 0x2ff   : > { %v4441_v45 = vrot.slane %v4413_v55, %v19150_v17  ;;  %v4443_v41 = vcombine.high %v4427_v0, %v4427_v0  ;;  %v4444_v58 = vcombine.high %v4434_v22, %v4434_v22  ;;  %v5853_v20 = vrot.slane %v4434_v22, %v20357_v54  ;;  %v25562_v22 = vld [vmem:[#allocation24_spill] sm:$0xff]  ;;  %7528 = vrot.lane.b32.xlu0 %v20580_v49, %s17536_s7 }
 0x300   : > { %v5857_v15 = vrot.slane %v4442_v37, %v20357_v54  ;;  %v5865_v27 = vrot.slane %v4427_v0, %v20357_v54  ;;  %v6959_v52 = vsel %vm6902_vm5, %v25559_v9, %v5849_v21  ;;  %v4392_v57 = vrot.slane %v4364_v2, %v19150_v17 }
 0x301   : > { %v4445_v30 = vcombine.high %v4441_v45, %v4441_v45  ;;  %v5861_v48 = vrot.slane %v4444_v58, %v20357_v54  ;;  %v5869_v46 = vrot.slane %v4441_v45, %v20357_v54  ;;  %v5873_v33 = vrot.slane %v4443_v41, %v20357_v54  ;;  %v25564_v45 = vld [vmem:[#allocation59_spill] sm:$0xff] }
 0x302   : > { %v6960_v12 = vsel %vm6902_vm5, %v25560_v10, %v5853_v20  ;;  %v25561_v55 = vcombine.high %v25559_v9, %v25559_v9  ;;  %v6963_v37 = vsel %vm6902_vm5, %v25562_v22, %v5865_v27  ;;  %v4393_v23 = vcombine.high %v20809_v35, %v20809_v35 }
 0x303   : > { %v5877_v53 = vrot.slane %v4445_v30, %v20357_v54  ;;  %v25563_v21 = vcombine.high %v25560_v10, %v25560_v10  ;;  %v6964_v41 = vsel %vm6902_vm5, %v25564_v45, %v5869_v46  ;;  %v25565_v58 = vcombine.high %v25562_v22, %v25562_v22  ;;  %7530 = vrot.lane.b32.xlu0 %v20615_v28, %s17536_s7 }
 0x304   : > { %v6961_v0 = vsel %vm6902_vm5, %v25561_v55, %v5857_v15  ;;  %v17457_v15 = vld [vmem:[#allocation2 + $0x152] sm:$0xff]  ;;  %v14714_v27 = vcombine.low %v6959_v52, %v6960_v12  ;;  %v14731_v9 = vcombine.low %v6963_v37, %v6964_v41  ;;  %v4394_v30 = vcombine.high %v4378_v11, %v4378_v11 }
 0x305   : > { %v6962_v2 = vsel %vm6902_vm5, %v25563_v21, %v5861_v48  ;;  %v6965_v20 = vsel %vm6902_vm5, %v25565_v58, %v5873_v33  ;;  %8080 = vrot.lane.b32.xlu1 %v17457_v15, %s17534_s27  ;;  %v25566_v10 = vcombine.high %v25564_v45, %v25564_v45  ;;  %v4395_v55 = vcombine.high %v4385_v59, %v4385_v59 }
 0x306   : > { %v14715_v49 = vcombine.low %v6961_v0, %v6962_v2  ;;  %v4396_v21 = vcombine.high %v4392_v57, %v4392_v57  ;;  %v5817_v46 = vrot.slane %v20809_v35, %v20357_v54  ;;  %v14722_v22 = vrot.slane %v14714_v27, %v20363_v43  ;;  %v17458_v35 = vld [vmem:[#allocation2 + $0x15a] sm:$0xff] }
 0x307   : > { %v6966_v48 = vsel %vm6902_vm5, %v25566_v10, %v5877_v53  ;;  %v14739_v52 = vrot.slane %v14731_v9, %v20363_v43  ;;  %v5821_v12 = vrot.slane %v4385_v59, %v20357_v54  ;;  %v5825_v0 = vrot.slane %v4393_v23, %v20357_v54  ;;  %v25567_v59 = vld [vmem:[#allocation58_spill] sm:$0xff]  ;;  %v25568_v23 = vld [vmem:[#allocation61_spill] sm:$0xff]  ;;  %v20886_v9 = vpop.f32.mrb[21].mxu1 }
 0x308   : > { %v14729_v33 = vrot.slane %v14715_v49, %v20363_v43  ;;  %v14732_v58 = vcombine.low %v6965_v20, %v6966_v48  ;;  %v5829_v37 = vrot.slane %v4395_v55, %v20357_v54  ;;  %v5833_v53 = vrot.slane %v4378_v11, %v20357_v54  ;;  %v25571_v48 = vld [vmem:[#allocation60_spill] sm:$0xff] }
 0x309   : > { %8082 = vrot.lane.b32.xlu1 %v17458_v35, %s17534_s27  ;;  %v5837_v41 = vrot.slane %v4392_v57, %v20357_v54  ;;  %v5841_v20 = vrot.slane %v4394_v30, %v20357_v54  ;;  %v5845_v28 = vrot.slane %v4396_v21, %v20357_v54  ;;  %v6951_v15 = vsel %vm6902_vm5, %v25567_v59, %v5817_v46  ;;  %v25572_v21 = vld [vmem:[#allocation62_spill] sm:$0xff] }
 0x30a   : > { %v14730_v2 = vcombine.low %v14722_v22, %v14729_v33  ;;  %v14746_v45 = vrot.slane %v14732_v58, %v20363_v43  ;;  %v6952_v27 = vsel %vm6902_vm5, %v25568_v23, %v5821_v12  ;;  %v25569_v11 = vcombine.high %v25567_v59, %v25567_v59  ;;  %v7507_v22 = vpop.permute.xlu0 %7506  ;;  %v8059_v33 = vpop.permute.xlu1 %8058 }
 0x30b   : > { %v25570_v57 = vcombine.high %v25568_v23, %v25568_v23  ;;  %v6955_v55 = vsel %vm6902_vm5, %v25571_v48, %v5833_v53  ;;  %v6956_v46 = vsel %vm6902_vm5, %v25572_v21, %v5837_v41  ;;  %v25573_v58 = vcombine.high %v25571_v48, %v25571_v48 }
 0x30c   : > { %v6953_v49 = vsel %vm6902_vm5, %v25569_v11, %v5825_v0  ;;  %v14747_v10 = vcombine.low %v14739_v52, %v14746_v45  ;;  %16602 = vst.msk [vmem:[%s20460_s8 + $0xd0] sm:$0xff] %vm346_vm1, %v14730_v2  ;;  %v25574_v12 = vcombine.high %v25572_v21, %v25572_v21  ;;  %v14680_v35 = vcombine.low %v6951_v15, %v6952_v27  ;;  %v17459_v2 = vld [vmem:[#allocation2 + $0x151] sm:$0xff]  ;;  %v17460_v15 = vld [vmem:[#allocation2 + $0xc9] sm:$0xff] }
 0x30d   : > { %v6954_v30 = vsel %vm6902_vm5, %v25570_v57, %v5829_v37  ;;  %v6957_v52 = vsel %vm6902_vm5, %v25573_v58, %v5841_v20  ;;  %7276 = vrot.lane.b32.xlu1 %v17459_v2, %s17534_s27  ;;  %v14697_v53 = vcombine.low %v6955_v55, %v6956_v46  ;;  %v2053_v41 = vadd.f32 %v20786_v18, %v20455_v1 }
 0x30e   : > { %v6958_v0 = vsel %vm6902_vm5, %v25574_v12, %v5845_v28  ;;  %v14681_v37 = vcombine.low %v6953_v49, %v6954_v30  ;;  %16603 = vst.msk [vmem:[%s20460_s8 + $0xd8] sm:$0xff] %vm346_vm1, %v14747_v10  ;;  %v2048_v20 = vadd.f32 %v20786_v18, %v20468_v56  ;;  %v14688_v59 = vrot.slane %v14680_v35, %v20363_v43 }
 0x30f   : > { %v14698_v45 = vcombine.low %v6957_v52, %v6958_v0  ;;  %v7653_v28 = vsel %vm967_vm3, %v20781_v42, %v7507_v22  ;;  %v20918_v27 = vsel %vm346_vm1, %v17460_v15, %v8059_v33  ;;  %v14705_v11 = vrot.slane %v14697_v53, %v20363_v43 }
 0x310   : > { %v14695_v23 = vrot.slane %v14681_v37, %v20363_v43  ;;  %v4495_v1 = vcombine.high %v2053_v41, %v2053_v41  ;;  %v4502_v56 = vrot.slane %v2053_v41, %v19150_v17  ;;  %17237 = vmatmul.mubr.msk.f32.gmra.mrb[44].mxu0 %vm1008_vm4, %v7653_v28  ;;  %v4446_v57 = vcombine.high %v2048_v20, %v2048_v20  ;;  %v20944_v41 = vpop.f32.mrb[22].mxu1 }
 0x311   : > { %v14712_v49 = vrot.slane %v14698_v45, %v20363_v43  ;;  %v4453_v30 = vrot.slane %v2048_v20, %v19150_v17  ;;  %v20927_v42 = vadd.f32 %v20786_v18, %v20494_v6 }
 0x312   : > { %v14696_v10 = vcombine.low %v14688_v59, %v14695_v23  ;;  %v4509_v55 = vrot.slane %v4495_v1, %v19150_v17  ;;  %v4510_v21 = vcombine.high %v4502_v56, %v4502_v56  ;;  %v4518_v46 = vrot.slane %v4502_v56, %v19150_v17 }
 0x313   : > { %v14713_v48 = vcombine.low %v14705_v11, %v14712_v49  ;;  %v4460_v22 = vrot.slane %v4446_v57, %v19150_v17  ;;  %v4461_v33 = vcombine.high %v4453_v30, %v4453_v30  ;;  %v4469_v58 = vrot.slane %v4453_v30, %v19150_v17  ;;  %v25575_v49 = vld [vmem:[#allocation63_spill] sm:$0xff] }
 0x314   : > { %16600 = vst.msk [vmem:[%s20460_s8 + $0xc0] sm:$0xff] %vm346_vm1, %v14696_v10  ;;  %v4511_v6 = vcombine.high %v4509_v55, %v4509_v55  ;;  %v4525_v12 = vrot.slane %v4509_v55, %v19150_v17  ;;  %v4532_v0 = vrot.slane %v4510_v21, %v19150_v17  ;;  %v4540_v35 = vcombine.high %v4518_v46, %v4518_v46  ;;  %v25576_v55 = vld [vmem:[#allocation66_spill] sm:$0xff] }
 0x315   : > { %16601 = vst.msk [vmem:[%s20460_s8 + $0xc8] sm:$0xff] %vm346_vm1, %v14713_v48  ;;  %v5913_v37 = vrot.slane %v4518_v46, %v20357_v54  ;;  %v4462_v2 = vcombine.high %v4460_v22, %v4460_v22  ;;  %v4476_v53 = vrot.slane %v4460_v22, %v19150_v17  ;;  %v4483_v45 = vrot.slane %v4461_v33, %v19150_v17  ;;  %v25578_v33 = vld [vmem:[#allocation65_spill] sm:$0xff] }
 0x316   : > { %v4539_v20 = vrot.slane %v4511_v6, %v19150_v17  ;;  %v4541_v59 = vcombine.high %v4525_v12, %v4525_v12  ;;  %v4542_v23 = vcombine.high %v4532_v0, %v4532_v0  ;;  %v5917_v28 = vrot.slane %v4532_v0, %v20357_v54 }
 0x317   : > { %v5921_v15 = vrot.slane %v4540_v35, %v20357_v54  ;;  %v5929_v11 = vrot.slane %v4525_v12, %v20357_v54  ;;  %v6975_v1 = vsel %vm6902_vm5, %v25575_v49, %v5913_v37  ;;  %v4490_v56 = vrot.slane %v4462_v2, %v19150_v17  ;;  %v25580_v2 = vld [vmem:[#allocation71_spill] sm:$0xff] }
 0x318   : > { %v4543_v10 = vcombine.high %v4539_v20, %v4539_v20  ;;  %v5925_v57 = vrot.slane %v4542_v23, %v20357_v54  ;;  %v5933_v30 = vrot.slane %v4539_v20, %v20357_v54  ;;  %v5937_v48 = vrot.slane %v4541_v59, %v20357_v54 }
 0x319   : > { %v6976_v21 = vsel %vm6902_vm5, %v25576_v55, %v5917_v28  ;;  %v25577_v46 = vcombine.high %v25575_v49, %v25575_v49  ;;  %v6979_v6 = vsel %vm6902_vm5, %v25578_v33, %v5929_v11  ;;  %v4491_v12 = vcombine.high %v4469_v58, %v4469_v58 }
 0x31a   : > { %v5941_v0 = vrot.slane %v4543_v10, %v20357_v54  ;;  %v25579_v35 = vcombine.high %v25576_v55, %v25576_v55  ;;  %v6980_v20 = vsel %vm6902_vm5, %v25580_v2, %v5933_v30  ;;  %v25581_v59 = vcombine.high %v25578_v33, %v25578_v33 }
 0x31b   : > { %v6977_v22 = vsel %vm6902_vm5, %v25577_v46, %v5921_v15  ;;  %v14850_v28 = vcombine.low %v6975_v1, %v6976_v21  ;;  %v14867_v49 = vcombine.low %v6979_v6, %v6980_v20  ;;  %v4492_v11 = vcombine.high %v4476_v53, %v4476_v53 }
 0x31c   : > { %v6978_v37 = vsel %vm6902_vm5, %v25579_v35, %v5925_v57  ;;  %v6981_v23 = vsel %vm6902_vm5, %v25581_v59, %v5937_v48  ;;  %v25582_v10 = vcombine.high %v25580_v2, %v25580_v2  ;;  %v4493_v55 = vcombine.high %v4483_v45, %v4483_v45  ;;  %v20983_v48 = vpop.f32.mrb[23].mxu1 }
 0x31d   : > { %v14851_v15 = vcombine.low %v6977_v22, %v6978_v37  ;;  %v4494_v52 = vcombine.high %v4490_v56, %v4490_v56  ;;  %v5881_v57 = vrot.slane %v4469_v58, %v20357_v54  ;;  %v14858_v30 = vrot.slane %v14850_v28, %v20363_v43 }
 0x31e   : > { %v6982_v46 = vsel %vm6902_vm5, %v25582_v10, %v5941_v0  ;;  %v14875_v1 = vrot.slane %v14867_v49, %v20363_v43  ;;  %v5885_v21 = vrot.slane %v4483_v45, %v20357_v54  ;;  %v5889_v22 = vrot.slane %v4491_v12, %v20357_v54  ;;  %v25584_v45 = vld [vmem:[#allocation69_spill] sm:$0xff] }
 0x31f   : > { %v14865_v35 = vrot.slane %v14851_v15, %v20363_v43  ;;  %v14868_v33 = vcombine.low %v6981_v23, %v6982_v46  ;;  %v5893_v6 = vrot.slane %v4493_v55, %v20357_v54  ;;  %v5897_v0 = vrot.slane %v4476_v53, %v20357_v54  ;;  %v25583_v23 = vld [vmem:[#allocation64_spill] sm:$0xff]  ;;  %v25588_v46 = vld [vmem:[#allocation73_spill] sm:$0xff] }
 0x320   : > { %v5901_v2 = vrot.slane %v4490_v56, %v20357_v54  ;;  %v5905_v20 = vrot.slane %v4492_v11, %v20357_v54  ;;  %v5909_v59 = vrot.slane %v4494_v52, %v20357_v54  ;;  %v6967_v28 = vsel %vm6902_vm5, %v25583_v23, %v5881_v57  ;;  %v25587_v52 = vld [vmem:[#allocation67_spill] sm:$0xff]  ;;  %v8153_v57 = vpop.permute.xlu0 %8152 }
 0x321   : > { %v14866_v37 = vcombine.low %v14858_v30, %v14865_v35  ;;  %v14882_v58 = vrot.slane %v14868_v33, %v20363_v43  ;;  %v6968_v12 = vsel %vm6902_vm5, %v25584_v45, %v5885_v21  ;;  %v25585_v15 = vcombine.high %v25583_v23, %v25583_v23 }
 0x322   : > { %v25586_v56 = vcombine.high %v25584_v45, %v25584_v45  ;;  %v6971_v10 = vsel %vm6902_vm5, %v25587_v52, %v5897_v0  ;;  %v6972_v55 = vsel %vm6902_vm5, %v25588_v46, %v5901_v2  ;;  %v25589_v30 = vcombine.high %v25587_v52, %v25587_v52 }
 0x323   : > { %v6969_v53 = vsel %vm6902_vm5, %v25585_v15, %v5889_v22  ;;  %v14883_v49 = vcombine.low %v14875_v1, %v14882_v58  ;;  %16610 = vst.msk [vmem:[%s20460_s8 + $0x110] sm:$0xff] %vm346_vm1, %v14866_v37  ;;  %v25590_v33 = vcombine.high %v25588_v46, %v25588_v46  ;;  %v14816_v21 = vcombine.low %v6967_v28, %v6968_v12 }
 0x324   : > { %v6970_v11 = vsel %vm6902_vm5, %v25586_v56, %v5893_v6  ;;  %v6973_v35 = vsel %vm6902_vm5, %v25589_v30, %v5905_v20  ;;  %v14833_v6 = vcombine.low %v6971_v10, %v6972_v55  ;;  %v4600_v37 = vrot.slane %v20927_v42, %v19150_v17 }
 0x325   : > { %v6974_v1 = vsel %vm6902_vm5, %v25590_v33, %v5909_v59  ;;  %v14817_v22 = vcombine.low %v6969_v53, %v6970_v11  ;;  %16611 = vst.msk [vmem:[%s20460_s8 + $0x118] sm:$0xff] %vm346_vm1, %v14883_v49  ;;  %v25591_v58 = vcombine.high %v20927_v42, %v20927_v42  ;;  %v14824_v20 = vrot.slane %v14816_v21, %v20363_v43 }
 0x326   : > { %v14834_v0 = vcombine.low %v6973_v35, %v6974_v1  ;;  %v2058_v59 = vadd.f32 %v20786_v18, %v20504_v44  ;;  %v21033_v28 = vsel %vm934_vm2, %v20802_v63, %v8153_v57  ;;  %v14841_v45 = vrot.slane %v14833_v6, %v20363_v43 }
 0x327   : > { %v4607_v2 = vrot.slane %v25591_v58, %v19150_v17  ;;  %v14831_v23 = vrot.slane %v14817_v22, %v20363_v43  ;;  %v4608_v15 = vcombine.high %v4600_v37, %v4600_v37  ;;  %v4616_v49 = vrot.slane %v4600_v37, %v19150_v17  ;;  %v25593_v58 = vld [vmem:[#allocation77_spill] sm:$0xff] }
 0x328   : > { %v14848_v12 = vrot.slane %v14834_v0, %v20363_v43  ;;  %v4544_v11 = vcombine.high %v2058_v59, %v2058_v59  ;;  %v4551_v63 = vrot.slane %v2058_v59, %v19150_v17  ;;  %v25592_v0 = vld [vmem:[#allocation75_spill] sm:$0xff] }
 0x329   : > { %v4609_v42 = vcombine.high %v4607_v2, %v4607_v2  ;;  %v14832_v53 = vcombine.low %v14824_v20, %v14831_v23  ;;  %v4623_v56 = vrot.slane %v4607_v2, %v19150_v17  ;;  %v4630_v44 = vrot.slane %v4608_v15, %v19150_v17  ;;  %v25594_v59 = vld [vmem:[#allocation79_spill] sm:$0xff] }
 0x32a   : > { %v14849_v52 = vcombine.low %v14841_v45, %v14848_v12  ;;  %v4638_v46 = vcombine.high %v4616_v49, %v4616_v49  ;;  %v5977_v57 = vrot.slane %v4616_v49, %v20357_v54  ;;  %v25595_v12 = vld [vmem:[#allocation83_spill] sm:$0xff] }
 0x32b   : > { %v4637_v10 = vrot.slane %v4609_v42, %v19150_v17  ;;  %16608 = vst.msk [vmem:[%s20460_s8 + $0x100] sm:$0xff] %vm346_vm1, %v14832_v53  ;;  %v4639_v55 = vcombine.high %v4623_v56, %v4623_v56  ;;  %v5993_v30 = vrot.slane %v4623_v56, %v20357_v54  ;;  %v4640_v35 = vcombine.high %v4630_v44, %v4630_v44  ;;  %v21062_v42 = vpop.f32.mrb[24].mxu1 }
 0x32c   : > { %16609 = vst.msk [vmem:[%s20460_s8 + $0x108] sm:$0xff] %vm346_vm1, %v14849_v52  ;;  %v5981_v1 = vrot.slane %v4630_v44, %v20357_v54  ;;  %v5985_v22 = vrot.slane %v4638_v46, %v20357_v54  ;;  %v6991_v37 = vsel %vm6902_vm5, %v25592_v0, %v5977_v57  ;;  %v25596_v53 = vcombine.high %v25592_v0, %v25592_v0 }
 0x32d   : > { %v4641_v33 = vcombine.high %v4637_v10, %v4637_v10  ;;  %v5997_v21 = vrot.slane %v4637_v10, %v20357_v54  ;;  %v6001_v6 = vrot.slane %v4639_v55, %v20357_v54  ;;  %v6995_v2 = vsel %vm6902_vm5, %v25593_v58, %v5993_v30 }
 0x32e   : > { %v5989_v20 = vrot.slane %v4640_v35, %v20357_v54  ;;  %v6992_v45 = vsel %vm6902_vm5, %v25594_v59, %v5981_v1  ;;  %v6993_v49 = vsel %vm6902_vm5, %v25596_v53, %v5985_v22  ;;  %v25597_v56 = vcombine.high %v25593_v58, %v25593_v58  ;;  %v7253_v1 = vpop.permute.xlu1 %7252 }
 0x32f   : > { %v6005_v23 = vrot.slane %v4641_v33, %v20357_v54  ;;  %v6996_v15 = vsel %vm6902_vm5, %v25595_v12, %v5997_v21  ;;  %v14986_v44 = vcombine.low %v6991_v37, %v6992_v45  ;;  %v25598_v46 = vcombine.high %v25594_v59, %v25594_v59 }
 0x330   : > { %v6997_v52 = vsel %vm6902_vm5, %v25597_v56, %v6001_v6  ;;  %v15003_v10 = vcombine.low %v6995_v2, %v6996_v15  ;;  %v25599_v57 = vcombine.high %v25595_v12, %v25595_v12  ;;  %v4558_v35 = vrot.slane %v4544_v11, %v19150_v17  ;;  %v17461_v11 = vld [vmem:[#allocation2 + $0xc0] sm:$0xff] }
 0x331   : > { %v6994_v55 = vsel %vm6902_vm5, %v25598_v46, %v5989_v20  ;;  %v4559_v33 = vcombine.high %v4551_v63, %v4551_v63  ;;  %v14994_v22 = vrot.slane %v14986_v44, %v20363_v43  ;;  %v4567_v58 = vrot.slane %v4551_v63, %v19150_v17  ;;  %v21096_v46 = vpop.f32.mrb[25].mxu1 }
 0x332   : > { %v6998_v30 = vsel %vm6902_vm5, %v25599_v57, %v6005_v23  ;;  %v14987_v21 = vcombine.low %v6993_v49, %v6994_v55  ;;  %v15011_v0 = vrot.slane %v15003_v10, %v20363_v43  ;;  %v4560_v37 = vcombine.high %v4558_v35, %v4558_v35 }
 0x333   : > { %v15004_v6 = vcombine.low %v6997_v52, %v6998_v30  ;;  %v4574_v2 = vrot.slane %v4558_v35, %v19150_v17  ;;  %v4581_v20 = vrot.slane %v4559_v33, %v19150_v17  ;;  %v21089_v45 = vsel %vm346_vm1, %v17461_v11, %v7253_v1  ;;  %v25600_v1 = vld [vmem:[#allocation81_spill] sm:$0xff] }
 0x334   : > { %v15001_v59 = vrot.slane %v14987_v21, %v20363_v43  ;;  %v2073_v12 = vadd.f32 %v20786_v18, %v20531_v40  ;;  %v4588_v15 = vrot.slane %v4560_v37, %v19150_v17  ;;  %v4589_v63 = vcombine.high %v4567_v58, %v4567_v58  ;;  %v25605_v11 = vld [vmem:[#allocation89_spill] sm:$0xff] }
 0x335   : > { %v15018_v23 = vrot.slane %v15004_v6, %v20363_v43  ;;  %v4590_v53 = vcombine.high %v4574_v2, %v4574_v2  ;;  %v4591_v49 = vcombine.high %v4581_v20, %v4581_v20  ;;  %v5945_v44 = vrot.slane %v4567_v58, %v20357_v54 }
 0x336   : > { %v15002_v56 = vcombine.low %v14994_v22, %v15001_v59  ;;  %v5949_v10 = vrot.slane %v4581_v20, %v20357_v54  ;;  %v4592_v55 = vcombine.high %v4588_v15, %v4588_v15  ;;  %v5953_v57 = vrot.slane %v4589_v63, %v20357_v54  ;;  %v25601_v22 = vld [vmem:[#allocation87_spill] sm:$0xff]  ;;  %v25604_v59 = vld [vmem:[#allocation85_spill] sm:$0xff] }
 0x337   : > { %v15019_v52 = vcombine.low %v15011_v0, %v15018_v23  ;;  %v5957_v30 = vrot.slane %v4591_v49, %v20357_v54  ;;  %v5961_v40 = vrot.slane %v4574_v2, %v20357_v54  ;;  %v5965_v35 = vrot.slane %v4588_v15, %v20357_v54 }
 0x338   : > { %16618 = vst.msk [vmem:[%s20460_s8 + $0x150] sm:$0xff] %vm346_vm1, %v15002_v56  ;;  %v5969_v33 = vrot.slane %v4590_v53, %v20357_v54  ;;  %v6983_v21 = vsel %vm6902_vm5, %v25600_v1, %v5945_v44  ;;  %v6984_v6 = vsel %vm6902_vm5, %v25601_v22, %v5949_v10  ;;  %v5973_v0 = vrot.slane %v4592_v55, %v20357_v54 }
 0x339   : > { %16619 = vst.msk [vmem:[%s20460_s8 + $0x158] sm:$0xff] %vm346_vm1, %v15019_v52  ;;  %v25602_v37 = vcombine.high %v25600_v1, %v25600_v1  ;;  %v25603_v2 = vcombine.high %v25601_v22, %v25601_v22  ;;  %v6987_v23 = vsel %vm6902_vm5, %v25604_v59, %v5961_v40  ;;  %v6988_v15 = vsel %vm6902_vm5, %v25605_v11, %v5965_v35 }
 0x33a   : > { %v25606_v63 = vcombine.high %v25604_v59, %v25604_v59  ;;  %v14952_v49 = vcombine.low %v6983_v21, %v6984_v6  ;;  %v25607_v52 = vcombine.high %v25605_v11, %v25605_v11  ;;  %v14969_v10 = vcombine.low %v6987_v23, %v6988_v15 }
 0x33b   : > { %v6985_v58 = vsel %vm6902_vm5, %v25602_v37, %v5953_v57  ;;  %v6986_v20 = vsel %vm6902_vm5, %v25603_v2, %v5957_v30  ;;  %v4691_v55 = vcombine.high %v2073_v12, %v2073_v12  ;;  %v4698_v57 = vrot.slane %v2073_v12, %v19150_v17 }
 0x33c   : > { %v6989_v53 = vsel %vm6902_vm5, %v25606_v63, %v5969_v33  ;;  %v14953_v56 = vcombine.low %v6985_v58, %v6986_v20  ;;  %v6990_v44 = vsel %vm6902_vm5, %v25607_v52, %v5973_v0  ;;  %v14960_v30 = vrot.slane %v14952_v49, %v20363_v43 }
 0x33d   : > { %v14970_v35 = vcombine.low %v6989_v53, %v6990_v44  ;;  %v2068_v33 = vadd.f32 %v20786_v18, %v20543_v32  ;;  %v14977_v1 = vrot.slane %v14969_v10, %v20363_v43  ;;  %v4705_v21 = vrot.slane %v4691_v55, %v19150_v17  ;;  %v25608_v55 = vld [vmem:[#allocation91_spill] sm:$0xff] }
 0x33e   : > { %v14967_v40 = vrot.slane %v14953_v56, %v20363_v43  ;;  %v4706_v22 = vcombine.high %v4698_v57, %v4698_v57  ;;  %v4714_v6 = vrot.slane %v4698_v57, %v19150_v17 }
 0x33f   : > { %v14984_v37 = vrot.slane %v14970_v35, %v20363_v43  ;;  %v4642_v12 = vcombine.high %v2068_v33, %v2068_v33  ;;  %v4649_v58 = vrot.slane %v2068_v33, %v19150_v17  ;;  %v4707_v2 = vcombine.high %v4705_v21, %v4705_v21 }
 0x340   : > { %v14968_v0 = vcombine.low %v14960_v30, %v14967_v40  ;;  %v4721_v20 = vrot.slane %v4705_v21, %v19150_v17  ;;  %v4728_v59 = vrot.slane %v4706_v22, %v19150_v17  ;;  %v4736_v32 = vcombine.high %v4714_v6, %v4714_v6  ;;  %v25609_v21 = vld [vmem:[#allocation3_spill] sm:$0xff] }
 0x341   : > { %v14985_v23 = vcombine.low %v14977_v1, %v14984_v37  ;;  %v6041_v11 = vrot.slane %v4714_v6, %v20357_v54  ;;  %v4656_v15 = vrot.slane %v4642_v12, %v19150_v17  ;;  %v4657_v63 = vcombine.high %v4649_v58, %v4649_v58  ;;  %v25611_v37 = vld [vmem:[#allocation95_spill] sm:$0xff] }
 0x342   : > { %16616 = vst.msk [vmem:[%s20460_s8 + $0x140] sm:$0xff] %vm346_vm1, %v14968_v0  ;;  %v4735_v53 = vrot.slane %v4707_v2, %v19150_v17  ;;  %v4737_v49 = vcombine.high %v4721_v20, %v4721_v20  ;;  %v4738_v56 = vcombine.high %v4728_v59, %v4728_v59  ;;  %v6045_v52 = vrot.slane %v4728_v59, %v20357_v54 }
 0x343   : > { %16617 = vst.msk [vmem:[%s20460_s8 + $0x148] sm:$0xff] %vm346_vm1, %v14985_v23  ;;  %v6049_v44 = vrot.slane %v4736_v32, %v20357_v54  ;;  %v6057_v10 = vrot.slane %v4721_v20, %v20357_v54  ;;  %v7007_v57 = vsel %vm6902_vm5, %v25608_v55, %v6041_v11  ;;  %v4658_v30 = vcombine.high %v4656_v15, %v4656_v15  ;;  %v25613_v23 = vld [vmem:[#allocation74_spill] sm:$0xff] }
 0x344   : > { %v4739_v40 = vcombine.high %v4735_v53, %v4735_v53  ;;  %v6053_v35 = vrot.slane %v4738_v56, %v20357_v54  ;;  %v6061_v33 = vrot.slane %v4735_v53, %v20357_v54  ;;  %v6065_v1 = vrot.slane %v4737_v49, %v20357_v54 }
 0x345   : > { %v7008_v22 = vsel %vm6902_vm5, %v25609_v21, %v6045_v52  ;;  %v25610_v6 = vcombine.high %v25608_v55, %v25608_v55  ;;  %v7011_v12 = vsel %vm6902_vm5, %v25611_v37, %v6057_v10  ;;  %v4665_v2 = vrot.slane %v4649_v58, %v19150_v17 }
 0x346   : > { %v6069_v20 = vrot.slane %v4739_v40, %v20357_v54  ;;  %v25612_v59 = vcombine.high %v25609_v21, %v25609_v21  ;;  %v7012_v11 = vsel %vm6902_vm5, %v25613_v23, %v6061_v33  ;;  %v25614_v53 = vcombine.high %v25611_v37, %v25611_v37 }
 0x347   : > { %v7009_v0 = vsel %vm6902_vm5, %v25610_v6, %v6049_v44  ;;  %v15122_v56 = vcombine.low %v7007_v57, %v7008_v22  ;;  %v15139_v44 = vcombine.low %v7011_v12, %v7012_v11  ;;  %v4672_v58 = vrot.slane %v4656_v15, %v19150_v17  ;;  %v8155_v22 = vpop.permute.xlu0 %8154 }
 0x348   : > { %v7010_v32 = vsel %vm6902_vm5, %v25612_v59, %v6053_v35  ;;  %v7013_v49 = vsel %vm6902_vm5, %v25614_v53, %v6065_v1  ;;  %v25615_v10 = vcombine.high %v25613_v23, %v25613_v23  ;;  %v4679_v40 = vrot.slane %v4657_v63, %v19150_v17  ;;  %v21193_v23 = vld [vmem:[#allocation2 + $0x169] sm:$0xff] }
 0x349   : > { %v15123_v52 = vcombine.low %v7009_v0, %v7010_v32  ;;  %v4686_v35 = vrot.slane %v4658_v30, %v19150_v17  ;;  %v4687_v33 = vcombine.high %v4665_v2, %v4665_v2  ;;  %v15130_v21 = vrot.slane %v15122_v56, %v20363_v43  ;;  %v8281_v0 = vpop.permute.xlu1 %8280  ;;  %8176 = vrot.lane.b32.xlu0 %v21193_v23, %s17535_s28 }
 0x34a   : > { %v7014_v55 = vsel %vm6902_vm5, %v25615_v10, %v6069_v20  ;;  %v15147_v57 = vrot.slane %v15139_v44, %v20363_v43  ;;  %v4688_v15 = vcombine.high %v4672_v58, %v4672_v58  ;;  %v4689_v37 = vcombine.high %v4679_v40, %v4679_v40  ;;  %v25616_v10 = vld [vmem:[#allocation93_spill] sm:$0xff] }
 0x34b   : > { %v15137_v6 = vrot.slane %v15123_v52, %v20363_v43  ;;  %v15140_v1 = vcombine.low %v7013_v49, %v7014_v55  ;;  %v4690_v12 = vcombine.high %v4686_v35, %v4686_v35  ;;  %v6009_v20 = vrot.slane %v4665_v2, %v20357_v54  ;;  %v21201_v2 = vpop.f32.mrb[26].mxu1 }
 0x34c   : > { %v6013_v30 = vrot.slane %v4679_v40, %v20357_v54  ;;  %v6017_v32 = vrot.slane %v4687_v33, %v20357_v54  ;;  %v6021_v11 = vrot.slane %v4689_v37, %v20357_v54  ;;  %v6025_v53 = vrot.slane %v4672_v58, %v20357_v54  ;;  %v25617_v40 = vld [vmem:[#allocation41_spill] sm:$0xff] }
 0x34d   : > { %v15138_v59 = vcombine.low %v15130_v21, %v15137_v6  ;;  %v15154_v63 = vrot.slane %v15140_v1, %v20363_v43  ;;  %v6029_v49 = vrot.slane %v4686_v35, %v20357_v54  ;;  %v6033_v56 = vrot.slane %v4688_v15, %v20357_v54  ;;  %v25620_v1 = vld [vmem:[#allocation28_spill] sm:$0xff]  ;;  %v25621_v15 = vld [vmem:[#allocation25_spill] sm:$0xff] }
 0x34e   : > { %v6037_v44 = vrot.slane %v4690_v12, %v20357_v54  ;;  %v6999_v55 = vsel %vm6902_vm5, %v25616_v10, %v6009_v20  ;;  %v7000_v58 = vsel %vm6902_vm5, %v25617_v40, %v6013_v30  ;;  %v25618_v35 = vcombine.high %v25616_v10, %v25616_v10  ;;  %v21222_v12 = vpop.f32.mrb[27].mxu1  ;;  %v7381_v10 = vpop.permute.xlu1 %7380 }
 0x34f   : > { %v15155_v52 = vcombine.low %v15147_v57, %v15154_v63  ;;  %16626 = vst.msk [vmem:[%s20460_s8 + $0x190] sm:$0xff] %vm346_vm1, %v15138_v59  ;;  %v25619_v21 = vcombine.high %v25617_v40, %v25617_v40  ;;  %v7003_v57 = vsel %vm6902_vm5, %v25620_v1, %v6025_v53  ;;  %v7004_v37 = vsel %vm6902_vm5, %v25621_v15, %v6029_v49  ;;  %v7255_v53 = vpop.permute.xlu0 %7254 }
 0x350   : > { %v7001_v33 = vsel %vm6902_vm5, %v25618_v35, %v6017_v32  ;;  %25622 = vst [vmem:[#allocation90_spill] sm:$0xff] %v21222_v12  ;;  %v25623_v20 = vcombine.high %v25620_v1, %v25620_v1  ;;  %v25624_v63 = vcombine.high %v25621_v15, %v25621_v15  ;;  %v15088_v32 = vcombine.low %v6999_v55, %v7000_v58 }
 0x351   : > { %v7002_v6 = vsel %vm6902_vm5, %v25619_v21, %v6021_v11  ;;  %16627 = vst.msk [vmem:[%s20460_s8 + $0x198] sm:$0xff] %vm346_vm1, %v15155_v52  ;;  %v15105_v40 = vcombine.low %v7003_v57, %v7004_v37  ;;  %v21236_v35 = vsel %vm934_vm2, %v20918_v27, %v8155_v22  ;;  %v8426_v52 = vsel %vm967_vm3, %v21033_v28, %v8281_v0  ;;  %v17462_v22 = vld [vmem:[#allocation2 + $0xc8] sm:$0xff] }
 0x352   : > { %v7005_v59 = vsel %vm6902_vm5, %v25623_v20, %v6033_v56  ;;  %v7006_v30 = vsel %vm6902_vm5, %v25624_v63, %v6037_v44  ;;  %v15089_v11 = vcombine.low %v7001_v33, %v7002_v6  ;;  %v15096_v56 = vrot.slane %v15088_v32, %v20363_v43  ;;  %17291 = vmatprep.mubr.msk.f32.mxu1 %vm1008_vm4, %v8426_v52 }
 0x353   : > { %v15106_v49 = vcombine.low %v7005_v59, %v7006_v30  ;;  %v2083_v44 = vadd.f32 %v20786_v18, %v20596_v36  ;;  %v2078_v55 = vadd.f32 %v20786_v18, %v20611_v4  ;;  %v15113_v58 = vrot.slane %v15105_v40, %v20363_v43  ;;  %v21282_v40 = vld [vmem:[#allocation2 + $0x171] sm:$0xff] }
 0x354   : > { %v15103_v21 = vrot.slane %v15089_v11, %v20363_v43  ;;  %v21250_v28 = vsel %vm346_vm1, %v17462_v22, %v7255_v53  ;;  %v21254_v0 = vsel %vm934_vm2, %v21089_v45, %v7381_v10  ;;  %v21260_v15 = vadd.f32 %v20786_v18, %v20634_v14  ;;  %8178 = vrot.lane.b32.xlu0 %v21282_v40, %s17535_s28 }
 0x355   : > { %v15120_v27 = vrot.slane %v15106_v49, %v20363_v43  ;;  %v4789_v33 = vcombine.high %v2083_v44, %v2083_v44  ;;  %v4796_v6 = vrot.slane %v2083_v44, %v19150_v17  ;;  %v4740_v1 = vcombine.high %v2078_v55, %v2078_v55  ;;  %v8022_v49 = vld [vmem:[#allocation2 + $0x16a] sm:$0xff] }
 0x356   : > { %v15104_v36 = vcombine.low %v15096_v56, %v15103_v21  ;;  %v4747_v4 = vrot.slane %v2078_v55, %v19150_v17  ;;  %v21264_v37 = vadd.f32 %v20786_v18, %v20639_v24  ;;  %v21278_v24 = vrot.slane %v21260_v15, %v19150_v17  ;;  %v21289_v55 = vpop.f32.mrb[28].mxu1  ;;  %8304 = vrot.lane.b32.xlu1 %v8022_v49, %s17536_s7 }
 0x357   : > { %v15121_v57 = vcombine.low %v15113_v58, %v15120_v27  ;;  %v4803_v45 = vrot.slane %v4789_v33, %v19150_v17  ;;  %v4804_v20 = vcombine.high %v4796_v6, %v4796_v6  ;;  %v4812_v59 = vrot.slane %v4796_v6, %v19150_v17  ;;  %25625 = vst [vmem:[#allocation53_spill] sm:$0xff] %v21289_v55 }
 0x358   : > { %16624 = vst.msk [vmem:[%s20460_s8 + $0x180] sm:$0xff] %vm346_vm1, %v15104_v36  ;;  %v4754_v63 = vrot.slane %v4740_v1, %v19150_v17  ;;  %v4755_v30 = vcombine.high %v4747_v4, %v4747_v4  ;;  %v4763_v32 = vrot.slane %v4747_v4, %v19150_v17  ;;  %v25626_v1 = vld [vmem:[#allocation68_spill] sm:$0xff] }
 0x359   : > { %16625 = vst.msk [vmem:[%s20460_s8 + $0x188] sm:$0xff] %vm346_vm1, %v15121_v57  ;;  %v4805_v18 = vcombine.high %v4803_v45, %v4803_v45  ;;  %v4819_v11 = vrot.slane %v4803_v45, %v19150_v17  ;;  %v4826_v53 = vrot.slane %v4804_v20, %v19150_v17  ;;  %v4834_v10 = vcombine.high %v4812_v59, %v4812_v59 }
 0x35a   : > { %v6105_v52 = vrot.slane %v4812_v59, %v20357_v54  ;;  %v4756_v56 = vcombine.high %v4754_v63, %v4754_v63  ;;  %v4770_v21 = vrot.slane %v4754_v63, %v19150_v17  ;;  %v4777_v44 = vrot.slane %v4755_v30, %v19150_v17  ;;  %v25627_v30 = vld [vmem:[#allocation45_spill] sm:$0xff] }
 0x35b   : > { %v4833_v58 = vrot.slane %v4805_v18, %v19150_v17  ;;  %v4835_v27 = vcombine.high %v4819_v11, %v4819_v11  ;;  %v4836_v22 = vcombine.high %v4826_v53, %v4826_v53  ;;  %v6109_v36 = vrot.slane %v4826_v53, %v20357_v54 }
 0x35c   : > { %v6113_v33 = vrot.slane %v4834_v10, %v20357_v54  ;;  %v6121_v6 = vrot.slane %v4819_v11, %v20357_v54  ;;  %v7023_v57 = vsel %vm6902_vm5, %v25626_v1, %v6105_v52  ;;  %v4784_v4 = vrot.slane %v4756_v56, %v19150_v17  ;;  %v25629_v10 = vld [vmem:[#allocation7_spill] sm:$0xff]  ;;  %v17463_v56 = vld [vmem:[#allocation2 + $0x159] sm:$0xff] }
 0x35d   : > { %v4837_v45 = vcombine.high %v4833_v58, %v4833_v58  ;;  %v6117_v20 = vrot.slane %v4836_v22, %v20357_v54  ;;  %v6125_v59 = vrot.slane %v4833_v58, %v20357_v54  ;;  %v6129_v63 = vrot.slane %v4835_v27, %v20357_v54  ;;  %7278 = vrot.lane.b32.xlu0 %v17463_v56, %s17534_s27  ;;  %v21322_v56 = vpop.f32.mrb[29].mxu1 }
 0x35e   : > { %v7024_v18 = vsel %vm6902_vm5, %v25627_v30, %v6109_v36  ;;  %v25628_v53 = vcombine.high %v25626_v1, %v25626_v1  ;;  %v7027_v49 = vsel %vm6902_vm5, %v25629_v10, %v6121_v6  ;;  %v4785_v52 = vcombine.high %v4763_v32, %v4763_v32 }
 0x35f   : > { %v6133_v22 = vrot.slane %v4837_v45, %v20357_v54  ;;  %v25630_v58 = vcombine.high %v25627_v30, %v25627_v30  ;;  %v7028_v36 = vsel %vm6902_vm5, %v19702_v62, %v6125_v59  ;;  %v15258_v6 = vcombine.low %v7023_v57, %v7024_v18 }
 0x360   : > { %v7025_v11 = vsel %vm6902_vm5, %v25628_v53, %v6113_v33  ;;  %v25631_v33 = vcombine.high %v25629_v10, %v25629_v10  ;;  %v15275_v14 = vcombine.low %v7027_v49, %v7028_v36  ;;  %v4786_v55 = vcombine.high %v4770_v21, %v4770_v21 }
 0x361   : > { %v7026_v27 = vsel %vm6902_vm5, %v25630_v58, %v6117_v20  ;;  %v25632_v45 = vcombine.high %v19702_v62, %v19702_v62  ;;  %v4787_v20 = vcombine.high %v4777_v44, %v4777_v44  ;;  %v4788_v58 = vcombine.high %v4784_v4, %v4784_v4 }
 0x362   : > { %v7029_v1 = vsel %vm6902_vm5, %v25631_v33, %v6129_v63  ;;  %v15259_v53 = vcombine.low %v7025_v11, %v7026_v27  ;;  %v6073_v59 = vrot.slane %v4763_v32, %v20357_v54  ;;  %v15266_v12 = vrot.slane %v15258_v6, %v20363_v43  ;;  %v25636_v6 = vld [vmem:[#allocation4_spill] sm:$0xff] }
 0x363   : > { %v7030_v30 = vsel %vm6902_vm5, %v25632_v45, %v6133_v22  ;;  %v15283_v63 = vrot.slane %v15275_v14, %v20363_v43  ;;  %v6077_v18 = vrot.slane %v4777_v44, %v20357_v54  ;;  %v6081_v11 = vrot.slane %v4785_v52, %v20357_v54  ;;  %v25633_v44 = vld [vmem:[#allocation29_spill] sm:$0xff]  ;;  %v25637_v45 = vld [vmem:[#allocation42_spill] sm:$0xff] }
 0x364   : > { %v15273_v10 = vrot.slane %v15259_v53, %v20363_v43  ;;  %v15276_v57 = vcombine.low %v7029_v1, %v7030_v30  ;;  %v6085_v62 = vrot.slane %v4787_v20, %v20357_v54  ;;  %v6089_v49 = vrot.slane %v4770_v21, %v20357_v54 }
 0x365   : > { %v6093_v32 = vrot.slane %v4784_v4, %v20357_v54  ;;  %v6097_v36 = vrot.slane %v4786_v55, %v20357_v54  ;;  %v6101_v33 = vrot.slane %v4788_v58, %v20357_v54  ;;  %v7015_v14 = vsel %vm6902_vm5, %v19707_v47, %v6073_v59 }
 0x366   : > { %v15274_v22 = vcombine.low %v15266_v12, %v15273_v10  ;;  %v15290_v27 = vrot.slane %v15276_v57, %v20363_v43  ;;  %v7016_v52 = vsel %vm6902_vm5, %v25633_v44, %v6077_v18  ;;  %v25634_v1 = vcombine.high %v19707_v47, %v19707_v47 }
 0x367   : > { %v25635_v4 = vcombine.high %v25633_v44, %v25633_v44  ;;  %v7019_v53 = vsel %vm6902_vm5, %v25636_v6, %v6089_v49  ;;  %v7020_v30 = vsel %vm6902_vm5, %v25637_v45, %v6093_v32  ;;  %v25638_v20 = vcombine.high %v25636_v6, %v25636_v6 }
 0x368   : > { %v7017_v12 = vsel %vm6902_vm5, %v25634_v1, %v6081_v11  ;;  %v15291_v21 = vcombine.low %v15283_v63, %v15290_v27  ;;  %16634 = vst.msk [vmem:[%s20460_s8 + $0x1d0] sm:$0xff] %vm346_vm1, %v15274_v22  ;;  %v25639_v58 = vcombine.high %v25637_v45, %v25637_v45  ;;  %v15224_v10 = vcombine.low %v7015_v14, %v7016_v52 }
 0x369   : > { %v7018_v55 = vsel %vm6902_vm5, %v25635_v4, %v6085_v62  ;;  %v7021_v47 = vsel %vm6902_vm5, %v25638_v20, %v6097_v36  ;;  %v15241_v63 = vcombine.low %v7019_v53, %v7020_v30  ;;  %v25640_v11 = vcombine.high %v21260_v15, %v21260_v15  ;;  %v25641_v20 = vld [vmem:[#allocation76_spill] sm:$0xff] }
 0x36a   : > { %v7022_v59 = vsel %vm6902_vm5, %v25639_v58, %v6101_v33  ;;  %v15225_v57 = vcombine.low %v7017_v12, %v7018_v55  ;;  %16635 = vst.msk [vmem:[%s20460_s8 + $0x1d8] sm:$0xff] %vm346_vm1, %v15291_v21  ;;  %v4902_v49 = vcombine.high %v21278_v24, %v21278_v24  ;;  %v15232_v22 = vrot.slane %v15224_v10, %v20363_v43 }
 0x36b   : > { %v15242_v18 = vcombine.low %v7021_v47, %v7022_v59  ;;  %v4901_v62 = vrot.slane %v25640_v11, %v19150_v17  ;;  %v4910_v32 = vrot.slane %v21278_v24, %v19150_v17  ;;  %v4838_v36 = vcombine.high %v21264_v37, %v21264_v37 }
 0x36c   : > { %v15239_v27 = vrot.slane %v15225_v57, %v20363_v43  ;;  %v15249_v33 = vrot.slane %v15241_v63, %v20363_v43  ;;  %v4924_v1 = vrot.slane %v4902_v49, %v19150_v17  ;;  %v25642_v57 = vld [vmem:[#allocation26_spill] sm:$0xff] }
 0x36d   : > { %v15256_v14 = vrot.slane %v15242_v18, %v20363_v43  ;;  %v4903_v15 = vcombine.high %v4901_v62, %v4901_v62  ;;  %v4917_v44 = vrot.slane %v4901_v62, %v19150_v17  ;;  %v4932_v12 = vcombine.high %v4910_v32, %v4910_v32 }
 0x36e   : > { %v15240_v52 = vcombine.low %v15232_v22, %v15239_v27  ;;  %v6169_v21 = vrot.slane %v4910_v32, %v20357_v54  ;;  %v4934_v53 = vcombine.high %v4924_v1, %v4924_v1  ;;  %v6173_v45 = vrot.slane %v4924_v1, %v20357_v54 }
 0x36f   : > { %v15257_v4 = vcombine.low %v15249_v33, %v15256_v14  ;;  %v4931_v24 = vrot.slane %v4903_v15, %v19150_v17  ;;  %v4933_v55 = vcombine.high %v4917_v44, %v4917_v44  ;;  %v6185_v6 = vrot.slane %v4917_v44, %v20357_v54 }
 0x370   : > { %16632 = vst.msk [vmem:[%s20460_s8 + $0x1c0] sm:$0xff] %vm346_vm1, %v15240_v52  ;;  %v6177_v30 = vrot.slane %v4932_v12, %v20357_v54  ;;  %v7039_v47 = vsel %vm6902_vm5, %v25641_v20, %v6169_v21  ;;  %v6181_v18 = vrot.slane %v4934_v53, %v20357_v54  ;;  %v7040_v11 = vsel %vm6902_vm5, %v19758_v8, %v6173_v45 }
 0x371   : > { %16633 = vst.msk [vmem:[%s20460_s8 + $0x1c8] sm:$0xff] %vm346_vm1, %v15257_v4  ;;  %v4935_v58 = vcombine.high %v4931_v24, %v4931_v24  ;;  %v6189_v59 = vrot.slane %v4931_v24, %v20357_v54  ;;  %v6193_v10 = vrot.slane %v4933_v55, %v20357_v54  ;;  %v7043_v63 = vsel %vm6902_vm5, %v25642_v57, %v6185_v6 }
 0x372   : > { %v25643_v62 = vcombine.high %v25641_v20, %v25641_v20  ;;  %v4845_v22 = vrot.slane %v21264_v37, %v19150_v17  ;;  %v25644_v33 = vcombine.high %v25642_v57, %v25642_v57  ;;  %v15394_v15 = vcombine.low %v7039_v47, %v7040_v11 }
 0x373   : > { %v6197_v27 = vrot.slane %v4935_v58, %v20357_v54  ;;  %v7044_v32 = vsel %vm6902_vm5, %v19768_v16, %v6189_v59  ;;  %v25645_v44 = vcombine.high %v19758_v8, %v19758_v8  ;;  %v4852_v12 = vrot.slane %v4838_v36, %v19150_v17  ;;  %v8283_v58 = vpop.permute.xlu0 %8282 }
 0x374   : > { %v7041_v49 = vsel %vm6902_vm5, %v25643_v62, %v6177_v30  ;;  %v7045_v14 = vsel %vm6902_vm5, %v25644_v33, %v6193_v10  ;;  %v15411_v1 = vcombine.low %v7043_v63, %v7044_v32  ;;  %v4853_v37 = vcombine.high %v4845_v22, %v4845_v22 }
 0x375   : > { %v7042_v52 = vsel %vm6902_vm5, %v25645_v44, %v6181_v18  ;;  %v25646_v21 = vcombine.high %v19768_v16, %v19768_v16  ;;  %v15402_v55 = vrot.slane %v15394_v15, %v20363_v43  ;;  %v4861_v6 = vrot.slane %v4845_v22, %v19150_v17  ;;  %v7383_v18 = vpop.permute.xlu1 %7382  ;;  %v21439_v44 = vpop.f32.mrb[30].mxu1 }
 0x376   : > { %v15395_v24 = vcombine.low %v7041_v49, %v7042_v52  ;;  %v15419_v45 = vrot.slane %v15411_v1, %v20363_v43  ;;  %v4854_v8 = vcombine.high %v4852_v12, %v4852_v12  ;;  %v4868_v30 = vrot.slane %v4852_v12, %v19150_v17  ;;  %v25647_v1 = vld [vmem:[#allocation70_spill] sm:$0xff] }
 0x377   : > { %v7046_v4 = vsel %vm6902_vm5, %v25646_v21, %v6197_v27  ;;  %v4875_v36 = vrot.slane %v4853_v37, %v19150_v17  ;;  %v4883_v47 = vcombine.high %v4861_v6, %v4861_v6  ;;  %v6137_v16 = vrot.slane %v4861_v6, %v20357_v54  ;;  %v7186_v27 = vld [vmem:[#allocation2 + $0x168] sm:$0xff] }
 0x378   : > { %v15412_v53 = vcombine.low %v7045_v14, %v7046_v4  ;;  %v15409_v20 = vrot.slane %v15395_v24, %v20363_v43  ;;  %v4882_v10 = vrot.slane %v4854_v8, %v19150_v17  ;;  %v4884_v57 = vcombine.high %v4868_v30, %v4868_v30  ;;  %7404 = vrot.lane.b32.xlu1 %v7186_v27, %s17535_s28  ;;  %v21452_v24 = vpop.f32.mrb[31].mxu1 }
 0x379   : > { %v6153_v63 = vrot.slane %v4868_v30, %v20357_v54  ;;  %v4885_v62 = vcombine.high %v4875_v36, %v4875_v36  ;;  %v6141_v49 = vrot.slane %v4875_v36, %v20357_v54  ;;  %v6145_v22 = vrot.slane %v4883_v47, %v20357_v54 }
 0x37a   : > { %v15426_v59 = vrot.slane %v15412_v53, %v20363_v43  ;;  %v15410_v11 = vcombine.low %v15402_v55, %v15409_v20  ;;  %v4886_v33 = vcombine.high %v4882_v10, %v4882_v10  ;;  %v6157_v14 = vrot.slane %v4882_v10, %v20357_v54 }
 0x37b   : > { %v6161_v15 = vrot.slane %v4884_v57, %v20357_v54  ;;  %v6149_v52 = vrot.slane %v4885_v62, %v20357_v54  ;;  %v7031_v12 = vsel %vm6902_vm5, %v25647_v1, %v6137_v16  ;;  %v7032_v37 = vsel %vm6902_vm5, %v19773_v3, %v6141_v49 }
 0x37c   : > { %v15427_v32 = vcombine.low %v15419_v45, %v15426_v59  ;;  %16642 = vst.msk [vmem:[%s20460_s8 + $0x210] sm:$0xff] %vm346_vm1, %v15410_v11  ;;  %v25648_v21 = vcombine.high %v25647_v1, %v25647_v1  ;;  %v6165_v55 = vrot.slane %v4886_v33, %v20357_v54  ;;  %v7035_v6 = vsel %vm6902_vm5, %v19763_v5, %v6153_v63  ;;  %v7509_v59 = vpop.permute.xlu0 %7508 }
 0x37d   : > { %v7036_v53 = vsel %vm6902_vm5, %v19780_v61, %v6157_v14  ;;  %v25649_v45 = vcombine.high %v19763_v5, %v19763_v5  ;;  %v25650_v30 = vcombine.high %v19773_v3, %v19773_v3  ;;  %v15360_v36 = vcombine.low %v7031_v12, %v7032_v37  ;;  %v21482_v3 = vld [vmem:[%s24824_s3] ss:$0 sm:$0xff] }
 0x37e   : > { %v7033_v4 = vsel %vm6902_vm5, %v25648_v21, %v6145_v22  ;;  %16643 = vst.msk [vmem:[%s20460_s8 + $0x218] sm:$0xff] %vm346_vm1, %v15427_v32  ;;  %v15377_v47 = vcombine.low %v7035_v6, %v7036_v53  ;;  %v8427_v16 = vsel %vm967_vm3, %v21236_v35, %v8283_v58  ;;  %v25651_v10 = vcombine.high %v19780_v61, %v19780_v61  ;;  %v8061_v35 = vpop.permute.xlu1 %8060  ;;  %v17465_v14 = vld [vmem:[#allocation2 + $0xd9] sm:$0xff] }
 0x37f   : > { %v7037_v8 = vsel %vm6902_vm5, %v25649_v45, %v6161_v15  ;;  %v7034_v20 = vsel %vm6902_vm5, %v25650_v30, %v6149_v52  ;;  %v21477_v5 = vsel %vm934_vm2, %v21250_v28, %v7383_v18  ;;  %v2103_v11 = vadd.f32 %v21482_v3, %v20743_v31  ;;  %17292 = vmatmul.mubr.msk.f32.gmra.mrb[46].mxu1 %vm1008_vm4, %v8427_v16  ;;  %v7187_v30 = vld [vmem:[#allocation2 + $0x170] sm:$0xff] }
 0x380   : > { %v7038_v57 = vsel %vm6902_vm5, %v25651_v10, %v6165_v55  ;;  %v15361_v63 = vcombine.low %v7033_v4, %v7034_v20  ;;  %v15368_v61 = vrot.slane %v15360_v36, %v20363_v43  ;;  %v15385_v62 = vrot.slane %v15377_v47, %v20363_v43  ;;  %7406 = vrot.lane.b32.xlu1 %v7187_v30, %s17535_s28 }
 0x381   : > { %v15378_v58 = vcombine.low %v7037_v8, %v7038_v57  ;;  %v2098_v28 = vadd.f32 %v21482_v3, %v20756_v34  ;;  %v4985_v49 = vcombine.high %v2103_v11, %v2103_v11  ;;  %v4992_v22 = vrot.slane %v2103_v11, %v19150_v17  ;;  %v8023_v8 = vld [vmem:[#allocation2 + $0x172] sm:$0xff] }
 0x382   : > { %v15375_v18 = vrot.slane %v15361_v63, %v20363_v43  ;;  %v7654_v31 = vsel %vm967_vm3, %v21254_v0, %v7509_v59  ;;  %v21498_v15 = vsel %vm346_vm1, %v17465_v14, %v8061_v35  ;;  %8306 = vrot.lane.b32.xlu0 %v8023_v8, %s17536_s7 }
 0x383   : > { %v15392_v27 = vrot.slane %v15378_v58, %v20363_v43  ;;  %v4936_v32 = vcombine.high %v2098_v28, %v2098_v28  ;;  %v4943_v33 = vrot.slane %v2098_v28, %v19150_v17  ;;  %17239 = vmatprep.mubr.msk.f32.mxu0 %vm1008_vm4, %v7654_v31  ;;  %v4999_v52 = vrot.slane %v4985_v49, %v19150_v17 }
 0x384   : > { %v15376_v34 = vcombine.low %v15368_v61, %v15375_v18  ;;  %v5000_v1 = vcombine.high %v4992_v22, %v4992_v22  ;;  %v5008_v12 = vrot.slane %v4992_v22, %v19150_v17  ;;  %v25652_v31 = vcombine.high %v19786_v51, %v19786_v51 }
 0x385   : > { %v15393_v37 = vcombine.low %v15385_v62, %v15392_v27  ;;  %v4950_v0 = vrot.slane %v4936_v32, %v19150_v17  ;;  %v4951_v21 = vcombine.high %v4943_v33, %v4943_v33  ;;  %v21505_v4 = vrot.slane %v4943_v33, %v19150_v17 }
 0x386   : > { %16640 = vst.msk [vmem:[%s20460_s8 + $0x200] sm:$0xff] %vm346_vm1, %v15376_v34  ;;  %v5001_v55 = vcombine.high %v4999_v52, %v4999_v52  ;;  %v5015_v6 = vrot.slane %v4999_v52, %v19150_v17  ;;  %v5022_v53 = vrot.slane %v5000_v1, %v19150_v17  ;;  %v5030_v45 = vcombine.high %v5008_v12, %v5008_v12 }
 0x387   : > { %16641 = vst.msk [vmem:[%s20460_s8 + $0x208] sm:$0xff] %vm346_vm1, %v15393_v37  ;;  %v6233_v20 = vrot.slane %v5008_v12, %v20357_v54  ;;  %v4952_v36 = vcombine.high %v4950_v0, %v4950_v0  ;;  %v4966_v47 = vrot.slane %v4950_v0, %v19150_v17  ;;  %v4973_v16 = vrot.slane %v4951_v21, %v19150_v17  ;;  %v17466_v37 = vld [vmem:[#allocation2 + $0x16a] sm:$0xff] }
 0x388   : > { %v5029_v59 = vrot.slane %v5001_v55, %v19150_v17  ;;  %v5031_v10 = vcombine.high %v5015_v6, %v5015_v6  ;;  %v5032_v57 = vcombine.high %v5022_v53, %v5022_v53  ;;  %v6237_v63 = vrot.slane %v5022_v53, %v20357_v54  ;;  %7532 = vrot.lane.b32.xlu0 %v21193_v23, %s17536_s7 }
 0x389   : > { %v6241_v11 = vrot.slane %v5030_v45, %v20357_v54  ;;  %v6249_v35 = vrot.slane %v5015_v6, %v20357_v54  ;;  %v7055_v61 = vsel %vm6902_vm5, %v19786_v51, %v6233_v20  ;;  %v4980_v58 = vrot.slane %v4952_v36, %v19150_v17  ;;  %8084 = vrot.lane.b32.xlu1 %v17466_v37, %s17534_s27 }
 0x38a   : > { %v5033_v62 = vcombine.high %v5029_v59, %v5029_v59  ;;  %v6245_v28 = vrot.slane %v5032_v57, %v20357_v54  ;;  %v6253_v18 = vrot.slane %v5029_v59, %v20357_v54  ;;  %v6257_v49 = vrot.slane %v5031_v10, %v20357_v54 }
 0x38b   : > { %v7056_v22 = vsel %vm6902_vm5, %v19907_v50, %v6237_v63  ;;  %v7057_v27 = vsel %vm6902_vm5, %v25652_v31, %v6241_v11  ;;  %v7059_v32 = vsel %vm6902_vm5, %v19895_v19, %v6249_v35  ;;  %v4981_v33 = vcombine.high %v21505_v4, %v21505_v4 }
 0x38c   : > { %v6261_v14 = vrot.slane %v5033_v62, %v20357_v54  ;;  %v25653_v34 = vcombine.high %v19907_v50, %v19907_v50  ;;  %v7060_v51 = vsel %vm6902_vm5, %v19926_v29, %v6253_v18  ;;  %v25654_v1 = vcombine.high %v19895_v19, %v19895_v19  ;;  %7534 = vrot.lane.b32.xlu0 %v21282_v40, %s17536_s7 }
 0x38d   : > { %v15530_v0 = vcombine.low %v7055_v61, %v7056_v22  ;;  %v15547_v21 = vcombine.low %v7059_v32, %v7060_v51  ;;  %v4982_v55 = vcombine.high %v4966_v47, %v4966_v47  ;;  %v25655_v50 = vcombine.high %v19926_v29, %v19926_v29  ;;  %v8063_v32 = vpop.permute.xlu1 %8062  ;;  %v17468_v51 = vld [vmem:[#allocation2 + $0x169] sm:$0xff] }
 0x38e   : > { %v7058_v52 = vsel %vm6902_vm5, %v25653_v34, %v6245_v28  ;;  %v7061_v12 = vsel %vm6902_vm5, %v25654_v1, %v6257_v49  ;;  %v4983_v53 = vcombine.high %v4973_v16, %v4973_v16  ;;  %v4984_v45 = vcombine.high %v4980_v58, %v4980_v58 }
 0x38f   : > { %v15531_v23 = vcombine.low %v7057_v27, %v7058_v52  ;;  %v7062_v6 = vsel %vm6902_vm5, %v25655_v50, %v6261_v14  ;;  %v6201_v8 = vrot.slane %v21505_v4, %v20357_v54  ;;  %v15538_v19 = vrot.slane %v15530_v0, %v20363_v43  ;;  %v17467_v4 = vld [vmem:[#allocation2 + $0x172] sm:$0xff]  ;;  %v7511_v27 = vpop.permute.xlu0 %7510  ;;  %v21612_v50 = vld [vmem:[#allocation2 + $0x181] sm:$0xff] }
 0x390   : > { %v15548_v20 = vcombine.low %v7061_v12, %v7062_v6  ;;  %v15555_v36 = vrot.slane %v15547_v21, %v20363_v43  ;;  %v6205_v29 = vrot.slane %v4973_v16, %v20357_v54  ;;  %v6209_v59 = vrot.slane %v4981_v33, %v20357_v54  ;;  %8086 = vrot.lane.b32.xlu1 %v17467_v4, %s17534_s27  ;;  %v17469_v21 = vld [vmem:[#allocation2 + $0xe1] sm:$0xff]  ;;  %v21630_v4 = vld [vmem:[#allocation2 + $0x189] sm:$0xff] }
 0x391   : > { %v15545_v30 = vrot.slane %v15531_v23, %v20363_v43  ;;  %v6213_v10 = vrot.slane %v4983_v53, %v20357_v54  ;;  %v6217_v57 = vrot.slane %v4966_v47, %v20357_v54  ;;  %v6221_v35 = vrot.slane %v4980_v58, %v20357_v54  ;;  %v8024_v6 = vld [vmem:[#allocation2 + $0x182] sm:$0xff]  ;;  %8180 = vrot.lane.b32.xlu0 %v21612_v50, %s17535_s28 }
 0x392   : > { %v15562_v11 = vrot.slane %v15548_v20, %v20363_v43  ;;  %v6225_v61 = vrot.slane %v4982_v55, %v20357_v54  ;;  %v6229_v40 = vrot.slane %v4984_v45, %v20357_v54  ;;  %v7047_v16 = vsel %vm6902_vm5, %v19918_v25, %v6201_v8  ;;  %v16832_v20 = vld [vmem:[%s17630_s22 + $0x10] sm:$0xff] }
 0x393   : > { %v15546_v63 = vcombine.low %v15538_v19, %v15545_v30  ;;  %v7048_v62 = vsel %vm6902_vm5, %v19947_v38, %v6205_v29  ;;  %v25656_v47 = vcombine.high %v19918_v25, %v19918_v25  ;;  %v25657_v58 = vcombine.high %v19947_v38, %v19947_v38  ;;  %387 = vst.msk [vmem:[#allocation2 + $0x199] sm:$0xff] %vm346_vm1, %v16832_v20 }
 0x394   : > { %v15563_v18 = vcombine.low %v15555_v36, %v15562_v11  ;;  %v7051_v22 = vsel %vm6902_vm5, %v19936_v39, %v6217_v57  ;;  %v7052_v31 = vsel %vm6902_vm5, %v19956_v7, %v6221_v35  ;;  %v25658_v25 = vcombine.high %v19936_v39, %v19936_v39  ;;  %7280 = vrot.lane.b32.xlu1 %v17468_v51, %s17534_s27  ;;  %v21626_v36 = vpop.f32.mrb[32].mxu1 }
 0x395   : > { %v7049_v28 = vsel %vm6902_vm5, %v25656_v47, %v6209_v59  ;;  %16650 = vst.msk [vmem:[%s20460_s8 + $0x250] sm:$0xff] %vm346_vm1, %v15546_v63  ;;  %v7050_v49 = vsel %vm6902_vm5, %v25657_v58, %v6213_v10  ;;  %v25659_v14 = vcombine.high %v19956_v7, %v19956_v7  ;;  %v15496_v34 = vcombine.low %v7047_v16, %v7048_v62 }
 0x396   : > { %v7053_v33 = vsel %vm6902_vm5, %v25658_v25, %v6225_v61  ;;  %v15497_v52 = vcombine.low %v7049_v28, %v7050_v49  ;;  %16651 = vst.msk [vmem:[%s20460_s8 + $0x258] sm:$0xff] %vm346_vm1, %v15563_v18  ;;  %v15513_v1 = vcombine.low %v7051_v22, %v7052_v31  ;;  %v2113_v37 = vadd.f32 %v21482_v3, %v20821_v60  ;;  %v7188_v61 = vld [vmem:[#allocation2 + $0x180] sm:$0xff] }
 0x397   : > { %v7054_v38 = vsel %vm6902_vm5, %v25659_v14, %v6229_v40  ;;  %v2108_v39 = vadd.f32 %v21482_v3, %v20886_v9  ;;  %v15504_v0 = vrot.slane %v15496_v34, %v20363_v43  ;;  %v7655_v23 = vsel %vm967_vm3, %v21477_v5, %v7511_v27  ;;  %8182 = vrot.lane.b32.xlu0 %v21630_v4, %s17535_s28  ;;  %v7189_v34 = vld [vmem:[#allocation2 + $0x188] sm:$0xff] }
 0x398   : > { %v15514_v12 = vcombine.low %v7053_v33, %v7054_v38  ;;  %v15511_v7 = vrot.slane %v15497_v52, %v20363_v43  ;;  %v21610_v55 = vsel %vm346_vm1, %v17469_v21, %v8063_v32  ;;  %v15521_v60 = vrot.slane %v15513_v1, %v20363_v43  ;;  %17240 = vmatmul.mubr.msk.f32.gmra.mrb[46].mxu0 %vm1008_vm4, %v7655_v23 }
 0x399   : > { %v5083_v9 = vcombine.high %v2113_v37, %v2113_v37  ;;  %v5090_v45 = vrot.slane %v2113_v37, %v19150_v17  ;;  %v5034_v19 = vcombine.high %v2108_v39, %v2108_v39  ;;  %v5041_v5 = vrot.slane %v2108_v39, %v19150_v17  ;;  %8308 = vrot.lane.b32.xlu1 %v8024_v6, %s17536_s7  ;;  %v17470_v6 = vld [vmem:[#allocation2 + $0x171] sm:$0xff] }
 0x39a   : > { %v15528_v53 = vrot.slane %v15514_v12, %v20363_v43  ;;  %v15512_v8 = vcombine.low %v15504_v0, %v15511_v7  ;;  %v21621_v30 = vadd.f32 %v21482_v3, %v20944_v41  ;;  %v25660_v39 = vcombine.high %v19963_v26, %v19963_v26  ;;  %v25661_v7 = vld [vmem:[#allocation46_spill] sm:$0xff] }
 0x39b   : > { %v5097_v59 = vrot.slane %v5083_v9, %v19150_v17  ;;  %v5098_v10 = vcombine.high %v5090_v45, %v5090_v45  ;;  %v5106_v57 = vrot.slane %v5090_v45, %v19150_v17  ;;  %v5048_v41 = vrot.slane %v5034_v19, %v19150_v17  ;;  %7282 = vrot.lane.b32.xlu0 %v17470_v6, %s17534_s27  ;;  %v25671_v6 = vld [vmem:[#allocation72_spill] sm:$0xff] }
 0x39c   : > { %v15529_v29 = vcombine.low %v15521_v60, %v15528_v53  ;;  %16648 = vst.msk [vmem:[%s20460_s8 + $0x240] sm:$0xff] %vm346_vm1, %v15512_v8  ;;  %v5049_v63 = vcombine.high %v5041_v5, %v5041_v5  ;;  %v21638_v11 = vrot.slane %v5041_v5, %v19150_v17  ;;  %v5181_v35 = vcombine.high %v21621_v30, %v21621_v30  ;;  %v8025_v5 = vld [vmem:[#allocation2 + $0x18a] sm:$0xff] }
 0x39d   : > { %v5099_v40 = vcombine.high %v5097_v59, %v5097_v59  ;;  %v5113_v16 = vrot.slane %v5097_v59, %v19150_v17  ;;  %v5120_v62 = vrot.slane %v5098_v10, %v19150_v17  ;;  %v5128_v47 = vcombine.high %v5106_v57, %v5106_v57  ;;  %7408 = vrot.lane.b32.xlu1 %v7188_v61, %s17535_s28 }
 0x39e   : > { %16649 = vst.msk [vmem:[%s20460_s8 + $0x248] sm:$0xff] %vm346_vm1, %v15529_v29  ;;  %v6297_v28 = vrot.slane %v5106_v57, %v20357_v54  ;;  %v5050_v18 = vcombine.high %v5048_v41, %v5048_v41  ;;  %v21648_v58 = vrot.slane %v5048_v41, %v19150_v17  ;;  %v5071_v49 = vrot.slane %v5049_v63, %v19150_v17 }
 0x39f   : > { %v5127_v22 = vrot.slane %v5099_v40, %v19150_v17  ;;  %v5129_v31 = vcombine.high %v5113_v16, %v5113_v16  ;;  %v5130_v27 = vcombine.high %v5120_v62, %v5120_v62  ;;  %v6301_v32 = vrot.slane %v5120_v62, %v20357_v54  ;;  %v16833_v40 = vld [vmem:[%s17630_s22 + $0x18] sm:$0xff]  ;;  %8310 = vrot.lane.b32.xlu0 %v8025_v5, %s17536_s7 }
 0x3a0   : > { %v6305_v25 = vrot.slane %v5128_v47, %v20357_v54  ;;  %v6313_v33 = vrot.slane %v5113_v16, %v20357_v54  ;;  %v7071_v14 = vsel %vm6902_vm5, %v19963_v26, %v6297_v28  ;;  %v5078_v38 = vrot.slane %v5050_v18, %v19150_v17  ;;  %v25663_v26 = vld [vmem:[#allocation27_spill] sm:$0xff]  ;;  %388 = vst.msk [vmem:[#allocation2 + $0x1a1] sm:$0xff] %vm346_vm1, %v16833_v40  ;;  %v21701_v18 = vpop.f32.mrb[33].mxu1 }
 0x3a1   : > { %v5131_v52 = vcombine.high %v5127_v22, %v5127_v22  ;;  %v6309_v51 = vrot.slane %v5130_v27, %v20357_v54  ;;  %v6317_v1 = vrot.slane %v5127_v22, %v20357_v54  ;;  %v6321_v12 = vrot.slane %v5129_v31, %v20357_v54  ;;  %7410 = vrot.lane.b32.xlu1 %v7189_v34, %s17535_s28  ;;  %v21703_v22 = vpop.f32.mrb[32].mxu0 }
 0x3a2   : > { %v7072_v37 = vsel %vm6902_vm5, %v19985_v13, %v6301_v32  ;;  %v7073_v0 = vsel %vm6902_vm5, %v25660_v39, %v6305_v25  ;;  %v7075_v23 = vsel %vm6902_vm5, %v25661_v7, %v6313_v33  ;;  %v5079_v21 = vcombine.high %v21638_v11, %v21638_v11  ;;  %v17471_v25 = vld [vmem:[#allocation2 + $0x182] sm:$0xff] }
 0x3a3   : > { %v6325_v60 = vrot.slane %v5131_v52, %v20357_v54  ;;  %v25662_v53 = vcombine.high %v19985_v13, %v19985_v13  ;;  %v7076_v45 = vsel %vm6902_vm5, %v25663_v26, %v6317_v1  ;;  %v25664_v8 = vcombine.high %v25661_v7, %v25661_v7  ;;  %7536 = vrot.lane.b32.xlu0 %v21612_v50, %s17536_s7 }
 0x3a4   : > { %v15666_v20 = vcombine.low %v7071_v14, %v7072_v37  ;;  %v15683_v59 = vcombine.low %v7075_v23, %v7076_v45  ;;  %v5080_v10 = vcombine.high %v21648_v58, %v21648_v58  ;;  %v25665_v13 = vcombine.high %v25663_v26, %v25663_v26  ;;  %v25670_v23 = vld [vmem:[#allocation5_spill] sm:$0xff] }
 0x3a5   : > { %v7074_v9 = vsel %vm6902_vm5, %v25662_v53, %v6309_v51  ;;  %v7077_v19 = vsel %vm6902_vm5, %v25664_v8, %v6321_v12  ;;  %v5081_v41 = vcombine.high %v5071_v49, %v5071_v49  ;;  %v5082_v63 = vcombine.high %v5078_v38, %v5078_v38  ;;  %8088 = vrot.lane.b32.xlu1 %v17471_v25, %s17534_s27  ;;  %v25667_v12 = vld [vmem:[#allocation43_spill] sm:$0xff]  ;;  %v8157_v53 = vpop.permute.xlu0 %8156 }
 0x3a6   : > { %v15667_v29 = vcombine.low %v7073_v0, %v7074_v9  ;;  %v7078_v57 = vsel %vm6902_vm5, %v25665_v13, %v6325_v60  ;;  %v6265_v61 = vrot.slane %v21638_v11, %v20357_v54  ;;  %v15674_v16 = vrot.slane %v15666_v20, %v20363_v43  ;;  %v17472_v20 = vld [vmem:[#allocation2 + $0x18a] sm:$0xff]  ;;  %v21752_v13 = vpop.permute.xlu1 %7256 }
 0x3a7   : > { %v15684_v47 = vcombine.low %v7077_v19, %v7078_v57  ;;  %v15691_v28 = vrot.slane %v15683_v59, %v20363_v43  ;;  %v6269_v31 = vrot.slane %v5071_v49, %v20357_v54  ;;  %v6273_v11 = vrot.slane %v5079_v21, %v20357_v54  ;;  %v25666_v49 = vld [vmem:[#allocation8_spill] sm:$0xff]  ;;  %7538 = vrot.lane.b32.xlu0 %v21630_v4, %s17536_s7 }
 0x3a8   : > { %v15681_v62 = vrot.slane %v15667_v29, %v20363_v43  ;;  %v6277_v27 = vrot.slane %v5081_v41, %v20357_v54  ;;  %v6281_v32 = vrot.slane %v21648_v58, %v20357_v54  ;;  %v6285_v34 = vrot.slane %v5078_v38, %v20357_v54  ;;  %v8026_v4 = vld [vmem:[#allocation2 + $0x19a] sm:$0xff] }
 0x3a9   : > { %v15698_v14 = vrot.slane %v15684_v47, %v20363_v43  ;;  %v6289_v52 = vrot.slane %v5080_v10, %v20357_v54  ;;  %v6293_v51 = vrot.slane %v5082_v63, %v20357_v54  ;;  %v7063_v1 = vsel %vm6902_vm5, %v25666_v49, %v6265_v61  ;;  %8090 = vrot.lane.b32.xlu1 %v17472_v20, %s17534_s27 }
 0x3aa   : > { %v15682_v33 = vcombine.low %v15674_v16, %v15681_v62  ;;  %v7064_v37 = vsel %vm6902_vm5, %v25667_v12, %v6269_v31  ;;  %v25668_v58 = vcombine.high %v25666_v49, %v25666_v49  ;;  %v25669_v38 = vcombine.high %v25667_v12, %v25667_v12  ;;  %v21768_v31 = vld [vmem:[#allocation2 + $0x199] sm:$0xff] }
 0x3ab   : > { %v15699_v0 = vcombine.low %v15691_v28, %v15698_v14  ;;  %v7067_v21 = vsel %vm6902_vm5, %v25670_v23, %v6281_v32  ;;  %v7068_v60 = vsel %vm6902_vm5, %v25671_v6, %v6285_v34  ;;  %v25672_v9 = vcombine.high %v25670_v23, %v25670_v23  ;;  %8184 = vrot.lane.b32.xlu0 %v21768_v31, %s17535_s28  ;;  %v25675_v23 = vld [vmem:[#allocation30_spill] sm:$0xff] }
 0x3ac   : > { %v7065_v39 = vsel %vm6902_vm5, %v25668_v58, %v6273_v11  ;;  %16658 = vst.msk [vmem:[%s20460_s8 + $0x290] sm:$0xff] %vm346_vm1, %v15682_v33  ;;  %v7066_v7 = vsel %vm6902_vm5, %v25669_v38, %v6277_v27  ;;  %v25673_v45 = vcombine.high %v25671_v6, %v25671_v6  ;;  %v15632_v19 = vcombine.low %v7063_v1, %v7064_v37  ;;  %v21784_v58 = vpop.permute.xlu1 %8284  ;;  %v25674_v38 = vld [vmem:[#allocation6_spill] sm:$0xff] }
 0x3ad   : > { %v7069_v26 = vsel %vm6902_vm5, %v25672_v9, %v6289_v52  ;;  %v15633_v5 = vcombine.low %v7065_v39, %v7066_v7  ;;  %16659 = vst.msk [vmem:[%s20460_s8 + $0x298] sm:$0xff] %vm346_vm1, %v15699_v0  ;;  %v15649_v29 = vcombine.low %v7067_v21, %v7068_v60  ;;  %v5188_v50 = vrot.slane %v21621_v30, %v19150_v17  ;;  %v21794_v6 = vld [vmem:[#allocation2 + $0x1a1] sm:$0xff]  ;;  %v25676_v9 = vld [vmem:[#allocation44_spill] sm:$0xff] }
 0x3ae   : > { %v7070_v8 = vsel %vm6902_vm5, %v25673_v45, %v6293_v51  ;;  %v5195_v10 = vrot.slane %v5181_v35, %v19150_v17  ;;  %v15640_v57 = vrot.slane %v15632_v19, %v20363_v43  ;;  %v2118_v63 = vadd.f32 %v21482_v3, %v20983_v48  ;;  %v21778_v51 = vpop.permute.xlu0 %8158  ;;  %v25677_v45 = vld [vmem:[#allocation9_spill] sm:$0xff]  ;;  %v7190_v19 = vld [vmem:[#allocation2 + $0x198] sm:$0xff] }
 0x3af   : > { %v15650_v59 = vcombine.low %v7069_v26, %v7070_v8  ;;  %v15647_v41 = vrot.slane %v15633_v5, %v20363_v43  ;;  %v21760_v61 = vsel %vm934_vm2, %v21498_v15, %v8157_v53  ;;  %v15657_v40 = vrot.slane %v15649_v29, %v20363_v43  ;;  %v17473_v15 = vld [vmem:[#allocation2 + $0x181] sm:$0xff]  ;;  %v21803_v5 = vpop.f32.mrb[33].mxu0  ;;  %8186 = vrot.lane.b32.xlu0 %v21794_v6, %s17535_s28 }
 0x3b0   : > { %v5196_v30 = vcombine.high %v5188_v50, %v5188_v50  ;;  %v5197_v35 = vcombine.high %v5195_v10, %v5195_v10  ;;  %v5204_v47 = vrot.slane %v5188_v50, %v19150_v17  ;;  %v5211_v28 = vrot.slane %v5195_v10, %v19150_v17  ;;  %7284 = vrot.lane.b32.xlu1 %v17473_v15, %s17534_s27 }
 0x3b1   : > { %v15664_v16 = vrot.slane %v15650_v59, %v20363_v43  ;;  %v15648_v62 = vcombine.low %v15640_v57, %v15647_v41  ;;  %v5132_v48 = vcombine.high %v2118_v63, %v2118_v63  ;;  %v5139_v25 = vrot.slane %v2118_v63, %v19150_v17 }
 0x3b2   : > { %v5218_v27 = vrot.slane %v5196_v30, %v19150_v17  ;;  %v5225_v32 = vrot.slane %v5197_v35, %v19150_v17  ;;  %v5226_v33 = vcombine.high %v5204_v47, %v5204_v47  ;;  %v5227_v14 = vcombine.high %v5211_v28, %v5211_v28 }
 0x3b3   : > { %v15665_v11 = vcombine.low %v15657_v40, %v15664_v16  ;;  %16656 = vst.msk [vmem:[%s20460_s8 + $0x280] sm:$0xff] %vm346_vm1, %v15648_v62  ;;  %v6361_v34 = vrot.slane %v5204_v47, %v20357_v54  ;;  %v6377_v52 = vrot.slane %v5211_v28, %v20357_v54  ;;  %v25678_v20 = vcombine.high %v25674_v38, %v25674_v38 }
 0x3b4   : > { %v5228_v49 = vcombine.high %v5218_v27, %v5218_v27  ;;  %v5229_v1 = vcombine.high %v5225_v32, %v5225_v32  ;;  %v6365_v12 = vrot.slane %v5218_v27, %v20357_v54  ;;  %v6381_v37 = vrot.slane %v5225_v32, %v20357_v54  ;;  %8312 = vrot.lane.b32.xlu1 %v8026_v4, %s17536_s7 }
 0x3b5   : > { %16657 = vst.msk [vmem:[%s20460_s8 + $0x288] sm:$0xff] %vm346_vm1, %v15665_v11  ;;  %v6369_v39 = vrot.slane %v5226_v33, %v20357_v54  ;;  %v6385_v0 = vrot.slane %v5227_v14, %v20357_v54  ;;  %v7087_v7 = vsel %vm6902_vm5, %v25674_v38, %v6361_v34  ;;  %v7091_v21 = vsel %vm6902_vm5, %v25675_v23, %v6377_v52  ;;  %v21826_v11 = vpop.permute.xlu0 %7258  ;;  %v21832_v33 = vpop.permute.xlu1 %7384  ;;  %v7191_v14 = vld [vmem:[#allocation2 + $0x1a0] sm:$0xff]  ;;  %v17475_v38 = vld [vmem:[#allocation2 + $0x189] sm:$0xff] }
 0x3b6   : > { %v6373_v60 = vrot.slane %v5228_v49, %v20357_v54  ;;  %v6389_v53 = vrot.slane %v5229_v1, %v20357_v54  ;;  %v7088_v26 = vsel %vm6902_vm5, %v25676_v9, %v6365_v12  ;;  %v7092_v8 = vsel %vm6902_vm5, %v25677_v45, %v6381_v37  ;;  %v17474_v49 = vld [vmem:[#allocation2 + $0xd8] sm:$0xff]  ;;  %7286 = vrot.lane.b32.xlu0 %v17475_v38, %s17534_s27 }
 0x3b7   : > { %v7089_v29 = vsel %vm6902_vm5, %v25678_v20, %v6369_v39  ;;  %v25679_v59 = vcombine.high %v25675_v23, %v25675_v23  ;;  %v15802_v10 = vcombine.low %v7087_v7, %v7088_v26  ;;  %v15819_v57 = vcombine.low %v7091_v21, %v7092_v8  ;;  %v21844_v7 = vpop.f32.mrb[34].mxu1  ;;  %v25682_v20 = vld [vmem:[#allocation78_spill] sm:$0xff] }
 0x3b8   : > { %v25680_v41 = vcombine.high %v25676_v9, %v25676_v9  ;;  %v25681_v40 = vcombine.high %v25677_v45, %v25677_v45  ;;  %v5146_v30 = vrot.slane %v5132_v48, %v19150_v17  ;;  %v5147_v35 = vcombine.high %v5139_v25, %v5139_v25  ;;  %7412 = vrot.lane.b32.xlu1 %v7190_v19, %s17535_s28 }
 0x3b9   : > { %v7093_v50 = vsel %vm6902_vm5, %v25679_v59, %v6385_v0  ;;  %v15810_v47 = vrot.slane %v15802_v10, %v20363_v43  ;;  %v15827_v15 = vrot.slane %v15819_v57, %v20363_v43  ;;  %v5155_v32 = vrot.slane %v5139_v25, %v19150_v17  ;;  %v25683_v59 = vld [vmem:[#allocation31_spill] sm:$0xff]  ;;  %v21862_v10 = vpop.permute.xlu0 %8286 }
 0x3ba   : > { %v7090_v63 = vsel %vm6902_vm5, %v25680_v41, %v6373_v60  ;;  %v7094_v16 = vsel %vm6902_vm5, %v25681_v40, %v6389_v53  ;;  %v5148_v27 = vcombine.high %v5146_v30, %v5146_v30  ;;  %v5162_v4 = vrot.slane %v5146_v30, %v19150_v17  ;;  %v8027_v53 = vld [vmem:[#allocation2 + $0x1a2] sm:$0xff]  ;;  %v25686_v30 = vld [vmem:[#allocation47_spill] sm:$0xff] }
 0x3bb   : > { %v15803_v62 = vcombine.low %v7089_v29, %v7090_v63  ;;  %v15820_v28 = vcombine.low %v7093_v50, %v7094_v16  ;;  %v5169_v48 = vrot.slane %v5147_v35, %v19150_v17  ;;  %v21838_v1 = vsel %vm346_vm1, %v17474_v49, %v21752_v13  ;;  %8314 = vrot.lane.b32.xlu0 %v8027_v53, %s17536_s7 }
 0x3bc   : > { %v2133_v12 = vadd.f32 %v21482_v3, %v21062_v42  ;;  %v5176_v25 = vrot.slane %v5148_v27, %v19150_v17  ;;  %v5177_v37 = vcombine.high %v5155_v32, %v5155_v32  ;;  %v5178_v39 = vcombine.high %v5162_v4, %v5162_v4  ;;  %7414 = vrot.lane.b32.xlu1 %v7191_v14, %s17535_s28 }
 0x3bd   : > { %v15817_v34 = vrot.slane %v15803_v62, %v20363_v43  ;;  %v15834_v52 = vrot.slane %v15820_v28, %v20363_v43  ;;  %v5179_v0 = vcombine.high %v5169_v48, %v5169_v48  ;;  %v6329_v13 = vrot.slane %v5155_v32, %v20357_v54  ;;  %v21875_v62 = vpop.permute.xlu1 %7386 }
 0x3be   : > { %v6333_v60 = vrot.slane %v5169_v48, %v20357_v54  ;;  %v5180_v42 = vcombine.high %v5176_v25, %v5176_v25  ;;  %v6337_v9 = vrot.slane %v5177_v37, %v20357_v54  ;;  %v6345_v45 = vrot.slane %v5162_v4, %v20357_v54 }
 0x3bf   : > { %v15818_v23 = vcombine.low %v15810_v47, %v15817_v34  ;;  %v15835_v21 = vcombine.low %v15827_v15, %v15834_v52  ;;  %v6341_v26 = vrot.slane %v5179_v0, %v20357_v54  ;;  %v6349_v8 = vrot.slane %v5176_v25, %v20357_v54  ;;  %v25687_v47 = vld [vmem:[#allocation80_spill] sm:$0xff]  ;;  %7540 = vrot.lane.b32.xlu0 %v21768_v31, %s17536_s7 }
 0x3c0   : > { %v6353_v19 = vrot.slane %v5178_v39, %v20357_v54  ;;  %v7079_v29 = vsel %vm6902_vm5, %v25682_v20, %v6329_v13  ;;  %v7080_v50 = vsel %vm6902_vm5, %v25683_v59, %v6333_v60  ;;  %v6357_v57 = vrot.slane %v5180_v42, %v20357_v54  ;;  %7542 = vrot.lane.b32.xlu1 %v21794_v6, %s17536_s7 }
 0x3c1   : > { %16666 = vst.msk [vmem:[%s20460_s8 + $0x2d0] sm:$0xff] %vm346_vm1, %v15818_v23  ;;  %16667 = vst.msk [vmem:[%s20460_s8 + $0x2d8] sm:$0xff] %vm346_vm1, %v15835_v21  ;;  %v25684_v41 = vcombine.high %v25682_v20, %v25682_v20  ;;  %v25685_v40 = vcombine.high %v25683_v59, %v25683_v59  ;;  %v7083_v35 = vsel %vm6902_vm5, %v25686_v30, %v6345_v45  ;;  %v21910_v31 = vpop.permute.xlu1 %8064 }
 0x3c2   : > { %v7084_v28 = vsel %vm6902_vm5, %v25687_v47, %v6349_v8  ;;  %v25688_v15 = vcombine.high %v25686_v30, %v25686_v30  ;;  %v15768_v32 = vcombine.low %v7079_v29, %v7080_v50  ;;  %v25689_v48 = vcombine.high %v25687_v47, %v25687_v47 }
 0x3c3   : > { %v7081_v63 = vsel %vm6902_vm5, %v25684_v41, %v6337_v9  ;;  %v7082_v16 = vsel %vm6902_vm5, %v25685_v40, %v6341_v26  ;;  %v15785_v34 = vcombine.low %v7083_v35, %v7084_v28  ;;  %v5279_v52 = vcombine.high %v2133_v12, %v2133_v12  ;;  %v21906_v9 = vpop.f32.mrb[34].mxu0  ;;  %v25690_v35 = vld [vmem:[#allocation48_spill] sm:$0xff] }
 0x3c4   : > { %v7085_v27 = vsel %vm6902_vm5, %v25688_v15, %v6353_v19  ;;  %v15769_v4 = vcombine.low %v7081_v63, %v7082_v16  ;;  %v7086_v14 = vsel %vm6902_vm5, %v25689_v48, %v6357_v57  ;;  %v5286_v49 = vrot.slane %v2133_v12, %v19150_v17  ;;  %v21900_v12 = vpop.f32.mrb[35].mxu1  ;;  %v25691_v48 = vld [vmem:[#allocation82_spill] sm:$0xff] }
 0x3c5   : > { %v15776_v25 = vrot.slane %v15768_v32, %v20363_v43  ;;  %v15786_v39 = vcombine.low %v7085_v27, %v7086_v14  ;;  %v2128_v0 = vadd.f32 %v21482_v3, %v21096_v46  ;;  %v15793_v38 = vrot.slane %v15785_v34, %v20363_v43  ;;  %v21904_v46 = vpop.permute.xlu0 %7512 }
 0x3c6   : > { %v15783_v37 = vrot.slane %v15769_v4, %v20363_v43  ;;  %v5293_v6 = vrot.slane %v5279_v52, %v19150_v17  ;;  %v5294_v23 = vcombine.high %v5286_v49, %v5286_v49  ;;  %v5302_v21 = vrot.slane %v5286_v49, %v19150_v17  ;;  %v25693_v49 = vld [vmem:[#allocation49_spill] sm:$0xff] }
 0x3c7   : > { %v15800_v60 = vrot.slane %v15786_v39, %v20363_v43  ;;  %v5230_v53 = vcombine.high %v2128_v0, %v2128_v0  ;;  %v5237_v42 = vrot.slane %v2128_v0, %v19150_v17  ;;  %v25692_v34 = vcombine.high %v25690_v35, %v25690_v35 }
 0x3c8   : > { %v15784_v13 = vcombine.low %v15776_v25, %v15783_v37  ;;  %v5295_v26 = vcombine.high %v5293_v6, %v5293_v6  ;;  %v5309_v45 = vrot.slane %v5293_v6, %v19150_v17  ;;  %v5316_v8 = vrot.slane %v5294_v23, %v19150_v17  ;;  %v25695_v23 = vld [vmem:[#allocation98_spill] sm:$0xff] }
 0x3c9   : > { %v5324_v19 = vcombine.high %v5302_v21, %v5302_v21  ;;  %v15801_v20 = vcombine.low %v15793_v38, %v15800_v60  ;;  %v6425_v29 = vrot.slane %v5302_v21, %v20357_v54  ;;  %v5244_v59 = vrot.slane %v5230_v53, %v19150_v17  ;;  %v21936_v39 = vpop.permute.xlu0 %7514  ;;  %v21949_v53 = vpop.permute.xlu1 %8066 }
 0x3ca   : > { %16664 = vst.msk [vmem:[%s20460_s8 + $0x2c0] sm:$0xff] %vm346_vm1, %v15784_v13  ;;  %v5245_v50 = vcombine.high %v5237_v42, %v5237_v42  ;;  %v5323_v57 = vrot.slane %v5295_v26, %v19150_v17  ;;  %v5325_v41 = vcombine.high %v5309_v45, %v5309_v45  ;;  %v5326_v63 = vcombine.high %v5316_v8, %v5316_v8 }
 0x3cb   : > { %v6429_v40 = vrot.slane %v5316_v8, %v20357_v54  ;;  %16665 = vst.msk [vmem:[%s20460_s8 + $0x2c8] sm:$0xff] %vm346_vm1, %v15801_v20  ;;  %v6433_v16 = vrot.slane %v5324_v19, %v20357_v54  ;;  %v6441_v30 = vrot.slane %v5309_v45, %v20357_v54  ;;  %v7103_v47 = vsel %vm6902_vm5, %v25690_v35, %v6425_v29 }
 0x3cc   : > { %v5246_v28 = vcombine.high %v5244_v59, %v5244_v59  ;;  %v5327_v15 = vcombine.high %v5323_v57, %v5323_v57  ;;  %v6437_v27 = vrot.slane %v5326_v63, %v20357_v54  ;;  %v6445_v32 = vrot.slane %v5323_v57, %v20357_v54 }
 0x3cd   : > { %v6449_v4 = vrot.slane %v5325_v41, %v20357_v54  ;;  %v7104_v14 = vsel %vm6902_vm5, %v25691_v48, %v6429_v40  ;;  %v7105_v52 = vsel %vm6902_vm5, %v25692_v34, %v6433_v16  ;;  %v7107_v25 = vsel %vm6902_vm5, %v25693_v49, %v6441_v30 }
 0x3ce   : > { %v5253_v37 = vrot.slane %v5237_v42, %v19150_v17  ;;  %v6453_v0 = vrot.slane %v5327_v15, %v20357_v54  ;;  %v25694_v38 = vcombine.high %v25691_v48, %v25691_v48  ;;  %v7108_v21 = vsel %vm6902_vm5, %v25695_v23, %v6445_v32 }
 0x3cf   : > { %v25696_v13 = vcombine.high %v25693_v49, %v25693_v49  ;;  %v15938_v42 = vcombine.low %v7103_v47, %v7104_v14  ;;  %v15955_v45 = vcombine.low %v7107_v25, %v7108_v21  ;;  %v5260_v8 = vrot.slane %v5244_v59, %v19150_v17  ;;  %v21971_v49 = vpop.permute.xlu1 %7260 }
 0x3d0   : > { %v7106_v6 = vsel %vm6902_vm5, %v25694_v38, %v6437_v27  ;;  %v25697_v19 = vcombine.high %v25695_v23, %v25695_v23  ;;  %v5267_v29 = vrot.slane %v5245_v50, %v19150_v17  ;;  %v5274_v57 = vrot.slane %v5246_v28, %v19150_v17 }
 0x3d1   : > { %v7109_v60 = vsel %vm6902_vm5, %v25696_v13, %v6449_v4  ;;  %v15939_v26 = vcombine.low %v7105_v52, %v7106_v6  ;;  %v5275_v41 = vcombine.high %v5253_v37, %v5253_v37  ;;  %v15946_v63 = vrot.slane %v15938_v42, %v20363_v43  ;;  %v21965_v4 = vpop.permute.xlu0 %8160  ;;  %v25699_v6 = vld [vmem:[#allocation99_spill] sm:$0xff] }
 0x3d2   : > { %v7110_v20 = vsel %vm6902_vm5, %v25697_v19, %v6453_v0  ;;  %v15963_v30 = vrot.slane %v15955_v45, %v20363_v43  ;;  %v5276_v35 = vcombine.high %v5260_v8, %v5260_v8  ;;  %v5277_v59 = vcombine.high %v5267_v29, %v5267_v29  ;;  %v25698_v0 = vld [vmem:[#allocation32_spill] sm:$0xff] }
 0x3d3   : > { %v15953_v40 = vrot.slane %v15939_v26, %v20363_v43  ;;  %v15956_v16 = vcombine.low %v7109_v60, %v7110_v20  ;;  %v5278_v47 = vcombine.high %v5274_v57, %v5274_v57  ;;  %v6393_v15 = vrot.slane %v5253_v37, %v20357_v54  ;;  %v25702_v26 = vld [vmem:[#allocation11_spill] sm:$0xff] }
 0x3d4   : > { %v6397_v50 = vrot.slane %v5267_v29, %v20357_v54  ;;  %v6401_v28 = vrot.slane %v5275_v41, %v20357_v54  ;;  %v6405_v48 = vrot.slane %v5277_v59, %v20357_v54  ;;  %v6409_v14 = vrot.slane %v5260_v8, %v20357_v54  ;;  %v25703_v8 = vld [vmem:[#allocation100_spill] sm:$0xff] }
 0x3d5   : > { %v15954_v27 = vcombine.low %v15946_v63, %v15953_v40  ;;  %v15970_v32 = vrot.slane %v15956_v16, %v20363_v43  ;;  %v6413_v34 = vrot.slane %v5274_v57, %v20357_v54  ;;  %v6417_v52 = vrot.slane %v5276_v35, %v20357_v54  ;;  %v22002_v16 = vpop.f32.mrb[35].mxu0 }
 0x3d6   : > { %v6421_v37 = vrot.slane %v5278_v47, %v20357_v54  ;;  %v7095_v38 = vsel %vm6902_vm5, %v25698_v0, %v6393_v15  ;;  %v7096_v23 = vsel %vm6902_vm5, %v25699_v6, %v6397_v50  ;;  %v25700_v21 = vcombine.high %v25698_v0, %v25698_v0  ;;  %v25706_v50 = vld [vmem:[#allocation90_spill] sm:$0xff] }
 0x3d7   : > { %v15971_v25 = vcombine.low %v15963_v30, %v15970_v32  ;;  %16674 = vst.msk [vmem:[%s20460_s8 + $0x310] sm:$0xff] %vm346_vm1, %v15954_v27  ;;  %v25701_v60 = vcombine.high %v25699_v6, %v25699_v6  ;;  %v7099_v45 = vsel %vm6902_vm5, %v25702_v26, %v6409_v14  ;;  %v7100_v19 = vsel %vm6902_vm5, %v25703_v8, %v6413_v34  ;;  %v22032_v14 = vpop.permute.xlu1 %8288  ;;  %v25707_v6 = vld [vmem:[#allocation53_spill] sm:$0xff] }
 0x3d8   : > { %v7097_v13 = vsel %vm6902_vm5, %v25700_v21, %v6401_v28  ;;  %v25704_v20 = vcombine.high %v25702_v26, %v25702_v26  ;;  %v25705_v57 = vcombine.high %v25703_v8, %v25703_v8  ;;  %v15904_v63 = vcombine.low %v7095_v38, %v7096_v23 }
 0x3d9   : > { %v7098_v42 = vsel %vm6902_vm5, %v25701_v60, %v6405_v48  ;;  %16675 = vst.msk [vmem:[%s20460_s8 + $0x318] sm:$0xff] %vm346_vm1, %v15971_v25  ;;  %v15921_v30 = vcombine.low %v7099_v45, %v7100_v19  ;;  %v22007_v59 = vsel %vm934_vm2, %v21610_v55, %v21778_v51  ;;  %v8428_v47 = vsel %vm967_vm3, %v21760_v61, %v21784_v58  ;;  %v22019_v48 = vpop.permute.xlu0 %8162  ;;  %v17476_v61 = vld [vmem:[#allocation2 + $0xe0] sm:$0xff] }
 0x3da   : > { %v7101_v29 = vsel %vm6902_vm5, %v25704_v20, %v6417_v52  ;;  %v7102_v41 = vsel %vm6902_vm5, %v25705_v57, %v6421_v37  ;;  %v15905_v40 = vcombine.low %v7097_v13, %v7098_v42  ;;  %v15912_v15 = vrot.slane %v15904_v63, %v20363_v43  ;;  %17294 = vmatprep.mubr.msk.f32.mxu1 %vm1008_vm4, %v8428_v47 }
 0x3db   : > { %v15922_v35 = vcombine.low %v7101_v29, %v7102_v41  ;;  %v2143_v32 = vadd.f32 %v21482_v3, %v21201_v2  ;;  %v2138_v28 = vadd.f32 %v21482_v3, %v25706_v50  ;;  %v15929_v55 = vrot.slane %v15921_v30, %v20363_v43  ;;  %v22067_v30 = vpop.permute.xlu1 %7388 }
 0x3dc   : > { %v15919_v27 = vrot.slane %v15905_v40, %v20363_v43  ;;  %v22025_v58 = vsel %vm346_vm1, %v17476_v61, %v21826_v11  ;;  %v22030_v2 = vsel %vm934_vm2, %v21838_v1, %v21832_v33  ;;  %v22038_v11 = vadd.f32 %v21482_v3, %v25707_v6  ;;  %v22044_v33 = vpop.f32.mrb[36].mxu1 }
 0x3dd   : > { %v15936_v51 = vrot.slane %v15922_v35, %v20363_v43  ;;  %v5377_v52 = vcombine.high %v2143_v32, %v2143_v32  ;;  %v5384_v25 = vrot.slane %v2143_v32, %v19150_v17  ;;  %v5328_v37 = vcombine.high %v2138_v28, %v2138_v28  ;;  %25708 = vst [vmem:[#allocation38_spill] sm:$0xff] %v22044_v33  ;;  %v22062_v29 = vpop.permute.xlu0 %7262  ;;  %v22076_v61 = vpop.f32.mrb[37].mxu1 }
 0x3de   : > { %v15920_v34 = vcombine.low %v15912_v15, %v15919_v27  ;;  %v5335_v38 = vrot.slane %v2138_v28, %v19150_v17  ;;  %v22042_v23 = vadd.f32 %v21482_v3, %v21322_v56  ;;  %v5475_v56 = vcombine.high %v22038_v11, %v22038_v11  ;;  %v25709_v28 = vld [vmem:[#allocation33_spill] sm:$0xff]  ;;  %25710 = vst [vmem:[#allocation10_spill] sm:$0xff] %v22076_v61 }
 0x3df   : > { %v15937_v0 = vcombine.low %v15929_v55, %v15936_v51  ;;  %v5391_v1 = vrot.slane %v5377_v52, %v19150_v17  ;;  %v5392_v21 = vcombine.high %v5384_v25, %v5384_v25  ;;  %v5400_v13 = vrot.slane %v5384_v25, %v19150_v17 }
 0x3e0   : > { %16672 = vst.msk [vmem:[%s20460_s8 + $0x300] sm:$0xff] %vm346_vm1, %v15920_v34  ;;  %v5342_v60 = vrot.slane %v5328_v37, %v19150_v17  ;;  %v5343_v42 = vcombine.high %v5335_v38, %v5335_v38  ;;  %v5351_v26 = vrot.slane %v5335_v38, %v19150_v17  ;;  %v22058_v3 = vrot.slane %v22038_v11, %v19150_v17  ;;  %v25712_v38 = vld [vmem:[#allocation84_spill] sm:$0xff] }
 0x3e1   : > { %16673 = vst.msk [vmem:[%s20460_s8 + $0x308] sm:$0xff] %vm346_vm1, %v15937_v0  ;;  %v5393_v45 = vcombine.high %v5391_v1, %v5391_v1  ;;  %v5407_v8 = vrot.slane %v5391_v1, %v19150_v17  ;;  %v5414_v19 = vrot.slane %v5392_v21, %v19150_v17  ;;  %v5422_v20 = vcombine.high %v5400_v13, %v5400_v13  ;;  %v22081_v0 = vpop.f32.mrb[36].mxu0 }
 0x3e2   : > { %v6489_v57 = vrot.slane %v5400_v13, %v20357_v54  ;;  %v5344_v41 = vcombine.high %v5342_v60, %v5342_v60  ;;  %v5358_v63 = vrot.slane %v5342_v60, %v19150_v17  ;;  %v5365_v40 = vrot.slane %v5343_v42, %v19150_v17  ;;  %25711 = vst [vmem:[#allocation50_spill] sm:$0xff] %v22081_v0  ;;  %v25714_v13 = vld [vmem:[#allocation12_spill] sm:$0xff] }
 0x3e3   : > { %v5421_v35 = vrot.slane %v5393_v45, %v19150_v17  ;;  %v5423_v47 = vcombine.high %v5407_v8, %v5407_v8  ;;  %v5424_v15 = vcombine.high %v5414_v19, %v5414_v19  ;;  %v6493_v27 = vrot.slane %v5414_v19, %v20357_v54 }
 0x3e4   : > { %v6497_v32 = vrot.slane %v5422_v20, %v20357_v54  ;;  %v6505_v50 = vrot.slane %v5407_v8, %v20357_v54  ;;  %v7119_v55 = vsel %vm6902_vm5, %v25709_v28, %v6489_v57  ;;  %v5372_v51 = vrot.slane %v5344_v41, %v19150_v17  ;;  %v25716_v20 = vld [vmem:[#allocation102_spill] sm:$0xff] }
 0x3e5   : > { %v5425_v34 = vcombine.high %v5421_v35, %v5421_v35  ;;  %v6501_v52 = vrot.slane %v5424_v15, %v20357_v54  ;;  %v6509_v25 = vrot.slane %v5421_v35, %v20357_v54  ;;  %v6513_v37 = vrot.slane %v5423_v47, %v20357_v54  ;;  %v22102_v47 = vpop.permute.xlu0 %8290 }
 0x3e6   : > { %v7120_v6 = vsel %vm6902_vm5, %v25712_v38, %v6493_v27  ;;  %v25713_v1 = vcombine.high %v25709_v28, %v25709_v28  ;;  %v7123_v60 = vsel %vm6902_vm5, %v25714_v13, %v6505_v50  ;;  %v5373_v42 = vcombine.high %v5351_v26, %v5351_v26  ;;  %v22104_v28 = vpop.permute.xlu1 %7390 }
 0x3e7   : > { %v6517_v45 = vrot.slane %v5425_v34, %v20357_v54  ;;  %v25715_v8 = vcombine.high %v25712_v38, %v25712_v38  ;;  %v7124_v57 = vsel %vm6902_vm5, %v25716_v20, %v6509_v25  ;;  %v25717_v41 = vcombine.high %v25714_v13, %v25714_v13 }
 0x3e8   : > { %v7121_v21 = vsel %vm6902_vm5, %v25713_v1, %v6497_v32  ;;  %v16074_v15 = vcombine.low %v7119_v55, %v7120_v6  ;;  %v16091_v32 = vcombine.low %v7123_v60, %v7124_v57  ;;  %v5374_v50 = vcombine.high %v5358_v63, %v5358_v63 }
 0x3e9   : > { %v7122_v19 = vsel %vm6902_vm5, %v25715_v8, %v6501_v52  ;;  %v7125_v35 = vsel %vm6902_vm5, %v25717_v41, %v6513_v37  ;;  %v25718_v34 = vcombine.high %v25716_v20, %v25716_v20  ;;  %v5375_v38 = vcombine.high %v5365_v40, %v5365_v40 }
 0x3ea   : > { %v16075_v27 = vcombine.low %v7121_v21, %v7122_v19  ;;  %v5376_v25 = vcombine.high %v5372_v51, %v5372_v51  ;;  %v6457_v1 = vrot.slane %v5351_v26, %v20357_v54  ;;  %v16082_v13 = vrot.slane %v16074_v15, %v20363_v43 }
 0x3eb   : > { %v7126_v52 = vsel %vm6902_vm5, %v25718_v34, %v6517_v45  ;;  %v16099_v55 = vrot.slane %v16091_v32, %v20363_v43  ;;  %v6461_v6 = vrot.slane %v5365_v40, %v20357_v54  ;;  %v6465_v21 = vrot.slane %v5373_v42, %v20357_v54  ;;  %v25720_v40 = vld [vmem:[#allocation13_spill] sm:$0xff]  ;;  %v22130_v32 = vpop.permute.xlu0 %7516  ;;  %v22132_v34 = vpop.f32.mrb[37].mxu0 }
 0x3ec   : > { %v16089_v37 = vrot.slane %v16075_v27, %v20363_v43  ;;  %v16092_v8 = vcombine.low %v7125_v35, %v7126_v52  ;;  %v6469_v60 = vrot.slane %v5375_v38, %v20357_v54  ;;  %v6473_v45 = vrot.slane %v5358_v63, %v20357_v54  ;;  %v25719_v35 = vld [vmem:[#allocation101_spill] sm:$0xff]  ;;  %25722 = vst [vmem:[#allocation35_spill] sm:$0xff] %v22132_v34  ;;  %v25724_v38 = vld [vmem:[#allocation34_spill] sm:$0xff] }
 0x3ed   : > { %v6477_v26 = vrot.slane %v5372_v51, %v20357_v54  ;;  %v6481_v57 = vrot.slane %v5374_v50, %v20357_v54  ;;  %v6485_v41 = vrot.slane %v5376_v25, %v20357_v54  ;;  %v7111_v15 = vsel %vm6902_vm5, %v25719_v35, %v6457_v1  ;;  %v25725_v1 = vld [vmem:[#allocation103_spill] sm:$0xff] }
 0x3ee   : > { %v16090_v19 = vcombine.low %v16082_v13, %v16089_v37  ;;  %v16106_v20 = vrot.slane %v16092_v8, %v20363_v43  ;;  %v7112_v42 = vsel %vm6902_vm5, %v25720_v40, %v6461_v6  ;;  %v25721_v27 = vcombine.high %v25719_v35, %v25719_v35  ;;  %v22144_v37 = vpop.permute.xlu1 %8068 }
 0x3ef   : > { %v25723_v50 = vcombine.high %v25720_v40, %v25720_v40  ;;  %v7115_v25 = vsel %vm6902_vm5, %v25724_v38, %v6473_v45  ;;  %v7116_v13 = vsel %vm6902_vm5, %v25725_v1, %v6477_v26  ;;  %v25726_v8 = vcombine.high %v25724_v38, %v25724_v38  ;;  %v22173_v38 = vpop.permute.xlu0 %7518 }
 0x3f0   : > { %v7113_v63 = vsel %vm6902_vm5, %v25721_v27, %v6465_v21  ;;  %v16107_v51 = vcombine.low %v16099_v55, %v16106_v20  ;;  %16682 = vst.msk [vmem:[%s20460_s8 + $0x350] sm:$0xff] %vm346_vm1, %v16090_v19  ;;  %v25727_v6 = vcombine.high %v25725_v1, %v25725_v1  ;;  %v16040_v19 = vcombine.low %v7111_v15, %v7112_v42 }
 0x3f1   : > { %v7114_v52 = vsel %vm6902_vm5, %v25723_v50, %v6469_v60  ;;  %v7117_v55 = vsel %vm6902_vm5, %v25726_v8, %v6481_v57  ;;  %v16057_v45 = vcombine.low %v7115_v25, %v7116_v13  ;;  %v5489_v26 = vrot.slane %v5475_v56, %v19150_v17 }
 0x3f2   : > { %v7118_v21 = vsel %vm6902_vm5, %v25727_v6, %v6485_v41  ;;  %v16041_v60 = vcombine.low %v7113_v63, %v7114_v52  ;;  %16683 = vst.msk [vmem:[%s20460_s8 + $0x358] sm:$0xff] %vm346_vm1, %v16107_v51  ;;  %v5490_v35 = vcombine.high %v22058_v3, %v22058_v3  ;;  %v16048_v57 = vrot.slane %v16040_v19, %v20363_v43  ;;  %v22177_v8 = vpop.permute.xlu1 %8070  ;;  %v25728_v19 = vld [vmem:[#allocation88_spill] sm:$0xff] }
 0x3f3   : > { %v16058_v20 = vcombine.low %v7117_v55, %v7118_v21  ;;  %v5498_v41 = vrot.slane %v22058_v3, %v19150_v17  ;;  %v5426_v15 = vcombine.high %v22042_v23, %v22042_v23  ;;  %v16065_v42 = vrot.slane %v16057_v45, %v20363_v43 }
 0x3f4   : > { %v16055_v40 = vrot.slane %v16041_v60, %v20363_v43  ;;  %v5491_v11 = vcombine.high %v5489_v26, %v5489_v26  ;;  %v5505_v56 = vrot.slane %v5489_v26, %v19150_v17  ;;  %v5512_v51 = vrot.slane %v5490_v35, %v19150_v17  ;;  %v25729_v35 = vld [vmem:[#allocation105_spill] sm:$0xff] }
 0x3f5   : > { %v16072_v27 = vrot.slane %v16058_v20, %v20363_v43  ;;  %v5520_v50 = vcombine.high %v5498_v41, %v5498_v41  ;;  %v6553_v52 = vrot.slane %v5498_v41, %v20357_v54  ;;  %v25730_v41 = vld [vmem:[#allocation106_spill] sm:$0xff] }
 0x3f6   : > { %v16056_v63 = vcombine.low %v16048_v57, %v16055_v40  ;;  %v5519_v25 = vrot.slane %v5491_v11, %v19150_v17  ;;  %v5521_v1 = vcombine.high %v5505_v56, %v5505_v56  ;;  %v6569_v13 = vrot.slane %v5505_v56, %v20357_v54 }
 0x3f7   : > { %v16073_v3 = vcombine.low %v16065_v42, %v16072_v27  ;;  %v5522_v55 = vcombine.high %v5512_v51, %v5512_v51  ;;  %v6557_v6 = vrot.slane %v5512_v51, %v20357_v54  ;;  %v6561_v21 = vrot.slane %v5520_v50, %v20357_v54  ;;  %v25732_v51 = vld [vmem:[#allocation108_spill] sm:$0xff] }
 0x3f8   : > { %16680 = vst.msk [vmem:[%s20460_s8 + $0x340] sm:$0xff] %vm346_vm1, %v16056_v63  ;;  %v7135_v60 = vsel %vm6902_vm5, %v25728_v19, %v6553_v52  ;;  %v5523_v45 = vcombine.high %v5519_v25, %v5519_v25  ;;  %v6573_v20 = vrot.slane %v5519_v25, %v20357_v54  ;;  %v6577_v26 = vrot.slane %v5521_v1, %v20357_v54  ;;  %v22207_v1 = vpop.f32.mrb[38].mxu1 }
 0x3f9   : > { %16681 = vst.msk [vmem:[%s20460_s8 + $0x348] sm:$0xff] %vm346_vm1, %v16073_v3  ;;  %v7139_v57 = vsel %vm6902_vm5, %v25729_v35, %v6569_v13  ;;  %v6565_v40 = vrot.slane %v5522_v55, %v20357_v54  ;;  %v7136_v42 = vsel %vm6902_vm5, %v25730_v41, %v6557_v6  ;;  %v25731_v27 = vcombine.high %v25728_v19, %v25728_v19  ;;  %v22214_v19 = vpop.permute.xlu0 %8164 }
 0x3fa   : > { %v5433_v56 = vrot.slane %v22042_v23, %v19150_v17  ;;  %v6581_v63 = vrot.slane %v5523_v45, %v20357_v54  ;;  %v7140_v50 = vsel %vm6902_vm5, %v25732_v51, %v6573_v20  ;;  %v25733_v52 = vcombine.high %v25729_v35, %v25729_v35  ;;  %25734 = vst [vmem:[#allocation51_spill] sm:$0xff] %v22207_v1  ;;  %v22216_v45 = vpop.f32.mrb[39].mxu1 }
 0x3fb   : > { %v7137_v11 = vsel %vm6902_vm5, %v25731_v27, %v6561_v21  ;;  %v16210_v25 = vcombine.low %v7135_v60, %v7136_v42  ;;  %v25735_v13 = vcombine.high %v25730_v41, %v25730_v41  ;;  %v16227_v6 = vcombine.low %v7139_v57, %v7140_v50  ;;  %25736 = vst [vmem:[#allocation15_spill] sm:$0xff] %v22216_v45  ;;  %v22224_v42 = vpop.permute.xlu1 %7264 }
 0x3fc   : > { %v7141_v3 = vsel %vm6902_vm5, %v25733_v52, %v6577_v26  ;;  %v5440_v23 = vrot.slane %v5426_v15, %v19150_v17  ;;  %v5441_v21 = vcombine.high %v5433_v56, %v5433_v56  ;;  %v25737_v20 = vcombine.high %v25732_v51, %v25732_v51 }
 0x3fd   : > { %v7138_v55 = vsel %vm6902_vm5, %v25735_v13, %v6565_v40  ;;  %v16218_v35 = vrot.slane %v16210_v25, %v20363_v43  ;;  %v5449_v41 = vrot.slane %v5433_v56, %v19150_v17  ;;  %v16235_v15 = vrot.slane %v16227_v6, %v20363_v43 }
 0x3fe   : > { %v7142_v60 = vsel %vm6902_vm5, %v25737_v20, %v6581_v63  ;;  %v16211_v26 = vcombine.low %v7137_v11, %v7138_v55  ;;  %v5442_v40 = vcombine.high %v5440_v23, %v5440_v23  ;;  %v5456_v27 = vrot.slane %v5440_v23, %v19150_v17 }
 0x3ff   : > { %v16228_v57 = vcombine.low %v7141_v3, %v7142_v60  ;;  %v5463_v52 = vrot.slane %v5441_v21, %v19150_v17  ;;  %v5471_v51 = vcombine.high %v5449_v41, %v5449_v41  ;;  %v6521_v11 = vrot.slane %v5449_v41, %v20357_v54  ;;  %v22238_v41 = vpop.permute.xlu0 %8166 }
 0x400   : > { %v16225_v50 = vrot.slane %v16211_v26, %v20363_v43  ;;  %v5470_v56 = vrot.slane %v5442_v40, %v19150_v17  ;;  %v5472_v25 = vcombine.high %v5456_v27, %v5456_v27  ;;  %v6537_v3 = vrot.slane %v5456_v27, %v20357_v54  ;;  %v25738_v40 = vld [vmem:[#allocation104_spill] sm:$0xff]  ;;  %v25739_v27 = vld [vmem:[#allocation109_spill] sm:$0xff] }
 0x401   : > { %v16242_v63 = vrot.slane %v16228_v57, %v20363_v43  ;;  %v5473_v55 = vcombine.high %v5463_v52, %v5463_v52  ;;  %v6525_v6 = vrot.slane %v5463_v52, %v20357_v54  ;;  %v6529_v23 = vrot.slane %v5471_v51, %v20357_v54  ;;  %v22251_v51 = vpop.permute.xlu1 %8292 }
 0x402   : > { %v16226_v13 = vcombine.low %v16218_v35, %v16225_v50  ;;  %v5474_v21 = vcombine.high %v5470_v56, %v5470_v56  ;;  %v6541_v60 = vrot.slane %v5470_v56, %v20357_v54  ;;  %v6545_v26 = vrot.slane %v5472_v25, %v20357_v54  ;;  %v25741_v56 = vld [vmem:[#allocation107_spill] sm:$0xff] }
 0x403   : > { %v16243_v20 = vcombine.low %v16235_v15, %v16242_v63  ;;  %v6533_v57 = vrot.slane %v5473_v55, %v20357_v54  ;;  %v7127_v35 = vsel %vm6902_vm5, %v25738_v40, %v6521_v11  ;;  %v7128_v50 = vsel %vm6902_vm5, %v25739_v27, %v6525_v6 }
 0x404   : > { %16690 = vst.msk [vmem:[%s20460_s8 + $0x390] sm:$0xff] %vm346_vm1, %v16226_v13  ;;  %v25740_v15 = vcombine.high %v25738_v40, %v25738_v40  ;;  %v6549_v63 = vrot.slane %v5474_v21, %v20357_v54  ;;  %v7131_v25 = vsel %vm6902_vm5, %v25741_v56, %v6537_v3  ;;  %v25742_v13 = vld [vmem:[#allocation110_spill] sm:$0xff]  ;;  %v25743_v55 = vcombine.high %v25741_v56, %v25741_v56  ;;  %v22264_v40 = vpop.f32.mrb[38].mxu0 }
 0x405   : > { %16691 = vst.msk [vmem:[%s20460_s8 + $0x398] sm:$0xff] %vm346_vm1, %v16243_v20  ;;  %v7132_v11 = vsel %vm6902_vm5, %v25742_v13, %v6541_v60  ;;  %25744 = vst [vmem:[#allocation86_spill] sm:$0xff] %v22264_v40  ;;  %v8429_v3 = vsel %vm967_vm3, %v22007_v59, %v21862_v10  ;;  %v22273_v45 = vpop.f32.mrb[39].mxu0  ;;  %v25747_v60 = vcombine.high %v25742_v13, %v25742_v13 }
 0x406   : > { %v7129_v52 = vsel %vm6902_vm5, %v25740_v15, %v6529_v23  ;;  %v7133_v6 = vsel %vm6902_vm5, %v25743_v55, %v6545_v26  ;;  %v25745_v23 = vcombine.high %v25739_v27, %v25739_v27  ;;  %v16176_v15 = vcombine.low %v7127_v35, %v7128_v50  ;;  %25746 = vst [vmem:[#allocation36_spill] sm:$0xff] %v22273_v45 }
 0x407   : > { %v16193_v21 = vcombine.low %v7131_v25, %v7132_v11  ;;  %v7134_v26 = vsel %vm6902_vm5, %v25747_v60, %v6549_v63  ;;  %v22282_v27 = vsel %vm934_vm2, %v22025_v58, %v21875_v62  ;;  %17295 = vmatmul.mubr.msk.f32.gmra.mrb[48].mxu1 %vm1008_vm4, %v8429_v3  ;;  %v7656_v25 = vsel %vm967_vm3, %v22030_v2, %v21904_v46 }
 0x408   : > { %v7130_v20 = vsel %vm6902_vm5, %v25745_v23, %v6533_v57  ;;  %v22287_v57 = vld [vmem:[%s24824_s3] ss:$0 sm:$0xff]  ;;  %v16184_v59 = vrot.slane %v16176_v15, %v20363_v43  ;;  %v16194_v35 = vcombine.low %v7133_v6, %v7134_v26  ;;  %v17478_v6 = vld [vmem:[#allocation2 + $0xf1] sm:$0xff]  ;;  %17242 = vmatprep.mubr.msk.f32.mxu0 %vm1008_vm4, %v7656_v25  ;;  %v22310_v23 = vpop.permute.xlu1 %7392 }
 0x409   : > { %v16177_v56 = vcombine.low %v7129_v52, %v7130_v20  ;;  %v2163_v10 = vadd.f32 %v22287_v57, %v21439_v44  ;;  %v16201_v50 = vrot.slane %v16193_v21, %v20363_v43  ;;  %v2158_v52 = vadd.f32 %v22287_v57, %v21452_v24  ;;  %v22301_v44 = vpop.permute.xlu0 %7266 }
 0x40a   : > { %v16208_v13 = vrot.slane %v16194_v35, %v20363_v43  ;;  %v22307_v24 = vsel %vm346_vm1, %v17478_v6, %v21910_v31 }
 0x40b   : > { %v16191_v62 = vrot.slane %v16177_v56, %v20363_v43  ;;  %v5573_v58 = vcombine.high %v2163_v10, %v2163_v10  ;;  %v5580_v63 = vrot.slane %v2163_v10, %v19150_v17  ;;  %v5524_v11 = vcombine.high %v2158_v52, %v2158_v52 }
 0x40c   : > { %v5531_v55 = vrot.slane %v2158_v52, %v19150_v17  ;;  %v16209_v21 = vcombine.low %v16201_v50, %v16208_v13 }
 0x40d   : > { %v16192_v20 = vcombine.low %v16184_v59, %v16191_v62  ;;  %v5587_v46 = vrot.slane %v5573_v58, %v19150_v17  ;;  %v5588_v2 = vcombine.high %v5580_v63, %v5580_v63  ;;  %v5596_v15 = vrot.slane %v5580_v63, %v19150_v17 }
 0x40e   : > { %v5538_v3 = vrot.slane %v5524_v11, %v19150_v17  ;;  %v5539_v60 = vcombine.high %v5531_v55, %v5531_v55  ;;  %v5547_v26 = vrot.slane %v5531_v55, %v19150_v17  ;;  %16689 = vst.msk [vmem:[%s20460_s8 + $0x388] sm:$0xff] %vm346_vm1, %v16209_v21  ;;  %v22327_v11 = vpop.permute.xlu0 %8294 }
 0x40f   : > { %16688 = vst.msk [vmem:[%s20460_s8 + $0x380] sm:$0xff] %vm346_vm1, %v16192_v20  ;;  %v5589_v31 = vcombine.high %v5587_v46, %v5587_v46  ;;  %v5603_v56 = vrot.slane %v5587_v46, %v19150_v17  ;;  %v5610_v10 = vrot.slane %v5588_v2, %v19150_v17  ;;  %v5618_v35 = vcombine.high %v5596_v15, %v5596_v15  ;;  %v25748_v20 = vld [vmem:[#allocation111_spill] sm:$0xff] }
 0x410   : > { %v6617_v59 = vrot.slane %v5596_v15, %v20357_v54  ;;  %v5540_v52 = vcombine.high %v5538_v3, %v5538_v3  ;;  %v5554_v50 = vrot.slane %v5538_v3, %v19150_v17  ;;  %v5561_v62 = vrot.slane %v5539_v60, %v19150_v17  ;;  %v22334_v15 = vpop.permute.xlu1 %7394 }
 0x411   : > { %v5617_v58 = vrot.slane %v5589_v31, %v19150_v17  ;;  %v5619_v63 = vcombine.high %v5603_v56, %v5603_v56  ;;  %v5620_v25 = vcombine.high %v5610_v10, %v5610_v10  ;;  %v6621_v13 = vrot.slane %v5610_v10, %v20357_v54  ;;  %v25749_v10 = vld [vmem:[#allocation113_spill] sm:$0xff] }
 0x412   : > { %v6625_v55 = vrot.slane %v5618_v35, %v20357_v54  ;;  %v6633_v6 = vrot.slane %v5603_v56, %v20357_v54  ;;  %v7151_v46 = vsel %vm6902_vm5, %v25748_v20, %v6617_v59  ;;  %v5568_v2 = vrot.slane %v5540_v52, %v19150_v17  ;;  %v25751_v59 = vld [vmem:[#allocation112_spill] sm:$0xff] }
 0x413   : > { %v5621_v21 = vcombine.high %v5617_v58, %v5617_v58  ;;  %v6629_v3 = vrot.slane %v5620_v25, %v20357_v54  ;;  %v6637_v60 = vrot.slane %v5617_v58, %v20357_v54  ;;  %v6641_v31 = vrot.slane %v5619_v63, %v20357_v54  ;;  %v25753_v63 = vld [vmem:[#allocation114_spill] sm:$0xff] }
 0x414   : > { %v7152_v45 = vsel %vm6902_vm5, %v25749_v10, %v6621_v13  ;;  %v25750_v56 = vcombine.high %v25748_v20, %v25748_v20  ;;  %v7155_v52 = vsel %vm6902_vm5, %v25751_v59, %v6633_v6  ;;  %v5569_v40 = vcombine.high %v5547_v26, %v5547_v26 }
 0x415   : > { %v6645_v1 = vrot.slane %v5621_v21, %v20357_v54  ;;  %v25752_v25 = vcombine.high %v25749_v10, %v25749_v10  ;;  %v7156_v34 = vsel %vm6902_vm5, %v25753_v63, %v6637_v60  ;;  %v25754_v13 = vcombine.high %v25751_v59, %v25751_v59 }
 0x416   : > { %v7153_v35 = vsel %vm6902_vm5, %v25750_v56, %v6625_v55  ;;  %v16346_v55 = vcombine.low %v7151_v46, %v7152_v45  ;;  %v16363_v0 = vcombine.low %v7155_v52, %v7156_v34  ;;  %v5570_v6 = vcombine.high %v5554_v50, %v5554_v50  ;;  %v22368_v45 = vpop.permute.xlu1 %8072 }
 0x417   : > { %v7154_v58 = vsel %vm6902_vm5, %v25752_v25, %v6629_v3  ;;  %v7157_v20 = vsel %vm6902_vm5, %v25754_v13, %v6641_v31  ;;  %v25755_v21 = vcombine.high %v25753_v63, %v25753_v63  ;;  %v5571_v10 = vcombine.high %v5561_v62, %v5561_v62  ;;  %v22363_v25 = vpop.permute.xlu0 %7520  ;;  %v25756_v13 = vld [vmem:[#allocation115_spill] sm:$0xff] }
 0x418   : > { %v16347_v56 = vcombine.low %v7153_v35, %v7154_v58  ;;  %v5572_v33 = vcombine.high %v5568_v2, %v5568_v2  ;;  %v6585_v3 = vrot.slane %v5547_v26, %v20357_v54  ;;  %v16354_v60 = vrot.slane %v16346_v55, %v20363_v43 }
 0x419   : > { %v7158_v61 = vsel %vm6902_vm5, %v25755_v21, %v6645_v1  ;;  %v16371_v34 = vrot.slane %v16363_v0, %v20363_v43  ;;  %v6589_v46 = vrot.slane %v5561_v62, %v20357_v54  ;;  %v6593_v1 = vrot.slane %v5569_v40, %v20357_v54  ;;  %v25757_v62 = vld [vmem:[#allocation117_spill] sm:$0xff] }
 0x41a   : > { %v16361_v59 = vrot.slane %v16347_v56, %v20363_v43  ;;  %v16364_v31 = vcombine.low %v7157_v20, %v7158_v61  ;;  %v6597_v35 = vrot.slane %v5571_v10, %v20357_v54  ;;  %v6601_v26 = vrot.slane %v5554_v50, %v20357_v54  ;;  %v25761_v10 = vld [vmem:[#allocation14_spill] sm:$0xff] }
 0x41b   : > { %v6605_v63 = vrot.slane %v5568_v2, %v20357_v54  ;;  %v6609_v61 = vrot.slane %v5570_v6, %v20357_v54  ;;  %v6613_v0 = vrot.slane %v5572_v33, %v20357_v54  ;;  %v7143_v20 = vsel %vm6902_vm5, %v25756_v13, %v6585_v3  ;;  %v25760_v33 = vld [vmem:[#allocation116_spill] sm:$0xff] }
 0x41c   : > { %v16362_v52 = vcombine.low %v16354_v60, %v16361_v59  ;;  %v16378_v58 = vrot.slane %v16364_v31, %v20363_v43  ;;  %v7144_v40 = vsel %vm6902_vm5, %v25757_v62, %v6589_v46  ;;  %v25758_v55 = vcombine.high %v25756_v13, %v25756_v13  ;;  %v22413_v13 = vpop.permute.xlu1 %8074 }
 0x41d   : > { %v25759_v2 = vcombine.high %v25757_v62, %v25757_v62  ;;  %v7147_v21 = vsel %vm6902_vm5, %v25760_v33, %v6601_v26  ;;  %v7148_v3 = vsel %vm6902_vm5, %v25761_v10, %v6605_v63  ;;  %v25762_v60 = vcombine.high %v25760_v33, %v25760_v33  ;;  %v17479_v63 = vld [vmem:[#allocation2 + $0xf9] sm:$0xff] }
 0x41e   : > { %v7145_v50 = vsel %vm6902_vm5, %v25758_v55, %v6593_v1  ;;  %v16379_v56 = vcombine.low %v16371_v34, %v16378_v58  ;;  %16698 = vst.msk [vmem:[%s20460_s8 + $0x3d0] sm:$0xff] %vm346_vm1, %v16362_v52  ;;  %v25763_v31 = vcombine.high %v25761_v10, %v25761_v10  ;;  %v16312_v46 = vcombine.low %v7143_v20, %v7144_v40  ;;  %v22404_v52 = vpop.permute.xlu0 %7522  ;;  %v17480_v40 = vld [vmem:[#allocation2 + $0xf0] sm:$0xff] }
 0x41f   : > { %v7146_v6 = vsel %vm6902_vm5, %v25759_v2, %v6597_v35  ;;  %v7149_v59 = vsel %vm6902_vm5, %v25762_v60, %v6609_v61  ;;  %v16329_v35 = vcombine.low %v7147_v21, %v7148_v3  ;;  %v7657_v58 = vsel %vm967_vm3, %v22282_v27, %v21936_v39  ;;  %v22423_v27 = vpop.f32.mrb[40].mxu1  ;;  %v17482_v10 = vld [vmem:[#allocation2 + $0x109] sm:$0xff] }
 0x420   : > { %v7150_v34 = vsel %vm6902_vm5, %v25763_v31, %v6613_v0  ;;  %v16313_v1 = vcombine.low %v7145_v50, %v7146_v6  ;;  %16699 = vst.msk [vmem:[%s20460_s8 + $0x3d8] sm:$0xff] %vm346_vm1, %v16379_v56  ;;  %v8367_v61 = vsel %vm346_vm1, %v17479_v63, %v21949_v53  ;;  %v16320_v0 = vrot.slane %v16312_v46, %v20363_v43  ;;  %v22431_v2 = vpop.f32.mrb[41].mxu1  ;;  %v17484_v60 = vld [vmem:[#allocation2 + $0x108] sm:$0xff] }
 0x421   : > { %v16330_v26 = vcombine.low %v7149_v59, %v7150_v34  ;;  %17243 = vmatmul.mubr.msk.f32.gmra.mrb[48].mxu0 %vm1008_vm4, %v7657_v58  ;;  %v8398_v62 = vsel %vm934_vm2, %v22307_v24, %v21965_v4  ;;  %v7594_v39 = vsel %vm346_vm1, %v17480_v40, %v21971_v49  ;;  %v16337_v53 = vrot.slane %v16329_v35, %v20363_v43  ;;  %v17481_v24 = vld [vmem:[#allocation2 + $0xf8] sm:$0xff] }
 0x422   : > { %v16327_v20 = vrot.slane %v16313_v1, %v20363_v43  ;;  %v8399_v50 = vsel %vm934_vm2, %v8367_v61, %v22019_v48  ;;  %v8430_v56 = vsel %vm967_vm3, %v8398_v62, %v22032_v14  ;;  %v7595_v49 = vsel %vm346_vm1, %v17481_v24, %v22062_v29  ;;  %v22458_v59 = vpop.permute.xlu0 %8168 }
 0x423   : > { %v16344_v55 = vrot.slane %v16330_v26, %v20363_v43  ;;  %17297 = vmatprep.mubr.msk.f32.mxu1 %vm1008_vm4, %v8430_v56  ;;  %v7626_v6 = vsel %vm934_vm2, %v7594_v39, %v22067_v30  ;;  %v8431_v33 = vsel %vm967_vm3, %v8399_v50, %v22102_v47  ;;  %v7627_v14 = vsel %vm934_vm2, %v7595_v49, %v22104_v28  ;;  %v17483_v47 = vld [vmem:[#allocation2 + $0x111] sm:$0xff] }
 0x424   : > { %v16328_v4 = vcombine.low %v16320_v0, %v16327_v20  ;;  %17298 = vmatmul.mubr.msk.f32.gmra.mrb[50].mxu1 %vm1008_vm4, %v8431_v33  ;;  %v7658_v21 = vsel %vm967_vm3, %v7626_v6, %v22130_v32  ;;  %v8368_v29 = vsel %vm346_vm1, %v17482_v10, %v22144_v37  ;;  %v7659_v30 = vsel %vm967_vm3, %v7627_v14, %v22173_v38 }
 0x425   : > { %v16345_v48 = vcombine.low %v16337_v53, %v16344_v55  ;;  %17245 = vmatprep.mubr.msk.f32.mxu0 %vm1008_vm4, %v7658_v21  ;;  %v8369_v28 = vsel %vm346_vm1, %v17483_v47, %v22177_v8  ;;  %v8400_v3 = vsel %vm934_vm2, %v8368_v29, %v22214_v19  ;;  %v7596_v32 = vsel %vm346_vm1, %v17484_v60, %v22224_v42  ;;  %v17485_v8 = vld [vmem:[#allocation2 + $0x110] sm:$0xff]  ;;  %v22471_v42 = vpop.permute.xlu1 %7268 }
 0x426   : > { %16696 = vst.msk [vmem:[%s20460_s8 + $0x3c0] sm:$0xff] %vm346_vm1, %v16328_v4  ;;  %17246 = vmatmul.mubr.msk.f32.gmra.mrb[50].mxu0 %vm1008_vm4, %v7659_v30  ;;  %v8401_v37 = vsel %vm934_vm2, %v8369_v28, %v22238_v41  ;;  %v8432_v38 = vsel %vm967_vm3, %v8400_v3, %v22251_v51  ;;  %v7597_v19 = vsel %vm346_vm1, %v17485_v8, %v22301_v44  ;;  %v22509_v40 = vpop.permute.xlu0 %8170 }
 0x427   : > { %16697 = vst.msk [vmem:[%s20460_s8 + $0x3c8] sm:$0xff] %vm346_vm1, %v16345_v48  ;;  %v7628_v31 = vsel %vm934_vm2, %v7596_v32, %v22310_v23  ;;  %17300 = vmatprep.mubr.msk.f32.mxu1 %vm1008_vm4, %v8432_v38  ;;  %v8615_v34 = vadd.f32 %v22287_v57, %v21626_v36  ;;  %v8610_v41 = vadd.f32 %v22287_v57, %v21701_v18  ;;  %v17486_v23 = vld [vmem:[#allocation2 + $0x121] sm:$0xff] }
 0x428   : > { %v8433_v51 = vsel %vm967_vm3, %v8401_v37, %v22327_v11  ;;  %v22482_v46 = vsel %vm934_vm2, %v7597_v19, %v22334_v15  ;;  %v7660_v44 = vsel %vm967_vm3, %v7628_v31, %v22363_v25  ;;  %v22489_v1 = vsel %vm346_vm1, %v17486_v23, %v22368_v45  ;;  %v22498_v25 = vpop.f32.mrb[40].mxu0 }
 0x429   : > { %17301 = vmatmul.mubr.msk.f32.gmra.mrb[52].mxu1 %vm1008_vm4, %v8433_v51  ;;  %v7843_v36 = vadd.f32 %v22287_v57, %v21703_v22  ;;  %v7838_v18 = vadd.f32 %v22287_v57, %v21803_v5  ;;  %v10705_v11 = vcombine.high %v8615_v34, %v8615_v34  ;;  %v10712_v15 = vrot.slane %v8615_v34, %v19150_v17  ;;  %v22504_v22 = vpop.f32.mrb[41].mxu0  ;;  %v22515_v56 = vpop.permute.xlu1 %8296 }
 0x42a   : > { %v10656_v35 = vcombine.high %v8610_v41, %v8610_v41  ;;  %v10663_v26 = vrot.slane %v8610_v41, %v19150_v17  ;;  %17248 = vmatprep.mubr.msk.f32.mxu0 %vm1008_vm4, %v7660_v44  ;;  %v22538_v31 = vpop.permute.xlu0 %7270 }
 0x42b   : > { %v8849_v58 = vcombine.high %v7843_v36, %v7843_v36  ;;  %v8856_v45 = vrot.slane %v7843_v36, %v19150_v17  ;;  %v8800_v63 = vcombine.high %v7838_v18, %v7838_v18  ;;  %v22502_v61 = vrot.slane %v7838_v18, %v19150_v17 }
 0x42c   : > { %v10719_v5 = vrot.slane %v10705_v11, %v19150_v17  ;;  %v10720_v0 = vcombine.high %v10712_v15, %v10712_v15  ;;  %v10728_v20 = vrot.slane %v10712_v15, %v19150_v17  ;;  %v10670_v62 = vrot.slane %v10656_v35, %v19150_v17 }
 0x42d   : > { %v10671_v39 = vcombine.high %v10663_v26, %v10663_v26  ;;  %v22512_v53 = vrot.slane %v10663_v26, %v19150_v17  ;;  %v8863_v55 = vrot.slane %v8849_v58, %v19150_v17  ;;  %v8864_v50 = vcombine.high %v8856_v45, %v8856_v45  ;;  %v22548_v23 = vpop.permute.xlu1 %7396 }
 0x42e   : > { %v10721_v4 = vcombine.high %v10719_v5, %v10719_v5  ;;  %v10735_v24 = vrot.slane %v10719_v5, %v19150_v17  ;;  %v10742_v49 = vrot.slane %v10720_v0, %v19150_v17  ;;  %v10750_v6 = vcombine.high %v10728_v20, %v10728_v20 }
 0x42f   : > { %v12259_v33 = vrot.slane %v10728_v20, %v20357_v54  ;;  %v10672_v48 = vcombine.high %v10670_v62, %v10670_v62  ;;  %v22521_v14 = vrot.slane %v10670_v62, %v19150_v17  ;;  %v22524_v21 = vrot.slane %v10671_v39, %v19150_v17 }
 0x430   : > { %v10749_v10 = vrot.slane %v10721_v4, %v19150_v17  ;;  %v10751_v29 = vcombine.high %v10735_v24, %v10735_v24  ;;  %v10752_v30 = vcombine.high %v10742_v49, %v10742_v49  ;;  %v12263_v47 = vrot.slane %v10742_v49, %v20357_v54 }
 0x431   : > { %v12267_v28 = vrot.slane %v10750_v6, %v20357_v54  ;;  %v12275_v3 = vrot.slane %v10735_v24, %v20357_v54  ;;  %v22531_v60 = vrot.slane %v10672_v48, %v19150_v17  ;;  %v10701_v32 = vcombine.high %v22512_v53, %v22512_v53 }
 0x432   : > { %v10753_v37 = vcombine.high %v10749_v10, %v10749_v10  ;;  %v12271_v38 = vrot.slane %v10752_v30, %v20357_v54  ;;  %v12279_v8 = vrot.slane %v10749_v10, %v20357_v54  ;;  %v12283_v19 = vrot.slane %v10751_v29, %v20357_v54  ;;  %v22579_v10 = vpop.permute.xlu1 %7398 }
 0x433   : > { %v10702_v34 = vcombine.high %v22521_v14, %v22521_v14  ;;  %v10703_v41 = vcombine.high %v22524_v21, %v22524_v21  ;;  %v10704_v51 = vcombine.high %v22531_v60, %v22531_v60  ;;  %v12227_v44 = vrot.slane %v22512_v53, %v20357_v54 }
 0x434   : > { %v12287_v36 = vrot.slane %v10753_v37, %v20357_v54  ;;  %v12231_v18 = vrot.slane %v22524_v21, %v20357_v54  ;;  %v12235_v11 = vrot.slane %v10701_v32, %v20357_v54  ;;  %v12243_v15 = vrot.slane %v22521_v14, %v20357_v54 }
 0x435   : > { %v12239_v35 = vrot.slane %v10703_v41, %v20357_v54  ;;  %v12247_v26 = vrot.slane %v22531_v60, %v20357_v54  ;;  %v12251_v58 = vrot.slane %v10702_v34, %v20357_v54  ;;  %v12255_v5 = vrot.slane %v10704_v51, %v20357_v54  ;;  %v22584_v60 = vpop.f32.mrb[42].mxu1 }
 0x436   : > { %v8865_v0 = vcombine.high %v8863_v55, %v8863_v55  ;;  %v8872_v20 = vrot.slane %v8856_v45, %v19150_v17  ;;  %v8879_v62 = vrot.slane %v8863_v55, %v19150_v17  ;;  %v8886_v39 = vrot.slane %v8864_v50, %v19150_v17  ;;  %v22574_v55 = vpop.permute.xlu0 %8298 }
 0x437   : > { %v8814_v53 = vrot.slane %v8800_v63, %v19150_v17  ;;  %v8815_v4 = vcombine.high %v22502_v61, %v22502_v61  ;;  %v8823_v24 = vrot.slane %v22502_v61, %v19150_v17  ;;  %v7661_v49 = vsel %vm967_vm3, %v22482_v46, %v22404_v52 }
 0x438   : > { %v8893_v6 = vrot.slane %v8865_v0, %v19150_v17  ;;  %v8894_v48 = vcombine.high %v8872_v20, %v8872_v20  ;;  %v8895_v45 = vcombine.high %v8879_v62, %v8879_v62  ;;  %v8896_v14 = vcombine.high %v8886_v39, %v8886_v39  ;;  %17249 = vmatmul.mubr.msk.f32.gmra.mrb[52].mxu0 %vm1008_vm4, %v7661_v49 }
 0x439   : > { %v13512_v63 = vsel %vm6902_vm5, %v8872_v20, %v12259_v33  ;;  %v13513_v50 = vsel %vm6902_vm5, %v8886_v39, %v12263_v47  ;;  %v13516_v21 = vsel %vm6902_vm5, %v8879_v62, %v12275_v3  ;;  %v8816_v61 = vcombine.high %v8814_v53, %v8814_v53  ;;  %v22587_v47 = vpop.f32.mrb[43].mxu1 }
 0x43a   : > { %v8897_v29 = vcombine.high %v8893_v6, %v8893_v6  ;;  %v13514_v52 = vsel %vm6902_vm5, %v8894_v48, %v12267_v28  ;;  %v13515_v46 = vsel %vm6902_vm5, %v8896_v14, %v12271_v38  ;;  %v13517_v30 = vsel %vm6902_vm5, %v8893_v6, %v12279_v8  ;;  %v7525_v6 = vpop.permute.xlu0 %7524 }
 0x43b   : > { %v13518_v32 = vsel %vm6902_vm5, %v8895_v45, %v12283_v19  ;;  %v14374_v37 = vcombine.low %v13512_v63, %v13513_v50  ;;  %v14375_v33 = vcombine.low %v13514_v52, %v13515_v46  ;;  %v14391_v34 = vcombine.low %v13516_v21, %v13517_v30  ;;  %v8077_v45 = vpop.permute.xlu1 %8076  ;;  %v17487_v30 = vld [vmem:[#allocation2 + $0x129] sm:$0xff] }
 0x43c   : > { %v13519_v3 = vsel %vm6902_vm5, %v8897_v29, %v12287_v36  ;;  %v8830_v41 = vrot.slane %v8814_v53, %v19150_v17  ;;  %v8837_v51 = vrot.slane %v8815_v4, %v19150_v17  ;;  %v8844_v28 = vrot.slane %v8816_v61, %v19150_v17 }
 0x43d   : > { %v14382_v38 = vrot.slane %v14374_v37, %v20363_v43  ;;  %v14389_v8 = vrot.slane %v14375_v33, %v20363_v43  ;;  %v14392_v0 = vcombine.low %v13518_v32, %v13519_v3  ;;  %v14399_v19 = vrot.slane %v14391_v34, %v20363_v43 }
 0x43e   : > { %v8845_v20 = vcombine.high %v8823_v24, %v8823_v24  ;;  %v8846_v62 = vcombine.high %v8830_v41, %v8830_v41  ;;  %v8847_v39 = vcombine.high %v8837_v51, %v8837_v51  ;;  %v8848_v49 = vcombine.high %v8844_v28, %v8844_v28  ;;  %v22624_v34 = vpop.permute.xlu0 %7526 }
 0x43f   : > { %v14390_v36 = vcombine.low %v14382_v38, %v14389_v8  ;;  %v14406_v53 = vrot.slane %v14392_v0, %v20363_v43  ;;  %v13504_v4 = vsel %vm6902_vm5, %v8823_v24, %v12227_v44  ;;  %v13505_v48 = vsel %vm6902_vm5, %v8837_v51, %v12231_v18 }
 0x440   : > { %v13506_v14 = vsel %vm6902_vm5, %v8845_v20, %v12235_v11  ;;  %v13507_v63 = vsel %vm6902_vm5, %v8847_v39, %v12239_v35  ;;  %v13508_v50 = vsel %vm6902_vm5, %v8830_v41, %v12243_v15  ;;  %v13509_v21 = vsel %vm6902_vm5, %v8844_v28, %v12247_v26  ;;  %v17488_v26 = vld [vmem:[#allocation2 + $0x120] sm:$0xff]  ;;  %v22637_v41 = vpop.f32.mrb[42].mxu0 }
 0x441   : > { %v14407_v61 = vcombine.low %v14399_v19, %v14406_v53  ;;  %16582 = vst.msk [vmem:[%s20460_s8 + $0x30] sm:$0xff] %vm346_vm1, %v14390_v36  ;;  %v13510_v29 = vsel %vm6902_vm5, %v8846_v62, %v12251_v58  ;;  %v13511_v52 = vsel %vm6902_vm5, %v8848_v49, %v12255_v5  ;;  %v14340_v44 = vcombine.low %v13504_v4, %v13505_v48  ;;  %v17490_v20 = vld [vmem:[#allocation2 + $0x139] sm:$0xff] }
 0x442   : > { %v14341_v24 = vcombine.low %v13506_v14, %v13507_v63  ;;  %v14357_v18 = vcombine.low %v13508_v50, %v13509_v21  ;;  %v14358_v46 = vcombine.low %v13510_v29, %v13511_v52  ;;  %v8371_v11 = vsel %vm346_vm1, %v17487_v30, %v22413_v13 }
 0x443   : > { %16583 = vst.msk [vmem:[%s20460_s8 + $0x38] sm:$0xff] %vm346_vm1, %v14407_v61  ;;  %v14348_v15 = vrot.slane %v14340_v44, %v20363_v43  ;;  %v8402_v35 = vsel %vm934_vm2, %v22489_v1, %v22458_v59  ;;  %v7598_v58 = vsel %vm346_vm1, %v17488_v26, %v22471_v42  ;;  %v8403_v5 = vsel %vm934_vm2, %v8371_v11, %v22509_v40  ;;  %v17489_v1 = vld [vmem:[#allocation2 + $0x128] sm:$0xff] }
 0x444   : > { %v14355_v32 = vrot.slane %v14341_v24, %v20363_v43  ;;  %v14365_v37 = vrot.slane %v14357_v18, %v20363_v43  ;;  %v14372_v13 = vrot.slane %v14358_v46, %v20363_v43  ;;  %v8434_v33 = vsel %vm967_vm3, %v8402_v35, %v22515_v56  ;;  %v22635_v56 = vpop.permute.xlu1 %8078 }
 0x445   : > { %v8625_v59 = vadd.f32 %v22287_v57, %v21844_v7  ;;  %v8620_v42 = vadd.f32 %v22287_v57, %v21900_v12  ;;  %17303 = vmatprep.mubr.msk.f32.mxu1 %vm1008_vm4, %v8434_v33  ;;  %v7599_v40 = vsel %vm346_vm1, %v17489_v1, %v22538_v31  ;;  %v7630_v3 = vsel %vm934_vm2, %v7598_v58, %v22548_v23  ;;  %v22648_v23 = vpop.f32.mrb[43].mxu0 }
 0x446   : > { %v14356_v51 = vcombine.low %v14348_v15, %v14355_v32  ;;  %v14373_v7 = vcombine.low %v14365_v37, %v14372_v13  ;;  %v8435_v12 = vsel %vm967_vm3, %v8403_v5, %v22574_v55  ;;  %v22643_v28 = vsel %vm934_vm2, %v7599_v40, %v22579_v10 }
 0x447   : > { %v10803_v38 = vcombine.high %v8625_v59, %v8625_v59  ;;  %v10810_v8 = vrot.slane %v8625_v59, %v19150_v17  ;;  %v10754_v31 = vcombine.high %v8620_v42, %v8620_v42  ;;  %v10761_v0 = vrot.slane %v8620_v42, %v19150_v17  ;;  %17304 = vmatmul.mubr.msk.f32.gmra.mrb[54].mxu1 %vm1008_vm4, %v8435_v12 }
 0x448   : > { %16580 = vst.msk [vmem:[%s20460_s8 + $0x20] sm:$0xff] %vm346_vm1, %v14356_v51  ;;  %16581 = vst.msk [vmem:[%s20460_s8 + $0x28] sm:$0xff] %vm346_vm1, %v14373_v7  ;;  %v7853_v55 = vadd.f32 %v22287_v57, %v21906_v9  ;;  %v22658_v10 = vadd.f32 %v22287_v57, %v22002_v16  ;;  %v7662_v19 = vsel %vm967_vm3, %v7630_v3, %v7525_v6  ;;  %v8173_v6 = vpop.permute.xlu0 %8172  ;;  %v22672_v21 = vpop.permute.xlu1 %7272 }
 0x449   : > { %v8372_v62 = vsel %vm346_vm1, %v17490_v20, %v8077_v45  ;;  %v10817_v39 = vrot.slane %v10803_v38, %v19150_v17  ;;  %v10818_v49 = vcombine.high %v10810_v8, %v10810_v8  ;;  %v10826_v36 = vrot.slane %v10810_v8, %v19150_v17  ;;  %17251 = vmatprep.mubr.msk.f32.mxu0 %vm1008_vm4, %v7662_v19 }
 0x44a   : > { %v10768_v53 = vrot.slane %v10754_v31, %v19150_v17  ;;  %v10769_v4 = vcombine.high %v10761_v0, %v10761_v0  ;;  %v22667_v9 = vrot.slane %v10761_v0, %v19150_v17  ;;  %v8947_v16 = vcombine.high %v7853_v55, %v7853_v55 }
 0x44b   : > { %v8954_v48 = vrot.slane %v7853_v55, %v19150_v17  ;;  %v10819_v14 = vcombine.high %v10817_v39, %v10817_v39  ;;  %v10833_v45 = vrot.slane %v10817_v39, %v19150_v17  ;;  %v10840_v63 = vrot.slane %v10818_v49, %v19150_v17 }
 0x44c   : > { %v10848_v50 = vcombine.high %v10826_v36, %v10826_v36  ;;  %v12323_v61 = vrot.slane %v10826_v36, %v20357_v54  ;;  %v10770_v29 = vcombine.high %v10768_v53, %v10768_v53  ;;  %v22676_v52 = vrot.slane %v10768_v53, %v19150_v17  ;;  %v22701_v1 = vpop.permute.xlu0 %8174  ;;  %v22709_v12 = vpop.permute.xlu1 %8300  ;;  %v17491_v53 = vld [vmem:[#allocation2 + $0x141] sm:$0xff] }
 0x44d   : > { %v22679_v44 = vrot.slane %v10769_v4, %v19150_v17  ;;  %v10847_v24 = vrot.slane %v10819_v14, %v19150_v17  ;;  %v10849_v18 = vcombine.high %v10833_v45, %v10833_v45  ;;  %v10850_v46 = vcombine.high %v10840_v63, %v10840_v63 }
 0x44e   : > { %v12327_v30 = vrot.slane %v10840_v63, %v20357_v54  ;;  %v12331_v11 = vrot.slane %v10848_v50, %v20357_v54  ;;  %v12339_v15 = vrot.slane %v10833_v45, %v20357_v54  ;;  %v22686_v35 = vrot.slane %v10770_v29, %v19150_v17 }
 0x44f   : > { %v10799_v26 = vcombine.high %v22667_v9, %v22667_v9  ;;  %v10851_v58 = vcombine.high %v10847_v24, %v10847_v24  ;;  %v12335_v5 = vrot.slane %v10850_v46, %v20357_v54  ;;  %v12343_v32 = vrot.slane %v10847_v24, %v20357_v54 }
 0x450   : > { %v12347_v37 = vrot.slane %v10849_v18, %v20357_v54  ;;  %v10800_v13 = vcombine.high %v22676_v52, %v22676_v52  ;;  %v10801_v33 = vcombine.high %v22679_v44, %v22679_v44  ;;  %v10802_v59 = vcombine.high %v22686_v35, %v22686_v35 }
 0x451   : > { %v12291_v42 = vrot.slane %v22667_v9, %v20357_v54  ;;  %v12351_v40 = vrot.slane %v10851_v58, %v20357_v54  ;;  %v12295_v3 = vrot.slane %v22679_v44, %v20357_v54  ;;  %v12299_v51 = vrot.slane %v10799_v26, %v20357_v54  ;;  %v22744_v44 = vpop.f32.mrb[44].mxu1 }
 0x452   : > { %v12307_v7 = vrot.slane %v22676_v52, %v20357_v54  ;;  %v12303_v38 = vrot.slane %v10801_v33, %v20357_v54  ;;  %v12311_v8 = vrot.slane %v22686_v35, %v20357_v54  ;;  %v12315_v31 = vrot.slane %v10800_v13, %v20357_v54  ;;  %v22742_v52 = vpop.permute.xlu1 %7400  ;;  %v22748_v35 = vpop.f32.mrb[45].mxu1 }
 0x453   : > { %v12319_v0 = vrot.slane %v10802_v59, %v20357_v54  ;;  %v8961_v55 = vrot.slane %v8947_v16, %v19150_v17  ;;  %v8962_v19 = vcombine.high %v8954_v48, %v8954_v48  ;;  %v8970_v20 = vrot.slane %v8954_v48, %v19150_v17 }
 0x454   : > { %v8898_v39 = vcombine.high %v22658_v10, %v22658_v10  ;;  %v8905_v49 = vrot.slane %v22658_v10, %v19150_v17  ;;  %v7663_v36 = vsel %vm967_vm3, %v22643_v28, %v22624_v34  ;;  %v22727_v4 = vsel %vm346_vm1, %v17491_v53, %v22635_v56  ;;  %v22738_v56 = vpop.permute.xlu0 %7274 }
 0x455   : > { %v22730_v9 = vsel %vm934_vm2, %v8372_v62, %v8173_v6  ;;  %v8963_v16 = vcombine.high %v8961_v55, %v8961_v55  ;;  %v8977_v48 = vrot.slane %v8961_v55, %v19150_v17  ;;  %v8984_v14 = vrot.slane %v8962_v19, %v19150_v17  ;;  %17252 = vmatmul.mubr.msk.f32.gmra.mrb[54].mxu0 %vm1008_vm4, %v7663_v36 }
 0x456   : > { %v8992_v45 = vcombine.high %v8970_v20, %v8970_v20  ;;  %v13528_v10 = vsel %vm6902_vm5, %v8970_v20, %v12323_v61  ;;  %v8912_v34 = vrot.slane %v8898_v39, %v19150_v17  ;;  %v8913_v28 = vcombine.high %v8905_v49, %v8905_v49 }
 0x457   : > { %v8921_v63 = vrot.slane %v8905_v49, %v19150_v17  ;;  %v8991_v62 = vrot.slane %v8963_v16, %v19150_v17  ;;  %v8993_v6 = vcombine.high %v8977_v48, %v8977_v48  ;;  %v8994_v50 = vcombine.high %v8984_v14, %v8984_v14 }
 0x458   : > { %v13529_v29 = vsel %vm6902_vm5, %v8984_v14, %v12327_v30  ;;  %v13530_v24 = vsel %vm6902_vm5, %v8992_v45, %v12331_v11  ;;  %v13532_v61 = vsel %vm6902_vm5, %v8977_v48, %v12339_v15  ;;  %v8914_v46 = vcombine.high %v8912_v34, %v8912_v34  ;;  %v22762_v14 = vpop.permute.xlu0 %8302 }
 0x459   : > { %v14510_v18 = vcombine.low %v13528_v10, %v13529_v29  ;;  %v8995_v26 = vcombine.high %v8991_v62, %v8991_v62  ;;  %v13531_v58 = vsel %vm6902_vm5, %v8994_v50, %v12335_v5  ;;  %v13533_v13 = vsel %vm6902_vm5, %v8991_v62, %v12343_v32 }
 0x45a   : > { %v13534_v33 = vsel %vm6902_vm5, %v8993_v6, %v12347_v37  ;;  %v14511_v30 = vcombine.low %v13530_v24, %v13531_v58  ;;  %v14527_v55 = vcombine.low %v13532_v61, %v13533_v13  ;;  %v8928_v19 = vrot.slane %v8912_v34, %v19150_v17  ;;  %v22789_v13 = vpop.f32.mrb[44].mxu0 }
 0x45b   : > { %v14518_v59 = vrot.slane %v14510_v18, %v20363_v43  ;;  %v13535_v11 = vsel %vm6902_vm5, %v8995_v26, %v12351_v40  ;;  %v8935_v15 = vrot.slane %v8913_v28, %v19150_v17  ;;  %v8942_v20 = vrot.slane %v8914_v46, %v19150_v17  ;;  %v22764_v40 = vpop.permute.xlu1 %7402  ;;  %v17492_v18 = vld [vmem:[#allocation2 + $0x138] sm:$0xff]  ;;  %v25765_v46 = vld [vmem:[#allocation10_spill] sm:$0xff] }
 0x45c   : > { %v8943_v39 = vcombine.high %v8921_v63, %v8921_v63  ;;  %v14525_v49 = vrot.slane %v14511_v30, %v20363_v43  ;;  %v14528_v5 = vcombine.low %v13534_v33, %v13535_v11  ;;  %v14535_v32 = vrot.slane %v14527_v55, %v20363_v43  ;;  %v7529_v55 = vpop.permute.xlu0 %7528 }
 0x45d   : > { %v8944_v36 = vcombine.high %v8928_v19, %v8928_v19  ;;  %v8945_v37 = vcombine.high %v8935_v15, %v8935_v15  ;;  %v8946_v53 = vcombine.high %v8942_v20, %v8942_v20  ;;  %v13520_v16 = vsel %vm6902_vm5, %v8921_v63, %v12291_v42 }
 0x45e   : > { %v13521_v48 = vsel %vm6902_vm5, %v8935_v15, %v12295_v3  ;;  %v14526_v45 = vcombine.low %v14518_v59, %v14525_v49  ;;  %v14542_v10 = vrot.slane %v14528_v5, %v20363_v43  ;;  %v13522_v34 = vsel %vm6902_vm5, %v8943_v39, %v12299_v51 }
 0x45f   : > { %v13524_v28 = vsel %vm6902_vm5, %v8928_v19, %v12307_v7  ;;  %v13523_v62 = vsel %vm6902_vm5, %v8945_v37, %v12303_v38  ;;  %v13525_v6 = vsel %vm6902_vm5, %v8942_v20, %v12311_v8  ;;  %v13526_v42 = vsel %vm6902_vm5, %v8944_v36, %v12315_v31  ;;  %v25764_v7 = vld [vmem:[#allocation38_spill] sm:$0xff]  ;;  %v8081_v19 = vpop.permute.xlu1 %8080 }
 0x460   : > { %v13527_v3 = vsel %vm6902_vm5, %v8946_v53, %v12319_v0  ;;  %v14543_v63 = vcombine.low %v14535_v32, %v14542_v10  ;;  %16590 = vst.msk [vmem:[%s20460_s8 + $0x70] sm:$0xff] %vm346_vm1, %v14526_v45  ;;  %v14476_v50 = vcombine.low %v13520_v16, %v13521_v48  ;;  %v14477_v29 = vcombine.low %v13522_v34, %v13523_v62 }
 0x461   : > { %v14493_v24 = vcombine.low %v13524_v28, %v13525_v6  ;;  %v14494_v61 = vcombine.low %v13526_v42, %v13527_v3  ;;  %v7600_v51 = vsel %vm346_vm1, %v17492_v18, %v22672_v21  ;;  %v8635_v38 = vadd.f32 %v22287_v57, %v25764_v7 }
 0x462   : > { %v8630_v8 = vadd.f32 %v22287_v57, %v25765_v46  ;;  %16591 = vst.msk [vmem:[%s20460_s8 + $0x78] sm:$0xff] %vm346_vm1, %v14543_v63  ;;  %v14484_v31 = vrot.slane %v14476_v50, %v20363_v43  ;;  %v14491_v0 = vrot.slane %v14477_v29, %v20363_v43  ;;  %v8405_v58 = vsel %vm934_vm2, %v22727_v4, %v22701_v1  ;;  %v17493_v1 = vld [vmem:[#allocation2 + $0x140] sm:$0xff]  ;;  %v7531_v63 = vpop.permute.xlu0 %7530 }
 0x463   : > { %v14501_v26 = vrot.slane %v14493_v24, %v20363_v43  ;;  %v14508_v21 = vrot.slane %v14494_v61, %v20363_v43  ;;  %v10901_v33 = vcombine.high %v8635_v38, %v8635_v38  ;;  %v10908_v30 = vrot.slane %v8635_v38, %v19150_v17  ;;  %v8083_v50 = vpop.permute.xlu1 %8082 }
 0x464   : > { %v10852_v59 = vcombine.high %v8630_v8, %v8630_v8  ;;  %v14492_v11 = vcombine.low %v14484_v31, %v14491_v0  ;;  %v10859_v15 = vrot.slane %v8630_v8, %v19150_v17  ;;  %v8436_v20 = vsel %vm967_vm3, %v22730_v9, %v22709_v12 }
 0x465   : > { %v7601_v4 = vsel %vm346_vm1, %v17493_v1, %v22738_v56  ;;  %v14509_v39 = vcombine.low %v14501_v26, %v14508_v21  ;;  %v10915_v49 = vrot.slane %v10901_v33, %v19150_v17  ;;  %v10916_v5 = vcombine.high %v10908_v30, %v10908_v30  ;;  %17306 = vmatprep.mubr.msk.f32.mxu1 %vm1008_vm4, %v8436_v20  ;;  %v22812_v56 = vpop.f32.mrb[45].mxu0 }
 0x466   : > { %v22801_v32 = vrot.slane %v10908_v30, %v19150_v17  ;;  %16588 = vst.msk [vmem:[%s20460_s8 + $0x60] sm:$0xff] %vm346_vm1, %v14492_v11  ;;  %v10866_v36 = vrot.slane %v10852_v59, %v19150_v17  ;;  %v10867_v37 = vcombine.high %v10859_v15, %v10859_v15  ;;  %v22808_v12 = vrot.slane %v10859_v15, %v19150_v17 }
 0x467   : > { %v7632_v9 = vsel %vm934_vm2, %v7600_v51, %v22742_v52  ;;  %16589 = vst.msk [vmem:[%s20460_s8 + $0x68] sm:$0xff] %vm346_vm1, %v14509_v39  ;;  %v10917_v53 = vcombine.high %v10915_v49, %v10915_v49  ;;  %v22817_v16 = vrot.slane %v10915_v49, %v19150_v17  ;;  %v22820_v48 = vrot.slane %v10916_v5, %v19150_v17  ;;  %v25766_v39 = vld [vmem:[#allocation50_spill] sm:$0xff]  ;;  %v25767_v5 = vld [vmem:[#allocation35_spill] sm:$0xff] }
 0x468   : > { %v10946_v45 = vcombine.high %v22801_v32, %v22801_v32  ;;  %v12387_v10 = vrot.slane %v22801_v32, %v20357_v54  ;;  %v10868_v34 = vcombine.high %v10866_v36, %v10866_v36  ;;  %v22827_v52 = vrot.slane %v10866_v36, %v19150_v17 }
 0x469   : > { %v22830_v28 = vrot.slane %v10867_v37, %v19150_v17  ;;  %v22833_v62 = vrot.slane %v10917_v53, %v19150_v17  ;;  %v10947_v6 = vcombine.high %v22817_v16, %v22817_v16  ;;  %v10948_v42 = vcombine.high %v22820_v48, %v22820_v48 }
 0x46a   : > { %v12391_v3 = vrot.slane %v22820_v48, %v20357_v54  ;;  %v22842_v29 = vrot.slane %v10946_v45, %v20357_v54  ;;  %v12403_v24 = vrot.slane %v22817_v16, %v20357_v54  ;;  %v22847_v61 = vrot.slane %v10868_v34, %v19150_v17  ;;  %v8177_v45 = vpop.permute.xlu0 %8176  ;;  %v7277_v34 = vpop.permute.xlu1 %7276 }
 0x46b   : > { %v10897_v18 = vcombine.high %v22808_v12, %v22808_v12  ;;  %v10949_v51 = vcombine.high %v22833_v62, %v22833_v62  ;;  %v22854_v7 = vrot.slane %v10948_v42, %v20357_v54  ;;  %v12407_v38 = vrot.slane %v22833_v62, %v20357_v54  ;;  %v17494_v42 = vld [vmem:[#allocation2 + $0x151] sm:$0xff] }
 0x46c   : > { %v22859_v46 = vrot.slane %v10947_v6, %v20357_v54  ;;  %v10898_v8 = vcombine.high %v22827_v52, %v22827_v52  ;;  %v10899_v31 = vcombine.high %v22830_v28, %v22830_v28  ;;  %v10900_v0 = vcombine.high %v22847_v61, %v22847_v61 }
 0x46d   : > { %v12355_v26 = vrot.slane %v22808_v12, %v20357_v54  ;;  %v22870_v21 = vrot.slane %v10949_v51, %v20357_v54  ;;  %v12359_v33 = vrot.slane %v22830_v28, %v20357_v54  ;;  %v22875_v30 = vrot.slane %v10897_v18, %v20357_v54 }
 0x46e   : > { %v12371_v59 = vrot.slane %v22827_v52, %v20357_v54  ;;  %v22880_v11 = vrot.slane %v10899_v31, %v20357_v54  ;;  %v12375_v15 = vrot.slane %v22847_v61, %v20357_v54  ;;  %v22885_v20 = vrot.slane %v10898_v8, %v20357_v54  ;;  %v17495_v8 = vld [vmem:[#allocation2 + $0x159] sm:$0xff] }
 0x46f   : > { %v22888_v1 = vrot.slane %v10900_v0, %v20357_v54  ;;  %v7863_v49 = vadd.f32 %v22287_v57, %v25766_v39  ;;  %v7858_v36 = vadd.f32 %v22287_v57, %v25767_v5  ;;  %v8437_v37 = vsel %vm967_vm3, %v8405_v58, %v22762_v14 }
 0x470   : > { %v7633_v53 = vsel %vm934_vm2, %v7601_v4, %v22764_v40  ;;  %17307 = vmatmul.mubr.msk.f32.gmra.mrb[56].mxu1 %vm1008_vm4, %v8437_v37  ;;  %v7664_v6 = vsel %vm967_vm3, %v7632_v9, %v7529_v55  ;;  %v8374_v18 = vsel %vm346_vm1, %v17494_v42, %v8081_v19  ;;  %v22903_v31 = vsel %vm346_vm1, %v17495_v8, %v8083_v50  ;;  %v25768_v4 = vld [vmem:[#allocation51_spill] sm:$0xff] }
 0x471   : > { %v7665_v51 = vsel %vm967_vm3, %v7633_v53, %v7531_v63  ;;  %v9045_v0 = vcombine.high %v7863_v49, %v7863_v49  ;;  %v9052_v14 = vrot.slane %v7863_v49, %v19150_v17  ;;  %v8996_v58 = vcombine.high %v7858_v36, %v7858_v36  ;;  %17254 = vmatprep.mubr.msk.f32.mxu0 %vm1008_vm4, %v7664_v6  ;;  %v25769_v19 = vld [vmem:[#allocation15_spill] sm:$0xff] }
 0x472   : > { %v9003_v40 = vrot.slane %v7858_v36, %v19150_v17  ;;  %v22910_v55 = vadd.f32 %v22287_v57, %v25768_v4  ;;  %17255 = vmatmul.mubr.msk.f32.gmra.mrb[56].mxu0 %vm1008_vm4, %v7665_v51  ;;  %v22915_v9 = vadd.f32 %v22287_v57, %v25769_v19  ;;  %v22918_v63 = vsel %vm934_vm2, %v8374_v18, %v8177_v45  ;;  %v17496_v50 = vld [vmem:[#allocation2 + $0x150] sm:$0xff] }
 0x473   : > { %v22921_v39 = vsel %vm346_vm1, %v17496_v50, %v7277_v34  ;;  %v9059_v49 = vrot.slane %v9045_v0, %v19150_v17  ;;  %v9060_v5 = vcombine.high %v9052_v14, %v9052_v14  ;;  %v9068_v36 = vrot.slane %v9052_v14, %v19150_v17 }
 0x474   : > { %v9010_v37 = vrot.slane %v8996_v58, %v19150_v17  ;;  %v9011_v53 = vcombine.high %v9003_v40, %v9003_v40  ;;  %v9019_v6 = vrot.slane %v9003_v40, %v19150_v17  ;;  %v10999_v57 = vcombine.high %v22910_v55, %v22910_v55 }
 0x475   : > { %v22931_v45 = vrot.slane %v22910_v55, %v19150_v17  ;;  %v9061_v42 = vcombine.high %v9059_v49, %v9059_v49  ;;  %v9075_v34 = vrot.slane %v9059_v49, %v19150_v17  ;;  %v9082_v18 = vrot.slane %v9060_v5, %v19150_v17  ;;  %v22953_v5 = vpop.permute.xlu0 %8178 }
 0x476   : > { %v9090_v51 = vcombine.high %v9068_v36, %v9068_v36  ;;  %v13544_v8 = vsel %vm6902_vm5, %v9068_v36, %v12387_v10  ;;  %v9012_v0 = vcombine.high %v9010_v37, %v9010_v37  ;;  %v9026_v14 = vrot.slane %v9010_v37, %v19150_v17 }
 0x477   : > { %v9033_v58 = vrot.slane %v9011_v53, %v19150_v17  ;;  %v9089_v40 = vrot.slane %v9061_v42, %v19150_v17  ;;  %v9091_v4 = vcombine.high %v9075_v34, %v9075_v34  ;;  %v9092_v55 = vcombine.high %v9082_v18, %v9082_v18  ;;  %v22964_v42 = vpop.permute.xlu1 %8304 }
 0x478   : > { %v13545_v19 = vsel %vm6902_vm5, %v9082_v18, %v12391_v3  ;;  %v13546_v50 = vsel %vm6902_vm5, %v9090_v51, %v22842_v29  ;;  %v13548_v32 = vsel %vm6902_vm5, %v9075_v34, %v12403_v24  ;;  %v9040_v49 = vrot.slane %v9012_v0, %v19150_v17  ;;  %v22966_v34 = vpop.f32.mrb[46].mxu1 }
 0x479   : > { %v14646_v10 = vcombine.low %v13544_v8, %v13545_v19  ;;  %v9093_v36 = vcombine.high %v9089_v40, %v9089_v40  ;;  %v13547_v37 = vsel %vm6902_vm5, %v9092_v55, %v22854_v7  ;;  %v13549_v48 = vsel %vm6902_vm5, %v9089_v40, %v12407_v38  ;;  %v22970_v8 = vpop.f32.mrb[47].mxu1 }
 0x47a   : > { %v13550_v3 = vsel %vm6902_vm5, %v9091_v4, %v22859_v46  ;;  %v14647_v16 = vcombine.low %v13546_v50, %v13547_v37  ;;  %v14663_v24 = vcombine.low %v13548_v32, %v13549_v48  ;;  %v9041_v53 = vcombine.high %v9019_v6, %v9019_v6  ;;  %25770 = vst [vmem:[#allocation52_spill] sm:$0xff] %v22970_v8  ;;  %v23024_v48 = vpop.f32.mrb[46].mxu0 }
 0x47b   : > { %v14654_v29 = vrot.slane %v14646_v10, %v20363_v43  ;;  %v13551_v7 = vsel %vm6902_vm5, %v9093_v36, %v22870_v21  ;;  %v9042_v18 = vcombine.high %v9026_v14, %v9026_v14  ;;  %v9043_v51 = vcombine.high %v9033_v58, %v9033_v58  ;;  %25771 = vst [vmem:[#allocation37_spill] sm:$0xff] %v23024_v48 }
 0x47c   : > { %v9044_v62 = vcombine.high %v9040_v49, %v9040_v49  ;;  %v14661_v38 = vrot.slane %v14647_v16, %v20363_v43  ;;  %v14664_v46 = vcombine.low %v13550_v3, %v13551_v7  ;;  %v14671_v0 = vrot.slane %v14663_v24, %v20363_v43  ;;  %v23032_v24 = vpop.f32.mrb[47].mxu0 }
 0x47d   : > { %v13536_v40 = vsel %vm6902_vm5, %v9019_v6, %v12355_v26  ;;  %v13537_v21 = vsel %vm6902_vm5, %v9033_v58, %v12359_v33  ;;  %v13538_v4 = vsel %vm6902_vm5, %v9041_v53, %v22875_v30  ;;  %v13539_v55 = vsel %vm6902_vm5, %v9043_v51, %v22880_v11  ;;  %v22997_v33 = vpop.permute.xlu0 %7278  ;;  %v23006_v58 = vpop.permute.xlu1 %7404  ;;  %25772 = vst [vmem:[#allocation92_spill] sm:$0xff] %v23032_v24 }
 0x47e   : > { %v13540_v19 = vsel %vm6902_vm5, %v9026_v14, %v12371_v59  ;;  %v14662_v12 = vcombine.low %v14654_v29, %v14661_v38  ;;  %v14678_v50 = vrot.slane %v14664_v46, %v20363_v43  ;;  %v13541_v28 = vsel %vm6902_vm5, %v9040_v49, %v12375_v15 }
 0x47f   : > { %v13542_v26 = vsel %vm6902_vm5, %v9042_v18, %v22885_v20  ;;  %v13543_v30 = vsel %vm6902_vm5, %v9044_v62, %v22888_v1  ;;  %v14612_v52 = vcombine.low %v13536_v40, %v13537_v21  ;;  %v14613_v11 = vcombine.low %v13538_v4, %v13539_v55 }
 0x480   : > { %v14629_v59 = vcombine.low %v13540_v19, %v13541_v28  ;;  %v14679_v6 = vcombine.low %v14671_v0, %v14678_v50  ;;  %16598 = vst.msk [vmem:[%s20460_s8 + $0xb0] sm:$0xff] %vm346_vm1, %v14662_v12  ;;  %v14630_v14 = vcombine.low %v13542_v26, %v13543_v30  ;;  %v11013_v61 = vrot.slane %v10999_v57, %v19150_v17 }
 0x481   : > { %v11014_v15 = vcombine.high %v22931_v45, %v22931_v45  ;;  %v14620_v20 = vrot.slane %v14612_v52, %v20363_v43  ;;  %v14627_v32 = vrot.slane %v14613_v11, %v20363_v43  ;;  %v23013_v10 = vrot.slane %v22931_v45, %v19150_v17  ;;  %v23041_v62 = vpop.permute.xlu0 %8306  ;;  %v23060_v12 = vpop.permute.xlu1 %7406  ;;  %v23078_v11 = vld [vmem:[%s24824_s3] ss:$0 sm:$0xff] }
 0x482   : > { %v14637_v1 = vrot.slane %v14629_v59, %v20363_v43  ;;  %16599 = vst.msk [vmem:[%s20460_s8 + $0xb8] sm:$0xff] %vm346_vm1, %v14679_v6  ;;  %v14644_v57 = vrot.slane %v14630_v14, %v20363_v43  ;;  %v11015_v49 = vcombine.high %v11013_v61, %v11013_v61  ;;  %v23019_v36 = vrot.slane %v11013_v61, %v19150_v17  ;;  %v25773_v59 = vld [vmem:[#allocation86_spill] sm:$0xff]  ;;  %v25774_v14 = vld [vmem:[#allocation36_spill] sm:$0xff] }
 0x483   : > { %v23022_v37 = vrot.slane %v11014_v15, %v19150_v17  ;;  %v14628_v3 = vcombine.low %v14620_v20, %v14627_v32  ;;  %v11044_v45 = vcombine.high %v23013_v10, %v23013_v10  ;;  %v12451_v16 = vrot.slane %v23013_v10, %v20357_v54 }
 0x484   : > { %v10950_v29 = vcombine.high %v22915_v9, %v22915_v9  ;;  %v14645_v53 = vcombine.low %v14637_v1, %v14644_v57  ;;  %v23035_v7 = vrot.slane %v11015_v49, %v19150_v17  ;;  %v11045_v18 = vcombine.high %v23019_v36, %v23019_v36 }
 0x485   : > { %v11046_v51 = vcombine.high %v23022_v37, %v23022_v37  ;;  %16596 = vst.msk [vmem:[%s20460_s8 + $0xa0] sm:$0xff] %vm346_vm1, %v14628_v3  ;;  %v12455_v38 = vrot.slane %v23022_v37, %v20357_v54  ;;  %v12459_v46 = vrot.slane %v11044_v45, %v20357_v54  ;;  %v12467_v0 = vrot.slane %v23019_v36, %v20357_v54  ;;  %v23096_v57 = vpop.permute.xlu0 %7532 }
 0x486   : > { %v10957_v40 = vrot.slane %v22915_v9, %v19150_v17  ;;  %16597 = vst.msk [vmem:[%s20460_s8 + $0xa8] sm:$0xff] %vm346_vm1, %v14645_v53  ;;  %v11047_v21 = vcombine.high %v23035_v7, %v23035_v7  ;;  %v12471_v55 = vrot.slane %v23035_v7, %v20357_v54  ;;  %v12475_v19 = vrot.slane %v11045_v18, %v20357_v54  ;;  %v23111_v18 = vpop.permute.xlu1 %8084 }
 0x487   : > { %v12463_v4 = vrot.slane %v11046_v51, %v20357_v54  ;;  %v10964_v50 = vrot.slane %v10950_v29, %v19150_v17  ;;  %v23069_v9 = vsel %vm934_vm2, %v22903_v31, %v22953_v5  ;;  %v8438_v52 = vsel %vm967_vm3, %v22918_v63, %v22964_v42 }
 0x488   : > { %v10965_v28 = vcombine.high %v10957_v40, %v10957_v40  ;;  %v23064_v26 = vrot.slane %v10957_v40, %v19150_v17  ;;  %v12479_v30 = vrot.slane %v11047_v21, %v20357_v54  ;;  %v7873_v6 = vadd.f32 %v23078_v11, %v25773_v59  ;;  %17309 = vmatprep.mubr.msk.f32.mxu1 %vm1008_vm4, %v8438_v52 }
 0x489   : > { %v7868_v61 = vadd.f32 %v23078_v11, %v25774_v14  ;;  %v10966_v15 = vcombine.high %v10964_v50, %v10964_v50  ;;  %v23085_v31 = vrot.slane %v10964_v50, %v19150_v17 }
 0x48a   : > { %v23088_v5 = vrot.slane %v10965_v28, %v19150_v17  ;;  %v10995_v63 = vcombine.high %v23064_v26, %v23064_v26  ;;  %v12419_v42 = vrot.slane %v23064_v26, %v20357_v54  ;;  %v9143_v20 = vcombine.high %v7873_v6, %v7873_v6 }
 0x48b   : > { %v9150_v32 = vrot.slane %v7873_v6, %v19150_v17  ;;  %v9094_v1 = vcombine.high %v7868_v61, %v7868_v61  ;;  %v23099_v49 = vrot.slane %v10966_v15, %v19150_v17  ;;  %v10996_v36 = vcombine.high %v23085_v31, %v23085_v31 }
 0x48c   : > { %v10997_v37 = vcombine.high %v23088_v5, %v23088_v5  ;;  %v12423_v3 = vrot.slane %v23088_v5, %v20357_v54  ;;  %v12427_v45 = vrot.slane %v10995_v63, %v20357_v54  ;;  %v12435_v29 = vrot.slane %v23085_v31, %v20357_v54  ;;  %v17498_v31 = vld [vmem:[#allocation2 + $0x158] sm:$0xff] }
 0x48d   : > { %v9157_v53 = vrot.slane %v9143_v20, %v19150_v17  ;;  %v9158_v7 = vcombine.high %v9150_v32, %v9150_v32  ;;  %v10998_v51 = vcombine.high %v23099_v49, %v23099_v49  ;;  %v12439_v21 = vrot.slane %v23099_v49, %v20357_v54 }
 0x48e   : > { %v12431_v40 = vrot.slane %v10997_v37, %v20357_v54  ;;  %v12443_v50 = vrot.slane %v10996_v36, %v20357_v54  ;;  %v9166_v26 = vrot.slane %v9150_v32, %v19150_v17  ;;  %v9101_v14 = vrot.slane %v7868_v61, %v19150_v17  ;;  %v23128_v32 = vpop.permute.xlu0 %7534 }
 0x48f   : > { %v9159_v28 = vcombine.high %v9157_v53, %v9157_v53  ;;  %v9173_v52 = vrot.slane %v9157_v53, %v19150_v17  ;;  %v9180_v59 = vrot.slane %v9158_v7, %v19150_v17  ;;  %v12447_v6 = vrot.slane %v10998_v51, %v20357_v54 }
 0x490   : > { %v9108_v15 = vrot.slane %v9094_v1, %v19150_v17  ;;  %v7603_v5 = vsel %vm346_vm1, %v17498_v31, %v22997_v33  ;;  %v9188_v20 = vcombine.high %v9166_v26, %v9166_v26  ;;  %v13560_v37 = vsel %vm6902_vm5, %v9166_v26, %v12451_v16  ;;  %v8087_v31 = vpop.permute.xlu1 %8086 }
 0x491   : > { %v9187_v63 = vrot.slane %v9159_v28, %v19150_v17  ;;  %v9189_v49 = vcombine.high %v9173_v52, %v9173_v52  ;;  %v9190_v36 = vcombine.high %v9180_v59, %v9180_v59  ;;  %v13561_v61 = vsel %vm6902_vm5, %v9180_v59, %v12455_v38 }
 0x492   : > { %v13564_v1 = vsel %vm6902_vm5, %v9173_v52, %v12467_v0  ;;  %v9109_v53 = vcombine.high %v9101_v14, %v9101_v14  ;;  %v13562_v33 = vsel %vm6902_vm5, %v9188_v20, %v12459_v46  ;;  %v14782_v48 = vcombine.low %v13560_v37, %v13561_v61 }
 0x493   : > { %v9191_v7 = vcombine.high %v9187_v63, %v9187_v63  ;;  %v13563_v51 = vsel %vm6902_vm5, %v9190_v36, %v12463_v4  ;;  %v13565_v28 = vsel %vm6902_vm5, %v9187_v63, %v12471_v55  ;;  %v13566_v24 = vsel %vm6902_vm5, %v9189_v49, %v12475_v19 }
 0x494   : > { %v14783_v8 = vcombine.low %v13562_v33, %v13563_v51  ;;  %v14799_v10 = vcombine.low %v13564_v1, %v13565_v28  ;;  %v9110_v26 = vcombine.high %v9108_v15, %v9108_v15  ;;  %v9117_v38 = vrot.slane %v9101_v14, %v19150_v17  ;;  %v7281_v61 = vpop.permute.xlu1 %7280 }
 0x495   : > { %v13567_v16 = vsel %vm6902_vm5, %v9191_v7, %v12479_v30  ;;  %v9124_v0 = vrot.slane %v9108_v15, %v19150_v17  ;;  %v14790_v52 = vrot.slane %v14782_v48, %v20363_v43  ;;  %v9131_v19 = vrot.slane %v9109_v53, %v19150_v17  ;;  %v8181_v30 = vpop.permute.xlu0 %8180 }
 0x496   : > { %v14797_v46 = vrot.slane %v14783_v8, %v20363_v43  ;;  %v14800_v4 = vcombine.low %v13566_v24, %v13567_v16  ;;  %v14807_v55 = vrot.slane %v14799_v10, %v20363_v43  ;;  %v9138_v59 = vrot.slane %v9110_v26, %v19150_v17 }
 0x497   : > { %v9139_v63 = vcombine.high %v9117_v38, %v9117_v38  ;;  %v9140_v20 = vcombine.high %v9124_v0, %v9124_v0  ;;  %v13552_v15 = vsel %vm6902_vm5, %v9117_v38, %v12419_v42  ;;  %v13556_v48 = vsel %vm6902_vm5, %v9124_v0, %v12435_v29  ;;  %v17501_v0 = vld [vmem:[#allocation2 + $0x168] sm:$0xff] }
 0x498   : > { %v14798_v49 = vcombine.low %v14790_v52, %v14797_v46  ;;  %v14814_v14 = vrot.slane %v14800_v4, %v20363_v43  ;;  %v9141_v8 = vcombine.high %v9131_v19, %v9131_v19  ;;  %v9142_v24 = vcombine.high %v9138_v59, %v9138_v59 }
 0x499   : > { %v13553_v36 = vsel %vm6902_vm5, %v9131_v19, %v12423_v3  ;;  %v13554_v37 = vsel %vm6902_vm5, %v9139_v63, %v12427_v45  ;;  %v13557_v53 = vsel %vm6902_vm5, %v9138_v59, %v12439_v21  ;;  %v13558_v7 = vsel %vm6902_vm5, %v9140_v20, %v12443_v50  ;;  %v8183_v16 = vpop.permute.xlu0 %8182 }
 0x49a   : > { %v14815_v1 = vcombine.low %v14807_v55, %v14814_v14  ;;  %16606 = vst.msk [vmem:[%s20460_s8 + $0xf0] sm:$0xff] %vm346_vm1, %v14798_v49  ;;  %v14748_v33 = vcombine.low %v13552_v15, %v13553_v36  ;;  %v13555_v42 = vsel %vm6902_vm5, %v9141_v8, %v12431_v40  ;;  %v13559_v51 = vsel %vm6902_vm5, %v9142_v24, %v12447_v6 }
 0x49b   : > { %v14765_v29 = vcombine.low %v13556_v48, %v13557_v53  ;;  %v7634_v3 = vsel %vm934_vm2, %v22921_v39, %v23006_v58  ;;  %v14749_v45 = vcombine.low %v13554_v37, %v13555_v42  ;;  %v14766_v10 = vcombine.low %v13558_v7, %v13559_v51  ;;  %v17499_v58 = vld [vmem:[#allocation2 + $0x169] sm:$0xff] }
 0x49c   : > { %16607 = vst.msk [vmem:[%s20460_s8 + $0xf8] sm:$0xff] %vm346_vm1, %v14815_v1  ;;  %v14756_v28 = vrot.slane %v14748_v33, %v20363_v43  ;;  %v8439_v21 = vsel %vm967_vm3, %v23069_v9, %v23041_v62  ;;  %v7635_v40 = vsel %vm934_vm2, %v7603_v5, %v23060_v12  ;;  %v7666_v39 = vsel %vm967_vm3, %v7634_v3, %v23096_v57  ;;  %v17500_v57 = vld [vmem:[#allocation2 + $0x171] sm:$0xff] }
 0x49d   : > { %v14773_v50 = vrot.slane %v14765_v29, %v20363_v43  ;;  %17310 = vmatmul.mubr.msk.f32.gmra.mrb[58].mxu1 %vm1008_vm4, %v8439_v21  ;;  %v8376_v6 = vsel %vm346_vm1, %v17499_v58, %v23111_v18  ;;  %v14763_v26 = vrot.slane %v14749_v45, %v20363_v43  ;;  %v14780_v38 = vrot.slane %v14766_v10, %v20363_v43 }
 0x49e   : > { %v8655_v62 = vadd.f32 %v23078_v11, %v22423_v27  ;;  %17257 = vmatprep.mubr.msk.f32.mxu0 %vm1008_vm4, %v7666_v39  ;;  %v8650_v12 = vadd.f32 %v23078_v11, %v22431_v2  ;;  %v7667_v9 = vsel %vm967_vm3, %v7635_v40, %v23128_v32  ;;  %v8377_v18 = vsel %vm346_vm1, %v17500_v57, %v8087_v31  ;;  %v8309_v27 = vpop.permute.xlu1 %8308 }
 0x49f   : > { %v23187_v5 = vsel %vm934_vm2, %v8376_v6, %v8181_v30  ;;  %v23190_v52 = vsel %vm346_vm1, %v17501_v0, %v7281_v61  ;;  %v14764_v46 = vcombine.low %v14756_v28, %v14763_v26  ;;  %v14781_v4 = vcombine.low %v14773_v50, %v14780_v38  ;;  %17258 = vmatmul.mubr.msk.f32.gmra.mrb[58].mxu0 %vm1008_vm4, %v7667_v9 }
 0x4a0   : > { %v11097_v55 = vcombine.high %v8655_v62, %v8655_v62  ;;  %v11104_v2 = vrot.slane %v8655_v62, %v19150_v17  ;;  %v11048_v32 = vcombine.high %v8650_v12, %v8650_v12  ;;  %v11055_v19 = vrot.slane %v8650_v12, %v19150_v17 }
 0x4a1   : > { %v7883_v31 = vadd.f32 %v23078_v11, %v22498_v25  ;;  %v7878_v59 = vadd.f32 %v23078_v11, %v22504_v22  ;;  %16604 = vst.msk [vmem:[%s20460_s8 + $0xe0] sm:$0xff] %vm346_vm1, %v14764_v46  ;;  %16605 = vst.msk [vmem:[%s20460_s8 + $0xe8] sm:$0xff] %vm346_vm1, %v14781_v4  ;;  %v8409_v49 = vsel %vm934_vm2, %v8377_v18, %v8183_v16  ;;  %v7283_v22 = vpop.permute.xlu0 %7282 }
 0x4a2   : > { %v11111_v63 = vrot.slane %v11097_v55, %v19150_v17  ;;  %v11112_v20 = vcombine.high %v11104_v2, %v11104_v2  ;;  %v23205_v30 = vrot.slane %v11104_v2, %v19150_v17  ;;  %v11062_v14 = vrot.slane %v11048_v32, %v19150_v17  ;;  %v7409_v33 = vpop.permute.xlu1 %7408 }
 0x4a3   : > { %v11063_v15 = vcombine.high %v11055_v19, %v11055_v19  ;;  %v23210_v25 = vrot.slane %v11055_v19, %v19150_v17  ;;  %v9241_v48 = vcombine.high %v7883_v31, %v7883_v31  ;;  %v9248_v32 = vrot.slane %v7883_v31, %v19150_v17 }
 0x4a4   : > { %v11113_v8 = vcombine.high %v11111_v63, %v11111_v63  ;;  %v11127_v24 = vrot.slane %v11111_v63, %v19150_v17  ;;  %v23214_v36 = vrot.slane %v11112_v20, %v19150_v17  ;;  %v11142_v37 = vcombine.high %v23205_v30, %v23205_v30 }
 0x4a5   : > { %v12515_v61 = vrot.slane %v23205_v30, %v20357_v54  ;;  %v11064_v1 = vcombine.high %v11062_v14, %v11062_v14  ;;  %v23221_v53 = vrot.slane %v11062_v14, %v19150_v17  ;;  %v23224_v7 = vrot.slane %v11063_v15, %v19150_v17  ;;  %v8311_v62 = vpop.permute.xlu0 %8310  ;;  %v17502_v14 = vld [vmem:[#allocation2 + $0x170] sm:$0xff] }
 0x4a6   : > { %v11141_v42 = vrot.slane %v11113_v8, %v19150_v17  ;;  %v11143_v51 = vcombine.high %v11127_v24, %v11127_v24  ;;  %v11144_v29 = vcombine.high %v23214_v36, %v23214_v36  ;;  %v12519_v3 = vrot.slane %v23214_v36, %v20357_v54  ;;  %v7411_v2 = vpop.permute.xlu1 %7410 }
 0x4a7   : > { %v12523_v45 = vrot.slane %v11142_v37, %v20357_v54  ;;  %v12531_v28 = vrot.slane %v11127_v24, %v20357_v54  ;;  %v23234_v10 = vrot.slane %v11064_v1, %v19150_v17  ;;  %v11093_v21 = vcombine.high %v23210_v25, %v23210_v25 }
 0x4a8   : > { %v11145_v50 = vcombine.high %v11141_v42, %v11141_v42  ;;  %v12527_v40 = vrot.slane %v11144_v29, %v20357_v54  ;;  %v12535_v39 = vrot.slane %v11141_v42, %v20357_v54  ;;  %v12539_v58 = vrot.slane %v11143_v51, %v20357_v54 }
 0x4a9   : > { %v11094_v6 = vcombine.high %v23221_v53, %v23221_v53  ;;  %v11095_v16 = vcombine.high %v23224_v7, %v23224_v7  ;;  %v11096_v26 = vcombine.high %v23234_v10, %v23234_v10  ;;  %v12483_v38 = vrot.slane %v23210_v25, %v20357_v54 }
 0x4aa   : > { %v12543_v12 = vrot.slane %v11145_v50, %v20357_v54  ;;  %v12487_v9 = vrot.slane %v23224_v7, %v20357_v54  ;;  %v23253_v57 = vrot.slane %v11093_v21, %v20357_v54  ;;  %v12499_v18 = vrot.slane %v23221_v53, %v20357_v54  ;;  %v8089_v50 = vpop.permute.xlu1 %8088 }
 0x4ab   : > { %v12495_v0 = vrot.slane %v11095_v16, %v20357_v54  ;;  %v12503_v46 = vrot.slane %v23234_v10, %v20357_v54  ;;  %v23261_v4 = vrot.slane %v11094_v6, %v20357_v54  ;;  %v23264_v55 = vrot.slane %v11096_v26, %v20357_v54 }
 0x4ac   : > { %v9255_v19 = vrot.slane %v9241_v48, %v19150_v17  ;;  %v9192_v63 = vcombine.high %v7878_v59, %v7878_v59  ;;  %v9199_v20 = vrot.slane %v7878_v59, %v19150_v17  ;;  %v8440_v30 = vsel %vm967_vm3, %v23187_v5, %v8309_v27 }
 0x4ad   : > { %v7605_v15 = vsel %vm346_vm1, %v17502_v14, %v7283_v22  ;;  %v23274_v8 = vsel %vm934_vm2, %v23190_v52, %v7409_v33  ;;  %v8441_v24 = vsel %vm967_vm3, %v8409_v49, %v8311_v62  ;;  %v9256_v36 = vcombine.high %v9248_v32, %v9248_v32  ;;  %17312 = vmatprep.mubr.msk.f32.mxu1 %vm1008_vm4, %v8440_v30  ;;  %v7537_v52 = vpop.permute.xlu0 %7536 }
 0x4ae   : > { %v9257_v37 = vcombine.high %v9255_v19, %v9255_v19  ;;  %v9264_v31 = vrot.slane %v9248_v32, %v19150_v17  ;;  %v9271_v48 = vrot.slane %v9255_v19, %v19150_v17  ;;  %v9206_v59 = vrot.slane %v9192_v63, %v19150_v17  ;;  %17313 = vmatmul.mubr.msk.f32.gmra.mrb[60].mxu1 %vm1008_vm4, %v8441_v24 }
 0x4af   : > { %v9207_v5 = vcombine.high %v9199_v20, %v9199_v20  ;;  %v9215_v27 = vrot.slane %v9199_v20, %v19150_v17  ;;  %v23283_v22 = vsel %vm934_vm2, %v7605_v15, %v7411_v2  ;;  %v9278_v49 = vrot.slane %v9256_v36, %v19150_v17 }
 0x4b0   : > { %v9285_v1 = vrot.slane %v9257_v37, %v19150_v17  ;;  %v9286_v7 = vcombine.high %v9264_v31, %v9264_v31  ;;  %v9287_v33 = vcombine.high %v9271_v48, %v9271_v48  ;;  %v13576_v42 = vsel %vm6902_vm5, %v9264_v31, %v12515_v61 }
 0x4b1   : > { %v13580_v51 = vsel %vm6902_vm5, %v9271_v48, %v12531_v28  ;;  %v9208_v29 = vcombine.high %v9206_v59, %v9206_v59  ;;  %v9222_v21 = vrot.slane %v9206_v59, %v19150_v17  ;;  %v9288_v6 = vcombine.high %v9278_v49, %v9278_v49  ;;  %v8091_v59 = vpop.permute.xlu1 %8090 }
 0x4b2   : > { %v9289_v16 = vcombine.high %v9285_v1, %v9285_v1  ;;  %v13577_v26 = vsel %vm6902_vm5, %v9278_v49, %v12519_v3  ;;  %v13578_v62 = vsel %vm6902_vm5, %v9286_v7, %v12523_v45  ;;  %v13581_v2 = vsel %vm6902_vm5, %v9285_v1, %v12535_v39  ;;  %v7539_v45 = vpop.permute.xlu0 %7538 }
 0x4b3   : > { %v13582_v32 = vsel %vm6902_vm5, %v9287_v33, %v12539_v58  ;;  %v14918_v19 = vcombine.low %v13576_v42, %v13577_v26  ;;  %v9229_v63 = vrot.slane %v9207_v5, %v19150_v17  ;;  %v13579_v61 = vsel %vm6902_vm5, %v9288_v6, %v12527_v40 }
 0x4b4   : > { %v13583_v28 = vsel %vm6902_vm5, %v9289_v16, %v12543_v12  ;;  %v14935_v20 = vcombine.low %v13580_v51, %v13581_v2  ;;  %v9236_v30 = vrot.slane %v9208_v29, %v19150_v17  ;;  %v14919_v14 = vcombine.low %v13578_v62, %v13579_v61  ;;  %v17504_v2 = vld [vmem:[#allocation2 + $0x189] sm:$0xff] }
 0x4b5   : > { %v14926_v15 = vrot.slane %v14918_v19, %v20363_v43  ;;  %v14936_v3 = vcombine.low %v13582_v32, %v13583_v28  ;;  %v9237_v24 = vcombine.high %v9215_v27, %v9215_v27  ;;  %v9238_v36 = vcombine.high %v9222_v21, %v9222_v21  ;;  %v7285_v6 = vpop.permute.xlu1 %7284 }
 0x4b6   : > { %v14943_v39 = vrot.slane %v14935_v20, %v20363_v43  ;;  %v9239_v58 = vcombine.high %v9229_v63, %v9229_v63  ;;  %v9240_v37 = vcombine.high %v9236_v30, %v9236_v30  ;;  %v14933_v31 = vrot.slane %v14919_v14, %v20363_v43 }
 0x4b7   : > { %v14950_v40 = vrot.slane %v14936_v3, %v20363_v43  ;;  %v13568_v12 = vsel %vm6902_vm5, %v9215_v27, %v12483_v38  ;;  %v13569_v48 = vsel %vm6902_vm5, %v9229_v63, %v12487_v9  ;;  %v13570_v5 = vsel %vm6902_vm5, %v9237_v24, %v23253_v57 }
 0x4b8   : > { %v13571_v49 = vsel %vm6902_vm5, %v9239_v58, %v12495_v0  ;;  %v13572_v1 = vsel %vm6902_vm5, %v9222_v21, %v12499_v18  ;;  %v13573_v25 = vsel %vm6902_vm5, %v9236_v30, %v12503_v46  ;;  %v14934_v38 = vcombine.low %v14926_v15, %v14933_v31  ;;  %v17503_v46 = vld [vmem:[#allocation2 + $0x181] sm:$0xff] }
 0x4b9   : > { %v14951_v27 = vcombine.low %v14943_v39, %v14950_v40  ;;  %v13574_v9 = vsel %vm6902_vm5, %v9238_v36, %v23261_v4  ;;  %v13575_v57 = vsel %vm6902_vm5, %v9240_v37, %v23264_v55  ;;  %v14884_v7 = vcombine.low %v13568_v12, %v13569_v48  ;;  %v23336_v55 = vpop.permute.xlu0 %8184  ;;  %v8313_v48 = vpop.permute.xlu1 %8312 }
 0x4ba   : > { %v14885_v0 = vcombine.low %v13570_v5, %v13571_v49  ;;  %v14901_v33 = vcombine.low %v13572_v1, %v13573_v25  ;;  %v14902_v42 = vcombine.low %v13574_v9, %v13575_v57  ;;  %16614 = vst.msk [vmem:[%s20460_s8 + $0x130] sm:$0xff] %vm346_vm1, %v14934_v38  ;;  %v8665_v53 = vadd.f32 %v23078_v11, %v22584_v60 }
 0x4bb   : > { %16615 = vst.msk [vmem:[%s20460_s8 + $0x138] sm:$0xff] %vm346_vm1, %v14951_v27  ;;  %v8660_v10 = vadd.f32 %v23078_v11, %v22587_v47  ;;  %v7668_v18 = vsel %vm967_vm3, %v23274_v8, %v7537_v52  ;;  %v23334_v4 = vsel %vm346_vm1, %v17503_v46, %v8089_v50  ;;  %v14892_v51 = vrot.slane %v14884_v7, %v20363_v43 }
 0x4bc   : > { %v14899_v29 = vrot.slane %v14885_v0, %v20363_v43  ;;  %v14909_v21 = vrot.slane %v14901_v33, %v20363_v43  ;;  %v14916_v60 = vrot.slane %v14902_v42, %v20363_v43  ;;  %17260 = vmatprep.mubr.msk.f32.mxu0 %vm1008_vm4, %v7668_v18  ;;  %v11195_v47 = vcombine.high %v8665_v53, %v8665_v53 }
 0x4bd   : > { %v11202_v8 = vrot.slane %v8665_v53, %v19150_v17  ;;  %v11146_v52 = vcombine.high %v8660_v10, %v8660_v10  ;;  %v11153_v50 = vrot.slane %v8660_v10, %v19150_v17  ;;  %v7669_v62 = vsel %vm967_vm3, %v23283_v22, %v7539_v45  ;;  %v8187_v39 = vpop.permute.xlu0 %8186 }
 0x4be   : > { %v14900_v16 = vcombine.low %v14892_v51, %v14899_v29  ;;  %v14917_v26 = vcombine.low %v14909_v21, %v14916_v60  ;;  %v8379_v32 = vsel %vm346_vm1, %v17504_v2, %v8091_v59  ;;  %v11209_v19 = vrot.slane %v11195_v47, %v19150_v17  ;;  %17261 = vmatmul.mubr.msk.f32.gmra.mrb[60].mxu0 %vm1008_vm4, %v7669_v62  ;;  %v17505_v62 = vld [vmem:[#allocation2 + $0x180] sm:$0xff] }
 0x4bf   : > { %v11210_v63 = vcombine.high %v11202_v8, %v11202_v8  ;;  %v23350_v61 = vrot.slane %v11202_v8, %v19150_v17  ;;  %v11160_v28 = vrot.slane %v11146_v52, %v19150_v17  ;;  %v11161_v20 = vcombine.high %v11153_v50, %v11153_v50 }
 0x4c0   : > { %16612 = vst.msk [vmem:[%s20460_s8 + $0x120] sm:$0xff] %vm346_vm1, %v14900_v16  ;;  %16613 = vst.msk [vmem:[%s20460_s8 + $0x128] sm:$0xff] %vm346_vm1, %v14917_v26  ;;  %v23359_v22 = vrot.slane %v11153_v50, %v19150_v17  ;;  %v7893_v30 = vadd.f32 %v23078_v11, %v22637_v41  ;;  %v7888_v14 = vadd.f32 %v23078_v11, %v22648_v23  ;;  %v7413_v16 = vpop.permute.xlu1 %7412 }
 0x4c1   : > { %v11211_v15 = vcombine.high %v11209_v19, %v11209_v19  ;;  %v23366_v3 = vrot.slane %v11209_v19, %v19150_v17  ;;  %v23369_v24 = vrot.slane %v11210_v63, %v19150_v17  ;;  %v11240_v45 = vcombine.high %v23350_v61, %v23350_v61  ;;  %v7287_v46 = vpop.permute.xlu0 %7286  ;;  %v17506_v63 = vld [vmem:[#allocation2 + $0x188] sm:$0xff] }
 0x4c2   : > { %v12579_v36 = vrot.slane %v23350_v61, %v20357_v54  ;;  %v11162_v58 = vcombine.high %v11160_v28, %v11160_v28  ;;  %v23376_v41 = vrot.slane %v11160_v28, %v19150_v17  ;;  %v23379_v23 = vrot.slane %v11161_v20, %v19150_v17 }
 0x4c3   : > { %v23382_v37 = vrot.slane %v11211_v15, %v19150_v17  ;;  %v11241_v31 = vcombine.high %v23366_v3, %v23366_v3  ;;  %v11242_v40 = vcombine.high %v23369_v24, %v23369_v24  ;;  %v12583_v12 = vrot.slane %v23369_v24, %v20357_v54 }
 0x4c4   : > { %v12587_v59 = vrot.slane %v11240_v45, %v20357_v54  ;;  %v12595_v5 = vrot.slane %v23366_v3, %v20357_v54  ;;  %v23394_v49 = vrot.slane %v11162_v58, %v19150_v17  ;;  %v11191_v1 = vcombine.high %v23359_v22, %v23359_v22 }
 0x4c5   : > { %v11243_v25 = vcombine.high %v23382_v37, %v23382_v37  ;;  %v12591_v38 = vrot.slane %v11242_v40, %v20357_v54  ;;  %v12599_v27 = vrot.slane %v23382_v37, %v20357_v54  ;;  %v12603_v9 = vrot.slane %v11241_v31, %v20357_v54 }
 0x4c6   : > { %v11192_v57 = vcombine.high %v23376_v41, %v23376_v41  ;;  %v11193_v7 = vcombine.high %v23379_v23, %v23379_v23  ;;  %v11194_v0 = vcombine.high %v23394_v49, %v23394_v49  ;;  %v12547_v33 = vrot.slane %v23359_v22, %v20357_v54 }
 0x4c7   : > { %v12607_v42 = vrot.slane %v11243_v25, %v20357_v54  ;;  %v12551_v53 = vrot.slane %v23379_v23, %v20357_v54  ;;  %v23416_v10 = vrot.slane %v11191_v1, %v20357_v54  ;;  %v12563_v18 = vrot.slane %v23376_v41, %v20357_v54 }
 0x4c8   : > { %v12559_v51 = vrot.slane %v11193_v7, %v20357_v54  ;;  %v12567_v29 = vrot.slane %v23394_v49, %v20357_v54  ;;  %v23424_v21 = vrot.slane %v11192_v57, %v20357_v54  ;;  %v23427_v60 = vrot.slane %v11194_v0, %v20357_v54 }
 0x4c9   : > { %v9339_v47 = vcombine.high %v7893_v30, %v7893_v30  ;;  %v9346_v8 = vrot.slane %v7893_v30, %v19150_v17  ;;  %v9290_v52 = vcombine.high %v7888_v14, %v7888_v14  ;;  %v9297_v50 = vrot.slane %v7888_v14, %v19150_v17 }
 0x4ca   : > { %v8410_v26 = vsel %vm934_vm2, %v23334_v4, %v23336_v55  ;;  %v7606_v2 = vsel %vm346_vm1, %v17505_v62, %v7285_v6  ;;  %v23436_v19 = vsel %vm934_vm2, %v8379_v32, %v8187_v39  ;;  %v23439_v61 = vsel %vm346_vm1, %v17506_v63, %v7287_v46 }
 0x4cb   : > { %v9353_v28 = vrot.slane %v9339_v47, %v19150_v17  ;;  %v9354_v20 = vcombine.high %v9346_v8, %v9346_v8  ;;  %v9362_v30 = vrot.slane %v9346_v8, %v19150_v17  ;;  %v9304_v14 = vrot.slane %v9290_v52, %v19150_v17 }
 0x4cc   : > { %v9305_v15 = vcombine.high %v9297_v50, %v9297_v50  ;;  %v9313_v4 = vrot.slane %v9297_v50, %v19150_v17  ;;  %v8442_v55 = vsel %vm967_vm3, %v8410_v26, %v8313_v48  ;;  %v23447_v6 = vsel %vm934_vm2, %v7606_v2, %v7413_v16 }
 0x4cd   : > { %v9355_v32 = vcombine.high %v9353_v28, %v9353_v28  ;;  %v9369_v3 = vrot.slane %v9353_v28, %v19150_v17  ;;  %v9376_v24 = vrot.slane %v9354_v20, %v19150_v17  ;;  %v9384_v45 = vcombine.high %v9362_v30, %v9362_v30  ;;  %17315 = vmatprep.mubr.msk.f32.mxu1 %vm1008_vm4, %v8442_v55 }
 0x4ce   : > { %v13592_v39 = vsel %vm6902_vm5, %v9362_v30, %v12579_v36  ;;  %v9306_v58 = vcombine.high %v9304_v14, %v9304_v14  ;;  %v9320_v37 = vrot.slane %v9304_v14, %v19150_v17  ;;  %v9327_v31 = vrot.slane %v9305_v15, %v19150_v17 }
 0x4cf   : > { %v9383_v40 = vrot.slane %v9355_v32, %v19150_v17  ;;  %v9385_v48 = vcombine.high %v9369_v3, %v9369_v3  ;;  %v9386_v1 = vcombine.high %v9376_v24, %v9376_v24  ;;  %v13593_v25 = vsel %vm6902_vm5, %v9376_v24, %v12583_v12  ;;  %v8315_v12 = vpop.permute.xlu0 %8314 }
 0x4d0   : > { %v13594_v57 = vsel %vm6902_vm5, %v9384_v45, %v12587_v59  ;;  %v13596_v7 = vsel %vm6902_vm5, %v9369_v3, %v12595_v5  ;;  %v15054_v0 = vcombine.low %v13592_v39, %v13593_v25  ;;  %v9334_v46 = vrot.slane %v9306_v58, %v19150_v17 }
 0x4d1   : > { %v9387_v47 = vcombine.high %v9383_v40, %v9383_v40  ;;  %v13595_v36 = vsel %vm6902_vm5, %v9386_v1, %v12591_v38  ;;  %v13597_v8 = vsel %vm6902_vm5, %v9383_v40, %v12599_v27  ;;  %v13598_v52 = vsel %vm6902_vm5, %v9385_v48, %v12603_v9  ;;  %v7415_v9 = vpop.permute.xlu1 %7414 }
 0x4d2   : > { %v15055_v50 = vcombine.low %v13594_v57, %v13595_v36  ;;  %v15062_v16 = vrot.slane %v15054_v0, %v20363_v43  ;;  %v15071_v26 = vcombine.low %v13596_v7, %v13597_v8  ;;  %v9335_v62 = vcombine.high %v9313_v4, %v9313_v4 }
 0x4d3   : > { %v13599_v59 = vsel %vm6902_vm5, %v9387_v47, %v12607_v42  ;;  %v9336_v2 = vcombine.high %v9320_v37, %v9320_v37  ;;  %v9337_v5 = vcombine.high %v9327_v31, %v9327_v31  ;;  %v9338_v63 = vcombine.high %v9334_v46, %v9334_v46 }
 0x4d4   : > { %v15069_v28 = vrot.slane %v15055_v50, %v20363_v43  ;;  %v15072_v20 = vcombine.low %v13598_v52, %v13599_v59  ;;  %v15079_v38 = vrot.slane %v15071_v26, %v20363_v43  ;;  %v13584_v27 = vsel %vm6902_vm5, %v9313_v4, %v12547_v33 }
 0x4d5   : > { %v13585_v42 = vsel %vm6902_vm5, %v9327_v31, %v12551_v53  ;;  %v13586_v30 = vsel %vm6902_vm5, %v9335_v62, %v23416_v10  ;;  %v13587_v14 = vsel %vm6902_vm5, %v9337_v5, %v12559_v51  ;;  %v13588_v15 = vsel %vm6902_vm5, %v9320_v37, %v12563_v18 }
 0x4d6   : > { %v15070_v22 = vcombine.low %v15062_v16, %v15069_v28  ;;  %v15086_v55 = vrot.slane %v15072_v20, %v20363_v43  ;;  %v13589_v23 = vsel %vm6902_vm5, %v9334_v46, %v12567_v29  ;;  %v13590_v33 = vsel %vm6902_vm5, %v9336_v2, %v23424_v21  ;;  %v7541_v29 = vpop.permute.xlu0 %7540 }
 0x4d7   : > { %v13591_v53 = vsel %vm6902_vm5, %v9338_v63, %v23427_v60  ;;  %v15020_v10 = vcombine.low %v13584_v27, %v13585_v42  ;;  %v15021_v51 = vcombine.low %v13586_v30, %v13587_v14  ;;  %v15037_v41 = vcombine.low %v13588_v15, %v13589_v23 }
 0x4d8   : > { %v15087_v4 = vcombine.low %v15079_v38, %v15086_v55  ;;  %16622 = vst.msk [vmem:[%s20460_s8 + $0x170] sm:$0xff] %vm346_vm1, %v15070_v22  ;;  %v15038_v18 = vcombine.low %v13590_v33, %v13591_v53  ;;  %v8675_v32 = vadd.f32 %v23078_v11, %v22744_v44  ;;  %v8670_v49 = vadd.f32 %v23078_v11, %v22748_v35  ;;  %v7543_v35 = vpop.permute.xlu1 %7542 }
 0x4d9   : > { %v15028_v3 = vrot.slane %v15020_v10, %v20363_v43  ;;  %v15035_v21 = vrot.slane %v15021_v51, %v20363_v43  ;;  %v15045_v60 = vrot.slane %v15037_v41, %v20363_v43  ;;  %v8443_v24 = vsel %vm967_vm3, %v23436_v19, %v8315_v12 }
 0x4da   : > { %16623 = vst.msk [vmem:[%s20460_s8 + $0x178] sm:$0xff] %vm346_vm1, %v15087_v4  ;;  %v15052_v45 = vrot.slane %v15038_v18, %v20363_v43  ;;  %v11293_v39 = vcombine.high %v8675_v32, %v8675_v32  ;;  %v11300_v44 = vrot.slane %v8675_v32, %v19150_v17  ;;  %v11244_v58 = vcombine.high %v8670_v49, %v8670_v49  ;;  %v17296_v5 = vpop.f32.mrb[48].mxu1 }
 0x4db   : > { %17316 = vmatmul.mubr.msk.f32.gmra.mrb[62].mxu1 %vm1008_vm4, %v8443_v24  ;;  %v15036_v37 = vcombine.low %v15028_v3, %v15035_v21  ;;  %v11251_v31 = vrot.slane %v8670_v49, %v19150_v17  ;;  %v7639_v40 = vsel %vm934_vm2, %v23439_v61, %v7415_v9  ;;  %v7670_v19 = vsel %vm967_vm3, %v23447_v6, %v7541_v29  ;;  %v8689_v27 = vpop.f32.mrb[49].mxu1  ;;  %v25775_v21 = vld [vmem:[#allocation52_spill] sm:$0xff]  ;;  %v25776_v24 = vld [vmem:[#allocation37_spill] sm:$0xff] }
 0x4dc   : > { %v15053_v48 = vcombine.low %v15045_v60, %v15052_v45  ;;  %v11307_v1 = vrot.slane %v11293_v39, %v19150_v17  ;;  %v11308_v25 = vcombine.high %v11300_v44, %v11300_v44  ;;  %v23514_v57 = vrot.slane %v11300_v44, %v19150_v17  ;;  %17263 = vmatprep.mubr.msk.f32.mxu0 %vm1008_vm4, %v7670_v19  ;;  %v25777_v39 = vld [vmem:[#allocation92_spill] sm:$0xff] }
 0x4dd   : > { %16620 = vst.msk [vmem:[%s20460_s8 + $0x160] sm:$0xff] %vm346_vm1, %v15036_v37  ;;  %v11258_v7 = vrot.slane %v11244_v58, %v19150_v17  ;;  %v11259_v0 = vcombine.high %v11251_v31, %v11251_v31  ;;  %v23521_v46 = vrot.slane %v11251_v31, %v19150_v17  ;;  %v7671_v61 = vsel %vm967_vm3, %v7639_v40, %v7543_v35 }
 0x4de   : > { %16621 = vst.msk [vmem:[%s20460_s8 + $0x168] sm:$0xff] %vm346_vm1, %v15053_v48  ;;  %v11309_v6 = vcombine.high %v11307_v1, %v11307_v1  ;;  %v23527_v47 = vrot.slane %v11307_v1, %v19150_v17  ;;  %v23530_v36 = vrot.slane %v11308_v25, %v19150_v17  ;;  %v11338_v8 = vcombine.high %v23514_v57, %v23514_v57 }
 0x4df   : > { %17264 = vmatmul.mubr.msk.f32.gmra.mrb[62].mxu0 %vm1008_vm4, %v7671_v61  ;;  %v12643_v52 = vrot.slane %v23514_v57, %v20357_v54  ;;  %v11260_v50 = vcombine.high %v11258_v7, %v11258_v7  ;;  %v23538_v16 = vrot.slane %v11258_v7, %v19150_v17  ;;  %v23541_v26 = vrot.slane %v11259_v0, %v19150_v17 }
 0x4e0   : > { %v23544_v62 = vrot.slane %v11309_v6, %v19150_v17  ;;  %v11339_v12 = vcombine.high %v23527_v47, %v23527_v47  ;;  %v11340_v59 = vcombine.high %v23530_v36, %v23530_v36  ;;  %v12647_v2 = vrot.slane %v23530_v36, %v20357_v54 }
 0x4e1   : > { %v12651_v63 = vrot.slane %v11338_v8, %v20357_v54  ;;  %v12659_v28 = vrot.slane %v23527_v47, %v20357_v54  ;;  %v23556_v20 = vrot.slane %v11260_v50, %v19150_v17  ;;  %v11289_v38 = vcombine.high %v23521_v46, %v23521_v46 }
 0x4e2   : > { %v11341_v9 = vcombine.high %v23544_v62, %v23544_v62  ;;  %v12655_v42 = vrot.slane %v11340_v59, %v20357_v54  ;;  %v12663_v30 = vrot.slane %v23544_v62, %v20357_v54  ;;  %v12667_v14 = vrot.slane %v11339_v12, %v20357_v54 }
 0x4e3   : > { %v11290_v15 = vcombine.high %v23538_v16, %v23538_v16  ;;  %v11291_v22 = vcombine.high %v23541_v26, %v23541_v26  ;;  %v11292_v55 = vcombine.high %v23556_v20, %v23556_v20  ;;  %v12611_v23 = vrot.slane %v23521_v46, %v20357_v54 }
 0x4e4   : > { %v12671_v33 = vrot.slane %v11341_v9, %v20357_v54  ;;  %v12615_v53 = vrot.slane %v23541_v26, %v20357_v54  ;;  %v23578_v10 = vrot.slane %v11289_v38, %v20357_v54  ;;  %v12627_v51 = vrot.slane %v23538_v16, %v20357_v54 }
 0x4e5   : > { %v23583_v41 = vrot.slane %v11291_v22, %v20357_v54  ;;  %v12631_v4 = vrot.slane %v23556_v20, %v20357_v54  ;;  %v23588_v18 = vrot.slane %v11290_v15, %v20357_v54  ;;  %v23591_v32 = vrot.slane %v11292_v55, %v20357_v54 }
 0x4e6   : > { %v7903_v49 = vadd.f32 %v23078_v11, %v22789_v13  ;;  %v7898_v29 = vadd.f32 %v23078_v11, %v22812_v56  ;;  %v8685_v3 = vadd.f32 %v23078_v11, %v22966_v34  ;;  %v23601_v60 = vadd.f32 %v23078_v11, %v25775_v21 }
 0x4e7   : > { %v23605_v45 = vadd.f32 %v23078_v11, %v25776_v24  ;;  %v23609_v44 = vadd.f32 %v23078_v11, %v25777_v39  ;;  %v23612_v13 = vadd.f32 %v23078_v11, %v17296_v5  ;;  %v23615_v56 = vadd.f32 %v23078_v11, %v8689_v27 }
 0x4e8   : > { %v9437_v58 = vcombine.high %v7903_v49, %v7903_v49  ;;  %v9444_v34 = vrot.slane %v7903_v49, %v19150_v17  ;;  %v9388_v35 = vcombine.high %v7898_v29, %v7898_v29  ;;  %v9395_v37 = vrot.slane %v7898_v29, %v19150_v17 }
 0x4e9   : > { %v11391_v31 = vcombine.high %v8685_v3, %v8685_v3  ;;  %v23620_v40 = vrot.slane %v8685_v3, %v19150_v17  ;;  %v11342_v19 = vcombine.high %v23601_v60, %v23601_v60  ;;  %v23626_v48 = vrot.slane %v23601_v60, %v19150_v17 }
 0x4ea   : > { %v9451_v11 = vrot.slane %v9437_v58, %v19150_v17  ;;  %v9452_v1 = vcombine.high %v9444_v34, %v9444_v34  ;;  %v9460_v25 = vrot.slane %v9444_v34, %v19150_v17  ;;  %v9402_v57 = vrot.slane %v9388_v35, %v19150_v17 }
 0x4eb   : > { %v9403_v7 = vcombine.high %v9395_v37, %v9395_v37  ;;  %v9411_v0 = vrot.slane %v9395_v37, %v19150_v17  ;;  %v11405_v61 = vrot.slane %v11391_v31, %v19150_v17  ;;  %v11406_v6 = vcombine.high %v23620_v40, %v23620_v40 }
 0x4ec   : > { %v9453_v47 = vcombine.high %v9451_v11, %v9451_v11  ;;  %v9467_v36 = vrot.slane %v9451_v11, %v19150_v17  ;;  %v9474_v8 = vrot.slane %v9452_v1, %v19150_v17  ;;  %v9482_v50 = vcombine.high %v9460_v25, %v9460_v25 }
 0x4ed   : > { %v13608_v62 = vsel %vm6902_vm5, %v9460_v25, %v12643_v52  ;;  %v9404_v12 = vcombine.high %v9402_v57, %v9402_v57  ;;  %v9418_v59 = vrot.slane %v9402_v57, %v19150_v17  ;;  %v9425_v5 = vrot.slane %v9403_v7, %v19150_v17 }
 0x4ee   : > { %v9481_v38 = vrot.slane %v9453_v47, %v19150_v17  ;;  %v9483_v27 = vcombine.high %v9467_v36, %v9467_v36  ;;  %v9484_v9 = vcombine.high %v9474_v8, %v9474_v8  ;;  %v13609_v15 = vsel %vm6902_vm5, %v9474_v8, %v12647_v2 }
 0x4ef   : > { %v13610_v22 = vsel %vm6902_vm5, %v9482_v50, %v12651_v63  ;;  %v13612_v55 = vsel %vm6902_vm5, %v9467_v36, %v12659_v28  ;;  %v15190_v49 = vcombine.low %v13608_v62, %v13609_v15  ;;  %v9432_v29 = vrot.slane %v9404_v12, %v19150_v17 }
 0x4f0   : > { %v9485_v3 = vcombine.high %v9481_v38, %v9481_v38  ;;  %v13611_v52 = vsel %vm6902_vm5, %v9484_v9, %v12655_v42  ;;  %v13613_v21 = vsel %vm6902_vm5, %v9481_v38, %v12663_v30  ;;  %v13614_v24 = vsel %vm6902_vm5, %v9483_v27, %v12667_v14 }
 0x4f1   : > { %v15191_v39 = vcombine.low %v13610_v22, %v13611_v52  ;;  %v15198_v58 = vrot.slane %v15190_v49, %v20363_v43  ;;  %v15207_v34 = vcombine.low %v13612_v55, %v13613_v21  ;;  %v9433_v35 = vcombine.high %v9411_v0, %v9411_v0 }
 0x4f2   : > { %v13615_v2 = vsel %vm6902_vm5, %v9485_v3, %v12671_v33  ;;  %v9434_v63 = vcombine.high %v9418_v59, %v9418_v59  ;;  %v9435_v37 = vcombine.high %v9425_v5, %v9425_v5  ;;  %v9436_v28 = vcombine.high %v9432_v29, %v9432_v29 }
 0x4f3   : > { %v15205_v31 = vrot.slane %v15191_v39, %v20363_v43  ;;  %v15208_v11 = vcombine.low %v13614_v24, %v13615_v2  ;;  %v15215_v1 = vrot.slane %v15207_v34, %v20363_v43  ;;  %v13600_v42 = vsel %vm6902_vm5, %v9411_v0, %v12611_v23 }
 0x4f4   : > { %v13601_v30 = vsel %vm6902_vm5, %v9425_v5, %v12615_v53  ;;  %v13602_v14 = vsel %vm6902_vm5, %v9433_v35, %v23578_v10  ;;  %v13603_v33 = vsel %vm6902_vm5, %v9435_v37, %v23583_v41  ;;  %v13604_v25 = vsel %vm6902_vm5, %v9418_v59, %v12627_v51  ;;  %v23677_v7 = vpop.f32.mrb[48].mxu0 }
 0x4f5   : > { %v15206_v46 = vcombine.low %v15198_v58, %v15205_v31  ;;  %v15222_v57 = vrot.slane %v15208_v11, %v20363_v43  ;;  %v13605_v26 = vsel %vm6902_vm5, %v9432_v29, %v12631_v4  ;;  %v13606_v23 = vsel %vm6902_vm5, %v9434_v63, %v23588_v18  ;;  %v23685_v4 = vpop.f32.mrb[49].mxu0 }
 0x4f6   : > { %v13607_v53 = vsel %vm6902_vm5, %v9436_v28, %v23591_v32  ;;  %v15156_v10 = vcombine.low %v13600_v42, %v13601_v30  ;;  %v15157_v41 = vcombine.low %v13602_v14, %v13603_v33  ;;  %v15173_v16 = vcombine.low %v13604_v25, %v13605_v26 }
 0x4f7   : > { %v15223_v51 = vcombine.low %v15215_v1, %v15222_v57  ;;  %16630 = vst.msk [vmem:[%s20460_s8 + $0x1b0] sm:$0xff] %vm346_vm1, %v15206_v46  ;;  %v15174_v0 = vcombine.low %v13606_v23, %v13607_v53  ;;  %v11407_v47 = vcombine.high %v11405_v61, %v11405_v61  ;;  %v23683_v20 = vrot.slane %v23620_v40, %v19150_v17  ;;  %v23702_v59 = vpop.f32.mrb[50].mxu1 }
 0x4f8   : > { %v15164_v18 = vrot.slane %v15156_v10, %v20363_v43  ;;  %v15171_v32 = vrot.slane %v15157_v41, %v20363_v43  ;;  %v15181_v36 = vrot.slane %v15173_v16, %v20363_v43  ;;  %v23691_v8 = vrot.slane %v11405_v61, %v19150_v17 }
 0x4f9   : > { %16631 = vst.msk [vmem:[%s20460_s8 + $0x1b8] sm:$0xff] %vm346_vm1, %v15223_v51  ;;  %v15188_v50 = vrot.slane %v15174_v0, %v20363_v43  ;;  %v11428_v62 = vrot.slane %v11406_v6, %v19150_v17  ;;  %v23698_v40 = vrot.slane %v11407_v47, %v19150_v17  ;;  %v11436_v12 = vcombine.high %v23683_v20, %v23683_v20  ;;  %v23710_v6 = vpop.f32.mrb[51].mxu1  ;;  %v23715_v49 = vpop.f32.mrb[50].mxu0 }
 0x4fa   : > { %v15172_v5 = vcombine.low %v15164_v18, %v15171_v32  ;;  %v11437_v61 = vcombine.high %v23691_v8, %v23691_v8  ;;  %v12707_v38 = vrot.slane %v23683_v20, %v20357_v54  ;;  %v12723_v27 = vrot.slane %v23691_v8, %v20357_v54  ;;  %v23727_v24 = vpop.f32.mrb[51].mxu0 }
 0x4fb   : > { %v15189_v9 = vcombine.low %v15181_v36, %v15188_v50  ;;  %v11438_v15 = vcombine.high %v11428_v62, %v11428_v62  ;;  %v11439_v22 = vcombine.high %v23698_v40, %v23698_v40  ;;  %v12711_v55 = vrot.slane %v11428_v62, %v20357_v54 }
 0x4fc   : > { %16628 = vst.msk [vmem:[%s20460_s8 + $0x1a0] sm:$0xff] %vm346_vm1, %v15172_v5  ;;  %v12715_v29 = vrot.slane %v11436_v12, %v20357_v54  ;;  %v12727_v3 = vrot.slane %v23698_v40, %v20357_v54  ;;  %v12731_v52 = vrot.slane %v11437_v61, %v20357_v54  ;;  %v11356_v21 = vrot.slane %v11342_v19, %v19150_v17  ;;  %v23737_v2 = vpop.f32.mrb[52].mxu1 }
 0x4fd   : > { %16629 = vst.msk [vmem:[%s20460_s8 + $0x1a8] sm:$0xff] %vm346_vm1, %v15189_v9  ;;  %v12719_v39 = vrot.slane %v11438_v15, %v20357_v54  ;;  %v12735_v58 = vrot.slane %v11439_v22, %v20357_v54  ;;  %v11357_v34 = vcombine.high %v23626_v48, %v23626_v48  ;;  %v11365_v35 = vrot.slane %v23626_v48, %v19150_v17  ;;  %v23746_v28 = vpop.f32.mrb[53].mxu1 }
 0x4fe   : > { %v11358_v63 = vcombine.high %v11356_v21, %v11356_v21  ;;  %v23740_v60 = vrot.slane %v11356_v21, %v19150_v17  ;;  %v9535_v19 = vcombine.high %v23605_v45, %v23605_v45  ;;  %v9542_v37 = vrot.slane %v23605_v45, %v19150_v17 }
 0x4ff   : > { %v11379_v31 = vrot.slane %v11357_v34, %v19150_v17  ;;  %v11387_v11 = vcombine.high %v11365_v35, %v11365_v35  ;;  %v12675_v1 = vrot.slane %v11365_v35, %v20357_v54  ;;  %v9486_v48 = vcombine.high %v23609_v44, %v23609_v44 }
 0x500   : > { %v11386_v42 = vrot.slane %v11358_v63, %v19150_v17  ;;  %v11388_v30 = vcombine.high %v23740_v60, %v23740_v60  ;;  %v12691_v14 = vrot.slane %v23740_v60, %v20357_v54  ;;  %v9549_v45 = vrot.slane %v9535_v19, %v19150_v17 }
 0x501   : > { %v11389_v33 = vcombine.high %v11379_v31, %v11379_v31  ;;  %v12679_v25 = vrot.slane %v11379_v31, %v20357_v54  ;;  %v12683_v46 = vrot.slane %v11387_v11, %v20357_v54  ;;  %v9550_v57 = vcombine.high %v9542_v37, %v9542_v37 }
 0x502   : > { %v11390_v26 = vcombine.high %v11386_v42, %v11386_v42  ;;  %v12695_v23 = vrot.slane %v11386_v42, %v20357_v54  ;;  %v12699_v53 = vrot.slane %v11388_v30, %v20357_v54  ;;  %v9551_v10 = vcombine.high %v9549_v45, %v9549_v45 }
 0x503   : > { %v12687_v41 = vrot.slane %v11389_v33, %v20357_v54  ;;  %v9558_v16 = vrot.slane %v9542_v37, %v19150_v17  ;;  %v9565_v51 = vrot.slane %v9549_v45, %v19150_v17  ;;  %v9572_v0 = vrot.slane %v9550_v57, %v19150_v17 }
 0x504   : > { %v12703_v47 = vrot.slane %v11390_v26, %v20357_v54  ;;  %v9579_v20 = vrot.slane %v9551_v10, %v19150_v17  ;;  %v9493_v18 = vrot.slane %v23609_v44, %v19150_v17  ;;  %v9500_v32 = vrot.slane %v9486_v48, %v19150_v17 }
 0x505   : > { %v9580_v36 = vcombine.high %v9558_v16, %v9558_v16  ;;  %v9581_v8 = vcombine.high %v9565_v51, %v9565_v51  ;;  %v9582_v50 = vcombine.high %v9572_v0, %v9572_v0  ;;  %v13624_v62 = vsel %vm6902_vm5, %v9558_v16, %v12707_v38 }
 0x506   : > { %v9583_v40 = vcombine.high %v9579_v20, %v9579_v20  ;;  %v13625_v12 = vsel %vm6902_vm5, %v9572_v0, %v12711_v55  ;;  %v13628_v5 = vsel %vm6902_vm5, %v9565_v51, %v12723_v27  ;;  %v13629_v61 = vsel %vm6902_vm5, %v9579_v20, %v12727_v3 }
 0x507   : > { %v13626_v9 = vsel %vm6902_vm5, %v9580_v36, %v12715_v29  ;;  %v13627_v15 = vsel %vm6902_vm5, %v9582_v50, %v12719_v39  ;;  %v13630_v44 = vsel %vm6902_vm5, %v9581_v8, %v12731_v52  ;;  %v15326_v22 = vcombine.low %v13624_v62, %v13625_v12 }
 0x508   : > { %v13631_v21 = vsel %vm6902_vm5, %v9583_v40, %v12735_v58  ;;  %v15327_v34 = vcombine.low %v13626_v9, %v13627_v15  ;;  %v15343_v35 = vcombine.low %v13628_v5, %v13629_v61  ;;  %v9501_v63 = vcombine.high %v9493_v18, %v9493_v18 }
 0x509   : > { %v15334_v38 = vrot.slane %v15326_v22, %v20363_v43  ;;  %v15344_v60 = vcombine.low %v13630_v44, %v13631_v21  ;;  %v9502_v55 = vcombine.high %v9500_v32, %v9500_v32  ;;  %v9509_v27 = vrot.slane %v9493_v18, %v19150_v17 }
 0x50a   : > { %v15341_v3 = vrot.slane %v15327_v34, %v20363_v43  ;;  %v15351_v29 = vrot.slane %v15343_v35, %v20363_v43  ;;  %v9516_v39 = vrot.slane %v9500_v32, %v19150_v17  ;;  %v9523_v52 = vrot.slane %v9501_v63, %v19150_v17 }
 0x50b   : > { %v15358_v58 = vrot.slane %v15344_v60, %v20363_v43  ;;  %v9530_v19 = vrot.slane %v9502_v55, %v19150_v17  ;;  %v9531_v37 = vcombine.high %v9509_v27, %v9509_v27  ;;  %v13616_v31 = vsel %vm6902_vm5, %v9509_v27, %v12675_v1  ;;  %v23789_v45 = vpop.f32.mrb[52].mxu0 }
 0x50c   : > { %v15342_v11 = vcombine.low %v15334_v38, %v15341_v3  ;;  %v9532_v48 = vcombine.high %v9516_v39, %v9516_v39  ;;  %v9533_v42 = vcombine.high %v9523_v52, %v9523_v52  ;;  %v13617_v30 = vsel %vm6902_vm5, %v9523_v52, %v12679_v25  ;;  %v23793_v16 = vpop.f32.mrb[53].mxu0 }
 0x50d   : > { %v15359_v33 = vcombine.low %v15351_v29, %v15358_v58  ;;  %v9534_v57 = vcombine.high %v9530_v19, %v9530_v19  ;;  %v13618_v26 = vsel %vm6902_vm5, %v9531_v37, %v12683_v46  ;;  %v13620_v10 = vsel %vm6902_vm5, %v9516_v39, %v12691_v14 }
 0x50e   : > { %16638 = vst.msk [vmem:[%s20460_s8 + $0x1f0] sm:$0xff] %vm346_vm1, %v15342_v11  ;;  %v13619_v1 = vsel %vm6902_vm5, %v9533_v42, %v12687_v41  ;;  %v13621_v51 = vsel %vm6902_vm5, %v9530_v19, %v12695_v23  ;;  %v13622_v0 = vsel %vm6902_vm5, %v9532_v48, %v12699_v53  ;;  %v15292_v20 = vcombine.low %v13616_v31, %v13617_v30 }
 0x50f   : > { %16639 = vst.msk [vmem:[%s20460_s8 + $0x1f8] sm:$0xff] %vm346_vm1, %v15359_v33  ;;  %v13623_v25 = vsel %vm6902_vm5, %v9534_v57, %v12703_v47  ;;  %v15293_v18 = vcombine.low %v13618_v26, %v13619_v1  ;;  %v15309_v32 = vcombine.low %v13620_v10, %v13621_v51  ;;  %v11489_v14 = vcombine.high %v23612_v13, %v23612_v13 }
 0x510   : > { %v15300_v46 = vrot.slane %v15292_v20, %v20363_v43  ;;  %v15310_v36 = vcombine.low %v13622_v0, %v13623_v25  ;;  %v11496_v41 = vrot.slane %v23612_v13, %v19150_v17  ;;  %v11440_v23 = vcombine.high %v23615_v56, %v23615_v56  ;;  %v23888_v20 = vld [vmem:[%s24824_s3] ss:$0 sm:$0xff] }
 0x511   : > { %v15307_v53 = vrot.slane %v15293_v18, %v20363_v43  ;;  %v15317_v8 = vrot.slane %v15309_v32, %v20363_v43  ;;  %v11503_v47 = vrot.slane %v11489_v14, %v19150_v17  ;;  %v11447_v50 = vrot.slane %v23615_v56, %v19150_v17 }
 0x512   : > { %v15324_v62 = vrot.slane %v15310_v36, %v20363_v43  ;;  %v11504_v40 = vcombine.high %v11496_v41, %v11496_v41  ;;  %v23817_v12 = vrot.slane %v11496_v41, %v19150_v17  ;;  %v11454_v13 = vrot.slane %v11440_v23, %v19150_v17 }
 0x513   : > { %v15308_v5 = vcombine.low %v15300_v46, %v15307_v53  ;;  %v11505_v61 = vcombine.high %v11503_v47, %v11503_v47  ;;  %v23821_v9 = vrot.slane %v11503_v47, %v19150_v17  ;;  %v11455_v15 = vcombine.high %v11447_v50, %v11447_v50 }
 0x514   : > { %v15325_v44 = vcombine.low %v15317_v8, %v15324_v62  ;;  %v23824_v22 = vrot.slane %v11504_v40, %v19150_v17  ;;  %v11534_v56 = vcombine.high %v23817_v12, %v23817_v12  ;;  %v12771_v21 = vrot.slane %v23817_v12, %v20357_v54 }
 0x515   : > { %16636 = vst.msk [vmem:[%s20460_s8 + $0x1e0] sm:$0xff] %vm346_vm1, %v15308_v5  ;;  %v23833_v34 = vrot.slane %v11505_v61, %v19150_v17  ;;  %v11535_v35 = vcombine.high %v23821_v9, %v23821_v9  ;;  %v12787_v63 = vrot.slane %v23821_v9, %v20357_v54  ;;  %v11456_v38 = vcombine.high %v11454_v13, %v11454_v13 }
 0x516   : > { %16637 = vst.msk [vmem:[%s20460_s8 + $0x1e8] sm:$0xff] %vm346_vm1, %v15325_v44  ;;  %v11536_v60 = vcombine.high %v23824_v22, %v23824_v22  ;;  %v12775_v55 = vrot.slane %v23824_v22, %v20357_v54  ;;  %v12779_v27 = vrot.slane %v11534_v56, %v20357_v54  ;;  %v23847_v3 = vrot.slane %v11447_v50, %v19150_v17 }
 0x517   : > { %v11537_v29 = vcombine.high %v23833_v34, %v23833_v34  ;;  %v12791_v39 = vrot.slane %v23833_v34, %v20357_v54  ;;  %v12795_v52 = vrot.slane %v11535_v35, %v20357_v54  ;;  %v23855_v58 = vrot.slane %v11454_v13, %v19150_v17 }
 0x518   : > { %v12783_v19 = vrot.slane %v11536_v60, %v20357_v54  ;;  %v23859_v37 = vrot.slane %v11455_v15, %v19150_v17  ;;  %v23862_v31 = vrot.slane %v11456_v38, %v19150_v17  ;;  %v11485_v11 = vcombine.high %v23847_v3, %v23847_v3 }
 0x519   : > { %v12799_v48 = vrot.slane %v11537_v29, %v20357_v54  ;;  %v11486_v42 = vcombine.high %v23855_v58, %v23855_v58  ;;  %v12739_v30 = vrot.slane %v23847_v3, %v20357_v54  ;;  %v12755_v33 = vrot.slane %v23855_v58, %v20357_v54 }
 0x51a   : > { %v11487_v57 = vcombine.high %v23859_v37, %v23859_v37  ;;  %v11488_v26 = vcombine.high %v23862_v31, %v23862_v31  ;;  %v12743_v10 = vrot.slane %v23859_v37, %v20357_v54  ;;  %v12747_v1 = vrot.slane %v11485_v11, %v20357_v54  ;;  %v23894_v32 = vpop.f32.mrb[54].mxu1 }
 0x51b   : > { %v12759_v51 = vrot.slane %v23862_v31, %v20357_v54  ;;  %v23883_v0 = vrot.slane %v11486_v42, %v20357_v54  ;;  %v7923_v25 = vadd.f32 %v23888_v20, %v23677_v7  ;;  %v7918_v18 = vadd.f32 %v23888_v20, %v23685_v4  ;;  %v23906_v23 = vpop.f32.mrb[55].mxu1 }
 0x51c   : > { %v12751_v14 = vrot.slane %v11487_v57, %v20357_v54  ;;  %v23898_v46 = vrot.slane %v11488_v26, %v20357_v54  ;;  %v8705_v36 = vadd.f32 %v23888_v20, %v23702_v59  ;;  %v23904_v41 = vadd.f32 %v23888_v20, %v23710_v6 }
 0x51d   : > { %v9633_v7 = vcombine.high %v7923_v25, %v7923_v25  ;;  %v9640_v53 = vrot.slane %v7923_v25, %v19150_v17  ;;  %v9584_v4 = vcombine.high %v7918_v18, %v7918_v18  ;;  %v9591_v8 = vrot.slane %v7918_v18, %v19150_v17 }
 0x51e   : > { %v11587_v47 = vcombine.high %v8705_v36, %v8705_v36  ;;  %v23911_v50 = vrot.slane %v8705_v36, %v19150_v17  ;;  %v11538_v62 = vcombine.high %v23904_v41, %v23904_v41  ;;  %v23917_v59 = vrot.slane %v23904_v41, %v19150_v17 }
 0x51f   : > { %v9647_v6 = vrot.slane %v9633_v7, %v19150_v17  ;;  %v9648_v40 = vcombine.high %v9640_v53, %v9640_v53  ;;  %v9656_v12 = vrot.slane %v9640_v53, %v19150_v17  ;;  %v9598_v13 = vrot.slane %v9584_v4, %v19150_v17 }
 0x520   : > { %v9599_v5 = vcombine.high %v9591_v8, %v9591_v8  ;;  %v9607_v61 = vrot.slane %v9591_v8, %v19150_v17  ;;  %v11601_v15 = vrot.slane %v11587_v47, %v19150_v17  ;;  %v11602_v44 = vcombine.high %v23911_v50, %v23911_v50 }
 0x521   : > { %v9649_v22 = vcombine.high %v9647_v6, %v9647_v6  ;;  %v9663_v56 = vrot.slane %v9647_v6, %v19150_v17  ;;  %v9670_v34 = vrot.slane %v9648_v40, %v19150_v17  ;;  %v9678_v35 = vcombine.high %v9656_v12, %v9656_v12 }
 0x522   : > { %v13640_v38 = vsel %vm6902_vm5, %v9656_v12, %v12771_v21  ;;  %v9600_v60 = vcombine.high %v9598_v13, %v9598_v13  ;;  %v9614_v29 = vrot.slane %v9598_v13, %v19150_v17  ;;  %v9621_v37 = vrot.slane %v9599_v5, %v19150_v17 }
 0x523   : > { %v9677_v11 = vrot.slane %v9649_v22, %v19150_v17  ;;  %v9679_v42 = vcombine.high %v9663_v56, %v9663_v56  ;;  %v9680_v57 = vcombine.high %v9670_v34, %v9670_v34  ;;  %v13641_v26 = vsel %vm6902_vm5, %v9670_v34, %v12775_v55 }
 0x524   : > { %v13642_v25 = vsel %vm6902_vm5, %v9678_v35, %v12779_v27  ;;  %v13644_v18 = vsel %vm6902_vm5, %v9663_v56, %v12787_v63  ;;  %v15462_v36 = vcombine.low %v13640_v38, %v13641_v26  ;;  %v9628_v21 = vrot.slane %v9600_v60, %v19150_v17 }
 0x525   : > { %v9681_v7 = vcombine.high %v9677_v11, %v9677_v11  ;;  %v13643_v53 = vsel %vm6902_vm5, %v9680_v57, %v12783_v19  ;;  %v13645_v4 = vsel %vm6902_vm5, %v9677_v11, %v12791_v39  ;;  %v13646_v8 = vsel %vm6902_vm5, %v9679_v42, %v12795_v52 }
 0x526   : > { %v15463_v47 = vcombine.low %v13642_v25, %v13643_v53  ;;  %v15470_v55 = vrot.slane %v15462_v36, %v20363_v43  ;;  %v15479_v6 = vcombine.low %v13644_v18, %v13645_v4  ;;  %v9629_v27 = vcombine.high %v9607_v61, %v9607_v61 }
 0x527   : > { %v13647_v40 = vsel %vm6902_vm5, %v9681_v7, %v12799_v48  ;;  %v9630_v9 = vcombine.high %v9614_v29, %v9614_v29  ;;  %v9631_v12 = vcombine.high %v9621_v37, %v9621_v37  ;;  %v9632_v63 = vcombine.high %v9628_v21, %v9628_v21 }
 0x528   : > { %v15477_v13 = vrot.slane %v15463_v47, %v20363_v43  ;;  %v15480_v5 = vcombine.low %v13646_v8, %v13647_v40  ;;  %v15487_v22 = vrot.slane %v15479_v6, %v20363_v43  ;;  %v13632_v39 = vsel %vm6902_vm5, %v9607_v61, %v12739_v30  ;;  %v23957_v34 = vpop.f32.mrb[54].mxu0 }
 0x529   : > { %v13633_v52 = vsel %vm6902_vm5, %v9621_v37, %v12743_v10  ;;  %v13634_v19 = vsel %vm6902_vm5, %v9629_v27, %v12747_v1  ;;  %v13635_v48 = vsel %vm6902_vm5, %v9631_v12, %v12751_v14  ;;  %v13636_v56 = vsel %vm6902_vm5, %v9614_v29, %v12755_v33  ;;  %v23966_v10 = vpop.f32.mrb[55].mxu0 }
 0x52a   : > { %v15478_v35 = vcombine.low %v15470_v55, %v15477_v13  ;;  %v15494_v38 = vrot.slane %v15480_v5, %v20363_v43  ;;  %v13637_v3 = vsel %vm6902_vm5, %v9628_v21, %v12759_v51  ;;  %v13638_v30 = vsel %vm6902_vm5, %v9630_v9, %v23883_v0 }
 0x52b   : > { %v13639_v58 = vsel %vm6902_vm5, %v9632_v63, %v23898_v46  ;;  %v15428_v33 = vcombine.low %v13632_v39, %v13633_v52  ;;  %v15429_v1 = vcombine.low %v13634_v19, %v13635_v48  ;;  %v15445_v14 = vcombine.low %v13636_v56, %v13637_v3 }
 0x52c   : > { %v15495_v61 = vcombine.low %v15487_v22, %v15494_v38  ;;  %16646 = vst.msk [vmem:[%s20460_s8 + $0x230] sm:$0xff] %vm346_vm1, %v15478_v35  ;;  %v15446_v60 = vcombine.low %v13638_v30, %v13639_v58  ;;  %v11603_v29 = vcombine.high %v11601_v15, %v11601_v15  ;;  %v11610_v31 = vrot.slane %v23911_v50, %v19150_v17 }
 0x52d   : > { %v15436_v51 = vrot.slane %v15428_v33, %v20363_v43  ;;  %v15443_v0 = vrot.slane %v15429_v1, %v20363_v43  ;;  %v15453_v37 = vrot.slane %v15445_v14, %v20363_v43  ;;  %v11617_v46 = vrot.slane %v11601_v15, %v19150_v17 }
 0x52e   : > { %16647 = vst.msk [vmem:[%s20460_s8 + $0x238] sm:$0xff] %vm346_vm1, %v15495_v61  ;;  %v15460_v11 = vrot.slane %v15446_v60, %v20363_v43  ;;  %v11624_v42 = vrot.slane %v11602_v44, %v19150_v17  ;;  %v23983_v57 = vrot.slane %v11603_v29, %v19150_v17  ;;  %v11632_v50 = vcombine.high %v11610_v31, %v11610_v31 }
 0x52f   : > { %v15444_v26 = vcombine.low %v15436_v51, %v15443_v0  ;;  %v11633_v25 = vcombine.high %v11617_v46, %v11617_v46  ;;  %v12835_v18 = vrot.slane %v11610_v31, %v20357_v54  ;;  %v12851_v36 = vrot.slane %v11617_v46, %v20357_v54 }
 0x530   : > { %v15461_v21 = vcombine.low %v15453_v37, %v15460_v11  ;;  %v11634_v7 = vcombine.high %v11624_v42, %v11624_v42  ;;  %v11635_v15 = vcombine.high %v23983_v57, %v23983_v57  ;;  %v12839_v53 = vrot.slane %v11624_v42, %v20357_v54 }
 0x531   : > { %16644 = vst.msk [vmem:[%s20460_s8 + $0x220] sm:$0xff] %vm346_vm1, %v15444_v26  ;;  %v12843_v44 = vrot.slane %v11632_v50, %v20357_v54  ;;  %v12855_v4 = vrot.slane %v23983_v57, %v20357_v54  ;;  %v12859_v8 = vrot.slane %v11633_v25, %v20357_v54  ;;  %v11552_v47 = vrot.slane %v11538_v62, %v19150_v17 }
 0x532   : > { %16645 = vst.msk [vmem:[%s20460_s8 + $0x228] sm:$0xff] %vm346_vm1, %v15461_v21  ;;  %v12847_v55 = vrot.slane %v11634_v7, %v20357_v54  ;;  %v12863_v6 = vrot.slane %v11635_v15, %v20357_v54  ;;  %v11553_v27 = vcombine.high %v23917_v59, %v23917_v59  ;;  %v11561_v40 = vrot.slane %v23917_v59, %v19150_v17 }
 0x533   : > { %v11554_v9 = vcombine.high %v11552_v47, %v11552_v47  ;;  %v24009_v12 = vrot.slane %v11552_v47, %v19150_v17  ;;  %v7933_v41 = vadd.f32 %v23888_v20, %v23715_v49  ;;  %v7928_v62 = vadd.f32 %v23888_v20, %v23727_v24 }
 0x534   : > { %v11575_v63 = vrot.slane %v11553_v27, %v19150_v17  ;;  %v11583_v13 = vcombine.high %v11561_v40, %v11561_v40  ;;  %v12803_v5 = vrot.slane %v11561_v40, %v20357_v54  ;;  %v24019_v22 = vadd.f32 %v23888_v20, %v23737_v2 }
 0x535   : > { %v11582_v59 = vrot.slane %v11554_v9, %v19150_v17  ;;  %v11584_v39 = vcombine.high %v24009_v12, %v24009_v12  ;;  %v12819_v49 = vrot.slane %v24009_v12, %v20357_v54  ;;  %v9731_v52 = vcombine.high %v7933_v41, %v7933_v41 }
 0x536   : > { %v11585_v19 = vcombine.high %v11575_v63, %v11575_v63  ;;  %v12807_v24 = vrot.slane %v11575_v63, %v20357_v54  ;;  %v12811_v48 = vrot.slane %v11583_v13, %v20357_v54  ;;  %v9738_v56 = vrot.slane %v7933_v41, %v19150_v17 }
 0x537   : > { %v11586_v35 = vcombine.high %v11582_v59, %v11582_v59  ;;  %v12823_v2 = vrot.slane %v11582_v59, %v20357_v54  ;;  %v12827_v38 = vrot.slane %v11584_v39, %v20357_v54  ;;  %v9745_v3 = vrot.slane %v9731_v52, %v19150_v17 }
 0x538   : > { %v12815_v30 = vrot.slane %v11585_v19, %v20357_v54  ;;  %v9746_v58 = vcombine.high %v9738_v56, %v9738_v56  ;;  %v9754_v33 = vrot.slane %v9738_v56, %v19150_v17  ;;  %v9682_v1 = vcombine.high %v7928_v62, %v7928_v62 }
 0x539   : > { %v12831_v14 = vrot.slane %v11586_v35, %v20357_v54  ;;  %v9747_v61 = vcombine.high %v9745_v3, %v9745_v3  ;;  %v9761_v60 = vrot.slane %v9745_v3, %v19150_v17  ;;  %v9689_v29 = vrot.slane %v7928_v62, %v19150_v17 }
 0x53a   : > { %v9768_v31 = vrot.slane %v9746_v58, %v19150_v17  ;;  %v9776_v51 = vcombine.high %v9754_v33, %v9754_v33  ;;  %v13656_v0 = vsel %vm6902_vm5, %v9754_v33, %v12835_v18  ;;  %v9696_v37 = vrot.slane %v9682_v1, %v19150_v17 }
 0x53b   : > { %v9775_v46 = vrot.slane %v9747_v61, %v19150_v17  ;;  %v9777_v11 = vcombine.high %v9761_v60, %v9761_v60  ;;  %v13660_v42 = vsel %vm6902_vm5, %v9761_v60, %v12851_v36  ;;  %v9697_v57 = vcombine.high %v9689_v29, %v9689_v29 }
 0x53c   : > { %v9778_v50 = vcombine.high %v9768_v31, %v9768_v31  ;;  %v13657_v26 = vsel %vm6902_vm5, %v9768_v31, %v12839_v53  ;;  %v13658_v25 = vsel %vm6902_vm5, %v9776_v51, %v12843_v44  ;;  %v9698_v21 = vcombine.high %v9696_v37, %v9696_v37 }
 0x53d   : > { %v9779_v7 = vcombine.high %v9775_v46, %v9775_v46  ;;  %v13661_v15 = vsel %vm6902_vm5, %v9775_v46, %v12855_v4  ;;  %v13662_v47 = vsel %vm6902_vm5, %v9777_v11, %v12859_v8  ;;  %v15598_v18 = vcombine.low %v13656_v0, %v13657_v26 }
 0x53e   : > { %v13659_v27 = vsel %vm6902_vm5, %v9778_v50, %v12847_v55  ;;  %v15615_v40 = vcombine.low %v13660_v42, %v13661_v15  ;;  %v9705_v9 = vrot.slane %v9689_v29, %v19150_v17  ;;  %v9712_v36 = vrot.slane %v9696_v37, %v19150_v17 }
 0x53f   : > { %v13663_v12 = vsel %vm6902_vm5, %v9779_v7, %v12863_v6  ;;  %v15599_v41 = vcombine.low %v13658_v25, %v13659_v27  ;;  %v15606_v53 = vrot.slane %v15598_v18, %v20363_v43  ;;  %v9719_v44 = vrot.slane %v9697_v57, %v19150_v17 }
 0x540   : > { %v15616_v62 = vcombine.low %v13662_v47, %v13663_v12  ;;  %v15623_v4 = vrot.slane %v15615_v40, %v20363_v43  ;;  %v9726_v8 = vrot.slane %v9698_v21, %v19150_v17  ;;  %v9727_v63 = vcombine.high %v9705_v9, %v9705_v9 }
 0x541   : > { %v15613_v55 = vrot.slane %v15599_v41, %v20363_v43  ;;  %v9728_v13 = vcombine.high %v9712_v36, %v9712_v36  ;;  %v9729_v59 = vcombine.high %v9719_v44, %v9719_v44  ;;  %v13648_v39 = vsel %vm6902_vm5, %v9705_v9, %v12803_v5 }
 0x542   : > { %v15630_v6 = vrot.slane %v15616_v62, %v20363_v43  ;;  %v9730_v52 = vcombine.high %v9726_v8, %v9726_v8  ;;  %v13649_v19 = vsel %vm6902_vm5, %v9719_v44, %v12807_v24  ;;  %v13650_v56 = vsel %vm6902_vm5, %v9727_v63, %v12811_v48 }
 0x543   : > { %v15614_v35 = vcombine.low %v15606_v53, %v15613_v55  ;;  %v13651_v3 = vsel %vm6902_vm5, %v9729_v59, %v12815_v30  ;;  %v13652_v58 = vsel %vm6902_vm5, %v9712_v36, %v12819_v49  ;;  %v13653_v33 = vsel %vm6902_vm5, %v9726_v8, %v12823_v2  ;;  %v24064_v29 = vpop.f32.mrb[56].mxu1 }
 0x544   : > { %v15631_v1 = vcombine.low %v15623_v4, %v15630_v6  ;;  %v13654_v61 = vsel %vm6902_vm5, %v9728_v13, %v12827_v38  ;;  %v13655_v5 = vsel %vm6902_vm5, %v9730_v52, %v12831_v14  ;;  %v15564_v60 = vcombine.low %v13648_v39, %v13649_v19  ;;  %v24070_v51 = vpop.f32.mrb[57].mxu1 }
 0x545   : > { %16654 = vst.msk [vmem:[%s20460_s8 + $0x270] sm:$0xff] %vm346_vm1, %v15614_v35  ;;  %v15565_v24 = vcombine.low %v13650_v56, %v13651_v3  ;;  %v15581_v48 = vcombine.low %v13652_v58, %v13653_v33  ;;  %v15582_v31 = vcombine.low %v13654_v61, %v13655_v5  ;;  %v11685_v30 = vcombine.high %v24019_v22, %v24019_v22  ;;  %v24081_v0 = vpop.f32.mrb[56].mxu0 }
 0x546   : > { %16655 = vst.msk [vmem:[%s20460_s8 + $0x278] sm:$0xff] %vm346_vm1, %v15631_v1  ;;  %v15572_v49 = vrot.slane %v15564_v60, %v20363_v43  ;;  %v11692_v2 = vrot.slane %v24019_v22, %v19150_v17  ;;  %v8710_v38 = vadd.f32 %v23888_v20, %v23746_v28  ;;  %v7943_v14 = vadd.f32 %v23888_v20, %v23789_v45  ;;  %v24087_v57 = vpop.f32.mrb[57].mxu0 }
 0x547   : > { %v15579_v37 = vrot.slane %v15565_v24, %v20363_v43  ;;  %v15589_v46 = vrot.slane %v15581_v48, %v20363_v43  ;;  %v15596_v11 = vrot.slane %v15582_v31, %v20363_v43  ;;  %v11699_v42 = vrot.slane %v11685_v30, %v19150_v17 }
 0x548   : > { %v11700_v22 = vcombine.high %v11692_v2, %v11692_v2  ;;  %v11708_v28 = vrot.slane %v11692_v2, %v19150_v17  ;;  %v11636_v50 = vcombine.high %v8710_v38, %v8710_v38  ;;  %v11643_v45 = vrot.slane %v8710_v38, %v19150_v17 }
 0x549   : > { %v15580_v26 = vcombine.low %v15572_v49, %v15579_v37  ;;  %v15597_v25 = vcombine.low %v15589_v46, %v15596_v11  ;;  %v11701_v21 = vcombine.high %v11699_v42, %v11699_v42  ;;  %v11715_v7 = vrot.slane %v11699_v42, %v19150_v17 }
 0x54a   : > { %v11722_v15 = vrot.slane %v11700_v22, %v19150_v17  ;;  %v11730_v47 = vcombine.high %v11708_v28, %v11708_v28  ;;  %v12899_v18 = vrot.slane %v11708_v28, %v20357_v54  ;;  %v11650_v27 = vrot.slane %v11636_v50, %v19150_v17 }
 0x54b   : > { %16652 = vst.msk [vmem:[%s20460_s8 + $0x260] sm:$0xff] %vm346_vm1, %v15580_v26  ;;  %16653 = vst.msk [vmem:[%s20460_s8 + $0x268] sm:$0xff] %vm346_vm1, %v15597_v25  ;;  %v11729_v40 = vrot.slane %v11701_v21, %v19150_v17  ;;  %v11731_v9 = vcombine.high %v11715_v7, %v11715_v7  ;;  %v12915_v36 = vrot.slane %v11715_v7, %v20357_v54 }
 0x54c   : > { %v11651_v12 = vcombine.high %v11643_v45, %v11643_v45  ;;  %v11732_v41 = vcombine.high %v11722_v15, %v11722_v15  ;;  %v12903_v53 = vrot.slane %v11722_v15, %v20357_v54  ;;  %v12907_v44 = vrot.slane %v11730_v47, %v20357_v54 }
 0x54d   : > { %v11652_v62 = vcombine.high %v11650_v27, %v11650_v27  ;;  %v11733_v4 = vcombine.high %v11729_v40, %v11729_v40  ;;  %v12919_v8 = vrot.slane %v11729_v40, %v20357_v54  ;;  %v12923_v63 = vrot.slane %v11731_v9, %v20357_v54 }
 0x54e   : > { %v11659_v55 = vrot.slane %v11643_v45, %v19150_v17  ;;  %v12911_v13 = vrot.slane %v11732_v41, %v20357_v54  ;;  %v24108_v59 = vrot.slane %v11650_v27, %v19150_v17  ;;  %v24111_v39 = vrot.slane %v11651_v12, %v19150_v17 }
 0x54f   : > { %v24114_v6 = vrot.slane %v11652_v62, %v19150_v17  ;;  %v12927_v52 = vrot.slane %v11733_v4, %v20357_v54  ;;  %v9829_v35 = vcombine.high %v7943_v14, %v7943_v14  ;;  %v9836_v24 = vrot.slane %v7943_v14, %v19150_v17 }
 0x550   : > { %v11681_v19 = vcombine.high %v11659_v55, %v11659_v55  ;;  %v12867_v56 = vrot.slane %v11659_v55, %v20357_v54  ;;  %v11682_v3 = vcombine.high %v24108_v59, %v24108_v59  ;;  %v11683_v58 = vcombine.high %v24111_v39, %v24111_v39 }
 0x551   : > { %v11684_v33 = vcombine.high %v24114_v6, %v24114_v6  ;;  %v12871_v1 = vrot.slane %v24111_v39, %v20357_v54  ;;  %v12883_v5 = vrot.slane %v24108_v59, %v20357_v54  ;;  %v12887_v60 = vrot.slane %v24114_v6, %v20357_v54 }
 0x552   : > { %v12875_v61 = vrot.slane %v11681_v19, %v20357_v54  ;;  %v12879_v48 = vrot.slane %v11683_v58, %v20357_v54  ;;  %v12891_v31 = vrot.slane %v11682_v3, %v20357_v54  ;;  %v9843_v49 = vrot.slane %v9829_v35, %v19150_v17 }
 0x553   : > { %v12895_v30 = vrot.slane %v11684_v33, %v20357_v54  ;;  %v9844_v2 = vcombine.high %v9836_v24, %v9836_v24  ;;  %v9852_v38 = vrot.slane %v9836_v24, %v19150_v17  ;;  %v7938_v37 = vadd.f32 %v23888_v20, %v23793_v16 }
 0x554   : > { %v24141_v46 = vadd.f32 %v23888_v20, %v23894_v32  ;;  %v9845_v11 = vcombine.high %v9843_v49, %v9843_v49  ;;  %v9859_v14 = vrot.slane %v9843_v49, %v19150_v17  ;;  %v24146_v42 = vadd.f32 %v23888_v20, %v23906_v23 }
 0x555   : > { %v24150_v22 = vadd.f32 %v23888_v20, %v23957_v34  ;;  %v9866_v28 = vrot.slane %v9844_v2, %v19150_v17  ;;  %v9874_v50 = vcombine.high %v9852_v38, %v9852_v38  ;;  %v13672_v16 = vsel %vm6902_vm5, %v9852_v38, %v12899_v18 }
 0x556   : > { %v9780_v45 = vcombine.high %v7938_v37, %v7938_v37  ;;  %v9873_v32 = vrot.slane %v9845_v11, %v19150_v17  ;;  %v9875_v26 = vcombine.high %v9859_v14, %v9859_v14  ;;  %v13676_v25 = vsel %vm6902_vm5, %v9859_v14, %v12915_v36 }
 0x557   : > { %v9787_v21 = vrot.slane %v7938_v37, %v19150_v17  ;;  %v9876_v7 = vcombine.high %v9866_v28, %v9866_v28  ;;  %v13673_v23 = vsel %vm6902_vm5, %v9866_v28, %v12903_v53  ;;  %v13674_v15 = vsel %vm6902_vm5, %v9874_v50, %v12907_v44 }
 0x558   : > { %v9794_v34 = vrot.slane %v9780_v45, %v19150_v17  ;;  %v9877_v47 = vcombine.high %v9873_v32, %v9873_v32  ;;  %v13677_v27 = vsel %vm6902_vm5, %v9873_v32, %v12919_v8  ;;  %v13678_v18 = vsel %vm6902_vm5, %v9875_v26, %v12923_v63 }
 0x559   : > { %v15734_v40 = vcombine.low %v13672_v16, %v13673_v23  ;;  %v13675_v9 = vsel %vm6902_vm5, %v9876_v7, %v12911_v13  ;;  %v15751_v12 = vcombine.low %v13676_v25, %v13677_v27  ;;  %v9795_v41 = vcombine.high %v9787_v21, %v9787_v21 }
 0x55a   : > { %v9796_v36 = vcombine.high %v9794_v34, %v9794_v34  ;;  %v13679_v62 = vsel %vm6902_vm5, %v9877_v47, %v12927_v52  ;;  %v15735_v4 = vcombine.low %v13674_v15, %v13675_v9  ;;  %v9803_v44 = vrot.slane %v9787_v21, %v19150_v17 }
 0x55b   : > { %v15742_v53 = vrot.slane %v15734_v40, %v20363_v43  ;;  %v15752_v55 = vcombine.low %v13678_v18, %v13679_v62  ;;  %v15759_v59 = vrot.slane %v15751_v12, %v20363_v43  ;;  %v9810_v8 = vrot.slane %v9794_v34, %v19150_v17 }
 0x55c   : > { %v9817_v63 = vrot.slane %v9795_v41, %v19150_v17  ;;  %v15749_v39 = vrot.slane %v15735_v4, %v20363_v43  ;;  %v9824_v13 = vrot.slane %v9796_v36, %v19150_v17  ;;  %v9825_v6 = vcombine.high %v9803_v44, %v9803_v44 }
 0x55d   : > { %v13664_v52 = vsel %vm6902_vm5, %v9803_v44, %v12867_v56  ;;  %v15766_v19 = vrot.slane %v15752_v55, %v20363_v43  ;;  %v9826_v35 = vcombine.high %v9810_v8, %v9810_v8  ;;  %v13668_v2 = vsel %vm6902_vm5, %v9810_v8, %v12883_v5 }
 0x55e   : > { %v9827_v3 = vcombine.high %v9817_v63, %v9817_v63  ;;  %v13665_v58 = vsel %vm6902_vm5, %v9817_v63, %v12871_v1  ;;  %v15750_v33 = vcombine.low %v15742_v53, %v15749_v39  ;;  %v9828_v24 = vcombine.high %v9824_v13, %v9824_v13 }
 0x55f   : > { %v13666_v49 = vsel %vm6902_vm5, %v9825_v6, %v12875_v61  ;;  %v15767_v38 = vcombine.low %v15759_v59, %v15766_v19  ;;  %v13669_v11 = vsel %vm6902_vm5, %v9824_v13, %v12887_v60  ;;  %v13670_v56 = vsel %vm6902_vm5, %v9826_v35, %v12891_v31 }
 0x560   : > { %v13667_v37 = vsel %vm6902_vm5, %v9827_v3, %v12879_v48  ;;  %16662 = vst.msk [vmem:[%s20460_s8 + $0x2b0] sm:$0xff] %vm346_vm1, %v15750_v33  ;;  %v13671_v14 = vsel %vm6902_vm5, %v9828_v24, %v12895_v30  ;;  %v15700_v28 = vcombine.low %v13664_v52, %v13665_v58  ;;  %v15717_v1 = vcombine.low %v13668_v2, %v13669_v11 }
 0x561   : > { %v15701_v50 = vcombine.low %v13666_v49, %v13667_v37  ;;  %16663 = vst.msk [vmem:[%s20460_s8 + $0x2b8] sm:$0xff] %vm346_vm1, %v15767_v38  ;;  %v15718_v16 = vcombine.low %v13670_v56, %v13671_v14  ;;  %v11783_v61 = vcombine.high %v24141_v46, %v24141_v46  ;;  %v11790_v5 = vrot.slane %v24141_v46, %v19150_v17 }
 0x562   : > { %v11734_v60 = vcombine.high %v24146_v42, %v24146_v42  ;;  %v15708_v48 = vrot.slane %v15700_v28, %v20363_v43  ;;  %v15725_v30 = vrot.slane %v15717_v1, %v20363_v43  ;;  %v11741_v45 = vrot.slane %v24146_v42, %v19150_v17 }
 0x563   : > { %v15715_v31 = vrot.slane %v15701_v50, %v20363_v43  ;;  %v15732_v32 = vrot.slane %v15718_v16, %v20363_v43  ;;  %v11797_v26 = vrot.slane %v11783_v61, %v19150_v17  ;;  %v11798_v25 = vcombine.high %v11790_v5, %v11790_v5 }
 0x564   : > { %v24198_v46 = vrot.slane %v11790_v5, %v19150_v17  ;;  %v11748_v7 = vrot.slane %v11734_v60, %v19150_v17  ;;  %v11749_v23 = vcombine.high %v11741_v45, %v11741_v45  ;;  %v24202_v15 = vrot.slane %v11741_v45, %v19150_v17 }
 0x565   : > { %v15716_v21 = vcombine.low %v15708_v48, %v15715_v31  ;;  %v15733_v34 = vcombine.low %v15725_v30, %v15732_v32  ;;  %v11799_v47 = vcombine.high %v11797_v26, %v11797_v26  ;;  %v24205_v42 = vrot.slane %v11797_v26, %v19150_v17 }
 0x566   : > { %v11820_v27 = vrot.slane %v11798_v25, %v19150_v17  ;;  %v11828_v18 = vcombine.high %v24198_v46, %v24198_v46  ;;  %v12963_v40 = vrot.slane %v24198_v46, %v20357_v54  ;;  %v11750_v9 = vcombine.high %v11748_v7, %v11748_v7 }
 0x567   : > { %16660 = vst.msk [vmem:[%s20460_s8 + $0x2a0] sm:$0xff] %vm346_vm1, %v15716_v21  ;;  %v24215_v12 = vrot.slane %v11748_v7, %v19150_v17  ;;  %16661 = vst.msk [vmem:[%s20460_s8 + $0x2a8] sm:$0xff] %vm346_vm1, %v15733_v34  ;;  %v24220_v41 = vrot.slane %v11799_v47, %v19150_v17  ;;  %v11829_v36 = vcombine.high %v24205_v42, %v24205_v42 }
 0x568   : > { %v11830_v62 = vcombine.high %v11820_v27, %v11820_v27  ;;  %v12967_v4 = vrot.slane %v11820_v27, %v20357_v54  ;;  %v12971_v53 = vrot.slane %v11828_v18, %v20357_v54  ;;  %v12979_v44 = vrot.slane %v24205_v42, %v20357_v54 }
 0x569   : > { %v24229_v55 = vrot.slane %v11749_v23, %v19150_v17  ;;  %v24232_v59 = vrot.slane %v11750_v9, %v19150_v17  ;;  %v11831_v8 = vcombine.high %v24220_v41, %v24220_v41  ;;  %v12983_v39 = vrot.slane %v24220_v41, %v20357_v54 }
 0x56a   : > { %v12975_v63 = vrot.slane %v11830_v62, %v20357_v54  ;;  %v12987_v13 = vrot.slane %v11829_v36, %v20357_v54  ;;  %v11779_v6 = vcombine.high %v24202_v15, %v24202_v15  ;;  %v11780_v52 = vcombine.high %v24215_v12, %v24215_v12 }
 0x56b   : > { %v11781_v19 = vcombine.high %v24229_v55, %v24229_v55  ;;  %v11782_v35 = vcombine.high %v24232_v59, %v24232_v59  ;;  %v12991_v3 = vrot.slane %v11831_v8, %v20357_v54  ;;  %v12931_v58 = vrot.slane %v24202_v15, %v20357_v54 }
 0x56c   : > { %v12935_v33 = vrot.slane %v24229_v55, %v20357_v54  ;;  %v12947_v24 = vrot.slane %v24215_v12, %v20357_v54  ;;  %v24256_v49 = vrot.slane %v11779_v6, %v20357_v54  ;;  %v12951_v38 = vrot.slane %v24232_v59, %v20357_v54 }
 0x56d   : > { %v24259_v2 = vrot.slane %v11781_v19, %v20357_v54  ;;  %v24264_v37 = vrot.slane %v11780_v52, %v20357_v54  ;;  %v24267_v11 = vrot.slane %v11782_v35, %v20357_v54  ;;  %v9927_v56 = vcombine.high %v24150_v22, %v24150_v22 }
 0x56e   : > { %v9934_v14 = vrot.slane %v24150_v22, %v19150_v17  ;;  %v7948_v28 = vadd.f32 %v23888_v20, %v23966_v10  ;;  %v24277_v50 = vadd.f32 %v23888_v20, %v24064_v29  ;;  %v24281_v1 = vadd.f32 %v23888_v20, %v24070_v51 }
 0x56f   : > { %v24285_v16 = vadd.f32 %v23888_v20, %v24081_v0  ;;  %v24289_v61 = vadd.f32 %v23888_v20, %v24087_v57  ;;  %v9941_v22 = vrot.slane %v9927_v56, %v19150_v17 }
 0x570   : > { %v9942_v5 = vcombine.high %v9934_v14, %v9934_v14  ;;  %v9950_v10 = vrot.slane %v9934_v14, %v19150_v17  ;;  %v9878_v60 = vcombine.high %v7948_v28, %v7948_v28  ;;  %v9885_v29 = vrot.slane %v7948_v28, %v19150_v17  ;;  %v24302_v20 = vpop.f32.mrb[58].mxu1 }
 0x571   : > { %v11881_v51 = vcombine.high %v24277_v50, %v24277_v50  ;;  %v24298_v48 = vrot.slane %v24277_v50, %v19150_v17  ;;  %v11832_v0 = vcombine.high %v24281_v1, %v24281_v1  ;;  %v9943_v57 = vcombine.high %v9941_v22, %v9941_v22  ;;  %v24306_v32 = vpop.f32.mrb[59].mxu1 }
 0x572   : > { %v9957_v31 = vrot.slane %v9941_v22, %v19150_v17  ;;  %v9964_v30 = vrot.slane %v9942_v5, %v19150_v17  ;;  %v9972_v45 = vcombine.high %v9950_v10, %v9950_v10  ;;  %v13688_v26 = vsel %vm6902_vm5, %v9950_v10, %v12963_v40  ;;  %v24313_v47 = vpop.f32.mrb[58].mxu0 }
 0x573   : > { %v9892_v25 = vrot.slane %v9878_v60, %v19150_v17  ;;  %v9893_v46 = vcombine.high %v9885_v29, %v9885_v29  ;;  %v9901_v21 = vrot.slane %v9885_v29, %v19150_v17  ;;  %v9971_v7 = vrot.slane %v9943_v57, %v19150_v17  ;;  %v24317_v40 = vpop.f32.mrb[59].mxu0 }
 0x574   : > { %v9973_v23 = vcombine.high %v9957_v31, %v9957_v31  ;;  %v9974_v15 = vcombine.high %v9964_v30, %v9964_v30  ;;  %v13689_v34 = vsel %vm6902_vm5, %v9964_v30, %v12967_v4  ;;  %v13690_v42 = vsel %vm6902_vm5, %v9972_v45, %v12971_v53 }
 0x575   : > { %v13692_v27 = vsel %vm6902_vm5, %v9957_v31, %v12979_v44  ;;  %v15870_v18 = vcombine.low %v13688_v26, %v13689_v34  ;;  %v9894_v9 = vcombine.high %v9892_v25, %v9892_v25  ;;  %v9975_v41 = vcombine.high %v9971_v7, %v9971_v7 }
 0x576   : > { %v13691_v36 = vsel %vm6902_vm5, %v9974_v15, %v12975_v63  ;;  %v13693_v62 = vsel %vm6902_vm5, %v9971_v7, %v12983_v39  ;;  %v13694_v55 = vsel %vm6902_vm5, %v9973_v23, %v12987_v13  ;;  %v9908_v52 = vrot.slane %v9892_v25, %v19150_v17 }
 0x577   : > { %v15871_v8 = vcombine.low %v13690_v42, %v13691_v36  ;;  %v15878_v4 = vrot.slane %v15870_v18, %v20363_v43  ;;  %v15887_v6 = vcombine.low %v13692_v27, %v13693_v62  ;;  %v13695_v53 = vsel %vm6902_vm5, %v9975_v41, %v12991_v3 }
 0x578   : > { %v9915_v44 = vrot.slane %v9893_v46, %v19150_v17  ;;  %v9922_v19 = vrot.slane %v9894_v9, %v19150_v17  ;;  %v9923_v35 = vcombine.high %v9901_v21, %v9901_v21  ;;  %v15888_v63 = vcombine.low %v13694_v55, %v13695_v53 }
 0x579   : > { %v15885_v56 = vrot.slane %v15871_v8, %v20363_v43  ;;  %v15895_v39 = vrot.slane %v15887_v6, %v20363_v43  ;;  %v9924_v13 = vcombine.high %v9908_v52, %v9908_v52  ;;  %v13680_v50 = vsel %vm6902_vm5, %v9901_v21, %v12931_v58 }
 0x57a   : > { %v9925_v14 = vcombine.high %v9915_v44, %v9915_v44  ;;  %v9926_v28 = vcombine.high %v9922_v19, %v9922_v19  ;;  %v13681_v22 = vsel %vm6902_vm5, %v9915_v44, %v12935_v33  ;;  %v15902_v3 = vrot.slane %v15888_v63, %v20363_v43 }
 0x57b   : > { %v15886_v5 = vcombine.low %v15878_v4, %v15885_v56  ;;  %v13682_v10 = vsel %vm6902_vm5, %v9923_v35, %v24256_v49  ;;  %v13684_v60 = vsel %vm6902_vm5, %v9908_v52, %v12947_v24  ;;  %v13685_v58 = vsel %vm6902_vm5, %v9922_v19, %v12951_v38 }
 0x57c   : > { %v13683_v29 = vsel %vm6902_vm5, %v9925_v14, %v24259_v2  ;;  %v13686_v33 = vsel %vm6902_vm5, %v9924_v13, %v24264_v37  ;;  %v13687_v57 = vsel %vm6902_vm5, %v9926_v28, %v24267_v11  ;;  %v15903_v49 = vcombine.low %v15895_v39, %v15902_v3 }
 0x57d   : > { %16670 = vst.msk [vmem:[%s20460_s8 + $0x2f0] sm:$0xff] %vm346_vm1, %v15886_v5  ;;  %v15836_v12 = vcombine.low %v13680_v50, %v13681_v22  ;;  %v15837_v31 = vcombine.low %v13682_v10, %v13683_v29  ;;  %v15853_v24 = vcombine.low %v13684_v60, %v13685_v58  ;;  %v15854_v30 = vcombine.low %v13686_v33, %v13687_v57 }
 0x57e   : > { %v11895_v2 = vrot.slane %v11881_v51, %v19150_v17  ;;  %v11896_v59 = vcombine.high %v24298_v48, %v24298_v48  ;;  %v24355_v38 = vrot.slane %v24298_v48, %v19150_v17  ;;  %16671 = vst.msk [vmem:[%s20460_s8 + $0x2f8] sm:$0xff] %vm346_vm1, %v15903_v49  ;;  %v11839_v26 = vrot.slane %v24281_v1, %v19150_v17 }
 0x57f   : > { %v15844_v37 = vrot.slane %v15836_v12, %v20363_v43  ;;  %v15851_v11 = vrot.slane %v15837_v31, %v20363_v43  ;;  %v15861_v45 = vrot.slane %v15853_v24, %v20363_v43  ;;  %v15868_v51 = vrot.slane %v15854_v30, %v20363_v43 }
 0x580   : > { %v11897_v25 = vcombine.high %v11895_v2, %v11895_v2  ;;  %v11911_v46 = vrot.slane %v11895_v2, %v19150_v17  ;;  %v11918_v48 = vrot.slane %v11896_v59, %v19150_v17  ;;  %v11926_v7 = vcombine.high %v24355_v38, %v24355_v38 }
 0x581   : > { %v15852_v21 = vcombine.low %v15844_v37, %v15851_v11  ;;  %v13027_v23 = vrot.slane %v24355_v38, %v20357_v54  ;;  %v11846_v15 = vrot.slane %v11832_v0, %v19150_v17  ;;  %v15869_v34 = vcombine.low %v15861_v45, %v15868_v51  ;;  %v24381_v55 = vpop.f32.mrb[60].mxu1 }
 0x582   : > { %v11925_v42 = vrot.slane %v11897_v25, %v19150_v17  ;;  %v11927_v27 = vcombine.high %v11911_v46, %v11911_v46  ;;  %v11928_v18 = vcombine.high %v11918_v48, %v11918_v48  ;;  %v13031_v9 = vrot.slane %v11918_v48, %v20357_v54  ;;  %v24388_v6 = vpop.f32.mrb[61].mxu1 }
 0x583   : > { %16668 = vst.msk [vmem:[%s20460_s8 + $0x2e0] sm:$0xff] %vm346_vm1, %v15852_v21  ;;  %v13035_v41 = vrot.slane %v11926_v7, %v20357_v54  ;;  %v13043_v36 = vrot.slane %v11911_v46, %v20357_v54  ;;  %v11847_v62 = vcombine.high %v11839_v26, %v11839_v26  ;;  %16669 = vst.msk [vmem:[%s20460_s8 + $0x2e8] sm:$0xff] %vm346_vm1, %v15869_v34 }
 0x584   : > { %v11929_v1 = vcombine.high %v11925_v42, %v11925_v42  ;;  %v13039_v0 = vrot.slane %v11928_v18, %v20357_v54  ;;  %v13047_v8 = vrot.slane %v11925_v42, %v20357_v54  ;;  %v13051_v4 = vrot.slane %v11927_v27, %v20357_v54 }
 0x585   : > { %v11848_v52 = vcombine.high %v11846_v15, %v11846_v15  ;;  %v11855_v53 = vrot.slane %v11839_v26, %v19150_v17  ;;  %v24392_v44 = vrot.slane %v11846_v15, %v19150_v17  ;;  %v11869_v19 = vrot.slane %v11847_v62, %v19150_v17 }
 0x586   : > { %v13055_v35 = vrot.slane %v11929_v1, %v20357_v54  ;;  %v10025_v56 = vcombine.high %v24285_v16, %v24285_v16  ;;  %v10032_v63 = vrot.slane %v24285_v16, %v19150_v17  ;;  %v9976_v39 = vcombine.high %v24289_v61, %v24289_v61 }
 0x587   : > { %v24403_v13 = vrot.slane %v11848_v52, %v19150_v17  ;;  %v11877_v14 = vcombine.high %v11855_v53, %v11855_v53  ;;  %v11878_v28 = vcombine.high %v24392_v44, %v24392_v44  ;;  %v11879_v50 = vcombine.high %v11869_v19, %v11869_v19 }
 0x588   : > { %v12995_v22 = vrot.slane %v11855_v53, %v20357_v54  ;;  %v12999_v5 = vrot.slane %v11869_v19, %v20357_v54  ;;  %v13011_v3 = vrot.slane %v24392_v44, %v20357_v54  ;;  %v10039_v16 = vrot.slane %v10025_v56, %v19150_v17 }
 0x589   : > { %v11880_v10 = vcombine.high %v24403_v13, %v24403_v13  ;;  %v13003_v60 = vrot.slane %v11877_v14, %v20357_v54  ;;  %v13007_v29 = vrot.slane %v11879_v50, %v20357_v54  ;;  %v13015_v58 = vrot.slane %v24403_v13, %v20357_v54 }
 0x58a   : > { %v13019_v33 = vrot.slane %v11878_v28, %v20357_v54  ;;  %v10040_v57 = vcombine.high %v10032_v63, %v10032_v63  ;;  %v10041_v49 = vcombine.high %v10039_v16, %v10039_v16  ;;  %v10048_v12 = vrot.slane %v10032_v63, %v19150_v17 }
 0x58b   : > { %v13023_v31 = vrot.slane %v11880_v10, %v20357_v54  ;;  %v10055_v24 = vrot.slane %v10039_v16, %v19150_v17  ;;  %v9983_v30 = vrot.slane %v24289_v61, %v19150_v17  ;;  %v9990_v2 = vrot.slane %v9976_v39, %v19150_v17 }
 0x58c   : > { %v10062_v59 = vrot.slane %v10040_v57, %v19150_v17  ;;  %v10069_v38 = vrot.slane %v10041_v49, %v19150_v17  ;;  %v10070_v37 = vcombine.high %v10048_v12, %v10048_v12  ;;  %v13704_v11 = vsel %vm6902_vm5, %v10048_v12, %v13027_v23 }
 0x58d   : > { %v10071_v45 = vcombine.high %v10055_v24, %v10055_v24  ;;  %v13708_v26 = vsel %vm6902_vm5, %v10055_v24, %v13043_v36  ;;  %v9991_v51 = vcombine.high %v9983_v30, %v9983_v30  ;;  %v9992_v25 = vcombine.high %v9990_v2, %v9990_v2 }
 0x58e   : > { %v10072_v46 = vcombine.high %v10062_v59, %v10062_v59  ;;  %v10073_v48 = vcombine.high %v10069_v38, %v10069_v38  ;;  %v13705_v21 = vsel %vm6902_vm5, %v10062_v59, %v13031_v9  ;;  %v13706_v61 = vsel %vm6902_vm5, %v10070_v37, %v13035_v41 }
 0x58f   : > { %v13709_v7 = vsel %vm6902_vm5, %v10069_v38, %v13047_v8  ;;  %v13710_v15 = vsel %vm6902_vm5, %v10071_v45, %v13051_v4  ;;  %v16006_v34 = vcombine.low %v13704_v11, %v13705_v21  ;;  %v9999_v42 = vrot.slane %v9983_v30, %v19150_v17 }
 0x590   : > { %v13707_v23 = vsel %vm6902_vm5, %v10072_v46, %v13039_v0  ;;  %v13711_v27 = vsel %vm6902_vm5, %v10073_v48, %v13055_v35  ;;  %v16023_v18 = vcombine.low %v13708_v26, %v13709_v7  ;;  %v10006_v36 = vrot.slane %v9990_v2, %v19150_v17 }
 0x591   : > { %v16007_v62 = vcombine.low %v13706_v61, %v13707_v23  ;;  %v16014_v1 = vrot.slane %v16006_v34, %v20363_v43  ;;  %v16024_v9 = vcombine.low %v13710_v15, %v13711_v27  ;;  %v10013_v41 = vrot.slane %v9991_v51, %v19150_v17  ;;  %v24444_v56 = vpop.f32.mrb[60].mxu0 }
 0x592   : > { %v16031_v8 = vrot.slane %v16023_v18, %v20363_v43  ;;  %v10020_v4 = vrot.slane %v9992_v25, %v19150_v17  ;;  %v10021_v52 = vcombine.high %v9999_v42, %v9999_v42  ;;  %v10022_v53 = vcombine.high %v10006_v36, %v10006_v36  ;;  %v24449_v28 = vpop.f32.mrb[61].mxu0 }
 0x593   : > { %v16021_v44 = vrot.slane %v16007_v62, %v20363_v43  ;;  %v16038_v0 = vrot.slane %v16024_v9, %v20363_v43  ;;  %v10023_v19 = vcombine.high %v10013_v41, %v10013_v41  ;;  %v13696_v35 = vsel %vm6902_vm5, %v9999_v42, %v12995_v22 }
 0x594   : > { %v10024_v63 = vcombine.high %v10020_v4, %v10020_v4  ;;  %v13697_v39 = vsel %vm6902_vm5, %v10013_v41, %v12999_v5  ;;  %v13698_v13 = vsel %vm6902_vm5, %v10021_v52, %v13003_v60  ;;  %v13700_v14 = vsel %vm6902_vm5, %v10006_v36, %v13011_v3  ;;  %v24462_v60 = vld [vmem:[%s24824_s3] ss:$0 sm:$0xff] }
 0x595   : > { %v16022_v50 = vcombine.low %v16014_v1, %v16021_v44  ;;  %v16039_v16 = vcombine.low %v16031_v8, %v16038_v0  ;;  %v13699_v10 = vsel %vm6902_vm5, %v10023_v19, %v13007_v29  ;;  %v13701_v57 = vsel %vm6902_vm5, %v10020_v4, %v13015_v58 }
 0x596   : > { %v13702_v22 = vsel %vm6902_vm5, %v10022_v53, %v13019_v33  ;;  %v13703_v49 = vsel %vm6902_vm5, %v10024_v63, %v13023_v31  ;;  %v15972_v12 = vcombine.low %v13696_v35, %v13697_v39  ;;  %v15973_v24 = vcombine.low %v13698_v13, %v13699_v10 }
 0x597   : > { %16678 = vst.msk [vmem:[%s20460_s8 + $0x330] sm:$0xff] %vm346_vm1, %v16022_v50  ;;  %16679 = vst.msk [vmem:[%s20460_s8 + $0x338] sm:$0xff] %vm346_vm1, %v16039_v16  ;;  %v15989_v5 = vcombine.low %v13700_v14, %v13701_v57  ;;  %v15990_v3 = vcombine.low %v13702_v22, %v13703_v49  ;;  %v8745_v29 = vadd.f32 %v24462_v60, %v24302_v20 }
 0x598   : > { %v8740_v58 = vadd.f32 %v24462_v60, %v24306_v32  ;;  %v15980_v33 = vrot.slane %v15972_v12, %v20363_v43  ;;  %v15987_v31 = vrot.slane %v15973_v24, %v20363_v43  ;;  %v7973_v30 = vadd.f32 %v24462_v60, %v24313_v47 }
 0x599   : > { %v24474_v2 = vadd.f32 %v24462_v60, %v24317_v40  ;;  %v15997_v59 = vrot.slane %v15989_v5, %v20363_v43  ;;  %v16004_v38 = vrot.slane %v15990_v3, %v20363_v43  ;;  %v11979_v20 = vcombine.high %v8745_v29, %v8745_v29 }
 0x59a   : > { %v11986_v32 = vrot.slane %v8745_v29, %v19150_v17  ;;  %v15988_v37 = vcombine.low %v15980_v33, %v15987_v31  ;;  %v11930_v11 = vcombine.high %v8740_v58, %v8740_v58  ;;  %v11937_v45 = vrot.slane %v8740_v58, %v19150_v17 }
 0x59b   : > { %v10123_v26 = vcombine.high %v7973_v30, %v7973_v30  ;;  %v16005_v51 = vcombine.low %v15997_v59, %v16004_v38  ;;  %v11993_v47 = vrot.slane %v11979_v20, %v19150_v17  ;;  %v10130_v61 = vrot.slane %v7973_v30, %v19150_v17 }
 0x59c   : > { %v11994_v25 = vcombine.high %v11986_v32, %v11986_v32  ;;  %v12002_v40 = vrot.slane %v11986_v32, %v19150_v17  ;;  %16676 = vst.msk [vmem:[%s20460_s8 + $0x320] sm:$0xff] %vm346_vm1, %v15988_v37  ;;  %v11944_v46 = vrot.slane %v11930_v11, %v19150_v17  ;;  %v11945_v48 = vcombine.high %v11937_v45, %v11937_v45 }
 0x59d   : > { %v24486_v21 = vrot.slane %v11937_v45, %v19150_v17  ;;  %16677 = vst.msk [vmem:[%s20460_s8 + $0x328] sm:$0xff] %vm346_vm1, %v16005_v51  ;;  %v11995_v7 = vcombine.high %v11993_v47, %v11993_v47  ;;  %v12009_v15 = vrot.slane %v11993_v47, %v19150_v17  ;;  %v10137_v5 = vrot.slane %v10123_v26, %v19150_v17 }
 0x59e   : > { %v12016_v34 = vrot.slane %v11994_v25, %v19150_v17  ;;  %v12024_v42 = vcombine.high %v12002_v40, %v12002_v40  ;;  %v13091_v23 = vrot.slane %v12002_v40, %v20357_v54  ;;  %v11946_v27 = vcombine.high %v11944_v46, %v11944_v46 }
 0x59f   : > { %v24495_v18 = vrot.slane %v11944_v46, %v19150_v17  ;;  %v24498_v36 = vrot.slane %v11945_v48, %v19150_v17  ;;  %v12023_v62 = vrot.slane %v11995_v7, %v19150_v17  ;;  %v12025_v1 = vcombine.high %v12009_v15, %v12009_v15 }
 0x5a0   : > { %v12026_v9 = vcombine.high %v12016_v34, %v12016_v34  ;;  %v13095_v41 = vrot.slane %v12016_v34, %v20357_v54  ;;  %v13099_v8 = vrot.slane %v12024_v42, %v20357_v54  ;;  %v13107_v4 = vrot.slane %v12009_v15, %v20357_v54 }
 0x5a1   : > { %v24505_v52 = vrot.slane %v11946_v27, %v19150_v17  ;;  %v11975_v53 = vcombine.high %v24486_v21, %v24486_v21  ;;  %v12027_v44 = vcombine.high %v12023_v62, %v12023_v62  ;;  %v13111_v19 = vrot.slane %v12023_v62, %v20357_v54 }
 0x5a2   : > { %v13103_v0 = vrot.slane %v12026_v9, %v20357_v54  ;;  %v13115_v35 = vrot.slane %v12025_v1, %v20357_v54  ;;  %v11976_v63 = vcombine.high %v24495_v18, %v24495_v18  ;;  %v11977_v39 = vcombine.high %v24498_v36, %v24498_v36 }
 0x5a3   : > { %v11978_v13 = vcombine.high %v24505_v52, %v24505_v52  ;;  %v13059_v14 = vrot.slane %v24486_v21, %v20357_v54  ;;  %v13119_v50 = vrot.slane %v12027_v44, %v20357_v54  ;;  %v13063_v16 = vrot.slane %v24498_v36, %v20357_v54 }
 0x5a4   : > { %v13067_v10 = vrot.slane %v11975_v53, %v20357_v54  ;;  %v13075_v57 = vrot.slane %v24495_v18, %v20357_v54  ;;  %v13071_v22 = vrot.slane %v11977_v39, %v20357_v54  ;;  %v13079_v49 = vrot.slane %v24505_v52, %v20357_v54 }
 0x5a5   : > { %v13083_v12 = vrot.slane %v11976_v63, %v20357_v54  ;;  %v13087_v24 = vrot.slane %v11978_v13, %v20357_v54  ;;  %v10138_v3 = vcombine.high %v10130_v61, %v10130_v61  ;;  %v10146_v29 = vrot.slane %v10130_v61, %v19150_v17 }
 0x5a6   : > { %v10074_v58 = vcombine.high %v24474_v2, %v24474_v2  ;;  %v10081_v33 = vrot.slane %v24474_v2, %v19150_v17  ;;  %v24539_v31 = vadd.f32 %v24462_v60, %v24381_v55  ;;  %v24543_v30 = vadd.f32 %v24462_v60, %v24388_v6 }
 0x5a7   : > { %v24547_v59 = vadd.f32 %v24462_v60, %v24444_v56  ;;  %v10139_v38 = vcombine.high %v10137_v5, %v10137_v5  ;;  %v10153_v20 = vrot.slane %v10137_v5, %v19150_v17  ;;  %v10160_v32 = vrot.slane %v10138_v3, %v19150_v17 }
 0x5a8   : > { %v10168_v37 = vcombine.high %v10146_v29, %v10146_v29  ;;  %v13720_v2 = vsel %vm6902_vm5, %v10146_v29, %v13091_v23  ;;  %v10088_v11 = vrot.slane %v10074_v58, %v19150_v17  ;;  %v10089_v55 = vcombine.high %v10081_v33, %v10081_v33 }
 0x5a9   : > { %v10097_v45 = vrot.slane %v10081_v33, %v19150_v17  ;;  %v10167_v6 = vrot.slane %v10139_v38, %v19150_v17  ;;  %v10169_v26 = vcombine.high %v10153_v20, %v10153_v20  ;;  %v10170_v51 = vcombine.high %v10160_v32, %v10160_v32 }
 0x5aa   : > { %v13721_v56 = vsel %vm6902_vm5, %v10160_v32, %v13095_v41  ;;  %v13722_v47 = vsel %vm6902_vm5, %v10168_v37, %v13099_v8  ;;  %v13724_v25 = vsel %vm6902_vm5, %v10153_v20, %v13107_v4  ;;  %v10090_v46 = vcombine.high %v10088_v11, %v10088_v11 }
 0x5ab   : > { %v16142_v40 = vcombine.low %v13720_v2, %v13721_v56  ;;  %v10171_v48 = vcombine.high %v10167_v6, %v10167_v6  ;;  %v13723_v21 = vsel %vm6902_vm5, %v10170_v51, %v13103_v0  ;;  %v13725_v61 = vsel %vm6902_vm5, %v10167_v6, %v13111_v19 }
 0x5ac   : > { %v13726_v7 = vsel %vm6902_vm5, %v10169_v26, %v13115_v35  ;;  %v16143_v15 = vcombine.low %v13722_v47, %v13723_v21  ;;  %v16159_v42 = vcombine.low %v13724_v25, %v13725_v61  ;;  %v10104_v23 = vrot.slane %v10088_v11, %v19150_v17 }
 0x5ad   : > { %v16150_v34 = vrot.slane %v16142_v40, %v20363_v43  ;;  %v13727_v27 = vsel %vm6902_vm5, %v10171_v48, %v13119_v50  ;;  %v10111_v18 = vrot.slane %v10089_v55, %v19150_v17  ;;  %v10118_v36 = vrot.slane %v10090_v46, %v19150_v17 }
 0x5ae   : > { %v10119_v62 = vcombine.high %v10097_v45, %v10097_v45  ;;  %v16157_v1 = vrot.slane %v16143_v15, %v20363_v43  ;;  %v16160_v9 = vcombine.low %v13726_v7, %v13727_v27  ;;  %v16167_v41 = vrot.slane %v16159_v42, %v20363_v43  ;;  %v24568_v4 = vpop.f32.mrb[62].mxu1 }
 0x5af   : > { %v10120_v8 = vcombine.high %v10104_v23, %v10104_v23  ;;  %v10121_v52 = vcombine.high %v10111_v18, %v10111_v18  ;;  %v10122_v53 = vcombine.high %v10118_v36, %v10118_v36  ;;  %v13712_v44 = vsel %vm6902_vm5, %v10097_v45, %v13059_v14  ;;  %v24572_v19 = vpop.f32.mrb[63].mxu1 }
 0x5b0   : > { %v13713_v0 = vsel %vm6902_vm5, %v10111_v18, %v13063_v16  ;;  %v16158_v35 = vcombine.low %v16150_v34, %v16157_v1  ;;  %v16174_v63 = vrot.slane %v16160_v9, %v20363_v43  ;;  %v13714_v39 = vsel %vm6902_vm5, %v10119_v62, %v13067_v10 }
 0x5b1   : > { %v13716_v13 = vsel %vm6902_vm5, %v10104_v23, %v13075_v57  ;;  %v13715_v50 = vsel %vm6902_vm5, %v10121_v52, %v13071_v22  ;;  %v13717_v5 = vsel %vm6902_vm5, %v10118_v36, %v13079_v49  ;;  %v13718_v3 = vsel %vm6902_vm5, %v10120_v8, %v13083_v12 }
 0x5b2   : > { %v13719_v14 = vsel %vm6902_vm5, %v10122_v53, %v13087_v24  ;;  %v16175_v29 = vcombine.low %v16167_v41, %v16174_v63  ;;  %16686 = vst.msk [vmem:[%s20460_s8 + $0x370] sm:$0xff] %vm346_vm1, %v16158_v35  ;;  %v16108_v16 = vcombine.low %v13712_v44, %v13713_v0  ;;  %v16109_v58 = vcombine.low %v13714_v39, %v13715_v50  ;;  %v17265_v38 = vpop.f32.mrb[62].mxu0 }
 0x5b3   : > { %v16125_v33 = vcombine.low %v13716_v13, %v13717_v5  ;;  %v16126_v20 = vcombine.low %v13718_v3, %v13719_v14  ;;  %v12077_v10 = vcombine.high %v24539_v31, %v24539_v31  ;;  %v12084_v57 = vrot.slane %v24539_v31, %v19150_v17  ;;  %v7987_v49 = vpop.f32.mrb[63].mxu0 }
 0x5b4   : > { %v12028_v22 = vcombine.high %v24543_v30, %v24543_v30  ;;  %16687 = vst.msk [vmem:[%s20460_s8 + $0x378] sm:$0xff] %vm346_vm1, %v16175_v29  ;;  %v16116_v12 = vrot.slane %v16108_v16, %v20363_v43  ;;  %v16123_v24 = vrot.slane %v16109_v58, %v20363_v43  ;;  %v12035_v37 = vrot.slane %v24543_v30, %v19150_v17 }
 0x5b5   : > { %v16133_v32 = vrot.slane %v16125_v33, %v20363_v43  ;;  %v16140_v2 = vrot.slane %v16126_v20, %v20363_v43  ;;  %v12091_v31 = vrot.slane %v12077_v10, %v19150_v17  ;;  %v12092_v11 = vcombine.high %v12084_v57, %v12084_v57 }
 0x5b6   : > { %v12100_v55 = vrot.slane %v12084_v57, %v19150_v17  ;;  %v16124_v45 = vcombine.low %v16116_v12, %v16123_v24  ;;  %v12042_v6 = vrot.slane %v12028_v22, %v19150_v17  ;;  %v12043_v26 = vcombine.high %v12035_v37, %v12035_v37 }
 0x5b7   : > { %v24601_v51 = vrot.slane %v12035_v37, %v19150_v17  ;;  %v16141_v56 = vcombine.low %v16133_v32, %v16140_v2  ;;  %v12093_v47 = vcombine.high %v12091_v31, %v12091_v31  ;;  %v24604_v25 = vrot.slane %v12091_v31, %v19150_v17 }
 0x5b8   : > { %v12114_v30 = vrot.slane %v12092_v11, %v19150_v17  ;;  %16684 = vst.msk [vmem:[%s20460_s8 + $0x360] sm:$0xff] %vm346_vm1, %v16124_v45  ;;  %v12122_v40 = vcombine.high %v12100_v55, %v12100_v55  ;;  %v13155_v46 = vrot.slane %v12100_v55, %v20357_v54  ;;  %v12044_v48 = vcombine.high %v12042_v6, %v12042_v6 }
 0x5b9   : > { %v24611_v21 = vrot.slane %v12042_v6, %v19150_v17  ;;  %16685 = vst.msk [vmem:[%s20460_s8 + $0x368] sm:$0xff] %vm346_vm1, %v16141_v56  ;;  %v12121_v61 = vrot.slane %v12093_v47, %v19150_v17  ;;  %v12123_v7 = vcombine.high %v24604_v25, %v24604_v25  ;;  %v13171_v23 = vrot.slane %v24604_v25, %v20357_v54 }
 0x5ba   : > { %v12124_v15 = vcombine.high %v12114_v30, %v12114_v30  ;;  %v13159_v34 = vrot.slane %v12114_v30, %v20357_v54  ;;  %v13163_v42 = vrot.slane %v12122_v40, %v20357_v54  ;;  %v24623_v27 = vrot.slane %v12043_v26, %v19150_v17 }
 0x5bb   : > { %v24626_v18 = vrot.slane %v12044_v48, %v19150_v17  ;;  %v12125_v36 = vcombine.high %v12121_v61, %v12121_v61  ;;  %v13175_v1 = vrot.slane %v12121_v61, %v20357_v54  ;;  %v13179_v9 = vrot.slane %v12123_v7, %v20357_v54 }
 0x5bc   : > { %v13167_v62 = vrot.slane %v12124_v15, %v20357_v54  ;;  %v12073_v41 = vcombine.high %v24601_v51, %v24601_v51  ;;  %v12074_v8 = vcombine.high %v24611_v21, %v24611_v21  ;;  %v12075_v52 = vcombine.high %v24623_v27, %v24623_v27 }
 0x5bd   : > { %v12076_v53 = vcombine.high %v24626_v18, %v24626_v18  ;;  %v13183_v44 = vrot.slane %v12125_v36, %v20357_v54  ;;  %v13123_v0 = vrot.slane %v24601_v51, %v20357_v54  ;;  %v13127_v35 = vrot.slane %v24623_v27, %v20357_v54 }
 0x5be   : > { %v13139_v63 = vrot.slane %v24611_v21, %v20357_v54  ;;  %v13131_v39 = vrot.slane %v12073_v41, %v20357_v54  ;;  %v13135_v13 = vrot.slane %v12075_v52, %v20357_v54  ;;  %v13143_v50 = vrot.slane %v24626_v18, %v20357_v54 }
 0x5bf   : > { %v13147_v5 = vrot.slane %v12074_v8, %v20357_v54  ;;  %v13151_v3 = vrot.slane %v12076_v53, %v20357_v54  ;;  %v10221_v14 = vcombine.high %v24547_v59, %v24547_v59  ;;  %v10228_v29 = vrot.slane %v24547_v59, %v19150_v17 }
 0x5c0   : > { %v7978_v16 = vadd.f32 %v24462_v60, %v24449_v28  ;;  %v24660_v58 = vadd.f32 %v24462_v60, %v24568_v4  ;;  %v24664_v33 = vadd.f32 %v24462_v60, %v24572_v19  ;;  %v24667_v20 = vadd.f32 %v24462_v60, %v17265_v38 }
 0x5c1   : > { %v24670_v10 = vadd.f32 %v24462_v60, %v7987_v49  ;;  %v10235_v57 = vrot.slane %v10221_v14, %v19150_v17  ;;  %v10236_v59 = vcombine.high %v10228_v29, %v10228_v29  ;;  %v10244_v22 = vrot.slane %v10228_v29, %v19150_v17 }
 0x5c2   : > { %v10172_v28 = vcombine.high %v7978_v16, %v7978_v16  ;;  %v10179_v12 = vrot.slane %v7978_v16, %v19150_v17  ;;  %v12175_v4 = vcombine.high %v24660_v58, %v24660_v58  ;;  %v24679_v19 = vrot.slane %v24660_v58, %v19150_v17 }
 0x5c3   : > { %v12126_v38 = vcombine.high %v24664_v33, %v24664_v33  ;;  %v10237_v60 = vcombine.high %v10235_v57, %v10235_v57  ;;  %v10251_v49 = vrot.slane %v10235_v57, %v19150_v17  ;;  %v10258_v24 = vrot.slane %v10236_v59, %v19150_v17 }
 0x5c4   : > { %v10266_v32 = vcombine.high %v10244_v22, %v10244_v22  ;;  %v13736_v37 = vsel %vm6902_vm5, %v10244_v22, %v13155_v46  ;;  %v10186_v2 = vrot.slane %v10172_v28, %v19150_v17  ;;  %v10187_v31 = vcombine.high %v10179_v12, %v10179_v12 }
 0x5c5   : > { %v10195_v11 = vrot.slane %v10179_v12, %v19150_v17  ;;  %v10265_v55 = vrot.slane %v10237_v60, %v19150_v17  ;;  %v10267_v45 = vcombine.high %v10251_v49, %v10251_v49  ;;  %v10268_v6 = vcombine.high %v10258_v24, %v10258_v24 }
 0x5c6   : > { %v13737_v26 = vsel %vm6902_vm5, %v10258_v24, %v13159_v34  ;;  %v13738_v51 = vsel %vm6902_vm5, %v10266_v32, %v13163_v42  ;;  %v13740_v56 = vsel %vm6902_vm5, %v10251_v49, %v13171_v23  ;;  %v10188_v25 = vcombine.high %v10186_v2, %v10186_v2 }
 0x5c7   : > { %v16278_v47 = vcombine.low %v13736_v37, %v13737_v26  ;;  %v10269_v30 = vcombine.high %v10265_v55, %v10265_v55  ;;  %v13739_v40 = vsel %vm6902_vm5, %v10268_v6, %v13167_v62  ;;  %v13741_v46 = vsel %vm6902_vm5, %v10265_v55, %v13175_v1 }
 0x5c8   : > { %v13742_v48 = vsel %vm6902_vm5, %v10267_v45, %v13179_v9  ;;  %v16279_v21 = vcombine.low %v13738_v51, %v13739_v40  ;;  %v16295_v7 = vcombine.low %v13740_v56, %v13741_v46  ;;  %v10202_v15 = vrot.slane %v10186_v2, %v19150_v17 }
 0x5c9   : > { %v16286_v61 = vrot.slane %v16278_v47, %v20363_v43  ;;  %v13743_v34 = vsel %vm6902_vm5, %v10269_v30, %v13183_v44  ;;  %v10209_v42 = vrot.slane %v10187_v31, %v19150_v17  ;;  %v10216_v23 = vrot.slane %v10188_v25, %v19150_v17 }
 0x5ca   : > { %v10217_v27 = vcombine.high %v10195_v11, %v10195_v11  ;;  %v16293_v18 = vrot.slane %v16279_v21, %v20363_v43  ;;  %v16296_v36 = vcombine.low %v13742_v48, %v13743_v34  ;;  %v16303_v62 = vrot.slane %v16295_v7, %v20363_v43 }
 0x5cb   : > { %v10218_v1 = vcombine.high %v10202_v15, %v10202_v15  ;;  %v10219_v9 = vcombine.high %v10209_v42, %v10209_v42  ;;  %v10220_v41 = vcombine.high %v10216_v23, %v10216_v23  ;;  %v13728_v8 = vsel %vm6902_vm5, %v10195_v11, %v13123_v0 }
 0x5cc   : > { %v13729_v52 = vsel %vm6902_vm5, %v10209_v42, %v13127_v35  ;;  %v16294_v53 = vcombine.low %v16286_v61, %v16293_v18  ;;  %v16310_v44 = vrot.slane %v16296_v36, %v20363_v43  ;;  %v13730_v14 = vsel %vm6902_vm5, %v10217_v27, %v13131_v39 }
 0x5cd   : > { %v13732_v29 = vsel %vm6902_vm5, %v10202_v15, %v13139_v63  ;;  %v13731_v16 = vsel %vm6902_vm5, %v10219_v9, %v13135_v13  ;;  %v13733_v58 = vsel %vm6902_vm5, %v10216_v23, %v13143_v50  ;;  %v13734_v57 = vsel %vm6902_vm5, %v10218_v1, %v13147_v5 }
 0x5ce   : > { %v13735_v59 = vsel %vm6902_vm5, %v10220_v41, %v13151_v3  ;;  %v16311_v22 = vcombine.low %v16303_v62, %v16310_v44  ;;  %16694 = vst.msk [vmem:[%s20460_s8 + $0x3b0] sm:$0xff] %vm346_vm1, %v16294_v53  ;;  %v16244_v0 = vcombine.low %v13728_v8, %v13729_v52  ;;  %v16245_v35 = vcombine.low %v13730_v14, %v13731_v16 }
 0x5cf   : > { %v16261_v28 = vcombine.low %v13732_v29, %v13733_v58  ;;  %v16262_v12 = vcombine.low %v13734_v57, %v13735_v59  ;;  %v12189_v60 = vrot.slane %v12175_v4, %v19150_v17  ;;  %v12190_v63 = vcombine.high %v24679_v19, %v24679_v19 }
 0x5d0   : > { %v12198_v39 = vrot.slane %v24679_v19, %v19150_v17  ;;  %16695 = vst.msk [vmem:[%s20460_s8 + $0x3b8] sm:$0xff] %vm346_vm1, %v16311_v22  ;;  %v16252_v13 = vrot.slane %v16244_v0, %v20363_v43  ;;  %v16259_v50 = vrot.slane %v16245_v35, %v20363_v43  ;;  %v12133_v3 = vrot.slane %v24664_v33, %v19150_v17 }
 0x5d1   : > { %v16269_v5 = vrot.slane %v16261_v28, %v20363_v43  ;;  %v16276_v4 = vrot.slane %v16262_v12, %v20363_v43  ;;  %v12191_v49 = vcombine.high %v12189_v60, %v12189_v60  ;;  %v12205_v24 = vrot.slane %v12189_v60, %v19150_v17 }
 0x5d2   : > { %v12212_v19 = vrot.slane %v12190_v63, %v19150_v17  ;;  %v16260_v32 = vcombine.low %v16252_v13, %v16259_v50  ;;  %v12220_v37 = vcombine.high %v12198_v39, %v12198_v39  ;;  %v13219_v2 = vrot.slane %v12198_v39, %v20357_v54 }
 0x5d3   : > { %v12140_v31 = vrot.slane %v12126_v38, %v19150_v17  ;;  %v16277_v11 = vcombine.low %v16269_v5, %v16276_v4  ;;  %v12219_v55 = vrot.slane %v12191_v49, %v19150_v17  ;;  %v12221_v45 = vcombine.high %v12205_v24, %v12205_v24 }
 0x5d4   : > { %v12222_v6 = vcombine.high %v12212_v19, %v12212_v19  ;;  %16692 = vst.msk [vmem:[%s20460_s8 + $0x3a0] sm:$0xff] %vm346_vm1, %v16260_v32  ;;  %v13223_v26 = vrot.slane %v12212_v19, %v20357_v54  ;;  %v13227_v51 = vrot.slane %v12220_v37, %v20357_v54  ;;  %v13235_v56 = vrot.slane %v12205_v24, %v20357_v54 }
 0x5d5   : > { %v12141_v47 = vcombine.high %v12133_v3, %v12133_v3  ;;  %16693 = vst.msk [vmem:[%s20460_s8 + $0x3a8] sm:$0xff] %vm346_vm1, %v16277_v11  ;;  %v12223_v25 = vcombine.high %v12219_v55, %v12219_v55  ;;  %v13239_v38 = vrot.slane %v12219_v55, %v20357_v54  ;;  %v13243_v30 = vrot.slane %v12221_v45, %v20357_v54 }
 0x5d6   : > { %v13231_v33 = vrot.slane %v12222_v6, %v20357_v54  ;;  %v12142_v40 = vcombine.high %v12140_v31, %v12140_v31  ;;  %v12149_v46 = vrot.slane %v12133_v3, %v19150_v17  ;;  %v24746_v48 = vrot.slane %v12140_v31, %v19150_v17 }
 0x5d7   : > { %v12163_v21 = vrot.slane %v12141_v47, %v19150_v17  ;;  %v13247_v61 = vrot.slane %v12223_v25, %v20357_v54  ;;  %v10319_v7 = vcombine.high %v24667_v20, %v24667_v20  ;;  %v10326_v15 = vrot.slane %v24667_v20, %v19150_v17 }
 0x5d8   : > { %v10270_v34 = vcombine.high %v24670_v10, %v24670_v10  ;;  %v12170_v42 = vrot.slane %v12142_v40, %v19150_v17  ;;  %v12171_v23 = vcombine.high %v12149_v46, %v12149_v46  ;;  %v12172_v27 = vcombine.high %v24746_v48, %v24746_v48 }
 0x5d9   : > { %v12173_v18 = vcombine.high %v12163_v21, %v12163_v21  ;;  %v13187_v36 = vrot.slane %v12149_v46, %v20357_v54  ;;  %v13191_v62 = vrot.slane %v12163_v21, %v20357_v54  ;;  %v13203_v1 = vrot.slane %v24746_v48, %v20357_v54 }
 0x5da   : > { %v10333_v9 = vrot.slane %v10319_v7, %v19150_v17  ;;  %v12174_v20 = vcombine.high %v12170_v42, %v12170_v42  ;;  %v13195_v41 = vrot.slane %v12171_v23, %v20357_v54  ;;  %v13207_v52 = vrot.slane %v12170_v42, %v20357_v54 }
 0x5db   : > { %v13199_v8 = vrot.slane %v12173_v18, %v20357_v54  ;;  %v13211_v53 = vrot.slane %v12172_v27, %v20357_v54  ;;  %v10334_v44 = vcombine.high %v10326_v15, %v10326_v15  ;;  %v10342_v29 = vrot.slane %v10326_v15, %v19150_v17 }
 0x5dc   : > { %v10335_v14 = vcombine.high %v10333_v9, %v10333_v9  ;;  %v13215_v16 = vrot.slane %v12174_v20, %v20357_v54  ;;  %v10349_v58 = vrot.slane %v10333_v9, %v19150_v17  ;;  %v10277_v57 = vrot.slane %v24670_v10, %v19150_v17 }
 0x5dd   : > { %v10284_v59 = vrot.slane %v10270_v34, %v19150_v17  ;;  %v10356_v22 = vrot.slane %v10334_v44, %v19150_v17  ;;  %v10364_v35 = vcombine.high %v10342_v29, %v10342_v29  ;;  %v13752_v28 = vsel %vm6902_vm5, %v10342_v29, %v13219_v2 }
 0x5de   : > { %v10363_v0 = vrot.slane %v10335_v14, %v19150_v17  ;;  %v10365_v12 = vcombine.high %v10349_v58, %v10349_v58  ;;  %v13756_v60 = vsel %vm6902_vm5, %v10349_v58, %v13235_v56  ;;  %v10285_v63 = vcombine.high %v10277_v57, %v10277_v57 }
 0x5df   : > { %v10286_v39 = vcombine.high %v10284_v59, %v10284_v59  ;;  %v10366_v54 = vcombine.high %v10356_v22, %v10356_v22  ;;  %v13753_v50 = vsel %vm6902_vm5, %v10356_v22, %v13223_v26  ;;  %v13754_v10 = vsel %vm6902_vm5, %v10364_v35, %v13227_v51 }
 0x5e0   : > { %v10367_v13 = vcombine.high %v10363_v0, %v10363_v0  ;;  %v13757_v5 = vsel %vm6902_vm5, %v10363_v0, %v13239_v38  ;;  %v13758_v3 = vsel %vm6902_vm5, %v10365_v12, %v13243_v30  ;;  %v16414_v4 = vcombine.low %v13752_v28, %v13753_v50 }
 0x5e1   : > { %v10293_v49 = vrot.slane %v10277_v57, %v19150_v17  ;;  %v13755_v24 = vsel %vm6902_vm5, %v10366_v54, %v13231_v33  ;;  %v16431_v32 = vcombine.low %v13756_v60, %v13757_v5  ;;  %v10300_v37 = vrot.slane %v10284_v59, %v19150_v17 }
 0x5e2   : > { %v13759_v19 = vsel %vm6902_vm5, %v10367_v13, %v13247_v61  ;;  %v16415_v2 = vcombine.low %v13754_v10, %v13755_v24  ;;  %v16422_v31 = vrot.slane %v16414_v4, %v20363_v43  ;;  %v10307_v55 = vrot.slane %v10285_v63, %v19150_v17 }
 0x5e3   : > { %v16432_v11 = vcombine.low %v13758_v3, %v13759_v19  ;;  %v16439_v45 = vrot.slane %v16431_v32, %v20363_v43  ;;  %v10314_v6 = vrot.slane %v10286_v39, %v19150_v17  ;;  %v10315_v26 = vcombine.high %v10293_v49, %v10293_v49 }
 0x5e4   : > { %v10316_v51 = vcombine.high %v10300_v37, %v10300_v37  ;;  %v16429_v56 = vrot.slane %v16415_v2, %v20363_v43  ;;  %v10317_v25 = vcombine.high %v10307_v55, %v10307_v55  ;;  %v13744_v33 = vsel %vm6902_vm5, %v10293_v49, %v13187_v36 }
 0x5e5   : > { %v16446_v47 = vrot.slane %v16432_v11, %v20363_v43  ;;  %v10318_v38 = vcombine.high %v10314_v6, %v10314_v6  ;;  %v13745_v30 = vsel %vm6902_vm5, %v10307_v55, %v13191_v62  ;;  %v13746_v40 = vsel %vm6902_vm5, %v10315_v26, %v13195_v41 }
 0x5e6   : > { %v13748_v46 = vsel %vm6902_vm5, %v10300_v37, %v13203_v1  ;;  %v16430_v48 = vcombine.low %v16422_v31, %v16429_v56  ;;  %v13747_v21 = vsel %vm6902_vm5, %v10317_v25, %v13199_v8  ;;  %v13749_v61 = vsel %vm6902_vm5, %v10314_v6, %v13207_v52 }
 0x5e7   : > { %v16447_v17 = vcombine.low %v16439_v45, %v16446_v47  ;;  %v13750_v7 = vsel %vm6902_vm5, %v10316_v51, %v13211_v53  ;;  %v13751_v15 = vsel %vm6902_vm5, %v10318_v38, %v13215_v16  ;;  %v16380_v34 = vcombine.low %v13744_v33, %v13745_v30 }
 0x5e8   : > { %v16381_v42 = vcombine.low %v13746_v40, %v13747_v21  ;;  %16702 = vst.msk [vmem:[%s20460_s8 + $0x3f0] sm:$0xff] %vm346_vm1, %v16430_v48  ;;  %v16397_v23 = vcombine.low %v13748_v46, %v13749_v61  ;;  %v16398_v27 = vcombine.low %v13750_v7, %v13751_v15 }
 0x5e9   : > { %16703 = vst.msk [vmem:[%s20460_s8 + $0x3f8] sm:$0xff] %vm346_vm1, %v16447_v17  ;;  %v16388_v18 = vrot.slane %v16380_v34, %v20363_v43 }
 0x5ea   : > { %v16395_v36 = vrot.slane %v16381_v42, %v20363_v43  ;;  %v16405_v62 = vrot.slane %v16397_v23, %v20363_v43  ;;  %v16412_v1 = vrot.slane %v16398_v27, %v20363_v43 }
 0x5ec   : > { %v16396_v9 = vcombine.low %v16388_v18, %v16395_v36  ;;  %v16413_v20 = vcombine.low %v16405_v62, %v16412_v1 }
 0x5ee   : > { %16700 = vst.msk [vmem:[%s20460_s8 + $0x3e0] sm:$0xff] %vm346_vm1, %v16396_v9  ;;  %16701 = vst.msk [vmem:[%s20460_s8 + $0x3e8] sm:$0xff] %vm346_vm1, %v16413_v20 }
 0x5ef PF: > { %s14_s17 = sadd.s32 1, %s17531_s17   ;;  %s25778_s15 = smov %s17527_s16 }
 0x5f0   : > { %p11_p5 = scmp.ge.s32.totalorder %s14_s17, 4   ;;  %s25779_s16 = smov %s25781_s18 }
 0x5f2   :  { %13 = sbr.rel (!%p11_p5) target bundleno = 2 (0x2), region = 76 }

</bundles_post_ra>
